<compile_context>
chip_gen: v7x
topology: tpu7x:2x2x1
jax: 0.10.0
libtpu: 0.0.40
codegen_flags: <defaults>
</compile_context>

<pallas_src>
import functools
import math

import jax
import jax.numpy as jnp
import numpy as np
from jax.experimental import pallas as pl
from jax.experimental.pallas import tpu as pltpu


PARAM_KEYS = (
    "mha_sb",   # (2, E)    f32  adaptive scale / bias for MHA module
    "wqkv",     # (E, 3E)   bf16 fused Wq|Wk|Wv (Wq pre-scaled by 1/sqrt(hd))
    "bqkv",     # (1, 3E)   f32  fused bq|bk|bv (bq pre-scaled)
    "wo",       # (E, E)    bf16 attention output projection
    "bo",       # (1, E)    f32
    "ln_g",     # (4, E)    f32  4 post-residual LayerNorm gammas
    "ln_b",     # (4, E)    f32  4 post-residual LayerNorm betas
    "ff_sb",    # (2, 2, E) f32  per-FFN adaptive scale / bias
    "ff_w1",    # (2, E, H) bf16 per-FFN first linear
    "ff_b1",    # (2, H)    f32
    "ff_w2",    # (2, H, E) bf16 per-FFN second linear (ff_resid_factor folded)
    "ff_b2",    # (2, E)    f32  (ff_resid_factor folded)
    "conv_sb",  # (2, E)    f32  adaptive scale / bias for conv module
    "pw1_w",    # (E, 2E)   bf16 pointwise conv1 (1x1 conv == matmul)
    "pw1_b",    # (1, 2E)   f32
    "dw_w",     # (K, 2E)   f32  depthwise taps (BatchNorm eval scale folded)
    "dw_b",     # (1, 2E)   f32  depthwise bias (BatchNorm eval affine folded)
    "pw2_w",    # (2E, E)   bf16 pointwise conv2
    "pw2_b",    # (1, E)    f32
)


# ----------------------------------------------------------------------------
# depthwise conv (zero-padded staging, per-tap unmasked MAC, 4 accumulators)
# ----------------------------------------------------------------------------
def _dw_conv_pallas(h1_3d, p, *, scratch, kernel_size, conv_dtype):
    """Kernel path: stage h1 into a zero-padded VMEM scratch; each tap is a
    sublane-shifted ref load + MAC (no masks, no rolls)."""
    Bt, L, C2 = h1_3d.shape
    pad = (kernel_size - 1) // 2
    pad_al = ((pad + 7) // 8) * 8          # 8-aligned left pad -> aligned h1 store
    off = pad_al - pad
    if pad_al > 0:
        scratch[:, pl.ds(0, pad_al), :] = jnp.zeros((Bt, pad_al, C2), conv_dtype)
    if pad > 0:
        scratch[:, pl.ds(pad_al + L, pad), :] = jnp.zeros((Bt, pad, C2), conv_dtype)
    scratch[:, pl.ds(pad_al, L), :] = h1_3d.astype(conv_dtype)

    accs = [jnp.zeros((Bt, L, C2), jnp.float32) for _ in range(4)]
    for kk in range(kernel_size):
        w_k = p["dw_w"][kk].astype(conv_dtype)
        tap = scratch[:, pl.ds(off + kk, L), :]
        accs[kk % 4] = accs[kk % 4] + (tap * w_k).astype(jnp.float32)
    return (accs[0] + accs[1]) + (accs[2] + accs[3]) + p["dw_b"][0]


def _dw_conv_jnp(h1_3d, p, *, kernel_size, conv_dtype):
    """Pure-JAX reference path with identical arithmetic (zero pad + MAC)."""
    Bt, L, C2 = h1_3d.shape
    pad = (kernel_size - 1) // 2
    staged = jnp.pad(h1_3d.astype(conv_dtype), ((0, 0), (pad, pad), (0, 0)))
    accs = [jnp.zeros((Bt, L, C2), jnp.float32) for _ in range(4)]
    for kk in range(kernel_size):
        w_k = p["dw_w"][kk].astype(conv_dtype)
        tap = jax.lax.dynamic_slice_in_dim(staged, kk, L, axis=1)
        accs[kk % 4] = accs[kk % 4] + (tap * w_k).astype(jnp.float32)
    return (accs[0] + accs[1]) + (accs[2] + accs[3]) + p["dw_b"][0]


# ----------------------------------------------------------------------------
# shared forward pass (kernel path gets Refs, reference path gets arrays)
# ----------------------------------------------------------------------------
def _forward_block(x3, pe, p, *, num_heads, dw_conv_fn, recip_fn):
    f32, bf16 = jnp.float32, jnp.bfloat16
    Bt, L, E = x3.shape
    M = Bt * L
    hd = E // num_heads
    eps = 1e-5

    x3 = x3.astype(f32)
    x = x3.reshape(M, E)

    def layernorm(v, idx):
        mu = jnp.mean(v, axis=-1, keepdims=True)
        var = jnp.mean(jnp.square(v - mu), axis=-1, keepdims=True)
        return (v - mu) * jax.lax.rsqrt(var + eps) * p["ln_g"][idx] + p["ln_b"][idx]

    def swish(v):
        return v * jax.nn.sigmoid(v)

    # ---- ResidualBlock(MHAModule, 'abs' pos-enc, adaptive scaling) + LN ----
    xs = (x3 * p["mha_sb"][0] + p["mha_sb"][1] + pe).reshape(M, E).astype(bf16)
    qkv = jnp.dot(xs, p["wqkv"][...], preferred_element_type=f32) + p["bqkv"][0]

    def heads(base):
        # (M, 3E) -> (num_heads * Bt, L, hd); batch index = h * Bt + b.
        return jnp.concatenate(
            [qkv[:, base + h * hd: base + (h + 1) * hd].reshape(Bt, L, hd)
             for h in range(num_heads)], axis=0).astype(bf16)

    q3, k3, v3 = heads(0), heads(E), heads(2 * E)   # 1/sqrt(hd) folded into Wq/bq
    s = jnp.einsum("bid,bjd->bij", q3, k3, preferred_element_type=f32)
    s = s - jnp.max(s, axis=-1, keepdims=True)
    pr = jnp.exp(s)
    denom = jnp.sum(pr, axis=-1, keepdims=True)
    o3 = jnp.einsum("bij,bjd->bid", pr.astype(bf16), v3,
                    preferred_element_type=f32) * recip_fn(denom)
    mha = jnp.concatenate(
        [o3[h * Bt:(h + 1) * Bt].reshape(M, hd) for h in range(num_heads)], axis=-1)
    mha = jnp.dot(mha.astype(bf16), p["wo"][...],
                  preferred_element_type=f32) + p["bo"][0]
    x = layernorm(x + mha, 0)

    # ---- FeedForwardModule: Linear -> Swish -> Linear (dropout = identity) ----
    def ffn(vin, i):
        sb = p["ff_sb"][i]
        vs = (vin * sb[0] + sb[1]).astype(bf16)
        hdn = jnp.dot(vs, p["ff_w1"][i], preferred_element_type=f32) + p["ff_b1"][i]
        hdn = swish(hdn)
        # ff_resid_factor already folded into ff_w2 / ff_b2
        return jnp.dot(hdn.astype(bf16), p["ff_w2"][i],
                       preferred_element_type=f32) + p["ff_b2"][i]

    x = layernorm(x + ffn(x, 0), 1)

    # ---- ConvolutionModule: pw-conv -> Swish (use_glu=False) -> depthwise conv
    #      (+ folded BatchNorm eval affine) -> Swish -> pw-conv ----
    xs = (x * p["conv_sb"][0] + p["conv_sb"][1]).astype(bf16)
    h1 = jnp.dot(xs, p["pw1_w"][...], preferred_element_type=f32) + p["pw1_b"][0]
    h1 = swish(h1)                                   # (M, 2E) f32
    C2 = h1.shape[-1]
    conv = dw_conv_fn(h1.reshape(Bt, L, C2), p)      # (Bt, L, 2E), BN folded in
    conv = swish(conv.reshape(M, C2))
    y = jnp.dot(conv.astype(bf16), p["pw2_w"][...],
                preferred_element_type=f32) + p["pw2_b"][0]
    x = layernorm(x + y, 2)

    # ---- second FeedForwardModule residual block ----
    x = layernorm(x + ffn(x, 1), 3)
    return x.reshape(Bt, L, E)


# ----------------------------------------------------------------------------
# Pallas kernel
# ----------------------------------------------------------------------------
def _squeezeformer_kernel(x_ref, pe_ref, *rest, num_heads, kernel_size, conv_dtype):
    n = len(PARAM_KEYS)
    param_refs, out_ref, conv_scratch = rest[:n], rest[n], rest[n + 1]
    p = dict(zip(PARAM_KEYS, param_refs))            # refs; loaded at point of use
    L, E = pe_ref.shape
    Bt = x_ref.shape[0]
    x3 = x_ref[...].reshape(Bt, L, E)                # handles lane-dense I/O layout
    out = _forward_block(
        x3, pe_ref[...], p, num_heads=num_heads,
        dw_conv_fn=functools.partial(_dw_conv_pallas, scratch=conv_scratch,
                                     kernel_size=kernel_size, conv_dtype=conv_dtype),
        recip_fn=lambda d: pl.reciprocal(d, approx=True))
    out_ref[...] = out.reshape(out_ref.shape).astype(out_ref.dtype)


# ----------------------------------------------------------------------------
# parameter preparation (all folding happens here, outside the kernel)
# ----------------------------------------------------------------------------
def prepare_params(raw, *, num_heads, ff_resid_factor=1.0, bn_eps=1e-5,
                   compute_dtype=jnp.bfloat16):
    f32 = jnp.float32
    E = raw["wqkvo"].shape[-1]
    hd = E // num_heads
    sm = 1.0 / math.sqrt(hd)
    wq, wk, wv, wo = (raw["wqkvo"].astype(f32)[i] for i in range(4))
    bq, bk, bv, bo = (raw["bqkvo"].astype(f32)[i] for i in range(4))
    wqkv = jnp.concatenate([wq * sm, wk, wv], axis=1)           # (E, 3E)
    bqkv = jnp.concatenate([bq * sm, bk, bv])[None, :]          # (1, 3E)
    gamma, beta, mean, var = raw["bn"].astype(f32)
    bn_scale = gamma * jax.lax.rsqrt(var + bn_eps)
    bn_shift = beta - mean * bn_scale
    dw_w = raw["dw_w"].astype(f32) * bn_scale[None, :]
    dw_b = raw["dw_b"].astype(f32) * bn_scale[None, :] + bn_shift[None, :]
    w = lambda a: a.astype(compute_dtype)
    g = lambda a: a.astype(f32)
    return {
        "mha_sb": g(raw["mha_sb"]),
        "wqkv": w(wqkv),
        "bqkv": bqkv,
        "wo": w(wo),
        "bo": bo[None, :],
        "ln_g": g(raw["ln_g"]),
        "ln_b": g(raw["ln_b"]),
        "ff_sb": g(raw["ff_sb"]),
        "ff_w1": w(raw["ff_w1"]),
        "ff_b1": g(raw["ff_b1"]),
        "ff_w2": w(raw["ff_w2"].astype(f32) * ff_resid_factor),
        "ff_b2": g(raw["ff_b2"]) * ff_resid_factor,
        "conv_sb": g(raw["conv_sb"]),
        "pw1_w": w(raw["pw1_w"]),
        "pw1_b": g(raw["pw1_b"]),
        "dw_w": dw_w,
        "dw_b": dw_b,
        "pw2_w": w(raw["pw2_w"]),
        "pw2_b": g(raw["pw2_b"]),
    }


def _default_conv_dtype():
    """bf16 depthwise-conv MACs on chips with a bf16 VPU (v6e / v7x), f32 else."""
    try:
        kind = jax.devices()[0].device_kind.lower()
    except Exception:
        return jnp.float32
    if "v6" in kind or "v7" in kind or "tpu7" in kind:
        return jnp.bfloat16
    return jnp.float32


# ----------------------------------------------------------------------------
# wrapper
# ----------------------------------------------------------------------------
def squeezeformer_block(x, pe, params, *, num_heads, kernel_size,
                        block_batch=None, conv_dtype=None,
                        single_buffer_weights=True):
    B, L, E = x.shape
    H = params["ff_w1"].shape[-1]
    C2 = params["pw1_w"].shape[-1]
    if conv_dtype is None:
        conv_dtype = _default_conv_dtype()

    if block_batch is None:
        row_cap = 1024                               # raised per review (v6e/v5e VMEM)
        divisors = [d for d in range(1, B + 1) if B % d == 0 and d * L <= row_cap] or [1]
        multi = [d for d in divisors if B // d >= 2]  # keep >=2 grid steps (v7x: 2 TCs)
        block_batch = max(multi) if multi else max(divisors)
    assert B % block_batch == 0
    grid = (B // block_batch,)

    pad = (kernel_size - 1) // 2
    pad_al = ((pad + 7) // 8) * 8
    conv_rows = pad_al + L + pad

    param_list = [params[k] for k in PARAM_KEYS]

    def _nbytes(a):
        return int(a.size) * a.dtype.itemsize

    weight_bytes = sum(_nbytes(a) for a in param_list) + _nbytes(pe)

    # Generation-aware scoped-VMEM budget: ~75% of physical (≈48 MiB on v7x,
    # up to ≈96 MiB on v5e/v6e).
    try:
        vmem_cap = int(pltpu.get_tpu_info().vmem_capacity_bytes)
    except Exception:
        vmem_cap = 64 << 20
    vmem_budget = (vmem_cap * 3) // 4

    rows = block_batch * L
    flat = (E % 128 != 0)                            # lane-dense I/O when E < 128-aligned

    # Advisory cost estimate for XLA scheduling.
    Mt = B * L
    flops = (2 * Mt * E * 3 * E + 4 * B * L * L * E + 2 * Mt * E * E
             + 2 * 2 * (2 * Mt * E * H)
             + 2 * Mt * E * C2 + 2 * Mt * C2 * kernel_size + 2 * Mt * C2 * E)
    transcendentals = num_heads * B * L * L + 2 * Mt * H + 2 * Mt * C2
    cost = pl.CostEstimate(flops=int(flops), transcendentals=int(transcendentals),
                           bytes_accessed=int(2 * _nbytes(x) + _nbytes(pe) + weight_bytes))

    def _run(use_buffered, cdt, use_flat):
        kernel = functools.partial(_squeezeformer_kernel, num_heads=num_heads,
                                   kernel_size=kernel_size, conv_dtype=cdt)
        buf_kw = {"pipeline_mode": pl.Buffered(1)} if use_buffered else {}

        def const_spec(a):
            n = a.ndim
            return pl.BlockSpec(a.shape, lambda b, _n=n: (0,) * _n, **buf_kw)

        if use_flat:
            x_in = x.reshape(B, 1, L * E)
            xo_block = (block_batch, 1, L * E)
            out_shape = jax.ShapeDtypeStruct((B, 1, L * E), x.dtype)
        else:
            x_in = x
            xo_block = (block_batch, L, E)
            out_shape = jax.ShapeDtypeStruct((B, L, E), x.dtype)
        xo_map = lambda b: (b, 0, 0)

        act_bytes = 4 * rows * (12 * E + 2 * H + 4 * C2) + 12 * num_heads * rows * L
        scratch_bytes = block_batch * conv_rows * C2 * np.dtype(cdt).itemsize
        io_bytes = 4 * rows * E * x.dtype.itemsize
        need = (weight_bytes * (1 if use_buffered else 2)
                + 3 * act_bytes + scratch_bytes + io_bytes)
        vmem_limit = int(min(vmem_budget, max(32 << 20, need)))

        out = pl.pallas_call(
            kernel,
            out_shape=out_shape,
            grid=grid,
            in_specs=([pl.BlockSpec(xo_block, xo_map), const_spec(pe)]
                      + [const_spec(a) for a in param_list]),
            out_specs=pl.BlockSpec(xo_block, xo_map),
            scratch_shapes=[pltpu.VMEM((block_batch, conv_rows, C2), cdt)],
            compiler_params=pltpu.CompilerParams(
                dimension_semantics=("parallel",),
                vmem_limit_bytes=vmem_limit),
            cost_estimate=cost,
        )(x_in, pe, *param_list)
        return out.reshape(B, L, E)

    # Optional features (Buffered(1), bf16 conv MAC, lane-dense layout) degrade
    # gracefully if a particular jax/libtpu combo refuses to lower them.
    attempts = [(single_buffer_weights, conv_dtype, flat),
                (False, conv_dtype, flat),
                (False, conv_dtype, False),
                (False, jnp.float32, False)]
    seen, last_err = set(), None
    for cfg in attempts:
        key = (cfg[0], np.dtype(cfg[1]).name, cfg[2])
        if key in seen:
            continue
        seen.add(key)
        try:
            return _run(*cfg)
        except Exception as e:
            last_err = e
    raise last_err


# ----------------------------------------------------------------------------
# test helpers
# ----------------------------------------------------------------------------
def sinusoidal_pe(L, E):
    pos = jnp.arange(L, dtype=jnp.float32)[:, None]
    i = jnp.arange(E)[None, :]
    angle = pos / jnp.power(10000.0, (2 * (i // 2)).astype(jnp.float32) / E)
    return jnp.where(i % 2 == 0, jnp.sin(angle), jnp.cos(angle)).astype(jnp.float32)


def init_params(key, E, ff_expansion=4, conv_expansion=2, kernel_size=31):
    H = E * ff_expansion
    C2 = E * conv_expansion
    ks = jax.random.split(key, 12)

    def rnd(k, shape, scale=0.08):
        return (scale * jax.random.normal(k, shape)).astype(jnp.float32)

    ones = lambda *s: jnp.ones(s, jnp.float32)
    zeros = lambda *s: jnp.zeros(s, jnp.float32)
    return {
        "mha_sb": jnp.stack([ones(E), zeros(E)]),
        "wqkvo":  rnd(ks[0], (4, E, E)),
        "bqkvo":  rnd(ks[1], (4, E)),
        "ln_g":   ones(4, E),
        "ln_b":   zeros(4, E),
        "ff_sb":  jnp.stack([jnp.stack([ones(E), zeros(E)])] * 2),
        "ff_w1":  rnd(ks[2], (2, E, H)),
        "ff_b1":  rnd(ks[3], (2, H)),
        "ff_w2":  rnd(ks[4], (2, H, E)),
        "ff_b2":  rnd(ks[5], (2, E)),
        "conv_sb": jnp.stack([ones(E), zeros(E)]),
        "pw1_w":  rnd(ks[6], (E, C2)),
        "pw1_b":  rnd(ks[7], (1, C2)),
        "dw_w":   rnd(ks[8], (kernel_size, C2)),
        "dw_b":   rnd(ks[9], (1, C2)),
        "bn":     jnp.stack([ones(C2), zeros(C2),
                             (0.01 * jax.random.normal(ks[10], (C2,))).astype(jnp.float32),
                             ones(C2)]),
        "pw2_w":  rnd(ks[11], (C2, E)),
        "pw2_b":  zeros(1, E),
    }


if __name__ == "__main__":
    B, L, E = 2, 16, 64
    num_heads = 8          # mha_num_heads
    ff_expansion = 4       # ff_expansion_factor
    conv_expansion = 2     # conv_expansion_factor
    kernel_size = 31       # conv_kernel_size
    ff_resid_factor = 1.0

    key = jax.random.PRNGKey(0)
    kx, kp = jax.random.split(key)
    x = jax.random.normal(kx, (B, L, E), dtype=jnp.float32)
    pe = sinusoidal_pe(L, E)
    raw = init_params(kp, E, ff_expansion, conv_expansion, kernel_size)
    params = prepare_params(raw, num_heads=num_heads, ff_resid_factor=ff_resid_factor)
    conv_dtype = _default_conv_dtype()

    out = squeezeformer_block(x, pe, params, num_heads=num_heads,
                              kernel_size=kernel_size, conv_dtype=conv_dtype)
    out = jax.block_until_ready(out)
    assert out.shape == x.shape and out.dtype == x.dtype

    # pure-JAX reference (same math / same prepared params) as a sanity check
    ref = _forward_block(
        x, pe, params, num_heads=num_heads,
        dw_conv_fn=functools.partial(_dw_conv_jnp, kernel_size=kernel_size,
                                     conv_dtype=conv_dtype),
        recip_fn=lambda d: 1.0 / d).astype(x.dtype)
    ref = jax.block_until_ready(ref)
    np.testing.assert_allclose(np.asarray(out), np.asarray(ref), rtol=2e-2, atol=2e-2)

    # multi-sequence-per-block path (checks per-sequence isolation of the conv)
    out2 = squeezeformer_block(x, pe, params, num_heads=num_heads,
                               kernel_size=kernel_size, conv_dtype=conv_dtype,
                               block_batch=B)
    out2 = jax.block_until_ready(out2)
    np.testing.assert_allclose(np.asarray(out2), np.asarray(ref), rtol=2e-2, atol=2e-2)

    print("KERNEL_OK")
</pallas_src>

<mosaic_0001>
module attributes {stable_mosaic.version = 11 : i64} {
  func.func @_squeezeformer_kernel(%arg0: i32, %arg1: memref<1x1x1024xf32, #tpu.memory_space<vmem>>, %arg2: memref<16x64xf32, #tpu.memory_space<vmem>>, %arg3: memref<2x64xf32, #tpu.memory_space<vmem>>, %arg4: memref<64x192xbf16, #tpu.memory_space<vmem>>, %arg5: memref<1x192xf32, #tpu.memory_space<vmem>>, %arg6: memref<64x64xbf16, #tpu.memory_space<vmem>>, %arg7: memref<1x64xf32, #tpu.memory_space<vmem>>, %arg8: memref<4x64xf32, #tpu.memory_space<vmem>>, %arg9: memref<4x64xf32, #tpu.memory_space<vmem>>, %arg10: memref<2x2x64xf32, #tpu.memory_space<vmem>>, %arg11: memref<2x64x256xbf16, #tpu.memory_space<vmem>>, %arg12: memref<2x256xf32, #tpu.memory_space<vmem>>, %arg13: memref<2x256x64xbf16, #tpu.memory_space<vmem>>, %arg14: memref<2x64xf32, #tpu.memory_space<vmem>>, %arg15: memref<2x64xf32, #tpu.memory_space<vmem>>, %arg16: memref<64x128xbf16, #tpu.memory_space<vmem>>, %arg17: memref<1x128xf32, #tpu.memory_space<vmem>>, %arg18: memref<31x128xf32, #tpu.memory_space<vmem>>, %arg19: memref<1x128xf32, #tpu.memory_space<vmem>>, %arg20: memref<128x64xbf16, #tpu.memory_space<vmem>>, %arg21: memref<1x64xf32, #tpu.memory_space<vmem>>, %arg22: memref<1x1x1024xf32, #tpu.memory_space<vmem>>, %arg23: memref<1x47x128xf32, #tpu.memory_space<vmem>>) attributes {dimension_semantics = [#tpu.dimension_semantics<parallel>], iteration_bounds = array<i64: 2>, scalar_prefetch = 0 : i64, scratch_operands = 1 : i64, tpu.core_type = #tpu.core_type<tc>, window_params = [{transform_indices = @transform_0, window_bounds = array<i64: 1, 1, 1024>}, {pipeline_mode = #tpu.pipeline_mode<synchronous>, transform_indices = @transform_1, window_bounds = array<i64: 16, 64>}, {pipeline_mode = #tpu.pipeline_mode<synchronous>, transform_indices = @transform_2, window_bounds = array<i64: 2, 64>}, {pipeline_mode = #tpu.pipeline_mode<synchronous>, transform_indices = @transform_3, window_bounds = array<i64: 64, 192>}, {pipeline_mode = #tpu.pipeline_mode<synchronous>, transform_indices = @transform_4, window_bounds = array<i64: 1, 192>}, {pipeline_mode = #tpu.pipeline_mode<synchronous>, transform_indices = @transform_5, window_bounds = array<i64: 64, 64>}, {pipeline_mode = #tpu.pipeline_mode<synchronous>, transform_indices = @transform_6, window_bounds = array<i64: 1, 64>}, {pipeline_mode = #tpu.pipeline_mode<synchronous>, transform_indices = @transform_7, window_bounds = array<i64: 4, 64>}, {pipeline_mode = #tpu.pipeline_mode<synchronous>, transform_indices = @transform_8, window_bounds = array<i64: 4, 64>}, {pipeline_mode = #tpu.pipeline_mode<synchronous>, transform_indices = @transform_9, window_bounds = array<i64: 2, 2, 64>}, {pipeline_mode = #tpu.pipeline_mode<synchronous>, transform_indices = @transform_10, window_bounds = array<i64: 2, 64, 256>}, {pipeline_mode = #tpu.pipeline_mode<synchronous>, transform_indices = @transform_11, window_bounds = array<i64: 2, 256>}, {pipeline_mode = #tpu.pipeline_mode<synchronous>, transform_indices = @transform_12, window_bounds = array<i64: 2, 256, 64>}, {pipeline_mode = #tpu.pipeline_mode<synchronous>, transform_indices = @transform_13, window_bounds = array<i64: 2, 64>}, {pipeline_mode = #tpu.pipeline_mode<synchronous>, transform_indices = @transform_14, window_bounds = array<i64: 2, 64>}, {pipeline_mode = #tpu.pipeline_mode<synchronous>, transform_indices = @transform_15, window_bounds = array<i64: 64, 128>}, {pipeline_mode = #tpu.pipeline_mode<synchronous>, transform_indices = @transform_16, window_bounds = array<i64: 1, 128>}, {pipeline_mode = #tpu.pipeline_mode<synchronous>, transform_indices = @transform_17, window_bounds = array<i64: 31, 128>}, {pipeline_mode = #tpu.pipeline_mode<synchronous>, transform_indices = @transform_18, window_bounds = array<i64: 1, 128>}, {pipeline_mode = #tpu.pipeline_mode<synchronous>, transform_indices = @transform_19, window_bounds = array<i64: 128, 64>}, {pipeline_mode = #tpu.pipeline_mode<synchronous>, transform_indices = @transform_20, window_bounds = array<i64: 1, 64>}, {transform_indices = @transform_21, window_bounds = array<i64: 1, 1, 1024>}]} {
    %c0 = arith.constant 0 : index
    %c0_0 = arith.constant 0 : index
    %c0_1 = arith.constant 0 : index
    %0 = vector.load %arg1[%c0, %c0_0, %c0_1] : memref<1x1x1024xf32, #tpu.memory_space<vmem>>, vector<1x1x1024xf32>
    %1 = vector.shape_cast %0 : vector<1x1x1024xf32> to vector<1x16x64xf32>
    %c0_2 = arith.constant 0 : index
    %c0_3 = arith.constant 0 : index
    %2 = vector.load %arg2[%c0_2, %c0_3] : memref<16x64xf32, #tpu.memory_space<vmem>>, vector<16x64xf32>
    %3 = vector.shape_cast %1 : vector<1x16x64xf32> to vector<16x64xf32>
    %c0_4 = arith.constant 0 : index
    %c0_5 = arith.constant 0 : index
    %4 = vector.load %arg3[%c0_4, %c0_5] : memref<2x64xf32, #tpu.memory_space<vmem>>, vector<1x64xf32>
    %5 = vector.shape_cast %4 : vector<1x64xf32> to vector<64xf32>
    %6 = vector.shape_cast %5 : vector<64xf32> to vector<1x1x64xf32>
    %7 = vector.broadcast %6 : vector<1x1x64xf32> to vector<1x16x64xf32>
    %8 = arith.mulf %1, %7 : vector<1x16x64xf32>
    %c1 = arith.constant 1 : index
    %c0_6 = arith.constant 0 : index
    %9 = vector.load %arg3[%c1, %c0_6] : memref<2x64xf32, #tpu.memory_space<vmem>>, vector<1x64xf32>
    %10 = vector.shape_cast %9 : vector<1x64xf32> to vector<64xf32>
    %11 = vector.shape_cast %10 : vector<64xf32> to vector<1x1x64xf32>
    %12 = vector.broadcast %11 : vector<1x1x64xf32> to vector<1x16x64xf32>
    %13 = arith.addf %8, %12 : vector<1x16x64xf32>
    %14 = vector.shape_cast %2 : vector<16x64xf32> to vector<1x16x64xf32>
    %15 = arith.addf %13, %14 : vector<1x16x64xf32>
    %16 = vector.shape_cast %15 : vector<1x16x64xf32> to vector<16x64xf32>
    %17 = arith.truncf %16 : vector<16x64xf32> to vector<16x64xbf16>
    %c0_7 = arith.constant 0 : index
    %c0_8 = arith.constant 0 : index
    %18 = vector.load %arg4[%c0_7, %c0_8] : memref<64x192xbf16, #tpu.memory_space<vmem>>, vector<64x192xbf16>
    %cst = arith.constant dense<0.000000e+00> : vector<16x192xf32>
    %19 = tpu.matmul %17, %18, %cst {dimension_numbers = #tpu.dot_dimension_numbers<[1], [0], [0], [1], [0, 0, 1, 1], [], []>} : vector<16x64xbf16>, vector<64x192xbf16>, vector<16x192xf32> -> vector<16x192xf32>
    %c0_9 = arith.constant 0 : index
    %c0_10 = arith.constant 0 : index
    %20 = vector.load %arg5[%c0_9, %c0_10] : memref<1x192xf32, #tpu.memory_space<vmem>>, vector<1x192xf32>
    %21 = vector.shape_cast %20 : vector<1x192xf32> to vector<192xf32>
    %22 = vector.shape_cast %21 : vector<192xf32> to vector<1x192xf32>
    %23 = vector.broadcast %22 : vector<1x192xf32> to vector<16x192xf32>
    %24 = arith.addf %19, %23 : vector<16x192xf32>
    %25 = vector.extract_strided_slice %24 {offsets = [0, 0], sizes = [16, 8], strides = [1, 1]} : vector<16x192xf32> to vector<16x8xf32>
    %26 = vector.shape_cast %25 : vector<16x8xf32> to vector<1x16x8xf32>
    %27 = vector.extract_strided_slice %24 {offsets = [0, 8], sizes = [16, 8], strides = [1, 1]} : vector<16x192xf32> to vector<16x8xf32>
    %28 = vector.shape_cast %27 : vector<16x8xf32> to vector<1x16x8xf32>
    %29 = vector.extract_strided_slice %24 {offsets = [0, 16], sizes = [16, 8], strides = [1, 1]} : vector<16x192xf32> to vector<16x8xf32>
    %30 = vector.shape_cast %29 : vector<16x8xf32> to vector<1x16x8xf32>
    %31 = vector.extract_strided_slice %24 {offsets = [0, 24], sizes = [16, 8], strides = [1, 1]} : vector<16x192xf32> to vector<16x8xf32>
    %32 = vector.shape_cast %31 : vector<16x8xf32> to vector<1x16x8xf32>
    %33 = vector.extract_strided_slice %24 {offsets = [0, 32], sizes = [16, 8], strides = [1, 1]} : vector<16x192xf32> to vector<16x8xf32>
    %34 = vector.shape_cast %33 : vector<16x8xf32> to vector<1x16x8xf32>
    %35 = vector.extract_strided_slice %24 {offsets = [0, 40], sizes = [16, 8], strides = [1, 1]} : vector<16x192xf32> to vector<16x8xf32>
    %36 = vector.shape_cast %35 : vector<16x8xf32> to vector<1x16x8xf32>
    %37 = vector.extract_strided_slice %24 {offsets = [0, 48], sizes = [16, 8], strides = [1, 1]} : vector<16x192xf32> to vector<16x8xf32>
    %38 = vector.shape_cast %37 : vector<16x8xf32> to vector<1x16x8xf32>
    %39 = vector.extract_strided_slice %24 {offsets = [0, 56], sizes = [16, 8], strides = [1, 1]} : vector<16x192xf32> to vector<16x8xf32>
    %40 = vector.shape_cast %39 : vector<16x8xf32> to vector<1x16x8xf32>
    %41 = tpu.concatenate %26, %28, %30, %32, %34, %36, %38, %40 in 0 : vector<1x16x8xf32>, vector<1x16x8xf32>, vector<1x16x8xf32>, vector<1x16x8xf32>, vector<1x16x8xf32>, vector<1x16x8xf32>, vector<1x16x8xf32>, vector<1x16x8xf32> -> vector<8x16x8xf32>
    %42 = arith.truncf %41 : vector<8x16x8xf32> to vector<8x16x8xbf16>
    %43 = vector.extract_strided_slice %24 {offsets = [0, 64], sizes = [16, 8], strides = [1, 1]} : vector<16x192xf32> to vector<16x8xf32>
    %44 = vector.shape_cast %43 : vector<16x8xf32> to vector<1x16x8xf32>
    %45 = vector.extract_strided_slice %24 {offsets = [0, 72], sizes = [16, 8], strides = [1, 1]} : vector<16x192xf32> to vector<16x8xf32>
    %46 = vector.shape_cast %45 : vector<16x8xf32> to vector<1x16x8xf32>
    %47 = vector.extract_strided_slice %24 {offsets = [0, 80], sizes = [16, 8], strides = [1, 1]} : vector<16x192xf32> to vector<16x8xf32>
    %48 = vector.shape_cast %47 : vector<16x8xf32> to vector<1x16x8xf32>
    %49 = vector.extract_strided_slice %24 {offsets = [0, 88], sizes = [16, 8], strides = [1, 1]} : vector<16x192xf32> to vector<16x8xf32>
    %50 = vector.shape_cast %49 : vector<16x8xf32> to vector<1x16x8xf32>
    %51 = vector.extract_strided_slice %24 {offsets = [0, 96], sizes = [16, 8], strides = [1, 1]} : vector<16x192xf32> to vector<16x8xf32>
    %52 = vector.shape_cast %51 : vector<16x8xf32> to vector<1x16x8xf32>
    %53 = vector.extract_strided_slice %24 {offsets = [0, 104], sizes = [16, 8], strides = [1, 1]} : vector<16x192xf32> to vector<16x8xf32>
    %54 = vector.shape_cast %53 : vector<16x8xf32> to vector<1x16x8xf32>
    %55 = vector.extract_strided_slice %24 {offsets = [0, 112], sizes = [16, 8], strides = [1, 1]} : vector<16x192xf32> to vector<16x8xf32>
    %56 = vector.shape_cast %55 : vector<16x8xf32> to vector<1x16x8xf32>
    %57 = vector.extract_strided_slice %24 {offsets = [0, 120], sizes = [16, 8], strides = [1, 1]} : vector<16x192xf32> to vector<16x8xf32>
    %58 = vector.shape_cast %57 : vector<16x8xf32> to vector<1x16x8xf32>
    %59 = tpu.concatenate %44, %46, %48, %50, %52, %54, %56, %58 in 0 : vector<1x16x8xf32>, vector<1x16x8xf32>, vector<1x16x8xf32>, vector<1x16x8xf32>, vector<1x16x8xf32>, vector<1x16x8xf32>, vector<1x16x8xf32>, vector<1x16x8xf32> -> vector<8x16x8xf32>
    %60 = arith.truncf %59 : vector<8x16x8xf32> to vector<8x16x8xbf16>
    %61 = vector.extract_strided_slice %24 {offsets = [0, 128], sizes = [16, 8], strides = [1, 1]} : vector<16x192xf32> to vector<16x8xf32>
    %62 = vector.shape_cast %61 : vector<16x8xf32> to vector<1x16x8xf32>
    %63 = vector.extract_strided_slice %24 {offsets = [0, 136], sizes = [16, 8], strides = [1, 1]} : vector<16x192xf32> to vector<16x8xf32>
    %64 = vector.shape_cast %63 : vector<16x8xf32> to vector<1x16x8xf32>
    %65 = vector.extract_strided_slice %24 {offsets = [0, 144], sizes = [16, 8], strides = [1, 1]} : vector<16x192xf32> to vector<16x8xf32>
    %66 = vector.shape_cast %65 : vector<16x8xf32> to vector<1x16x8xf32>
    %67 = vector.extract_strided_slice %24 {offsets = [0, 152], sizes = [16, 8], strides = [1, 1]} : vector<16x192xf32> to vector<16x8xf32>
    %68 = vector.shape_cast %67 : vector<16x8xf32> to vector<1x16x8xf32>
    %69 = vector.extract_strided_slice %24 {offsets = [0, 160], sizes = [16, 8], strides = [1, 1]} : vector<16x192xf32> to vector<16x8xf32>
    %70 = vector.shape_cast %69 : vector<16x8xf32> to vector<1x16x8xf32>
    %71 = vector.extract_strided_slice %24 {offsets = [0, 168], sizes = [16, 8], strides = [1, 1]} : vector<16x192xf32> to vector<16x8xf32>
    %72 = vector.shape_cast %71 : vector<16x8xf32> to vector<1x16x8xf32>
    %73 = vector.extract_strided_slice %24 {offsets = [0, 176], sizes = [16, 8], strides = [1, 1]} : vector<16x192xf32> to vector<16x8xf32>
    %74 = vector.shape_cast %73 : vector<16x8xf32> to vector<1x16x8xf32>
    %75 = vector.extract_strided_slice %24 {offsets = [0, 184], sizes = [16, 8], strides = [1, 1]} : vector<16x192xf32> to vector<16x8xf32>
    %76 = vector.shape_cast %75 : vector<16x8xf32> to vector<1x16x8xf32>
    %77 = tpu.concatenate %62, %64, %66, %68, %70, %72, %74, %76 in 0 : vector<1x16x8xf32>, vector<1x16x8xf32>, vector<1x16x8xf32>, vector<1x16x8xf32>, vector<1x16x8xf32>, vector<1x16x8xf32>, vector<1x16x8xf32>, vector<1x16x8xf32> -> vector<8x16x8xf32>
    %78 = arith.truncf %77 : vector<8x16x8xf32> to vector<8x16x8xbf16>
    "tpu.trace_start"() <{level = 10 : i32, message = "bid,bjd->bij"}> : () -> ()
    %cst_11 = arith.constant dense<0.000000e+00> : vector<8x16x16xf32>
    %79 = tpu.matmul %42, %60, %cst_11 {dimension_numbers = #tpu.dot_dimension_numbers<[2], [2], [1], [1], [0, 0, 0, 1, 1, 1], [0], [0]>} : vector<8x16x8xbf16>, vector<8x16x8xbf16>, vector<8x16x16xf32> -> vector<8x16x16xf32>
    "tpu.trace_stop"() : () -> ()
    %cst_12 = arith.constant dense<0xFF800000> : vector<8x16xf32>
    %80 = vector.multi_reduction <maximumf>, %79, %cst_12 [2] : vector<8x16x16xf32> to vector<8x16xf32>
    %81 = vector.shape_cast %80 : vector<8x16xf32> to vector<8x16x1xf32>
    %82 = vector.broadcast %81 : vector<8x16x1xf32> to vector<8x16x16xf32>
    %83 = arith.subf %79, %82 : vector<8x16x16xf32>
    %84 = math.exp %83 : vector<8x16x16xf32>
    %cst_13 = arith.constant dense<0.000000e+00> : vector<8x16xf32>
    %85 = vector.multi_reduction <add>, %84, %cst_13 [2] : vector<8x16x16xf32> to vector<8x16xf32>
    %86 = vector.shape_cast %85 : vector<8x16xf32> to vector<8x16x1xf32>
    %87 = arith.truncf %84 : vector<8x16x16xf32> to vector<8x16x16xbf16>
    "tpu.trace_start"() <{level = 10 : i32, message = "bij,bjd->bid"}> : () -> ()
    %cst_14 = arith.constant dense<0.000000e+00> : vector<8x16x8xf32>
    %88 = tpu.matmul %87, %78, %cst_14 {dimension_numbers = #tpu.dot_dimension_numbers<[2], [1], [1], [2], [0, 0, 0, 1, 1, 2], [0], [0]>} : vector<8x16x16xbf16>, vector<8x16x8xbf16>, vector<8x16x8xf32> -> vector<8x16x8xf32>
    "tpu.trace_stop"() : () -> ()
    %89 = tpu.reciprocal %86 {approx = true} : vector<8x16x1xf32> -> vector<8x16x1xf32>
    %90 = vector.broadcast %89 : vector<8x16x1xf32> to vector<8x16x8xf32>
    %91 = arith.mulf %88, %90 : vector<8x16x8xf32>
    %92 = vector.extract_strided_slice %91 {offsets = [0, 0, 0], sizes = [1, 16, 8], strides = [1, 1, 1]} : vector<8x16x8xf32> to vector<1x16x8xf32>
    %93 = vector.shape_cast %92 : vector<1x16x8xf32> to vector<16x8xf32>
    %94 = vector.extract_strided_slice %91 {offsets = [1, 0, 0], sizes = [1, 16, 8], strides = [1, 1, 1]} : vector<8x16x8xf32> to vector<1x16x8xf32>
    %95 = vector.shape_cast %94 : vector<1x16x8xf32> to vector<16x8xf32>
    %96 = vector.extract_strided_slice %91 {offsets = [2, 0, 0], sizes = [1, 16, 8], strides = [1, 1, 1]} : vector<8x16x8xf32> to vector<1x16x8xf32>
    %97 = vector.shape_cast %96 : vector<1x16x8xf32> to vector<16x8xf32>
    %98 = vector.extract_strided_slice %91 {offsets = [3, 0, 0], sizes = [1, 16, 8], strides = [1, 1, 1]} : vector<8x16x8xf32> to vector<1x16x8xf32>
    %99 = vector.shape_cast %98 : vector<1x16x8xf32> to vector<16x8xf32>
    %100 = vector.extract_strided_slice %91 {offsets = [4, 0, 0], sizes = [1, 16, 8], strides = [1, 1, 1]} : vector<8x16x8xf32> to vector<1x16x8xf32>
    %101 = vector.shape_cast %100 : vector<1x16x8xf32> to vector<16x8xf32>
    %102 = vector.extract_strided_slice %91 {offsets = [5, 0, 0], sizes = [1, 16, 8], strides = [1, 1, 1]} : vector<8x16x8xf32> to vector<1x16x8xf32>
    %103 = vector.shape_cast %102 : vector<1x16x8xf32> to vector<16x8xf32>
    %104 = vector.extract_strided_slice %91 {offsets = [6, 0, 0], sizes = [1, 16, 8], strides = [1, 1, 1]} : vector<8x16x8xf32> to vector<1x16x8xf32>
    %105 = vector.shape_cast %104 : vector<1x16x8xf32> to vector<16x8xf32>
    %106 = vector.extract_strided_slice %91 {offsets = [7, 0, 0], sizes = [1, 16, 8], strides = [1, 1, 1]} : vector<8x16x8xf32> to vector<1x16x8xf32>
    %107 = vector.shape_cast %106 : vector<1x16x8xf32> to vector<16x8xf32>
    %108 = tpu.concatenate %93, %95, %97, %99, %101, %103, %105, %107 in 1 : vector<16x8xf32>, vector<16x8xf32>, vector<16x8xf32>, vector<16x8xf32>, vector<16x8xf32>, vector<16x8xf32>, vector<16x8xf32>, vector<16x8xf32> -> vector<16x64xf32>
    %109 = arith.truncf %108 : vector<16x64xf32> to vector<16x64xbf16>
    %c0_15 = arith.constant 0 : index
    %c0_16 = arith.constant 0 : index
    %110 = vector.load %arg6[%c0_15, %c0_16] : memref<64x64xbf16, #tpu.memory_space<vmem>>, vector<64x64xbf16>
    %cst_17 = arith.constant dense<0.000000e+00> : vector<16x64xf32>
    %111 = tpu.matmul %109, %110, %cst_17 {dimension_numbers = #tpu.dot_dimension_numbers<[1], [0], [0], [1], [0, 0, 1, 1], [], []>} : vector<16x64xbf16>, vector<64x64xbf16>, vector<16x64xf32> -> vector<16x64xf32>
    %c0_18 = arith.constant 0 : index
    %c0_19 = arith.constant 0 : index
    %112 = vector.load %arg7[%c0_18, %c0_19] : memref<1x64xf32, #tpu.memory_space<vmem>>, vector<1x64xf32>
    %113 = vector.shape_cast %112 : vector<1x64xf32> to vector<64xf32>
    %114 = vector.shape_cast %113 : vector<64xf32> to vector<1x64xf32>
    %115 = vector.broadcast %114 : vector<1x64xf32> to vector<16x64xf32>
    %116 = arith.addf %111, %115 : vector<16x64xf32>
    %117 = arith.addf %3, %116 : vector<16x64xf32>
    %cst_20 = arith.constant dense<0.000000e+00> : vector<16xf32>
    %118 = vector.multi_reduction <add>, %117, %cst_20 [1] : vector<16x64xf32> to vector<16xf32>
    %119 = vector.shape_cast %118 : vector<16xf32> to vector<16x1xf32>
    %cst_21 = arith.constant 6.400000e+01 : f32
    %120 = vector.broadcast %cst_21 : f32 to vector<16x1xf32>
    %121 = arith.divf %119, %120 : vector<16x1xf32>
    %122 = vector.broadcast %121 : vector<16x1xf32> to vector<16x64xf32>
    %123 = arith.subf %117, %122 : vector<16x64xf32>
    %124 = arith.mulf %123, %123 : vector<16x64xf32>
    %cst_22 = arith.constant dense<0.000000e+00> : vector<16xf32>
    %125 = vector.multi_reduction <add>, %124, %cst_22 [1] : vector<16x64xf32> to vector<16xf32>
    %126 = vector.shape_cast %125 : vector<16xf32> to vector<16x1xf32>
    %cst_23 = arith.constant 6.400000e+01 : f32
    %127 = vector.broadcast %cst_23 : f32 to vector<16x1xf32>
    %128 = arith.divf %126, %127 : vector<16x1xf32>
    %129 = vector.broadcast %121 : vector<16x1xf32> to vector<16x64xf32>
    %130 = arith.subf %117, %129 : vector<16x64xf32>
    %cst_24 = arith.constant 9.99999974E-6 : f32
    %131 = vector.broadcast %cst_24 : f32 to vector<16x1xf32>
    %132 = arith.addf %128, %131 : vector<16x1xf32>
    %133 = math.rsqrt %132 : vector<16x1xf32>
    %134 = vector.broadcast %133 : vector<16x1xf32> to vector<16x64xf32>
    %135 = arith.mulf %130, %134 : vector<16x64xf32>
    %c0_25 = arith.constant 0 : index
    %c0_26 = arith.constant 0 : index
    %136 = vector.load %arg8[%c0_25, %c0_26] : memref<4x64xf32, #tpu.memory_space<vmem>>, vector<1x64xf32>
    %137 = vector.shape_cast %136 : vector<1x64xf32> to vector<64xf32>
    %138 = vector.shape_cast %137 : vector<64xf32> to vector<1x64xf32>
    %139 = vector.broadcast %138 : vector<1x64xf32> to vector<16x64xf32>
    %140 = arith.mulf %135, %139 : vector<16x64xf32>
    %c0_27 = arith.constant 0 : index
    %c0_28 = arith.constant 0 : index
    %141 = vector.load %arg9[%c0_27, %c0_28] : memref<4x64xf32, #tpu.memory_space<vmem>>, vector<1x64xf32>
    %142 = vector.shape_cast %141 : vector<1x64xf32> to vector<64xf32>
    %143 = vector.shape_cast %142 : vector<64xf32> to vector<1x64xf32>
    %144 = vector.broadcast %143 : vector<1x64xf32> to vector<16x64xf32>
    %145 = arith.addf %140, %144 : vector<16x64xf32>
    %c0_29 = arith.constant 0 : index
    %c0_30 = arith.constant 0 : index
    %c0_31 = arith.constant 0 : index
    %146 = vector.load %arg10[%c0_29, %c0_30, %c0_31] : memref<2x2x64xf32, #tpu.memory_space<vmem>>, vector<1x2x64xf32>
    %147 = vector.shape_cast %146 : vector<1x2x64xf32> to vector<2x64xf32>
    %148 = vector.extract_strided_slice %147 {offsets = [0, 0], sizes = [1, 64], strides = [1, 1]} : vector<2x64xf32> to vector<1x64xf32>
    %149 = vector.shape_cast %148 : vector<1x64xf32> to vector<64xf32>
    %150 = vector.shape_cast %149 : vector<64xf32> to vector<1x64xf32>
    %151 = vector.broadcast %150 : vector<1x64xf32> to vector<16x64xf32>
    %152 = arith.mulf %145, %151 : vector<16x64xf32>
    %153 = vector.extract_strided_slice %147 {offsets = [1, 0], sizes = [1, 64], strides = [1, 1]} : vector<2x64xf32> to vector<1x64xf32>
    %154 = vector.shape_cast %153 : vector<1x64xf32> to vector<64xf32>
    %155 = vector.shape_cast %154 : vector<64xf32> to vector<1x64xf32>
    %156 = vector.broadcast %155 : vector<1x64xf32> to vector<16x64xf32>
    %157 = arith.addf %152, %156 : vector<16x64xf32>
    %158 = arith.truncf %157 : vector<16x64xf32> to vector<16x64xbf16>
    %c0_32 = arith.constant 0 : index
    %c0_33 = arith.constant 0 : index
    %c0_34 = arith.constant 0 : index
    %159 = vector.load %arg11[%c0_32, %c0_33, %c0_34] : memref<2x64x256xbf16, #tpu.memory_space<vmem>>, vector<1x64x256xbf16>
    %160 = vector.shape_cast %159 : vector<1x64x256xbf16> to vector<64x256xbf16>
    %cst_35 = arith.constant dense<0.000000e+00> : vector<16x256xf32>
    %161 = tpu.matmul %158, %160, %cst_35 {dimension_numbers = #tpu.dot_dimension_numbers<[1], [0], [0], [1], [0, 0, 1, 1], [], []>} : vector<16x64xbf16>, vector<64x256xbf16>, vector<16x256xf32> -> vector<16x256xf32>
    %c0_36 = arith.constant 0 : index
    %c0_37 = arith.constant 0 : index
    %162 = vector.load %arg12[%c0_36, %c0_37] : memref<2x256xf32, #tpu.memory_space<vmem>>, vector<1x256xf32>
    %163 = vector.shape_cast %162 : vector<1x256xf32> to vector<256xf32>
    %164 = vector.shape_cast %163 : vector<256xf32> to vector<1x256xf32>
    %165 = vector.broadcast %164 : vector<1x256xf32> to vector<16x256xf32>
    %166 = arith.addf %161, %165 : vector<16x256xf32>
    %167 = arith.negf %166 : vector<16x256xf32>
    %168 = math.exp %167 : vector<16x256xf32>
    %cst_38 = arith.constant 1.000000e+00 : f32
    %169 = vector.broadcast %cst_38 : f32 to vector<16x256xf32>
    %170 = arith.addf %169, %168 : vector<16x256xf32>
    %171 = arith.divf %169, %170 : vector<16x256xf32>
    %172 = arith.mulf %166, %171 : vector<16x256xf32>
    %173 = arith.truncf %172 : vector<16x256xf32> to vector<16x256xbf16>
    %c0_39 = arith.constant 0 : index
    %c0_40 = arith.constant 0 : index
    %c0_41 = arith.constant 0 : index
    %174 = vector.load %arg13[%c0_39, %c0_40, %c0_41] : memref<2x256x64xbf16, #tpu.memory_space<vmem>>, vector<1x256x64xbf16>
    %175 = vector.shape_cast %174 : vector<1x256x64xbf16> to vector<256x64xbf16>
    %cst_42 = arith.constant dense<0.000000e+00> : vector<16x64xf32>
    %176 = tpu.matmul %173, %175, %cst_42 {dimension_numbers = #tpu.dot_dimension_numbers<[1], [0], [0], [1], [0, 0, 1, 1], [], []>} : vector<16x256xbf16>, vector<256x64xbf16>, vector<16x64xf32> -> vector<16x64xf32>
    %c0_43 = arith.constant 0 : index
    %c0_44 = arith.constant 0 : index
    %177 = vector.load %arg14[%c0_43, %c0_44] : memref<2x64xf32, #tpu.memory_space<vmem>>, vector<1x64xf32>
    %178 = vector.shape_cast %177 : vector<1x64xf32> to vector<64xf32>
    %179 = vector.shape_cast %178 : vector<64xf32> to vector<1x64xf32>
    %180 = vector.broadcast %179 : vector<1x64xf32> to vector<16x64xf32>
    %181 = arith.addf %176, %180 : vector<16x64xf32>
    %182 = arith.addf %145, %181 : vector<16x64xf32>
    %cst_45 = arith.constant dense<0.000000e+00> : vector<16xf32>
    %183 = vector.multi_reduction <add>, %182, %cst_45 [1] : vector<16x64xf32> to vector<16xf32>
    %184 = vector.shape_cast %183 : vector<16xf32> to vector<16x1xf32>
    %cst_46 = arith.constant 6.400000e+01 : f32
    %185 = vector.broadcast %cst_46 : f32 to vector<16x1xf32>
    %186 = arith.divf %184, %185 : vector<16x1xf32>
    %187 = vector.broadcast %186 : vector<16x1xf32> to vector<16x64xf32>
    %188 = arith.subf %182, %187 : vector<16x64xf32>
    %189 = arith.mulf %188, %188 : vector<16x64xf32>
    %cst_47 = arith.constant dense<0.000000e+00> : vector<16xf32>
    %190 = vector.multi_reduction <add>, %189, %cst_47 [1] : vector<16x64xf32> to vector<16xf32>
    %191 = vector.shape_cast %190 : vector<16xf32> to vector<16x1xf32>
    %cst_48 = arith.constant 6.400000e+01 : f32
    %192 = vector.broadcast %cst_48 : f32 to vector<16x1xf32>
    %193 = arith.divf %191, %192 : vector<16x1xf32>
    %194 = vector.broadcast %186 : vector<16x1xf32> to vector<16x64xf32>
    %195 = arith.subf %182, %194 : vector<16x64xf32>
    %cst_49 = arith.constant 9.99999974E-6 : f32
    %196 = vector.broadcast %cst_49 : f32 to vector<16x1xf32>
    %197 = arith.addf %193, %196 : vector<16x1xf32>
    %198 = math.rsqrt %197 : vector<16x1xf32>
    %199 = vector.broadcast %198 : vector<16x1xf32> to vector<16x64xf32>
    %200 = arith.mulf %195, %199 : vector<16x64xf32>
    %c1_50 = arith.constant 1 : index
    %c0_51 = arith.constant 0 : index
    %201 = vector.load %arg8[%c1_50, %c0_51] : memref<4x64xf32, #tpu.memory_space<vmem>>, vector<1x64xf32>
    %202 = vector.shape_cast %201 : vector<1x64xf32> to vector<64xf32>
    %203 = vector.shape_cast %202 : vector<64xf32> to vector<1x64xf32>
    %204 = vector.broadcast %203 : vector<1x64xf32> to vector<16x64xf32>
    %205 = arith.mulf %200, %204 : vector<16x64xf32>
    %c1_52 = arith.constant 1 : index
    %c0_53 = arith.constant 0 : index
    %206 = vector.load %arg9[%c1_52, %c0_53] : memref<4x64xf32, #tpu.memory_space<vmem>>, vector<1x64xf32>
    %207 = vector.shape_cast %206 : vector<1x64xf32> to vector<64xf32>
    %208 = vector.shape_cast %207 : vector<64xf32> to vector<1x64xf32>
    %209 = vector.broadcast %208 : vector<1x64xf32> to vector<16x64xf32>
    %210 = arith.addf %205, %209 : vector<16x64xf32>
    %c0_54 = arith.constant 0 : index
    %c0_55 = arith.constant 0 : index
    %211 = vector.load %arg15[%c0_54, %c0_55] : memref<2x64xf32, #tpu.memory_space<vmem>>, vector<1x64xf32>
    %212 = vector.shape_cast %211 : vector<1x64xf32> to vector<64xf32>
    %213 = vector.shape_cast %212 : vector<64xf32> to vector<1x64xf32>
    %214 = vector.broadcast %213 : vector<1x64xf32> to vector<16x64xf32>
    %215 = arith.mulf %210, %214 : vector<16x64xf32>
    %c1_56 = arith.constant 1 : index
    %c0_57 = arith.constant 0 : index
    %216 = vector.load %arg15[%c1_56, %c0_57] : memref<2x64xf32, #tpu.memory_space<vmem>>, vector<1x64xf32>
    %217 = vector.shape_cast %216 : vector<1x64xf32> to vector<64xf32>
    %218 = vector.shape_cast %217 : vector<64xf32> to vector<1x64xf32>
    %219 = vector.broadcast %218 : vector<1x64xf32> to vector<16x64xf32>
    %220 = arith.addf %215, %219 : vector<16x64xf32>
    %221 = arith.truncf %220 : vector<16x64xf32> to vector<16x64xbf16>
    %c0_58 = arith.constant 0 : index
    %c0_59 = arith.constant 0 : index
    %222 = vector.load %arg16[%c0_58, %c0_59] : memref<64x128xbf16, #tpu.memory_space<vmem>>, vector<64x128xbf16>
    %cst_60 = arith.constant dense<0.000000e+00> : vector<16x128xf32>
    %223 = tpu.matmul %221, %222, %cst_60 {dimension_numbers = #tpu.dot_dimension_numbers<[1], [0], [0], [1], [0, 0, 1, 1], [], []>} : vector<16x64xbf16>, vector<64x128xbf16>, vector<16x128xf32> -> vector<16x128xf32>
    %c0_61 = arith.constant 0 : index
    %c0_62 = arith.constant 0 : index
    %224 = vector.load %arg17[%c0_61, %c0_62] : memref<1x128xf32, #tpu.memory_space<vmem>>, vector<1x128xf32>
    %225 = vector.shape_cast %224 : vector<1x128xf32> to vector<128xf32>
    %226 = vector.shape_cast %225 : vector<128xf32> to vector<1x128xf32>
    %227 = vector.broadcast %226 : vector<1x128xf32> to vector<16x128xf32>
    %228 = arith.addf %223, %227 : vector<16x128xf32>
    %229 = arith.negf %228 : vector<16x128xf32>
    %230 = math.exp %229 : vector<16x128xf32>
    %cst_63 = arith.constant 1.000000e+00 : f32
    %231 = vector.broadcast %cst_63 : f32 to vector<16x128xf32>
    %232 = arith.addf %231, %230 : vector<16x128xf32>
    %233 = arith.divf %231, %232 : vector<16x128xf32>
    %234 = arith.mulf %228, %233 : vector<16x128xf32>
    %235 = vector.shape_cast %234 : vector<16x128xf32> to vector<1x16x128xf32>
    %cst_64 = arith.constant 0.000000e+00 : f32
    %236 = vector.broadcast %cst_64 : f32 to vector<1x16x128xf32>
    %c0_65 = arith.constant 0 : index
    %c0_66 = arith.constant 0 : index
    %c0_67 = arith.constant 0 : index
    %237 = vector.load %arg23[%c0_65, %c0_66, %c0_67] : memref<1x47x128xf32, #tpu.memory_space<vmem>>, vector<1x16x128xf32>
    tpu.vector_store %arg23[%c0_65, %c0_66, %c0_67], %236 {strides = array<i32>} : memref<1x47x128xf32, #tpu.memory_space<vmem>>, vector<1x16x128xf32>,
    %cst_68 = arith.constant 0.000000e+00 : f32
    %238 = vector.broadcast %cst_68 : f32 to vector<1x15x128xf32>
    %c0_69 = arith.constant 0 : index
    %c32 = arith.constant 32 : index
    %c0_70 = arith.constant 0 : index
    %239 = vector.load %arg23[%c0_69, %c32, %c0_70] : memref<1x47x128xf32, #tpu.memory_space<vmem>>, vector<1x15x128xf32>
    tpu.vector_store %arg23[%c0_69, %c32, %c0_70], %238 {strides = array<i32>} : memref<1x47x128xf32, #tpu.memory_space<vmem>>, vector<1x15x128xf32>,
    %c0_71 = arith.constant 0 : index
    %c16 = arith.constant 16 : index
    %c0_72 = arith.constant 0 : index
    %240 = vector.load %arg23[%c0_71, %c16, %c0_72] : memref<1x47x128xf32, #tpu.memory_space<vmem>>, vector<1x16x128xf32>
    tpu.vector_store %arg23[%c0_71, %c16, %c0_72], %235 {strides = array<i32>} : memref<1x47x128xf32, #tpu.memory_space<vmem>>, vector<1x16x128xf32>,
    %cst_73 = arith.constant 0.000000e+00 : f32
    %241 = vector.broadcast %cst_73 : f32 to vector<1x16x128xf32>
    %cst_74 = arith.constant 0.000000e+00 : f32
    %242 = vector.broadcast %cst_74 : f32 to vector<1x16x128xf32>
    %cst_75 = arith.constant 0.000000e+00 : f32
    %243 = vector.broadcast %cst_75 : f32 to vector<1x16x128xf32>
    %cst_76 = arith.constant 0.000000e+00 : f32
    %244 = vector.broadcast %cst_76 : f32 to vector<1x16x128xf32>
    %c0_77 = arith.constant 0 : index
    %c0_78 = arith.constant 0 : index
    %245 = vector.load %arg18[%c0_77, %c0_78] : memref<31x128xf32, #tpu.memory_space<vmem>>, vector<1x128xf32>
    %246 = vector.shape_cast %245 : vector<1x128xf32> to vector<128xf32>
    %c0_79 = arith.constant 0 : index
    %c1_80 = arith.constant 1 : index
    %c0_81 = arith.constant 0 : index
    %247 = vector.load %arg23[%c0_79, %c1_80, %c0_81] : memref<1x47x128xf32, #tpu.memory_space<vmem>>, vector<1x16x128xf32>
    %248 = vector.shape_cast %246 : vector<128xf32> to vector<1x1x128xf32>
    %249 = vector.broadcast %248 : vector<1x1x128xf32> to vector<1x16x128xf32>
    %250 = arith.mulf %247, %249 : vector<1x16x128xf32>
    %251 = arith.addf %241, %250 : vector<1x16x128xf32>
    %c1_82 = arith.constant 1 : index
    %c0_83 = arith.constant 0 : index
    %252 = vector.load %arg18[%c1_82, %c0_83] : memref<31x128xf32, #tpu.memory_space<vmem>>, vector<1x128xf32>
    %253 = vector.shape_cast %252 : vector<1x128xf32> to vector<128xf32>
    %c0_84 = arith.constant 0 : index
    %c2 = arith.constant 2 : index
    %c0_85 = arith.constant 0 : index
    %254 = vector.load %arg23[%c0_84, %c2, %c0_85] : memref<1x47x128xf32, #tpu.memory_space<vmem>>, vector<1x16x128xf32>
    %255 = vector.shape_cast %253 : vector<128xf32> to vector<1x1x128xf32>
    %256 = vector.broadcast %255 : vector<1x1x128xf32> to vector<1x16x128xf32>
    %257 = arith.mulf %254, %256 : vector<1x16x128xf32>
    %258 = arith.addf %242, %257 : vector<1x16x128xf32>
    %c2_86 = arith.constant 2 : index
    %c0_87 = arith.constant 0 : index
    %259 = vector.load %arg18[%c2_86, %c0_87] : memref<31x128xf32, #tpu.memory_space<vmem>>, vector<1x128xf32>
    %260 = vector.shape_cast %259 : vector<1x128xf32> to vector<128xf32>
    %c0_88 = arith.constant 0 : index
    %c3 = arith.constant 3 : index
    %c0_89 = arith.constant 0 : index
    %261 = vector.load %arg23[%c0_88, %c3, %c0_89] : memref<1x47x128xf32, #tpu.memory_space<vmem>>, vector<1x16x128xf32>
    %262 = vector.shape_cast %260 : vector<128xf32> to vector<1x1x128xf32>
    %263 = vector.broadcast %262 : vector<1x1x128xf32> to vector<1x16x128xf32>
    %264 = arith.mulf %261, %263 : vector<1x16x128xf32>
    %265 = arith.addf %243, %264 : vector<1x16x128xf32>
    %c3_90 = arith.constant 3 : index
    %c0_91 = arith.constant 0 : index
    %266 = vector.load %arg18[%c3_90, %c0_91] : memref<31x128xf32, #tpu.memory_space<vmem>>, vector<1x128xf32>
    %267 = vector.shape_cast %266 : vector<1x128xf32> to vector<128xf32>
    %c0_92 = arith.constant 0 : index
    %c4 = arith.constant 4 : index
    %c0_93 = arith.constant 0 : index
    %268 = vector.load %arg23[%c0_92, %c4, %c0_93] : memref<1x47x128xf32, #tpu.memory_space<vmem>>, vector<1x16x128xf32>
    %269 = vector.shape_cast %267 : vector<128xf32> to vector<1x1x128xf32>
    %270 = vector.broadcast %269 : vector<1x1x128xf32> to vector<1x16x128xf32>
    %271 = arith.mulf %268, %270 : vector<1x16x128xf32>
    %272 = arith.addf %244, %271 : vector<1x16x128xf32>
    %c4_94 = arith.constant 4 : index
    %c0_95 = arith.constant 0 : index
    %273 = vector.load %arg18[%c4_94, %c0_95] : memref<31x128xf32, #tpu.memory_space<vmem>>, vector<1x128xf32>
    %274 = vector.shape_cast %273 : vector<1x128xf32> to vector<128xf32>
    %c0_96 = arith.constant 0 : index
    %c5 = arith.constant 5 : index
    %c0_97 = arith.constant 0 : index
    %275 = vector.load %arg23[%c0_96, %c5, %c0_97] : memref<1x47x128xf32, #tpu.memory_space<vmem>>, vector<1x16x128xf32>
    %276 = vector.shape_cast %274 : vector<128xf32> to vector<1x1x128xf32>
    %277 = vector.broadcast %276 : vector<1x1x128xf32> to vector<1x16x128xf32>
    %278 = arith.mulf %275, %277 : vector<1x16x128xf32>
    %279 = arith.addf %251, %278 : vector<1x16x128xf32>
    %c5_98 = arith.constant 5 : index
    %c0_99 = arith.constant 0 : index
    %280 = vector.load %arg18[%c5_98, %c0_99] : memref<31x128xf32, #tpu.memory_space<vmem>>, vector<1x128xf32>
    %281 = vector.shape_cast %280 : vector<1x128xf32> to vector<128xf32>
    %c0_100 = arith.constant 0 : index
    %c6 = arith.constant 6 : index
    %c0_101 = arith.constant 0 : index
    %282 = vector.load %arg23[%c0_100, %c6, %c0_101] : memref<1x47x128xf32, #tpu.memory_space<vmem>>, vector<1x16x128xf32>
    %283 = vector.shape_cast %281 : vector<128xf32> to vector<1x1x128xf32>
    %284 = vector.broadcast %283 : vector<1x1x128xf32> to vector<1x16x128xf32>
    %285 = arith.mulf %282, %284 : vector<1x16x128xf32>
    %286 = arith.addf %258, %285 : vector<1x16x128xf32>
    %c6_102 = arith.constant 6 : index
    %c0_103 = arith.constant 0 : index
    %287 = vector.load %arg18[%c6_102, %c0_103] : memref<31x128xf32, #tpu.memory_space<vmem>>, vector<1x128xf32>
    %288 = vector.shape_cast %287 : vector<1x128xf32> to vector<128xf32>
    %c0_104 = arith.constant 0 : index
    %c7 = arith.constant 7 : index
    %c0_105 = arith.constant 0 : index
    %289 = vector.load %arg23[%c0_104, %c7, %c0_105] : memref<1x47x128xf32, #tpu.memory_space<vmem>>, vector<1x16x128xf32>
    %290 = vector.shape_cast %288 : vector<128xf32> to vector<1x1x128xf32>
    %291 = vector.broadcast %290 : vector<1x1x128xf32> to vector<1x16x128xf32>
    %292 = arith.mulf %289, %291 : vector<1x16x128xf32>
    %293 = arith.addf %265, %292 : vector<1x16x128xf32>
    %c7_106 = arith.constant 7 : index
    %c0_107 = arith.constant 0 : index
    %294 = vector.load %arg18[%c7_106, %c0_107] : memref<31x128xf32, #tpu.memory_space<vmem>>, vector<1x128xf32>
    %295 = vector.shape_cast %294 : vector<1x128xf32> to vector<128xf32>
    %c0_108 = arith.constant 0 : index
    %c8 = arith.constant 8 : index
    %c0_109 = arith.constant 0 : index
    %296 = vector.load %arg23[%c0_108, %c8, %c0_109] : memref<1x47x128xf32, #tpu.memory_space<vmem>>, vector<1x16x128xf32>
    %297 = vector.shape_cast %295 : vector<128xf32> to vector<1x1x128xf32>
    %298 = vector.broadcast %297 : vector<1x1x128xf32> to vector<1x16x128xf32>
    %299 = arith.mulf %296, %298 : vector<1x16x128xf32>
    %300 = arith.addf %272, %299 : vector<1x16x128xf32>
    %c8_110 = arith.constant 8 : index
    %c0_111 = arith.constant 0 : index
    %301 = vector.load %arg18[%c8_110, %c0_111] : memref<31x128xf32, #tpu.memory_space<vmem>>, vector<1x128xf32>
    %302 = vector.shape_cast %301 : vector<1x128xf32> to vector<128xf32>
    %c0_112 = arith.constant 0 : index
    %c9 = arith.constant 9 : index
    %c0_113 = arith.constant 0 : index
    %303 = vector.load %arg23[%c0_112, %c9, %c0_113] : memref<1x47x128xf32, #tpu.memory_space<vmem>>, vector<1x16x128xf32>
    %304 = vector.shape_cast %302 : vector<128xf32> to vector<1x1x128xf32>
    %305 = vector.broadcast %304 : vector<1x1x128xf32> to vector<1x16x128xf32>
    %306 = arith.mulf %303, %305 : vector<1x16x128xf32>
    %307 = arith.addf %279, %306 : vector<1x16x128xf32>
    %c9_114 = arith.constant 9 : index
    %c0_115 = arith.constant 0 : index
    %308 = vector.load %arg18[%c9_114, %c0_115] : memref<31x128xf32, #tpu.memory_space<vmem>>, vector<1x128xf32>
    %309 = vector.shape_cast %308 : vector<1x128xf32> to vector<128xf32>
    %c0_116 = arith.constant 0 : index
    %c10 = arith.constant 10 : index
    %c0_117 = arith.constant 0 : index
    %310 = vector.load %arg23[%c0_116, %c10, %c0_117] : memref<1x47x128xf32, #tpu.memory_space<vmem>>, vector<1x16x128xf32>
    %311 = vector.shape_cast %309 : vector<128xf32> to vector<1x1x128xf32>
    %312 = vector.broadcast %311 : vector<1x1x128xf32> to vector<1x16x128xf32>
    %313 = arith.mulf %310, %312 : vector<1x16x128xf32>
    %314 = arith.addf %286, %313 : vector<1x16x128xf32>
    %c10_118 = arith.constant 10 : index
    %c0_119 = arith.constant 0 : index
    %315 = vector.load %arg18[%c10_118, %c0_119] : memref<31x128xf32, #tpu.memory_space<vmem>>, vector<1x128xf32>
    %316 = vector.shape_cast %315 : vector<1x128xf32> to vector<128xf32>
    %c0_120 = arith.constant 0 : index
    %c11 = arith.constant 11 : index
    %c0_121 = arith.constant 0 : index
    %317 = vector.load %arg23[%c0_120, %c11, %c0_121] : memref<1x47x128xf32, #tpu.memory_space<vmem>>, vector<1x16x128xf32>
    %318 = vector.shape_cast %316 : vector<128xf32> to vector<1x1x128xf32>
    %319 = vector.broadcast %318 : vector<1x1x128xf32> to vector<1x16x128xf32>
    %320 = arith.mulf %317, %319 : vector<1x16x128xf32>
    %321 = arith.addf %293, %320 : vector<1x16x128xf32>
    %c11_122 = arith.constant 11 : index
    %c0_123 = arith.constant 0 : index
    %322 = vector.load %arg18[%c11_122, %c0_123] : memref<31x128xf32, #tpu.memory_space<vmem>>, vector<1x128xf32>
    %323 = vector.shape_cast %322 : vector<1x128xf32> to vector<128xf32>
    %c0_124 = arith.constant 0 : index
    %c12 = arith.constant 12 : index
    %c0_125 = arith.constant 0 : index
    %324 = vector.load %arg23[%c0_124, %c12, %c0_125] : memref<1x47x128xf32, #tpu.memory_space<vmem>>, vector<1x16x128xf32>
    %325 = vector.shape_cast %323 : vector<128xf32> to vector<1x1x128xf32>
    %326 = vector.broadcast %325 : vector<1x1x128xf32> to vector<1x16x128xf32>
    %327 = arith.mulf %324, %326 : vector<1x16x128xf32>
    %328 = arith.addf %300, %327 : vector<1x16x128xf32>
    %c12_126 = arith.constant 12 : index
    %c0_127 = arith.constant 0 : index
    %329 = vector.load %arg18[%c12_126, %c0_127] : memref<31x128xf32, #tpu.memory_space<vmem>>, vector<1x128xf32>
    %330 = vector.shape_cast %329 : vector<1x128xf32> to vector<128xf32>
    %c0_128 = arith.constant 0 : index
    %c13 = arith.constant 13 : index
    %c0_129 = arith.constant 0 : index
    %331 = vector.load %arg23[%c0_128, %c13, %c0_129] : memref<1x47x128xf32, #tpu.memory_space<vmem>>, vector<1x16x128xf32>
    %332 = vector.shape_cast %330 : vector<128xf32> to vector<1x1x128xf32>
    %333 = vector.broadcast %332 : vector<1x1x128xf32> to vector<1x16x128xf32>
    %334 = arith.mulf %331, %333 : vector<1x16x128xf32>
    %335 = arith.addf %307, %334 : vector<1x16x128xf32>
    %c13_130 = arith.constant 13 : index
    %c0_131 = arith.constant 0 : index
    %336 = vector.load %arg18[%c13_130, %c0_131] : memref<31x128xf32, #tpu.memory_space<vmem>>, vector<1x128xf32>
    %337 = vector.shape_cast %336 : vector<1x128xf32> to vector<128xf32>
    %c0_132 = arith.constant 0 : index
    %c14 = arith.constant 14 : index
    %c0_133 = arith.constant 0 : index
    %338 = vector.load %arg23[%c0_132, %c14, %c0_133] : memref<1x47x128xf32, #tpu.memory_space<vmem>>, vector<1x16x128xf32>
    %339 = vector.shape_cast %337 : vector<128xf32> to vector<1x1x128xf32>
    %340 = vector.broadcast %339 : vector<1x1x128xf32> to vector<1x16x128xf32>
    %341 = arith.mulf %338, %340 : vector<1x16x128xf32>
    %342 = arith.addf %314, %341 : vector<1x16x128xf32>
    %c14_134 = arith.constant 14 : index
    %c0_135 = arith.constant 0 : index
    %343 = vector.load %arg18[%c14_134, %c0_135] : memref<31x128xf32, #tpu.memory_space<vmem>>, vector<1x128xf32>
    %344 = vector.shape_cast %343 : vector<1x128xf32> to vector<128xf32>
    %c0_136 = arith.constant 0 : index
    %c15 = arith.constant 15 : index
    %c0_137 = arith.constant 0 : index
    %345 = vector.load %arg23[%c0_136, %c15, %c0_137] : memref<1x47x128xf32, #tpu.memory_space<vmem>>, vector<1x16x128xf32>
    %346 = vector.shape_cast %344 : vector<128xf32> to vector<1x1x128xf32>
    %347 = vector.broadcast %346 : vector<1x1x128xf32> to vector<1x16x128xf32>
    %348 = arith.mulf %345, %347 : vector<1x16x128xf32>
    %349 = arith.addf %321, %348 : vector<1x16x128xf32>
    %c15_138 = arith.constant 15 : index
    %c0_139 = arith.constant 0 : index
    %350 = vector.load %arg18[%c15_138, %c0_139] : memref<31x128xf32, #tpu.memory_space<vmem>>, vector<1x128xf32>
    %351 = vector.shape_cast %350 : vector<1x128xf32> to vector<128xf32>
    %c0_140 = arith.constant 0 : index
    %c16_141 = arith.constant 16 : index
    %c0_142 = arith.constant 0 : index
    %352 = vector.load %arg23[%c0_140, %c16_141, %c0_142] : memref<1x47x128xf32, #tpu.memory_space<vmem>>, vector<1x16x128xf32>
    %353 = vector.shape_cast %351 : vector<128xf32> to vector<1x1x128xf32>
    %354 = vector.broadcast %353 : vector<1x1x128xf32> to vector<1x16x128xf32>
    %355 = arith.mulf %352, %354 : vector<1x16x128xf32>
    %356 = arith.addf %328, %355 : vector<1x16x128xf32>
    %c16_143 = arith.constant 16 : index
    %c0_144 = arith.constant 0 : index
    %357 = vector.load %arg18[%c16_143, %c0_144] : memref<31x128xf32, #tpu.memory_space<vmem>>, vector<1x128xf32>
    %358 = vector.shape_cast %357 : vector<1x128xf32> to vector<128xf32>
    %c0_145 = arith.constant 0 : index
    %c17 = arith.constant 17 : index
    %c0_146 = arith.constant 0 : index
    %359 = vector.load %arg23[%c0_145, %c17, %c0_146] : memref<1x47x128xf32, #tpu.memory_space<vmem>>, vector<1x16x128xf32>
    %360 = vector.shape_cast %358 : vector<128xf32> to vector<1x1x128xf32>
    %361 = vector.broadcast %360 : vector<1x1x128xf32> to vector<1x16x128xf32>
    %362 = arith.mulf %359, %361 : vector<1x16x128xf32>
    %363 = arith.addf %335, %362 : vector<1x16x128xf32>
    %c17_147 = arith.constant 17 : index
    %c0_148 = arith.constant 0 : index
    %364 = vector.load %arg18[%c17_147, %c0_148] : memref<31x128xf32, #tpu.memory_space<vmem>>, vector<1x128xf32>
    %365 = vector.shape_cast %364 : vector<1x128xf32> to vector<128xf32>
    %c0_149 = arith.constant 0 : index
    %c18 = arith.constant 18 : index
    %c0_150 = arith.constant 0 : index
    %366 = vector.load %arg23[%c0_149, %c18, %c0_150] : memref<1x47x128xf32, #tpu.memory_space<vmem>>, vector<1x16x128xf32>
    %367 = vector.shape_cast %365 : vector<128xf32> to vector<1x1x128xf32>
    %368 = vector.broadcast %367 : vector<1x1x128xf32> to vector<1x16x128xf32>
    %369 = arith.mulf %366, %368 : vector<1x16x128xf32>
    %370 = arith.addf %342, %369 : vector<1x16x128xf32>
    %c18_151 = arith.constant 18 : index
    %c0_152 = arith.constant 0 : index
    %371 = vector.load %arg18[%c18_151, %c0_152] : memref<31x128xf32, #tpu.memory_space<vmem>>, vector<1x128xf32>
    %372 = vector.shape_cast %371 : vector<1x128xf32> to vector<128xf32>
    %c0_153 = arith.constant 0 : index
    %c19 = arith.constant 19 : index
    %c0_154 = arith.constant 0 : index
    %373 = vector.load %arg23[%c0_153, %c19, %c0_154] : memref<1x47x128xf32, #tpu.memory_space<vmem>>, vector<1x16x128xf32>
    %374 = vector.shape_cast %372 : vector<128xf32> to vector<1x1x128xf32>
    %375 = vector.broadcast %374 : vector<1x1x128xf32> to vector<1x16x128xf32>
    %376 = arith.mulf %373, %375 : vector<1x16x128xf32>
    %377 = arith.addf %349, %376 : vector<1x16x128xf32>
    %c19_155 = arith.constant 19 : index
    %c0_156 = arith.constant 0 : index
    %378 = vector.load %arg18[%c19_155, %c0_156] : memref<31x128xf32, #tpu.memory_space<vmem>>, vector<1x128xf32>
    %379 = vector.shape_cast %378 : vector<1x128xf32> to vector<128xf32>
    %c0_157 = arith.constant 0 : index
    %c20 = arith.constant 20 : index
    %c0_158 = arith.constant 0 : index
    %380 = vector.load %arg23[%c0_157, %c20, %c0_158] : memref<1x47x128xf32, #tpu.memory_space<vmem>>, vector<1x16x128xf32>
    %381 = vector.shape_cast %379 : vector<128xf32> to vector<1x1x128xf32>
    %382 = vector.broadcast %381 : vector<1x1x128xf32> to vector<1x16x128xf32>
    %383 = arith.mulf %380, %382 : vector<1x16x128xf32>
    %384 = arith.addf %356, %383 : vector<1x16x128xf32>
    %c20_159 = arith.constant 20 : index
    %c0_160 = arith.constant 0 : index
    %385 = vector.load %arg18[%c20_159, %c0_160] : memref<31x128xf32, #tpu.memory_space<vmem>>, vector<1x128xf32>
    %386 = vector.shape_cast %385 : vector<1x128xf32> to vector<128xf32>
    %c0_161 = arith.constant 0 : index
    %c21 = arith.constant 21 : index
    %c0_162 = arith.constant 0 : index
    %387 = vector.load %arg23[%c0_161, %c21, %c0_162] : memref<1x47x128xf32, #tpu.memory_space<vmem>>, vector<1x16x128xf32>
    %388 = vector.shape_cast %386 : vector<128xf32> to vector<1x1x128xf32>
    %389 = vector.broadcast %388 : vector<1x1x128xf32> to vector<1x16x128xf32>
    %390 = arith.mulf %387, %389 : vector<1x16x128xf32>
    %391 = arith.addf %363, %390 : vector<1x16x128xf32>
    %c21_163 = arith.constant 21 : index
    %c0_164 = arith.constant 0 : index
    %392 = vector.load %arg18[%c21_163, %c0_164] : memref<31x128xf32, #tpu.memory_space<vmem>>, vector<1x128xf32>
    %393 = vector.shape_cast %392 : vector<1x128xf32> to vector<128xf32>
    %c0_165 = arith.constant 0 : index
    %c22 = arith.constant 22 : index
    %c0_166 = arith.constant 0 : index
    %394 = vector.load %arg23[%c0_165, %c22, %c0_166] : memref<1x47x128xf32, #tpu.memory_space<vmem>>, vector<1x16x128xf32>
    %395 = vector.shape_cast %393 : vector<128xf32> to vector<1x1x128xf32>
    %396 = vector.broadcast %395 : vector<1x1x128xf32> to vector<1x16x128xf32>
    %397 = arith.mulf %394, %396 : vector<1x16x128xf32>
    %398 = arith.addf %370, %397 : vector<1x16x128xf32>
    %c22_167 = arith.constant 22 : index
    %c0_168 = arith.constant 0 : index
    %399 = vector.load %arg18[%c22_167, %c0_168] : memref<31x128xf32, #tpu.memory_space<vmem>>, vector<1x128xf32>
    %400 = vector.shape_cast %399 : vector<1x128xf32> to vector<128xf32>
    %c0_169 = arith.constant 0 : index
    %c23 = arith.constant 23 : index
    %c0_170 = arith.constant 0 : index
    %401 = vector.load %arg23[%c0_169, %c23, %c0_170] : memref<1x47x128xf32, #tpu.memory_space<vmem>>, vector<1x16x128xf32>
    %402 = vector.shape_cast %400 : vector<128xf32> to vector<1x1x128xf32>
    %403 = vector.broadcast %402 : vector<1x1x128xf32> to vector<1x16x128xf32>
    %404 = arith.mulf %401, %403 : vector<1x16x128xf32>
    %405 = arith.addf %377, %404 : vector<1x16x128xf32>
    %c23_171 = arith.constant 23 : index
    %c0_172 = arith.constant 0 : index
    %406 = vector.load %arg18[%c23_171, %c0_172] : memref<31x128xf32, #tpu.memory_space<vmem>>, vector<1x128xf32>
    %407 = vector.shape_cast %406 : vector<1x128xf32> to vector<128xf32>
    %c0_173 = arith.constant 0 : index
    %c24 = arith.constant 24 : index
    %c0_174 = arith.constant 0 : index
    %408 = vector.load %arg23[%c0_173, %c24, %c0_174] : memref<1x47x128xf32, #tpu.memory_space<vmem>>, vector<1x16x128xf32>
    %409 = vector.shape_cast %407 : vector<128xf32> to vector<1x1x128xf32>
    %410 = vector.broadcast %409 : vector<1x1x128xf32> to vector<1x16x128xf32>
    %411 = arith.mulf %408, %410 : vector<1x16x128xf32>
    %412 = arith.addf %384, %411 : vector<1x16x128xf32>
    %c24_175 = arith.constant 24 : index
    %c0_176 = arith.constant 0 : index
    %413 = vector.load %arg18[%c24_175, %c0_176] : memref<31x128xf32, #tpu.memory_space<vmem>>, vector<1x128xf32>
    %414 = vector.shape_cast %413 : vector<1x128xf32> to vector<128xf32>
    %c0_177 = arith.constant 0 : index
    %c25 = arith.constant 25 : index
    %c0_178 = arith.constant 0 : index
    %415 = vector.load %arg23[%c0_177, %c25, %c0_178] : memref<1x47x128xf32, #tpu.memory_space<vmem>>, vector<1x16x128xf32>
    %416 = vector.shape_cast %414 : vector<128xf32> to vector<1x1x128xf32>
    %417 = vector.broadcast %416 : vector<1x1x128xf32> to vector<1x16x128xf32>
    %418 = arith.mulf %415, %417 : vector<1x16x128xf32>
    %419 = arith.addf %391, %418 : vector<1x16x128xf32>
    %c25_179 = arith.constant 25 : index
    %c0_180 = arith.constant 0 : index
    %420 = vector.load %arg18[%c25_179, %c0_180] : memref<31x128xf32, #tpu.memory_space<vmem>>, vector<1x128xf32>
    %421 = vector.shape_cast %420 : vector<1x128xf32> to vector<128xf32>
    %c0_181 = arith.constant 0 : index
    %c26 = arith.constant 26 : index
    %c0_182 = arith.constant 0 : index
    %422 = vector.load %arg23[%c0_181, %c26, %c0_182] : memref<1x47x128xf32, #tpu.memory_space<vmem>>, vector<1x16x128xf32>
    %423 = vector.shape_cast %421 : vector<128xf32> to vector<1x1x128xf32>
    %424 = vector.broadcast %423 : vector<1x1x128xf32> to vector<1x16x128xf32>
    %425 = arith.mulf %422, %424 : vector<1x16x128xf32>
    %426 = arith.addf %398, %425 : vector<1x16x128xf32>
    %c26_183 = arith.constant 26 : index
    %c0_184 = arith.constant 0 : index
    %427 = vector.load %arg18[%c26_183, %c0_184] : memref<31x128xf32, #tpu.memory_space<vmem>>, vector<1x128xf32>
    %428 = vector.shape_cast %427 : vector<1x128xf32> to vector<128xf32>
    %c0_185 = arith.constant 0 : index
    %c27 = arith.constant 27 : index
    %c0_186 = arith.constant 0 : index
    %429 = vector.load %arg23[%c0_185, %c27, %c0_186] : memref<1x47x128xf32, #tpu.memory_space<vmem>>, vector<1x16x128xf32>
    %430 = vector.shape_cast %428 : vector<128xf32> to vector<1x1x128xf32>
    %431 = vector.broadcast %430 : vector<1x1x128xf32> to vector<1x16x128xf32>
    %432 = arith.mulf %429, %431 : vector<1x16x128xf32>
    %433 = arith.addf %405, %432 : vector<1x16x128xf32>
    %c27_187 = arith.constant 27 : index
    %c0_188 = arith.constant 0 : index
    %434 = vector.load %arg18[%c27_187, %c0_188] : memref<31x128xf32, #tpu.memory_space<vmem>>, vector<1x128xf32>
    %435 = vector.shape_cast %434 : vector<1x128xf32> to vector<128xf32>
    %c0_189 = arith.constant 0 : index
    %c28 = arith.constant 28 : index
    %c0_190 = arith.constant 0 : index
    %436 = vector.load %arg23[%c0_189, %c28, %c0_190] : memref<1x47x128xf32, #tpu.memory_space<vmem>>, vector<1x16x128xf32>
    %437 = vector.shape_cast %435 : vector<128xf32> to vector<1x1x128xf32>
    %438 = vector.broadcast %437 : vector<1x1x128xf32> to vector<1x16x128xf32>
    %439 = arith.mulf %436, %438 : vector<1x16x128xf32>
    %440 = arith.addf %412, %439 : vector<1x16x128xf32>
    %c28_191 = arith.constant 28 : index
    %c0_192 = arith.constant 0 : index
    %441 = vector.load %arg18[%c28_191, %c0_192] : memref<31x128xf32, #tpu.memory_space<vmem>>, vector<1x128xf32>
    %442 = vector.shape_cast %441 : vector<1x128xf32> to vector<128xf32>
    %c0_193 = arith.constant 0 : index
    %c29 = arith.constant 29 : index
    %c0_194 = arith.constant 0 : index
    %443 = vector.load %arg23[%c0_193, %c29, %c0_194] : memref<1x47x128xf32, #tpu.memory_space<vmem>>, vector<1x16x128xf32>
    %444 = vector.shape_cast %442 : vector<128xf32> to vector<1x1x128xf32>
    %445 = vector.broadcast %444 : vector<1x1x128xf32> to vector<1x16x128xf32>
    %446 = arith.mulf %443, %445 : vector<1x16x128xf32>
    %447 = arith.addf %419, %446 : vector<1x16x128xf32>
    %c29_195 = arith.constant 29 : index
    %c0_196 = arith.constant 0 : index
    %448 = vector.load %arg18[%c29_195, %c0_196] : memref<31x128xf32, #tpu.memory_space<vmem>>, vector<1x128xf32>
    %449 = vector.shape_cast %448 : vector<1x128xf32> to vector<128xf32>
    %c0_197 = arith.constant 0 : index
    %c30 = arith.constant 30 : index
    %c0_198 = arith.constant 0 : index
    %450 = vector.load %arg23[%c0_197, %c30, %c0_198] : memref<1x47x128xf32, #tpu.memory_space<vmem>>, vector<1x16x128xf32>
    %451 = vector.shape_cast %449 : vector<128xf32> to vector<1x1x128xf32>
    %452 = vector.broadcast %451 : vector<1x1x128xf32> to vector<1x16x128xf32>
    %453 = arith.mulf %450, %452 : vector<1x16x128xf32>
    %454 = arith.addf %426, %453 : vector<1x16x128xf32>
    %c30_199 = arith.constant 30 : index
    %c0_200 = arith.constant 0 : index
    %455 = vector.load %arg18[%c30_199, %c0_200] : memref<31x128xf32, #tpu.memory_space<vmem>>, vector<1x128xf32>
    %456 = vector.shape_cast %455 : vector<1x128xf32> to vector<128xf32>
    %c0_201 = arith.constant 0 : index
    %c31 = arith.constant 31 : index
    %c0_202 = arith.constant 0 : index
    %457 = vector.load %arg23[%c0_201, %c31, %c0_202] : memref<1x47x128xf32, #tpu.memory_space<vmem>>, vector<1x16x128xf32>
    %458 = vector.shape_cast %456 : vector<128xf32> to vector<1x1x128xf32>
    %459 = vector.broadcast %458 : vector<1x1x128xf32> to vector<1x16x128xf32>
    %460 = arith.mulf %457, %459 : vector<1x16x128xf32>
    %461 = arith.addf %433, %460 : vector<1x16x128xf32>
    %462 = arith.addf %447, %454 : vector<1x16x128xf32>
    %463 = arith.addf %461, %440 : vector<1x16x128xf32>
    %464 = arith.addf %462, %463 : vector<1x16x128xf32>
    %c0_203 = arith.constant 0 : index
    %c0_204 = arith.constant 0 : index
    %465 = vector.load %arg19[%c0_203, %c0_204] : memref<1x128xf32, #tpu.memory_space<vmem>>, vector<1x128xf32>
    %466 = vector.shape_cast %465 : vector<1x128xf32> to vector<128xf32>
    %467 = vector.shape_cast %466 : vector<128xf32> to vector<1x1x128xf32>
    %468 = vector.broadcast %467 : vector<1x1x128xf32> to vector<1x16x128xf32>
    %469 = arith.addf %464, %468 : vector<1x16x128xf32>
    %470 = vector.shape_cast %469 : vector<1x16x128xf32> to vector<16x128xf32>
    %471 = arith.negf %470 : vector<16x128xf32>
    %472 = math.exp %471 : vector<16x128xf32>
    %cst_205 = arith.constant 1.000000e+00 : f32
    %473 = vector.broadcast %cst_205 : f32 to vector<16x128xf32>
    %474 = arith.addf %473, %472 : vector<16x128xf32>
    %475 = arith.divf %473, %474 : vector<16x128xf32>
    %476 = arith.mulf %470, %475 : vector<16x128xf32>
    %477 = arith.truncf %476 : vector<16x128xf32> to vector<16x128xbf16>
    %c0_206 = arith.constant 0 : index
    %c0_207 = arith.constant 0 : index
    %478 = vector.load %arg20[%c0_206, %c0_207] : memref<128x64xbf16, #tpu.memory_space<vmem>>, vector<128x64xbf16>
    %cst_208 = arith.constant dense<0.000000e+00> : vector<16x64xf32>
    %479 = tpu.matmul %477, %478, %cst_208 {dimension_numbers = #tpu.dot_dimension_numbers<[1], [0], [0], [1], [0, 0, 1, 1], [], []>} : vector<16x128xbf16>, vector<128x64xbf16>, vector<16x64xf32> -> vector<16x64xf32>
    %c0_209 = arith.constant 0 : index
    %c0_210 = arith.constant 0 : index
    %480 = vector.load %arg21[%c0_209, %c0_210] : memref<1x64xf32, #tpu.memory_space<vmem>>, vector<1x64xf32>
    %481 = vector.shape_cast %480 : vector<1x64xf32> to vector<64xf32>
    %482 = vector.shape_cast %481 : vector<64xf32> to vector<1x64xf32>
    %483 = vector.broadcast %482 : vector<1x64xf32> to vector<16x64xf32>
    %484 = arith.addf %479, %483 : vector<16x64xf32>
    %485 = arith.addf %210, %484 : vector<16x64xf32>
    %cst_211 = arith.constant dense<0.000000e+00> : vector<16xf32>
    %486 = vector.multi_reduction <add>, %485, %cst_211 [1] : vector<16x64xf32> to vector<16xf32>
    %487 = vector.shape_cast %486 : vector<16xf32> to vector<16x1xf32>
    %cst_212 = arith.constant 6.400000e+01 : f32
    %488 = vector.broadcast %cst_212 : f32 to vector<16x1xf32>
    %489 = arith.divf %487, %488 : vector<16x1xf32>
    %490 = vector.broadcast %489 : vector<16x1xf32> to vector<16x64xf32>
    %491 = arith.subf %485, %490 : vector<16x64xf32>
    %492 = arith.mulf %491, %491 : vector<16x64xf32>
    %cst_213 = arith.constant dense<0.000000e+00> : vector<16xf32>
    %493 = vector.multi_reduction <add>, %492, %cst_213 [1] : vector<16x64xf32> to vector<16xf32>
    %494 = vector.shape_cast %493 : vector<16xf32> to vector<16x1xf32>
    %cst_214 = arith.constant 6.400000e+01 : f32
    %495 = vector.broadcast %cst_214 : f32 to vector<16x1xf32>
    %496 = arith.divf %494, %495 : vector<16x1xf32>
    %497 = vector.broadcast %489 : vector<16x1xf32> to vector<16x64xf32>
    %498 = arith.subf %485, %497 : vector<16x64xf32>
    %cst_215 = arith.constant 9.99999974E-6 : f32
    %499 = vector.broadcast %cst_215 : f32 to vector<16x1xf32>
    %500 = arith.addf %496, %499 : vector<16x1xf32>
    %501 = math.rsqrt %500 : vector<16x1xf32>
    %502 = vector.broadcast %501 : vector<16x1xf32> to vector<16x64xf32>
    %503 = arith.mulf %498, %502 : vector<16x64xf32>
    %c2_216 = arith.constant 2 : index
    %c0_217 = arith.constant 0 : index
    %504 = vector.load %arg8[%c2_216, %c0_217] : memref<4x64xf32, #tpu.memory_space<vmem>>, vector<1x64xf32>
    %505 = vector.shape_cast %504 : vector<1x64xf32> to vector<64xf32>
    %506 = vector.shape_cast %505 : vector<64xf32> to vector<1x64xf32>
    %507 = vector.broadcast %506 : vector<1x64xf32> to vector<16x64xf32>
    %508 = arith.mulf %503, %507 : vector<16x64xf32>
    %c2_218 = arith.constant 2 : index
    %c0_219 = arith.constant 0 : index
    %509 = vector.load %arg9[%c2_218, %c0_219] : memref<4x64xf32, #tpu.memory_space<vmem>>, vector<1x64xf32>
    %510 = vector.shape_cast %509 : vector<1x64xf32> to vector<64xf32>
    %511 = vector.shape_cast %510 : vector<64xf32> to vector<1x64xf32>
    %512 = vector.broadcast %511 : vector<1x64xf32> to vector<16x64xf32>
    %513 = arith.addf %508, %512 : vector<16x64xf32>
    %c1_220 = arith.constant 1 : index
    %c0_221 = arith.constant 0 : index
    %c0_222 = arith.constant 0 : index
    %514 = vector.load %arg10[%c1_220, %c0_221, %c0_222] : memref<2x2x64xf32, #tpu.memory_space<vmem>>, vector<1x2x64xf32>
    %515 = vector.shape_cast %514 : vector<1x2x64xf32> to vector<2x64xf32>
    %516 = vector.extract_strided_slice %515 {offsets = [0, 0], sizes = [1, 64], strides = [1, 1]} : vector<2x64xf32> to vector<1x64xf32>
    %517 = vector.shape_cast %516 : vector<1x64xf32> to vector<64xf32>
    %518 = vector.shape_cast %517 : vector<64xf32> to vector<1x64xf32>
    %519 = vector.broadcast %518 : vector<1x64xf32> to vector<16x64xf32>
    %520 = arith.mulf %513, %519 : vector<16x64xf32>
    %521 = vector.extract_strided_slice %515 {offsets = [1, 0], sizes = [1, 64], strides = [1, 1]} : vector<2x64xf32> to vector<1x64xf32>
    %522 = vector.shape_cast %521 : vector<1x64xf32> to vector<64xf32>
    %523 = vector.shape_cast %522 : vector<64xf32> to vector<1x64xf32>
    %524 = vector.broadcast %523 : vector<1x64xf32> to vector<16x64xf32>
    %525 = arith.addf %520, %524 : vector<16x64xf32>
    %526 = arith.truncf %525 : vector<16x64xf32> to vector<16x64xbf16>
    %c1_223 = arith.constant 1 : index
    %c0_224 = arith.constant 0 : index
    %c0_225 = arith.constant 0 : index
    %527 = vector.load %arg11[%c1_223, %c0_224, %c0_225] : memref<2x64x256xbf16, #tpu.memory_space<vmem>>, vector<1x64x256xbf16>
    %528 = vector.shape_cast %527 : vector<1x64x256xbf16> to vector<64x256xbf16>
    %cst_226 = arith.constant dense<0.000000e+00> : vector<16x256xf32>
    %529 = tpu.matmul %526, %528, %cst_226 {dimension_numbers = #tpu.dot_dimension_numbers<[1], [0], [0], [1], [0, 0, 1, 1], [], []>} : vector<16x64xbf16>, vector<64x256xbf16>, vector<16x256xf32> -> vector<16x256xf32>
    %c1_227 = arith.constant 1 : index
    %c0_228 = arith.constant 0 : index
    %530 = vector.load %arg12[%c1_227, %c0_228] : memref<2x256xf32, #tpu.memory_space<vmem>>, vector<1x256xf32>
    %531 = vector.shape_cast %530 : vector<1x256xf32> to vector<256xf32>
    %532 = vector.shape_cast %531 : vector<256xf32> to vector<1x256xf32>
    %533 = vector.broadcast %532 : vector<1x256xf32> to vector<16x256xf32>
    %534 = arith.addf %529, %533 : vector<16x256xf32>
    %535 = arith.negf %534 : vector<16x256xf32>
    %536 = math.exp %535 : vector<16x256xf32>
    %cst_229 = arith.constant 1.000000e+00 : f32
    %537 = vector.broadcast %cst_229 : f32 to vector<16x256xf32>
    %538 = arith.addf %537, %536 : vector<16x256xf32>
    %539 = arith.divf %537, %538 : vector<16x256xf32>
    %540 = arith.mulf %534, %539 : vector<16x256xf32>
    %541 = arith.truncf %540 : vector<16x256xf32> to vector<16x256xbf16>
    %c1_230 = arith.constant 1 : index
    %c0_231 = arith.constant 0 : index
    %c0_232 = arith.constant 0 : index
    %542 = vector.load %arg13[%c1_230, %c0_231, %c0_232] : memref<2x256x64xbf16, #tpu.memory_space<vmem>>, vector<1x256x64xbf16>
    %543 = vector.shape_cast %542 : vector<1x256x64xbf16> to vector<256x64xbf16>
    %cst_233 = arith.constant dense<0.000000e+00> : vector<16x64xf32>
    %544 = tpu.matmul %541, %543, %cst_233 {dimension_numbers = #tpu.dot_dimension_numbers<[1], [0], [0], [1], [0, 0, 1, 1], [], []>} : vector<16x256xbf16>, vector<256x64xbf16>, vector<16x64xf32> -> vector<16x64xf32>
    %c1_234 = arith.constant 1 : index
    %c0_235 = arith.constant 0 : index
    %545 = vector.load %arg14[%c1_234, %c0_235] : memref<2x64xf32, #tpu.memory_space<vmem>>, vector<1x64xf32>
    %546 = vector.shape_cast %545 : vector<1x64xf32> to vector<64xf32>
    %547 = vector.shape_cast %546 : vector<64xf32> to vector<1x64xf32>
    %548 = vector.broadcast %547 : vector<1x64xf32> to vector<16x64xf32>
    %549 = arith.addf %544, %548 : vector<16x64xf32>
    %550 = arith.addf %513, %549 : vector<16x64xf32>
    %cst_236 = arith.constant dense<0.000000e+00> : vector<16xf32>
    %551 = vector.multi_reduction <add>, %550, %cst_236 [1] : vector<16x64xf32> to vector<16xf32>
    %552 = vector.shape_cast %551 : vector<16xf32> to vector<16x1xf32>
    %cst_237 = arith.constant 6.400000e+01 : f32
    %553 = vector.broadcast %cst_237 : f32 to vector<16x1xf32>
    %554 = arith.divf %552, %553 : vector<16x1xf32>
    %555 = vector.broadcast %554 : vector<16x1xf32> to vector<16x64xf32>
    %556 = arith.subf %550, %555 : vector<16x64xf32>
    %557 = arith.mulf %556, %556 : vector<16x64xf32>
    %cst_238 = arith.constant dense<0.000000e+00> : vector<16xf32>
    %558 = vector.multi_reduction <add>, %557, %cst_238 [1] : vector<16x64xf32> to vector<16xf32>
    %559 = vector.shape_cast %558 : vector<16xf32> to vector<16x1xf32>
    %cst_239 = arith.constant 6.400000e+01 : f32
    %560 = vector.broadcast %cst_239 : f32 to vector<16x1xf32>
    %561 = arith.divf %559, %560 : vector<16x1xf32>
    %562 = vector.broadcast %554 : vector<16x1xf32> to vector<16x64xf32>
    %563 = arith.subf %550, %562 : vector<16x64xf32>
    %cst_240 = arith.constant 9.99999974E-6 : f32
    %564 = vector.broadcast %cst_240 : f32 to vector<16x1xf32>
    %565 = arith.addf %561, %564 : vector<16x1xf32>
    %566 = math.rsqrt %565 : vector<16x1xf32>
    %567 = vector.broadcast %566 : vector<16x1xf32> to vector<16x64xf32>
    %568 = arith.mulf %563, %567 : vector<16x64xf32>
    %c3_241 = arith.constant 3 : index
    %c0_242 = arith.constant 0 : index
    %569 = vector.load %arg8[%c3_241, %c0_242] : memref<4x64xf32, #tpu.memory_space<vmem>>, vector<1x64xf32>
    %570 = vector.shape_cast %569 : vector<1x64xf32> to vector<64xf32>
    %571 = vector.shape_cast %570 : vector<64xf32> to vector<1x64xf32>
    %572 = vector.broadcast %571 : vector<1x64xf32> to vector<16x64xf32>
    %573 = arith.mulf %568, %572 : vector<16x64xf32>
    %c3_243 = arith.constant 3 : index
    %c0_244 = arith.constant 0 : index
    %574 = vector.load %arg9[%c3_243, %c0_244] : memref<4x64xf32, #tpu.memory_space<vmem>>, vector<1x64xf32>
    %575 = vector.shape_cast %574 : vector<1x64xf32> to vector<64xf32>
    %576 = vector.shape_cast %575 : vector<64xf32> to vector<1x64xf32>
    %577 = vector.broadcast %576 : vector<1x64xf32> to vector<16x64xf32>
    %578 = arith.addf %573, %577 : vector<16x64xf32>
    %579 = vector.shape_cast %578 : vector<16x64xf32> to vector<1x16x64xf32>
    %580 = vector.shape_cast %579 : vector<1x16x64xf32> to vector<1x1x1024xf32>
    %c0_245 = arith.constant 0 : index
    %c0_246 = arith.constant 0 : index
    %c0_247 = arith.constant 0 : index
    %581 = vector.load %arg22[%c0_245, %c0_246, %c0_247] : memref<1x1x1024xf32, #tpu.memory_space<vmem>>, vector<1x1x1024xf32>
    tpu.vector_store %arg22[%c0_245, %c0_246, %c0_247], %580 {strides = array<i32>} : memref<1x1x1024xf32, #tpu.memory_space<vmem>>, vector<1x1x1024xf32>,
    return
  }
  func.func @transform_0(%arg0: i32) -> (i32, i32, i32) {
    %c0_i32 = arith.constant 0 : i32
    %c0_i32_0 = arith.constant 0 : i32
    %c0_i32_1 = arith.constant 0 : i32
    return %arg0, %c0_i32, %c0_i32_0 : i32, i32, i32
  }
  func.func @transform_1(%arg0: i32) -> (i32, i32) {
    %c0_i32 = arith.constant 0 : i32
    %c0_i32_0 = arith.constant 0 : i32
    %c0_i32_1 = arith.constant 0 : i32
    return %c0_i32, %c0_i32_0 : i32, i32
  }
  func.func @transform_2(%arg0: i32) -> (i32, i32) {
    %c0_i32 = arith.constant 0 : i32
    %c0_i32_0 = arith.constant 0 : i32
    %c0_i32_1 = arith.constant 0 : i32
    return %c0_i32, %c0_i32_0 : i32, i32
  }
  func.func @transform_3(%arg0: i32) -> (i32, i32) {
    %c0_i32 = arith.constant 0 : i32
    %c0_i32_0 = arith.constant 0 : i32
    %c0_i32_1 = arith.constant 0 : i32
    return %c0_i32, %c0_i32_0 : i32, i32
  }
  func.func @transform_4(%arg0: i32) -> (i32, i32) {
    %c0_i32 = arith.constant 0 : i32
    %c0_i32_0 = arith.constant 0 : i32
    %c0_i32_1 = arith.constant 0 : i32
    return %c0_i32, %c0_i32_0 : i32, i32
  }
  func.func @transform_5(%arg0: i32) -> (i32, i32) {
    %c0_i32 = arith.constant 0 : i32
    %c0_i32_0 = arith.constant 0 : i32
    %c0_i32_1 = arith.constant 0 : i32
    return %c0_i32, %c0_i32_0 : i32, i32
  }
  func.func @transform_6(%arg0: i32) -> (i32, i32) {
    %c0_i32 = arith.constant 0 : i32
    %c0_i32_0 = arith.constant 0 : i32
    %c0_i32_1 = arith.constant 0 : i32
    return %c0_i32, %c0_i32_0 : i32, i32
  }
  func.func @transform_7(%arg0: i32) -> (i32, i32) {
    %c0_i32 = arith.constant 0 : i32
    %c0_i32_0 = arith.constant 0 : i32
    %c0_i32_1 = arith.constant 0 : i32
    return %c0_i32, %c0_i32_0 : i32, i32
  }
  func.func @transform_8(%arg0: i32) -> (i32, i32) {
    %c0_i32 = arith.constant 0 : i32
    %c0_i32_0 = arith.constant 0 : i32
    %c0_i32_1 = arith.constant 0 : i32
    return %c0_i32, %c0_i32_0 : i32, i32
  }
  func.func @transform_9(%arg0: i32) -> (i32, i32, i32) {
    %c0_i32 = arith.constant 0 : i32
    %c0_i32_0 = arith.constant 0 : i32
    %c0_i32_1 = arith.constant 0 : i32
    %c0_i32_2 = arith.constant 0 : i32
    return %c0_i32, %c0_i32_0, %c0_i32_1 : i32, i32, i32
  }
  func.func @transform_10(%arg0: i32) -> (i32, i32, i32) {
    %c0_i32 = arith.constant 0 : i32
    %c0_i32_0 = arith.constant 0 : i32
    %c0_i32_1 = arith.constant 0 : i32
    %c0_i32_2 = arith.constant 0 : i32
    return %c0_i32, %c0_i32_0, %c0_i32_1 : i32, i32, i32
  }
  func.func @transform_11(%arg0: i32) -> (i32, i32) {
    %c0_i32 = arith.constant 0 : i32
    %c0_i32_0 = arith.constant 0 : i32
    %c0_i32_1 = arith.constant 0 : i32
    return %c0_i32, %c0_i32_0 : i32, i32
  }
  func.func @transform_12(%arg0: i32) -> (i32, i32, i32) {
    %c0_i32 = arith.constant 0 : i32
    %c0_i32_0 = arith.constant 0 : i32
    %c0_i32_1 = arith.constant 0 : i32
    %c0_i32_2 = arith.constant 0 : i32
    return %c0_i32, %c0_i32_0, %c0_i32_1 : i32, i32, i32
  }
  func.func @transform_13(%arg0: i32) -> (i32, i32) {
    %c0_i32 = arith.constant 0 : i32
    %c0_i32_0 = arith.constant 0 : i32
    %c0_i32_1 = arith.constant 0 : i32
    return %c0_i32, %c0_i32_0 : i32, i32
  }
  func.func @transform_14(%arg0: i32) -> (i32, i32) {
    %c0_i32 = arith.constant 0 : i32
    %c0_i32_0 = arith.constant 0 : i32
    %c0_i32_1 = arith.constant 0 : i32
    return %c0_i32, %c0_i32_0 : i32, i32
  }
  func.func @transform_15(%arg0: i32) -> (i32, i32) {
    %c0_i32 = arith.constant 0 : i32
    %c0_i32_0 = arith.constant 0 : i32
    %c0_i32_1 = arith.constant 0 : i32
    return %c0_i32, %c0_i32_0 : i32, i32
  }
  func.func @transform_16(%arg0: i32) -> (i32, i32) {
    %c0_i32 = arith.constant 0 : i32
    %c0_i32_0 = arith.constant 0 : i32
    %c0_i32_1 = arith.constant 0 : i32
    return %c0_i32, %c0_i32_0 : i32, i32
  }
  func.func @transform_17(%arg0: i32) -> (i32, i32) {
    %c0_i32 = arith.constant 0 : i32
    %c0_i32_0 = arith.constant 0 : i32
    %c0_i32_1 = arith.constant 0 : i32
    return %c0_i32, %c0_i32_0 : i32, i32
  }
  func.func @transform_18(%arg0: i32) -> (i32, i32) {
    %c0_i32 = arith.constant 0 : i32
    %c0_i32_0 = arith.constant 0 : i32
    %c0_i32_1 = arith.constant 0 : i32
    return %c0_i32, %c0_i32_0 : i32, i32
  }
  func.func @transform_19(%arg0: i32) -> (i32, i32) {
    %c0_i32 = arith.constant 0 : i32
    %c0_i32_0 = arith.constant 0 : i32
    %c0_i32_1 = arith.constant 0 : i32
    return %c0_i32, %c0_i32_0 : i32, i32
  }
  func.func @transform_20(%arg0: i32) -> (i32, i32) {
    %c0_i32 = arith.constant 0 : i32
    %c0_i32_0 = arith.constant 0 : i32
    %c0_i32_1 = arith.constant 0 : i32
    return %c0_i32, %c0_i32_0 : i32, i32
  }
  func.func @transform_21(%arg0: i32) -> (i32, i32, i32) {
    %c0_i32 = arith.constant 0 : i32
    %c0_i32_0 = arith.constant 0 : i32
    %c0_i32_1 = arith.constant 0 : i32
    return %arg0, %c0_i32, %c0_i32_0 : i32, i32, i32
  }
}

module attributes {stable_mosaic.version = 11 : i64} {
  func.func @_squeezeformer_kernel(%arg0: i32, %arg1: memref<1x1x1024xf32, #tpu.memory_space<vmem>>, %arg2: memref<16x64xf32, #tpu.memory_space<vmem>>, %arg3: memref<2x64xf32, #tpu.memory_space<vmem>>, %arg4: memref<64x192xbf16, #tpu.memory_space<vmem>>, %arg5: memref<1x192xf32, #tpu.memory_space<vmem>>, %arg6: memref<64x64xbf16, #tpu.memory_space<vmem>>, %arg7: memref<1x64xf32, #tpu.memory_space<vmem>>, %arg8: memref<4x64xf32, #tpu.memory_space<vmem>>, %arg9: memref<4x64xf32, #tpu.memory_space<vmem>>, %arg10: memref<2x2x64xf32, #tpu.memory_space<vmem>>, %arg11: memref<2x64x256xbf16, #tpu.memory_space<vmem>>, %arg12: memref<2x256xf32, #tpu.memory_space<vmem>>, %arg13: memref<2x256x64xbf16, #tpu.memory_space<vmem>>, %arg14: memref<2x64xf32, #tpu.memory_space<vmem>>, %arg15: memref<2x64xf32, #tpu.memory_space<vmem>>, %arg16: memref<64x128xbf16, #tpu.memory_space<vmem>>, %arg17: memref<1x128xf32, #tpu.memory_space<vmem>>, %arg18: memref<31x128xf32, #tpu.memory_space<vmem>>, %arg19: memref<1x128xf32, #tpu.memory_space<vmem>>, %arg20: memref<128x64xbf16, #tpu.memory_space<vmem>>, %arg21: memref<1x64xf32, #tpu.memory_space<vmem>>, %arg22: memref<1x1x1024xf32, #tpu.memory_space<vmem>>, %arg23: memref<1x47x128xf32, #tpu.memory_space<vmem>>) attributes {dimension_semantics = [#tpu.dimension_semantics<parallel>], iteration_bounds = array<i64: 2>, scalar_prefetch = 0 : i64, scratch_operands = 1 : i64, tpu.core_type = #tpu.core_type<tc>, window_params = [{transform_indices = @transform_0, window_bounds = array<i64: 1, 1, 1024>}, {pipeline_mode = #tpu.pipeline_mode<synchronous>, transform_indices = @transform_1, window_bounds = array<i64: 16, 64>}, {pipeline_mode = #tpu.pipeline_mode<synchronous>, transform_indices = @transform_2, window_bounds = array<i64: 2, 64>}, {pipeline_mode = #tpu.pipeline_mode<synchronous>, transform_indices = @transform_3, window_bounds = array<i64: 64, 192>}, {pipeline_mode = #tpu.pipeline_mode<synchronous>, transform_indices = @transform_4, window_bounds = array<i64: 1, 192>}, {pipeline_mode = #tpu.pipeline_mode<synchronous>, transform_indices = @transform_5, window_bounds = array<i64: 64, 64>}, {pipeline_mode = #tpu.pipeline_mode<synchronous>, transform_indices = @transform_6, window_bounds = array<i64: 1, 64>}, {pipeline_mode = #tpu.pipeline_mode<synchronous>, transform_indices = @transform_7, window_bounds = array<i64: 4, 64>}, {pipeline_mode = #tpu.pipeline_mode<synchronous>, transform_indices = @transform_8, window_bounds = array<i64: 4, 64>}, {pipeline_mode = #tpu.pipeline_mode<synchronous>, transform_indices = @transform_9, window_bounds = array<i64: 2, 2, 64>}, {pipeline_mode = #tpu.pipeline_mode<synchronous>, transform_indices = @transform_10, window_bounds = array<i64: 2, 64, 256>}, {pipeline_mode = #tpu.pipeline_mode<synchronous>, transform_indices = @transform_11, window_bounds = array<i64: 2, 256>}, {pipeline_mode = #tpu.pipeline_mode<synchronous>, transform_indices = @transform_12, window_bounds = array<i64: 2, 256, 64>}, {pipeline_mode = #tpu.pipeline_mode<synchronous>, transform_indices = @transform_13, window_bounds = array<i64: 2, 64>}, {pipeline_mode = #tpu.pipeline_mode<synchronous>, transform_indices = @transform_14, window_bounds = array<i64: 2, 64>}, {pipeline_mode = #tpu.pipeline_mode<synchronous>, transform_indices = @transform_15, window_bounds = array<i64: 64, 128>}, {pipeline_mode = #tpu.pipeline_mode<synchronous>, transform_indices = @transform_16, window_bounds = array<i64: 1, 128>}, {pipeline_mode = #tpu.pipeline_mode<synchronous>, transform_indices = @transform_17, window_bounds = array<i64: 31, 128>}, {pipeline_mode = #tpu.pipeline_mode<synchronous>, transform_indices = @transform_18, window_bounds = array<i64: 1, 128>}, {pipeline_mode = #tpu.pipeline_mode<synchronous>, transform_indices = @transform_19, window_bounds = array<i64: 128, 64>}, {pipeline_mode = #tpu.pipeline_mode<synchronous>, transform_indices = @transform_20, window_bounds = array<i64: 1, 64>}, {transform_indices = @transform_21, window_bounds = array<i64: 1, 1, 1024>}]} {
    %c0 = arith.constant 0 : index
    %c0_0 = arith.constant 0 : index
    %c0_1 = arith.constant 0 : index
    %0 = vector.load %arg1[%c0, %c0_0, %c0_1] : memref<1x1x1024xf32, #tpu.memory_space<vmem>>, vector<1x1x1024xf32>
    %1 = vector.shape_cast %0 : vector<1x1x1024xf32> to vector<1x16x64xf32>
    %c0_2 = arith.constant 0 : index
    %c0_3 = arith.constant 0 : index
    %2 = vector.load %arg2[%c0_2, %c0_3] : memref<16x64xf32, #tpu.memory_space<vmem>>, vector<16x64xf32>
    %3 = vector.shape_cast %1 : vector<1x16x64xf32> to vector<16x64xf32>
    %c0_4 = arith.constant 0 : index
    %c0_5 = arith.constant 0 : index
    %4 = vector.load %arg3[%c0_4, %c0_5] : memref<2x64xf32, #tpu.memory_space<vmem>>, vector<1x64xf32>
    %5 = vector.shape_cast %4 : vector<1x64xf32> to vector<64xf32>
    %6 = vector.shape_cast %5 : vector<64xf32> to vector<1x1x64xf32>
    %7 = vector.broadcast %6 : vector<1x1x64xf32> to vector<1x16x64xf32>
    %8 = arith.mulf %1, %7 : vector<1x16x64xf32>
    %c1 = arith.constant 1 : index
    %c0_6 = arith.constant 0 : index
    %9 = vector.load %arg3[%c1, %c0_6] : memref<2x64xf32, #tpu.memory_space<vmem>>, vector<1x64xf32>
    %10 = vector.shape_cast %9 : vector<1x64xf32> to vector<64xf32>
    %11 = vector.shape_cast %10 : vector<64xf32> to vector<1x1x64xf32>
    %12 = vector.broadcast %11 : vector<1x1x64xf32> to vector<1x16x64xf32>
    %13 = arith.addf %8, %12 : vector<1x16x64xf32>
    %14 = vector.shape_cast %2 : vector<16x64xf32> to vector<1x16x64xf32>
    %15 = arith.addf %13, %14 : vector<1x16x64xf32>
    %16 = vector.shape_cast %15 : vector<1x16x64xf32> to vector<16x64xf32>
    %17 = arith.truncf %16 : vector<16x64xf32> to vector<16x64xbf16>
    %c0_7 = arith.constant 0 : index
    %c0_8 = arith.constant 0 : index
    %18 = vector.load %arg4[%c0_7, %c0_8] : memref<64x192xbf16, #tpu.memory_space<vmem>>, vector<64x192xbf16>
    %cst = arith.constant dense<0.000000e+00> : vector<16x192xf32>
    %19 = tpu.matmul %17, %18, %cst {dimension_numbers = #tpu.dot_dimension_numbers<[1], [0], [0], [1], [0, 0, 1, 1], [], []>} : vector<16x64xbf16>, vector<64x192xbf16>, vector<16x192xf32> -> vector<16x192xf32>
    %c0_9 = arith.constant 0 : index
    %c0_10 = arith.constant 0 : index
    %20 = vector.load %arg5[%c0_9, %c0_10] : memref<1x192xf32, #tpu.memory_space<vmem>>, vector<1x192xf32>
    %21 = vector.shape_cast %20 : vector<1x192xf32> to vector<192xf32>
    %22 = vector.shape_cast %21 : vector<192xf32> to vector<1x192xf32>
    %23 = vector.broadcast %22 : vector<1x192xf32> to vector<16x192xf32>
    %24 = arith.addf %19, %23 : vector<16x192xf32>
    %25 = vector.extract_strided_slice %24 {offsets = [0, 0], sizes = [16, 8], strides = [1, 1]} : vector<16x192xf32> to vector<16x8xf32>
    %26 = vector.shape_cast %25 : vector<16x8xf32> to vector<1x16x8xf32>
    %27 = vector.extract_strided_slice %24 {offsets = [0, 8], sizes = [16, 8], strides = [1, 1]} : vector<16x192xf32> to vector<16x8xf32>
    %28 = vector.shape_cast %27 : vector<16x8xf32> to vector<1x16x8xf32>
    %29 = vector.extract_strided_slice %24 {offsets = [0, 16], sizes = [16, 8], strides = [1, 1]} : vector<16x192xf32> to vector<16x8xf32>
    %30 = vector.shape_cast %29 : vector<16x8xf32> to vector<1x16x8xf32>
    %31 = vector.extract_strided_slice %24 {offsets = [0, 24], sizes = [16, 8], strides = [1, 1]} : vector<16x192xf32> to vector<16x8xf32>
    %32 = vector.shape_cast %31 : vector<16x8xf32> to vector<1x16x8xf32>
    %33 = vector.extract_strided_slice %24 {offsets = [0, 32], sizes = [16, 8], strides = [1, 1]} : vector<16x192xf32> to vector<16x8xf32>
    %34 = vector.shape_cast %33 : vector<16x8xf32> to vector<1x16x8xf32>
    %35 = vector.extract_strided_slice %24 {offsets = [0, 40], sizes = [16, 8], strides = [1, 1]} : vector<16x192xf32> to vector<16x8xf32>
    %36 = vector.shape_cast %35 : vector<16x8xf32> to vector<1x16x8xf32>
    %37 = vector.extract_strided_slice %24 {offsets = [0, 48], sizes = [16, 8], strides = [1, 1]} : vector<16x192xf32> to vector<16x8xf32>
    %38 = vector.shape_cast %37 : vector<16x8xf32> to vector<1x16x8xf32>
    %39 = vector.extract_strided_slice %24 {offsets = [0, 56], sizes = [16, 8], strides = [1, 1]} : vector<16x192xf32> to vector<16x8xf32>
    %40 = vector.shape_cast %39 : vector<16x8xf32> to vector<1x16x8xf32>
    %41 = tpu.concatenate %26, %28, %30, %32, %34, %36, %38, %40 in 0 : vector<1x16x8xf32>, vector<1x16x8xf32>, vector<1x16x8xf32>, vector<1x16x8xf32>, vector<1x16x8xf32>, vector<1x16x8xf32>, vector<1x16x8xf32>, vector<1x16x8xf32> -> vector<8x16x8xf32>
    %42 = arith.truncf %41 : vector<8x16x8xf32> to vector<8x16x8xbf16>
    %43 = vector.extract_strided_slice %24 {offsets = [0, 64], sizes = [16, 8], strides = [1, 1]} : vector<16x192xf32> to vector<16x8xf32>
    %44 = vector.shape_cast %43 : vector<16x8xf32> to vector<1x16x8xf32>
    %45 = vector.extract_strided_slice %24 {offsets = [0, 72], sizes = [16, 8], strides = [1, 1]} : vector<16x192xf32> to vector<16x8xf32>
    %46 = vector.shape_cast %45 : vector<16x8xf32> to vector<1x16x8xf32>
    %47 = vector.extract_strided_slice %24 {offsets = [0, 80], sizes = [16, 8], strides = [1, 1]} : vector<16x192xf32> to vector<16x8xf32>
    %48 = vector.shape_cast %47 : vector<16x8xf32> to vector<1x16x8xf32>
    %49 = vector.extract_strided_slice %24 {offsets = [0, 88], sizes = [16, 8], strides = [1, 1]} : vector<16x192xf32> to vector<16x8xf32>
    %50 = vector.shape_cast %49 : vector<16x8xf32> to vector<1x16x8xf32>
    %51 = vector.extract_strided_slice %24 {offsets = [0, 96], sizes = [16, 8], strides = [1, 1]} : vector<16x192xf32> to vector<16x8xf32>
    %52 = vector.shape_cast %51 : vector<16x8xf32> to vector<1x16x8xf32>
    %53 = vector.extract_strided_slice %24 {offsets = [0, 104], sizes = [16, 8], strides = [1, 1]} : vector<16x192xf32> to vector<16x8xf32>
    %54 = vector.shape_cast %53 : vector<16x8xf32> to vector<1x16x8xf32>
    %55 = vector.extract_strided_slice %24 {offsets = [0, 112], sizes = [16, 8], strides = [1, 1]} : vector<16x192xf32> to vector<16x8xf32>
    %56 = vector.shape_cast %55 : vector<16x8xf32> to vector<1x16x8xf32>
    %57 = vector.extract_strided_slice %24 {offsets = [0, 120], sizes = [16, 8], strides = [1, 1]} : vector<16x192xf32> to vector<16x8xf32>
    %58 = vector.shape_cast %57 : vector<16x8xf32> to vector<1x16x8xf32>
    %59 = tpu.concatenate %44, %46, %48, %50, %52, %54, %56, %58 in 0 : vector<1x16x8xf32>, vector<1x16x8xf32>, vector<1x16x8xf32>, vector<1x16x8xf32>, vector<1x16x8xf32>, vector<1x16x8xf32>, vector<1x16x8xf32>, vector<1x16x8xf32> -> vector<8x16x8xf32>
    %60 = arith.truncf %59 : vector<8x16x8xf32> to vector<8x16x8xbf16>
    %61 = vector.extract_strided_slice %24 {offsets = [0, 128], sizes = [16, 8], strides = [1, 1]} : vector<16x192xf32> to vector<16x8xf32>
    %62 = vector.shape_cast %61 : vector<16x8xf32> to vector<1x16x8xf32>
    %63 = vector.extract_strided_slice %24 {offsets = [0, 136], sizes = [16, 8], strides = [1, 1]} : vector<16x192xf32> to vector<16x8xf32>
    %64 = vector.shape_cast %63 : vector<16x8xf32> to vector<1x16x8xf32>
    %65 = vector.extract_strided_slice %24 {offsets = [0, 144], sizes = [16, 8], strides = [1, 1]} : vector<16x192xf32> to vector<16x8xf32>
    %66 = vector.shape_cast %65 : vector<16x8xf32> to vector<1x16x8xf32>
    %67 = vector.extract_strided_slice %24 {offsets = [0, 152], sizes = [16, 8], strides = [1, 1]} : vector<16x192xf32> to vector<16x8xf32>
    %68 = vector.shape_cast %67 : vector<16x8xf32> to vector<1x16x8xf32>
    %69 = vector.extract_strided_slice %24 {offsets = [0, 160], sizes = [16, 8], strides = [1, 1]} : vector<16x192xf32> to vector<16x8xf32>
    %70 = vector.shape_cast %69 : vector<16x8xf32> to vector<1x16x8xf32>
    %71 = vector.extract_strided_slice %24 {offsets = [0, 168], sizes = [16, 8], strides = [1, 1]} : vector<16x192xf32> to vector<16x8xf32>
    %72 = vector.shape_cast %71 : vector<16x8xf32> to vector<1x16x8xf32>
    %73 = vector.extract_strided_slice %24 {offsets = [0, 176], sizes = [16, 8], strides = [1, 1]} : vector<16x192xf32> to vector<16x8xf32>
    %74 = vector.shape_cast %73 : vector<16x8xf32> to vector<1x16x8xf32>
    %75 = vector.extract_strided_slice %24 {offsets = [0, 184], sizes = [16, 8], strides = [1, 1]} : vector<16x192xf32> to vector<16x8xf32>
    %76 = vector.shape_cast %75 : vector<16x8xf32> to vector<1x16x8xf32>
    %77 = tpu.concatenate %62, %64, %66, %68, %70, %72, %74, %76 in 0 : vector<1x16x8xf32>, vector<1x16x8xf32>, vector<1x16x8xf32>, vector<1x16x8xf32>, vector<1x16x8xf32>, vector<1x16x8xf32>, vector<1x16x8xf32>, vector<1x16x8xf32> -> vector<8x16x8xf32>
    %78 = arith.truncf %77 : vector<8x16x8xf32> to vector<8x16x8xbf16>
    "tpu.trace_start"() <{level = 10 : i32, message = "bid,bjd->bij"}> : () -> ()
    %cst_11 = arith.constant dense<0.000000e+00> : vector<8x16x16xf32>
    %79 = tpu.matmul %42, %60, %cst_11 {dimension_numbers = #tpu.dot_dimension_numbers<[2], [2], [1], [1], [0, 0, 0, 1, 1, 1], [0], [0]>} : vector<8x16x8xbf16>, vector<8x16x8xbf16>, vector<8x16x16xf32> -> vector<8x16x16xf32>
    "tpu.trace_stop"() : () -> ()
    %cst_12 = arith.constant dense<0xFF800000> : vector<8x16xf32>
    %80 = vector.multi_reduction <maximumf>, %79, %cst_12 [2] : vector<8x16x16xf32> to vector<8x16xf32>
    %81 = vector.shape_cast %80 : vector<8x16xf32> to vector<8x16x1xf32>
    %82 = vector.broadcast %81 : vector<8x16x1xf32> to vector<8x16x16xf32>
    %83 = arith.subf %79, %82 : vector<8x16x16xf32>
    %84 = math.exp %83 : vector<8x16x16xf32>
    %cst_13 = arith.constant dense<0.000000e+00> : vector<8x16xf32>
    %85 = vector.multi_reduction <add>, %84, %cst_13 [2] : vector<8x16x16xf32> to vector<8x16xf32>
    %86 = vector.shape_cast %85 : vector<8x16xf32> to vector<8x16x1xf32>
    %87 = arith.truncf %84 : vector<8x16x16xf32> to vector<8x16x16xbf16>
    "tpu.trace_start"() <{level = 10 : i32, message = "bij,bjd->bid"}> : () -> ()
    %cst_14 = arith.constant dense<0.000000e+00> : vector<8x16x8xf32>
    %88 = tpu.matmul %87, %78, %cst_14 {dimension_numbers = #tpu.dot_dimension_numbers<[2], [1], [1], [2], [0, 0, 0, 1, 1, 2], [0], [0]>} : vector<8x16x16xbf16>, vector<8x16x8xbf16>, vector<8x16x8xf32> -> vector<8x16x8xf32>
    "tpu.trace_stop"() : () -> ()
    %89 = tpu.reciprocal %86 {approx = true} : vector<8x16x1xf32> -> vector<8x16x1xf32>
    %90 = vector.broadcast %89 : vector<8x16x1xf32> to vector<8x16x8xf32>
    %91 = arith.mulf %88, %90 : vector<8x16x8xf32>
    %92 = vector.extract_strided_slice %91 {offsets = [0, 0, 0], sizes = [1, 16, 8], strides = [1, 1, 1]} : vector<8x16x8xf32> to vector<1x16x8xf32>
    %93 = vector.shape_cast %92 : vector<1x16x8xf32> to vector<16x8xf32>
    %94 = vector.extract_strided_slice %91 {offsets = [1, 0, 0], sizes = [1, 16, 8], strides = [1, 1, 1]} : vector<8x16x8xf32> to vector<1x16x8xf32>
    %95 = vector.shape_cast %94 : vector<1x16x8xf32> to vector<16x8xf32>
    %96 = vector.extract_strided_slice %91 {offsets = [2, 0, 0], sizes = [1, 16, 8], strides = [1, 1, 1]} : vector<8x16x8xf32> to vector<1x16x8xf32>
    %97 = vector.shape_cast %96 : vector<1x16x8xf32> to vector<16x8xf32>
    %98 = vector.extract_strided_slice %91 {offsets = [3, 0, 0], sizes = [1, 16, 8], strides = [1, 1, 1]} : vector<8x16x8xf32> to vector<1x16x8xf32>
    %99 = vector.shape_cast %98 : vector<1x16x8xf32> to vector<16x8xf32>
    %100 = vector.extract_strided_slice %91 {offsets = [4, 0, 0], sizes = [1, 16, 8], strides = [1, 1, 1]} : vector<8x16x8xf32> to vector<1x16x8xf32>
    %101 = vector.shape_cast %100 : vector<1x16x8xf32> to vector<16x8xf32>
    %102 = vector.extract_strided_slice %91 {offsets = [5, 0, 0], sizes = [1, 16, 8], strides = [1, 1, 1]} : vector<8x16x8xf32> to vector<1x16x8xf32>
    %103 = vector.shape_cast %102 : vector<1x16x8xf32> to vector<16x8xf32>
    %104 = vector.extract_strided_slice %91 {offsets = [6, 0, 0], sizes = [1, 16, 8], strides = [1, 1, 1]} : vector<8x16x8xf32> to vector<1x16x8xf32>
    %105 = vector.shape_cast %104 : vector<1x16x8xf32> to vector<16x8xf32>
    %106 = vector.extract_strided_slice %91 {offsets = [7, 0, 0], sizes = [1, 16, 8], strides = [1, 1, 1]} : vector<8x16x8xf32> to vector<1x16x8xf32>
    %107 = vector.shape_cast %106 : vector<1x16x8xf32> to vector<16x8xf32>
    %108 = tpu.concatenate %93, %95, %97, %99, %101, %103, %105, %107 in 1 : vector<16x8xf32>, vector<16x8xf32>, vector<16x8xf32>, vector<16x8xf32>, vector<16x8xf32>, vector<16x8xf32>, vector<16x8xf32>, vector<16x8xf32> -> vector<16x64xf32>
    %109 = arith.truncf %108 : vector<16x64xf32> to vector<16x64xbf16>
    %c0_15 = arith.constant 0 : index
    %c0_16 = arith.constant 0 : index
    %110 = vector.load %arg6[%c0_15, %c0_16] : memref<64x64xbf16, #tpu.memory_space<vmem>>, vector<64x64xbf16>
    %cst_17 = arith.constant dense<0.000000e+00> : vector<16x64xf32>
    %111 = tpu.matmul %109, %110, %cst_17 {dimension_numbers = #tpu.dot_dimension_numbers<[1], [0], [0], [1], [0, 0, 1, 1], [], []>} : vector<16x64xbf16>, vector<64x64xbf16>, vector<16x64xf32> -> vector<16x64xf32>
    %c0_18 = arith.constant 0 : index
    %c0_19 = arith.constant 0 : index
    %112 = vector.load %arg7[%c0_18, %c0_19] : memref<1x64xf32, #tpu.memory_space<vmem>>, vector<1x64xf32>
    %113 = vector.shape_cast %112 : vector<1x64xf32> to vector<64xf32>
    %114 = vector.shape_cast %113 : vector<64xf32> to vector<1x64xf32>
    %115 = vector.broadcast %114 : vector<1x64xf32> to vector<16x64xf32>
    %116 = arith.addf %111, %115 : vector<16x64xf32>
    %117 = arith.addf %3, %116 : vector<16x64xf32>
    %cst_20 = arith.constant dense<0.000000e+00> : vector<16xf32>
    %118 = vector.multi_reduction <add>, %117, %cst_20 [1] : vector<16x64xf32> to vector<16xf32>
    %119 = vector.shape_cast %118 : vector<16xf32> to vector<16x1xf32>
    %cst_21 = arith.constant 6.400000e+01 : f32
    %120 = vector.broadcast %cst_21 : f32 to vector<16x1xf32>
    %121 = arith.divf %119, %120 : vector<16x1xf32>
    %122 = vector.broadcast %121 : vector<16x1xf32> to vector<16x64xf32>
    %123 = arith.subf %117, %122 : vector<16x64xf32>
    %124 = arith.mulf %123, %123 : vector<16x64xf32>
    %cst_22 = arith.constant dense<0.000000e+00> : vector<16xf32>
    %125 = vector.multi_reduction <add>, %124, %cst_22 [1] : vector<16x64xf32> to vector<16xf32>
    %126 = vector.shape_cast %125 : vector<16xf32> to vector<16x1xf32>
    %cst_23 = arith.constant 6.400000e+01 : f32
    %127 = vector.broadcast %cst_23 : f32 to vector<16x1xf32>
    %128 = arith.divf %126, %127 : vector<16x1xf32>
    %129 = vector.broadcast %121 : vector<16x1xf32> to vector<16x64xf32>
    %130 = arith.subf %117, %129 : vector<16x64xf32>
    %cst_24 = arith.constant 9.99999974E-6 : f32
    %131 = vector.broadcast %cst_24 : f32 to vector<16x1xf32>
    %132 = arith.addf %128, %131 : vector<16x1xf32>
    %133 = math.rsqrt %132 : vector<16x1xf32>
    %134 = vector.broadcast %133 : vector<16x1xf32> to vector<16x64xf32>
    %135 = arith.mulf %130, %134 : vector<16x64xf32>
    %c0_25 = arith.constant 0 : index
    %c0_26 = arith.constant 0 : index
    %136 = vector.load %arg8[%c0_25, %c0_26] : memref<4x64xf32, #tpu.memory_space<vmem>>, vector<1x64xf32>
    %137 = vector.shape_cast %136 : vector<1x64xf32> to vector<64xf32>
    %138 = vector.shape_cast %137 : vector<64xf32> to vector<1x64xf32>
    %139 = vector.broadcast %138 : vector<1x64xf32> to vector<16x64xf32>
    %140 = arith.mulf %135, %139 : vector<16x64xf32>
    %c0_27 = arith.constant 0 : index
    %c0_28 = arith.constant 0 : index
    %141 = vector.load %arg9[%c0_27, %c0_28] : memref<4x64xf32, #tpu.memory_space<vmem>>, vector<1x64xf32>
    %142 = vector.shape_cast %141 : vector<1x64xf32> to vector<64xf32>
    %143 = vector.shape_cast %142 : vector<64xf32> to vector<1x64xf32>
    %144 = vector.broadcast %143 : vector<1x64xf32> to vector<16x64xf32>
    %145 = arith.addf %140, %144 : vector<16x64xf32>
    %c0_29 = arith.constant 0 : index
    %c0_30 = arith.constant 0 : index
    %c0_31 = arith.constant 0 : index
    %146 = vector.load %arg10[%c0_29, %c0_30, %c0_31] : memref<2x2x64xf32, #tpu.memory_space<vmem>>, vector<1x2x64xf32>
    %147 = vector.shape_cast %146 : vector<1x2x64xf32> to vector<2x64xf32>
    %148 = vector.extract_strided_slice %147 {offsets = [0, 0], sizes = [1, 64], strides = [1, 1]} : vector<2x64xf32> to vector<1x64xf32>
    %149 = vector.shape_cast %148 : vector<1x64xf32> to vector<64xf32>
    %150 = vector.shape_cast %149 : vector<64xf32> to vector<1x64xf32>
    %151 = vector.broadcast %150 : vector<1x64xf32> to vector<16x64xf32>
    %152 = arith.mulf %145, %151 : vector<16x64xf32>
    %153 = vector.extract_strided_slice %147 {offsets = [1, 0], sizes = [1, 64], strides = [1, 1]} : vector<2x64xf32> to vector<1x64xf32>
    %154 = vector.shape_cast %153 : vector<1x64xf32> to vector<64xf32>
    %155 = vector.shape_cast %154 : vector<64xf32> to vector<1x64xf32>
    %156 = vector.broadcast %155 : vector<1x64xf32> to vector<16x64xf32>
    %157 = arith.addf %152, %156 : vector<16x64xf32>
    %158 = arith.truncf %157 : vector<16x64xf32> to vector<16x64xbf16>
    %c0_32 = arith.constant 0 : index
    %c0_33 = arith.constant 0 : index
    %c0_34 = arith.constant 0 : index
    %159 = vector.load %arg11[%c0_32, %c0_33, %c0_34] : memref<2x64x256xbf16, #tpu.memory_space<vmem>>, vector<1x64x256xbf16>
    %160 = vector.shape_cast %159 : vector<1x64x256xbf16> to vector<64x256xbf16>
    %cst_35 = arith.constant dense<0.000000e+00> : vector<16x256xf32>
    %161 = tpu.matmul %158, %160, %cst_35 {dimension_numbers = #tpu.dot_dimension_numbers<[1], [0], [0], [1], [0, 0, 1, 1], [], []>} : vector<16x64xbf16>, vector<64x256xbf16>, vector<16x256xf32> -> vector<16x256xf32>
    %c0_36 = arith.constant 0 : index
    %c0_37 = arith.constant 0 : index
    %162 = vector.load %arg12[%c0_36, %c0_37] : memref<2x256xf32, #tpu.memory_space<vmem>>, vector<1x256xf32>
    %163 = vector.shape_cast %162 : vector<1x256xf32> to vector<256xf32>
    %164 = vector.shape_cast %163 : vector<256xf32> to vector<1x256xf32>
    %165 = vector.broadcast %164 : vector<1x256xf32> to vector<16x256xf32>
    %166 = arith.addf %161, %165 : vector<16x256xf32>
    %167 = arith.negf %166 : vector<16x256xf32>
    %168 = math.exp %167 : vector<16x256xf32>
    %cst_38 = arith.constant 1.000000e+00 : f32
    %169 = vector.broadcast %cst_38 : f32 to vector<16x256xf32>
    %170 = arith.addf %169, %168 : vector<16x256xf32>
    %171 = arith.divf %169, %170 : vector<16x256xf32>
    %172 = arith.mulf %166, %171 : vector<16x256xf32>
    %173 = arith.truncf %172 : vector<16x256xf32> to vector<16x256xbf16>
    %c0_39 = arith.constant 0 : index
    %c0_40 = arith.constant 0 : index
    %c0_41 = arith.constant 0 : index
    %174 = vector.load %arg13[%c0_39, %c0_40, %c0_41] : memref<2x256x64xbf16, #tpu.memory_space<vmem>>, vector<1x256x64xbf16>
    %175 = vector.shape_cast %174 : vector<1x256x64xbf16> to vector<256x64xbf16>
    %cst_42 = arith.constant dense<0.000000e+00> : vector<16x64xf32>
    %176 = tpu.matmul %173, %175, %cst_42 {dimension_numbers = #tpu.dot_dimension_numbers<[1], [0], [0], [1], [0, 0, 1, 1], [], []>} : vector<16x256xbf16>, vector<256x64xbf16>, vector<16x64xf32> -> vector<16x64xf32>
    %c0_43 = arith.constant 0 : index
    %c0_44 = arith.constant 0 : index
    %177 = vector.load %arg14[%c0_43, %c0_44] : memref<2x64xf32, #tpu.memory_space<vmem>>, vector<1x64xf32>
    %178 = vector.shape_cast %177 : vector<1x64xf32> to vector<64xf32>
    %179 = vector.shape_cast %178 : vector<64xf32> to vector<1x64xf32>
    %180 = vector.broadcast %179 : vector<1x64xf32> to vector<16x64xf32>
    %181 = arith.addf %176, %180 : vector<16x64xf32>
    %182 = arith.addf %145, %181 : vector<16x64xf32>
    %cst_45 = arith.constant dense<0.000000e+00> : vector<16xf32>
    %183 = vector.multi_reduction <add>, %182, %cst_45 [1] : vector<16x64xf32> to vector<16xf32>
    %184 = vector.shape_cast %183 : vector<16xf32> to vector<16x1xf32>
    %cst_46 = arith.constant 6.400000e+01 : f32
    %185 = vector.broadcast %cst_46 : f32 to vector<16x1xf32>
    %186 = arith.divf %184, %185 : vector<16x1xf32>
    %187 = vector.broadcast %186 : vector<16x1xf32> to vector<16x64xf32>
    %188 = arith.subf %182, %187 : vector<16x64xf32>
    %189 = arith.mulf %188, %188 : vector<16x64xf32>
    %cst_47 = arith.constant dense<0.000000e+00> : vector<16xf32>
    %190 = vector.multi_reduction <add>, %189, %cst_47 [1] : vector<16x64xf32> to vector<16xf32>
    %191 = vector.shape_cast %190 : vector<16xf32> to vector<16x1xf32>
    %cst_48 = arith.constant 6.400000e+01 : f32
    %192 = vector.broadcast %cst_48 : f32 to vector<16x1xf32>
    %193 = arith.divf %191, %192 : vector<16x1xf32>
    %194 = vector.broadcast %186 : vector<16x1xf32> to vector<16x64xf32>
    %195 = arith.subf %182, %194 : vector<16x64xf32>
    %cst_49 = arith.constant 9.99999974E-6 : f32
    %196 = vector.broadcast %cst_49 : f32 to vector<16x1xf32>
    %197 = arith.addf %193, %196 : vector<16x1xf32>
    %198 = math.rsqrt %197 : vector<16x1xf32>
    %199 = vector.broadcast %198 : vector<16x1xf32> to vector<16x64xf32>
    %200 = arith.mulf %195, %199 : vector<16x64xf32>
    %c1_50 = arith.constant 1 : index
    %c0_51 = arith.constant 0 : index
    %201 = vector.load %arg8[%c1_50, %c0_51] : memref<4x64xf32, #tpu.memory_space<vmem>>, vector<1x64xf32>
    %202 = vector.shape_cast %201 : vector<1x64xf32> to vector<64xf32>
    %203 = vector.shape_cast %202 : vector<64xf32> to vector<1x64xf32>
    %204 = vector.broadcast %203 : vector<1x64xf32> to vector<16x64xf32>
    %205 = arith.mulf %200, %204 : vector<16x64xf32>
    %c1_52 = arith.constant 1 : index
    %c0_53 = arith.constant 0 : index
    %206 = vector.load %arg9[%c1_52, %c0_53] : memref<4x64xf32, #tpu.memory_space<vmem>>, vector<1x64xf32>
    %207 = vector.shape_cast %206 : vector<1x64xf32> to vector<64xf32>
    %208 = vector.shape_cast %207 : vector<64xf32> to vector<1x64xf32>
    %209 = vector.broadcast %208 : vector<1x64xf32> to vector<16x64xf32>
    %210 = arith.addf %205, %209 : vector<16x64xf32>
    %c0_54 = arith.constant 0 : index
    %c0_55 = arith.constant 0 : index
    %211 = vector.load %arg15[%c0_54, %c0_55] : memref<2x64xf32, #tpu.memory_space<vmem>>, vector<1x64xf32>
    %212 = vector.shape_cast %211 : vector<1x64xf32> to vector<64xf32>
    %213 = vector.shape_cast %212 : vector<64xf32> to vector<1x64xf32>
    %214 = vector.broadcast %213 : vector<1x64xf32> to vector<16x64xf32>
    %215 = arith.mulf %210, %214 : vector<16x64xf32>
    %c1_56 = arith.constant 1 : index
    %c0_57 = arith.constant 0 : index
    %216 = vector.load %arg15[%c1_56, %c0_57] : memref<2x64xf32, #tpu.memory_space<vmem>>, vector<1x64xf32>
    %217 = vector.shape_cast %216 : vector<1x64xf32> to vector<64xf32>
    %218 = vector.shape_cast %217 : vector<64xf32> to vector<1x64xf32>
    %219 = vector.broadcast %218 : vector<1x64xf32> to vector<16x64xf32>
    %220 = arith.addf %215, %219 : vector<16x64xf32>
    %221 = arith.truncf %220 : vector<16x64xf32> to vector<16x64xbf16>
    %c0_58 = arith.constant 0 : index
    %c0_59 = arith.constant 0 : index
    %222 = vector.load %arg16[%c0_58, %c0_59] : memref<64x128xbf16, #tpu.memory_space<vmem>>, vector<64x128xbf16>
    %cst_60 = arith.constant dense<0.000000e+00> : vector<16x128xf32>
    %223 = tpu.matmul %221, %222, %cst_60 {dimension_numbers = #tpu.dot_dimension_numbers<[1], [0], [0], [1], [0, 0, 1, 1], [], []>} : vector<16x64xbf16>, vector<64x128xbf16>, vector<16x128xf32> -> vector<16x128xf32>
    %c0_61 = arith.constant 0 : index
    %c0_62 = arith.constant 0 : index
    %224 = vector.load %arg17[%c0_61, %c0_62] : memref<1x128xf32, #tpu.memory_space<vmem>>, vector<1x128xf32>
    %225 = vector.shape_cast %224 : vector<1x128xf32> to vector<128xf32>
    %226 = vector.shape_cast %225 : vector<128xf32> to vector<1x128xf32>
    %227 = vector.broadcast %226 : vector<1x128xf32> to vector<16x128xf32>
    %228 = arith.addf %223, %227 : vector<16x128xf32>
    %229 = arith.negf %228 : vector<16x128xf32>
    %230 = math.exp %229 : vector<16x128xf32>
    %cst_63 = arith.constant 1.000000e+00 : f32
    %231 = vector.broadcast %cst_63 : f32 to vector<16x128xf32>
    %232 = arith.addf %231, %230 : vector<16x128xf32>
    %233 = arith.divf %231, %232 : vector<16x128xf32>
    %234 = arith.mulf %228, %233 : vector<16x128xf32>
    %235 = vector.shape_cast %234 : vector<16x128xf32> to vector<1x16x128xf32>
    %cst_64 = arith.constant 0.000000e+00 : f32
    %236 = vector.broadcast %cst_64 : f32 to vector<1x16x128xf32>
    %c0_65 = arith.constant 0 : index
    %c0_66 = arith.constant 0 : index
    %c0_67 = arith.constant 0 : index
    %237 = vector.load %arg23[%c0_65, %c0_66, %c0_67] : memref<1x47x128xf32, #tpu.memory_space<vmem>>, vector<1x16x128xf32>
    tpu.vector_store %arg23[%c0_65, %c0_66, %c0_67], %236 {strides = array<i32>} : memref<1x47x128xf32, #tpu.memory_space<vmem>>, vector<1x16x128xf32>,
    %cst_68 = arith.constant 0.000000e+00 : f32
    %238 = vector.broadcast %cst_68 : f32 to vector<1x15x128xf32>
    %c0_69 = arith.constant 0 : index
    %c32 = arith.constant 32 : index
    %c0_70 = arith.constant 0 : index
    %239 = vector.load %arg23[%c0_69, %c32, %c0_70] : memref<1x47x128xf32, #tpu.memory_space<vmem>>, vector<1x15x128xf32>
    tpu.vector_store %arg23[%c0_69, %c32, %c0_70], %238 {strides = array<i32>} : memref<1x47x128xf32, #tpu.memory_space<vmem>>, vector<1x15x128xf32>,
    %c0_71 = arith.constant 0 : index
    %c16 = arith.constant 16 : index
    %c0_72 = arith.constant 0 : index
    %240 = vector.load %arg23[%c0_71, %c16, %c0_72] : memref<1x47x128xf32, #tpu.memory_space<vmem>>, vector<1x16x128xf32>
    tpu.vector_store %arg23[%c0_71, %c16, %c0_72], %235 {strides = array<i32>} : memref<1x47x128xf32, #tpu.memory_space<vmem>>, vector<1x16x128xf32>,
    %cst_73 = arith.constant 0.000000e+00 : f32
    %241 = vector.broadcast %cst_73 : f32 to vector<1x16x128xf32>
    %cst_74 = arith.constant 0.000000e+00 : f32
    %242 = vector.broadcast %cst_74 : f32 to vector<1x16x128xf32>
    %cst_75 = arith.constant 0.000000e+00 : f32
    %243 = vector.broadcast %cst_75 : f32 to vector<1x16x128xf32>
    %cst_76 = arith.constant 0.000000e+00 : f32
    %244 = vector.broadcast %cst_76 : f32 to vector<1x16x128xf32>
    %c0_77 = arith.constant 0 : index
    %c0_78 = arith.constant 0 : index
    %245 = vector.load %arg18[%c0_77, %c0_78] : memref<31x128xf32, #tpu.memory_space<vmem>>, vector<1x128xf32>
    %246 = vector.shape_cast %245 : vector<1x128xf32> to vector<128xf32>
    %c0_79 = arith.constant 0 : index
    %c1_80 = arith.constant 1 : index
    %c0_81 = arith.constant 0 : index
    %247 = vector.load %arg23[%c0_79, %c1_80, %c0_81] : memref<1x47x128xf32, #tpu.memory_space<vmem>>, vector<1x16x128xf32>
    %248 = vector.shape_cast %246 : vector<128xf32> to vector<1x1x128xf32>
    %249 = vector.broadcast %248 : vector<1x1x128xf32> to vector<1x16x128xf32>
    %250 = arith.mulf %247, %249 : vector<1x16x128xf32>
    %251 = arith.addf %241, %250 : vector<1x16x128xf32>
    %c1_82 = arith.constant 1 : index
    %c0_83 = arith.constant 0 : index
    %252 = vector.load %arg18[%c1_82, %c0_83] : memref<31x128xf32, #tpu.memory_space<vmem>>, vector<1x128xf32>
    %253 = vector.shape_cast %252 : vector<1x128xf32> to vector<128xf32>
    %c0_84 = arith.constant 0 : index
    %c2 = arith.constant 2 : index
    %c0_85 = arith.constant 0 : index
    %254 = vector.load %arg23[%c0_84, %c2, %c0_85] : memref<1x47x128xf32, #tpu.memory_space<vmem>>, vector<1x16x128xf32>
    %255 = vector.shape_cast %253 : vector<128xf32> to vector<1x1x128xf32>
    %256 = vector.broadcast %255 : vector<1x1x128xf32> to vector<1x16x128xf32>
    %257 = arith.mulf %254, %256 : vector<1x16x128xf32>
    %258 = arith.addf %242, %257 : vector<1x16x128xf32>
    %c2_86 = arith.constant 2 : index
    %c0_87 = arith.constant 0 : index
    %259 = vector.load %arg18[%c2_86, %c0_87] : memref<31x128xf32, #tpu.memory_space<vmem>>, vector<1x128xf32>
    %260 = vector.shape_cast %259 : vector<1x128xf32> to vector<128xf32>
    %c0_88 = arith.constant 0 : index
    %c3 = arith.constant 3 : index
    %c0_89 = arith.constant 0 : index
    %261 = vector.load %arg23[%c0_88, %c3, %c0_89] : memref<1x47x128xf32, #tpu.memory_space<vmem>>, vector<1x16x128xf32>
    %262 = vector.shape_cast %260 : vector<128xf32> to vector<1x1x128xf32>
    %263 = vector.broadcast %262 : vector<1x1x128xf32> to vector<1x16x128xf32>
    %264 = arith.mulf %261, %263 : vector<1x16x128xf32>
    %265 = arith.addf %243, %264 : vector<1x16x128xf32>
    %c3_90 = arith.constant 3 : index
    %c0_91 = arith.constant 0 : index
    %266 = vector.load %arg18[%c3_90, %c0_91] : memref<31x128xf32, #tpu.memory_space<vmem>>, vector<1x128xf32>
    %267 = vector.shape_cast %266 : vector<1x128xf32> to vector<128xf32>
    %c0_92 = arith.constant 0 : index
    %c4 = arith.constant 4 : index
    %c0_93 = arith.constant 0 : index
    %268 = vector.load %arg23[%c0_92, %c4, %c0_93] : memref<1x47x128xf32, #tpu.memory_space<vmem>>, vector<1x16x128xf32>
    %269 = vector.shape_cast %267 : vector<128xf32> to vector<1x1x128xf32>
    %270 = vector.broadcast %269 : vector<1x1x128xf32> to vector<1x16x128xf32>
    %271 = arith.mulf %268, %270 : vector<1x16x128xf32>
    %272 = arith.addf %244, %271 : vector<1x16x128xf32>
    %c4_94 = arith.constant 4 : index
    %c0_95 = arith.constant 0 : index
    %273 = vector.load %arg18[%c4_94, %c0_95] : memref<31x128xf32, #tpu.memory_space<vmem>>, vector<1x128xf32>
    %274 = vector.shape_cast %273 : vector<1x128xf32> to vector<128xf32>
    %c0_96 = arith.constant 0 : index
    %c5 = arith.constant 5 : index
    %c0_97 = arith.constant 0 : index
    %275 = vector.load %arg23[%c0_96, %c5, %c0_97] : memref<1x47x128xf32, #tpu.memory_space<vmem>>, vector<1x16x128xf32>
    %276 = vector.shape_cast %274 : vector<128xf32> to vector<1x1x128xf32>
    %277 = vector.broadcast %276 : vector<1x1x128xf32> to vector<1x16x128xf32>
    %278 = arith.mulf %275, %277 : vector<1x16x128xf32>
    %279 = arith.addf %251, %278 : vector<1x16x128xf32>
    %c5_98 = arith.constant 5 : index
    %c0_99 = arith.constant 0 : index
    %280 = vector.load %arg18[%c5_98, %c0_99] : memref<31x128xf32, #tpu.memory_space<vmem>>, vector<1x128xf32>
    %281 = vector.shape_cast %280 : vector<1x128xf32> to vector<128xf32>
    %c0_100 = arith.constant 0 : index
    %c6 = arith.constant 6 : index
    %c0_101 = arith.constant 0 : index
    %282 = vector.load %arg23[%c0_100, %c6, %c0_101] : memref<1x47x128xf32, #tpu.memory_space<vmem>>, vector<1x16x128xf32>
    %283 = vector.shape_cast %281 : vector<128xf32> to vector<1x1x128xf32>
    %284 = vector.broadcast %283 : vector<1x1x128xf32> to vector<1x16x128xf32>
    %285 = arith.mulf %282, %284 : vector<1x16x128xf32>
    %286 = arith.addf %258, %285 : vector<1x16x128xf32>
    %c6_102 = arith.constant 6 : index
    %c0_103 = arith.constant 0 : index
    %287 = vector.load %arg18[%c6_102, %c0_103] : memref<31x128xf32, #tpu.memory_space<vmem>>, vector<1x128xf32>
    %288 = vector.shape_cast %287 : vector<1x128xf32> to vector<128xf32>
    %c0_104 = arith.constant 0 : index
    %c7 = arith.constant 7 : index
    %c0_105 = arith.constant 0 : index
    %289 = vector.load %arg23[%c0_104, %c7, %c0_105] : memref<1x47x128xf32, #tpu.memory_space<vmem>>, vector<1x16x128xf32>
    %290 = vector.shape_cast %288 : vector<128xf32> to vector<1x1x128xf32>
    %291 = vector.broadcast %290 : vector<1x1x128xf32> to vector<1x16x128xf32>
    %292 = arith.mulf %289, %291 : vector<1x16x128xf32>
    %293 = arith.addf %265, %292 : vector<1x16x128xf32>
    %c7_106 = arith.constant 7 : index
    %c0_107 = arith.constant 0 : index
    %294 = vector.load %arg18[%c7_106, %c0_107] : memref<31x128xf32, #tpu.memory_space<vmem>>, vector<1x128xf32>
    %295 = vector.shape_cast %294 : vector<1x128xf32> to vector<128xf32>
    %c0_108 = arith.constant 0 : index
    %c8 = arith.constant 8 : index
    %c0_109 = arith.constant 0 : index
    %296 = vector.load %arg23[%c0_108, %c8, %c0_109] : memref<1x47x128xf32, #tpu.memory_space<vmem>>, vector<1x16x128xf32>
    %297 = vector.shape_cast %295 : vector<128xf32> to vector<1x1x128xf32>
    %298 = vector.broadcast %297 : vector<1x1x128xf32> to vector<1x16x128xf32>
    %299 = arith.mulf %296, %298 : vector<1x16x128xf32>
    %300 = arith.addf %272, %299 : vector<1x16x128xf32>
    %c8_110 = arith.constant 8 : index
    %c0_111 = arith.constant 0 : index
    %301 = vector.load %arg18[%c8_110, %c0_111] : memref<31x128xf32, #tpu.memory_space<vmem>>, vector<1x128xf32>
    %302 = vector.shape_cast %301 : vector<1x128xf32> to vector<128xf32>
    %c0_112 = arith.constant 0 : index
    %c9 = arith.constant 9 : index
    %c0_113 = arith.constant 0 : index
    %303 = vector.load %arg23[%c0_112, %c9, %c0_113] : memref<1x47x128xf32, #tpu.memory_space<vmem>>, vector<1x16x128xf32>
    %304 = vector.shape_cast %302 : vector<128xf32> to vector<1x1x128xf32>
    %305 = vector.broadcast %304 : vector<1x1x128xf32> to vector<1x16x128xf32>
    %306 = arith.mulf %303, %305 : vector<1x16x128xf32>
    %307 = arith.addf %279, %306 : vector<1x16x128xf32>
    %c9_114 = arith.constant 9 : index
    %c0_115 = arith.constant 0 : index
    %308 = vector.load %arg18[%c9_114, %c0_115] : memref<31x128xf32, #tpu.memory_space<vmem>>, vector<1x128xf32>
    %309 = vector.shape_cast %308 : vector<1x128xf32> to vector<128xf32>
    %c0_116 = arith.constant 0 : index
    %c10 = arith.constant 10 : index
    %c0_117 = arith.constant 0 : index
    %310 = vector.load %arg23[%c0_116, %c10, %c0_117] : memref<1x47x128xf32, #tpu.memory_space<vmem>>, vector<1x16x128xf32>
    %311 = vector.shape_cast %309 : vector<128xf32> to vector<1x1x128xf32>
    %312 = vector.broadcast %311 : vector<1x1x128xf32> to vector<1x16x128xf32>
    %313 = arith.mulf %310, %312 : vector<1x16x128xf32>
    %314 = arith.addf %286, %313 : vector<1x16x128xf32>
    %c10_118 = arith.constant 10 : index
    %c0_119 = arith.constant 0 : index
    %315 = vector.load %arg18[%c10_118, %c0_119] : memref<31x128xf32, #tpu.memory_space<vmem>>, vector<1x128xf32>
    %316 = vector.shape_cast %315 : vector<1x128xf32> to vector<128xf32>
    %c0_120 = arith.constant 0 : index
    %c11 = arith.constant 11 : index
    %c0_121 = arith.constant 0 : index
    %317 = vector.load %arg23[%c0_120, %c11, %c0_121] : memref<1x47x128xf32, #tpu.memory_space<vmem>>, vector<1x16x128xf32>
    %318 = vector.shape_cast %316 : vector<128xf32> to vector<1x1x128xf32>
    %319 = vector.broadcast %318 : vector<1x1x128xf32> to vector<1x16x128xf32>
    %320 = arith.mulf %317, %319 : vector<1x16x128xf32>
    %321 = arith.addf %293, %320 : vector<1x16x128xf32>
    %c11_122 = arith.constant 11 : index
    %c0_123 = arith.constant 0 : index
    %322 = vector.load %arg18[%c11_122, %c0_123] : memref<31x128xf32, #tpu.memory_space<vmem>>, vector<1x128xf32>
    %323 = vector.shape_cast %322 : vector<1x128xf32> to vector<128xf32>
    %c0_124 = arith.constant 0 : index
    %c12 = arith.constant 12 : index
    %c0_125 = arith.constant 0 : index
    %324 = vector.load %arg23[%c0_124, %c12, %c0_125] : memref<1x47x128xf32, #tpu.memory_space<vmem>>, vector<1x16x128xf32>
    %325 = vector.shape_cast %323 : vector<128xf32> to vector<1x1x128xf32>
    %326 = vector.broadcast %325 : vector<1x1x128xf32> to vector<1x16x128xf32>
    %327 = arith.mulf %324, %326 : vector<1x16x128xf32>
    %328 = arith.addf %300, %327 : vector<1x16x128xf32>
    %c12_126 = arith.constant 12 : index
    %c0_127 = arith.constant 0 : index
    %329 = vector.load %arg18[%c12_126, %c0_127] : memref<31x128xf32, #tpu.memory_space<vmem>>, vector<1x128xf32>
    %330 = vector.shape_cast %329 : vector<1x128xf32> to vector<128xf32>
    %c0_128 = arith.constant 0 : index
    %c13 = arith.constant 13 : index
    %c0_129 = arith.constant 0 : index
    %331 = vector.load %arg23[%c0_128, %c13, %c0_129] : memref<1x47x128xf32, #tpu.memory_space<vmem>>, vector<1x16x128xf32>
    %332 = vector.shape_cast %330 : vector<128xf32> to vector<1x1x128xf32>
    %333 = vector.broadcast %332 : vector<1x1x128xf32> to vector<1x16x128xf32>
    %334 = arith.mulf %331, %333 : vector<1x16x128xf32>
    %335 = arith.addf %307, %334 : vector<1x16x128xf32>
    %c13_130 = arith.constant 13 : index
    %c0_131 = arith.constant 0 : index
    %336 = vector.load %arg18[%c13_130, %c0_131] : memref<31x128xf32, #tpu.memory_space<vmem>>, vector<1x128xf32>
    %337 = vector.shape_cast %336 : vector<1x128xf32> to vector<128xf32>
    %c0_132 = arith.constant 0 : index
    %c14 = arith.constant 14 : index
    %c0_133 = arith.constant 0 : index
    %338 = vector.load %arg23[%c0_132, %c14, %c0_133] : memref<1x47x128xf32, #tpu.memory_space<vmem>>, vector<1x16x128xf32>
    %339 = vector.shape_cast %337 : vector<128xf32> to vector<1x1x128xf32>
    %340 = vector.broadcast %339 : vector<1x1x128xf32> to vector<1x16x128xf32>
    %341 = arith.mulf %338, %340 : vector<1x16x128xf32>
    %342 = arith.addf %314, %341 : vector<1x16x128xf32>
    %c14_134 = arith.constant 14 : index
    %c0_135 = arith.constant 0 : index
    %343 = vector.load %arg18[%c14_134, %c0_135] : memref<31x128xf32, #tpu.memory_space<vmem>>, vector<1x128xf32>
    %344 = vector.shape_cast %343 : vector<1x128xf32> to vector<128xf32>
    %c0_136 = arith.constant 0 : index
    %c15 = arith.constant 15 : index
    %c0_137 = arith.constant 0 : index
    %345 = vector.load %arg23[%c0_136, %c15, %c0_137] : memref<1x47x128xf32, #tpu.memory_space<vmem>>, vector<1x16x128xf32>
    %346 = vector.shape_cast %344 : vector<128xf32> to vector<1x1x128xf32>
    %347 = vector.broadcast %346 : vector<1x1x128xf32> to vector<1x16x128xf32>
    %348 = arith.mulf %345, %347 : vector<1x16x128xf32>
    %349 = arith.addf %321, %348 : vector<1x16x128xf32>
    %c15_138 = arith.constant 15 : index
    %c0_139 = arith.constant 0 : index
    %350 = vector.load %arg18[%c15_138, %c0_139] : memref<31x128xf32, #tpu.memory_space<vmem>>, vector<1x128xf32>
    %351 = vector.shape_cast %350 : vector<1x128xf32> to vector<128xf32>
    %c0_140 = arith.constant 0 : index
    %c16_141 = arith.constant 16 : index
    %c0_142 = arith.constant 0 : index
    %352 = vector.load %arg23[%c0_140, %c16_141, %c0_142] : memref<1x47x128xf32, #tpu.memory_space<vmem>>, vector<1x16x128xf32>
    %353 = vector.shape_cast %351 : vector<128xf32> to vector<1x1x128xf32>
    %354 = vector.broadcast %353 : vector<1x1x128xf32> to vector<1x16x128xf32>
    %355 = arith.mulf %352, %354 : vector<1x16x128xf32>
    %356 = arith.addf %328, %355 : vector<1x16x128xf32>
    %c16_143 = arith.constant 16 : index
    %c0_144 = arith.constant 0 : index
    %357 = vector.load %arg18[%c16_143, %c0_144] : memref<31x128xf32, #tpu.memory_space<vmem>>, vector<1x128xf32>
    %358 = vector.shape_cast %357 : vector<1x128xf32> to vector<128xf32>
    %c0_145 = arith.constant 0 : index
    %c17 = arith.constant 17 : index
    %c0_146 = arith.constant 0 : index
    %359 = vector.load %arg23[%c0_145, %c17, %c0_146] : memref<1x47x128xf32, #tpu.memory_space<vmem>>, vector<1x16x128xf32>
    %360 = vector.shape_cast %358 : vector<128xf32> to vector<1x1x128xf32>
    %361 = vector.broadcast %360 : vector<1x1x128xf32> to vector<1x16x128xf32>
    %362 = arith.mulf %359, %361 : vector<1x16x128xf32>
    %363 = arith.addf %335, %362 : vector<1x16x128xf32>
    %c17_147 = arith.constant 17 : index
    %c0_148 = arith.constant 0 : index
    %364 = vector.load %arg18[%c17_147, %c0_148] : memref<31x128xf32, #tpu.memory_space<vmem>>, vector<1x128xf32>
    %365 = vector.shape_cast %364 : vector<1x128xf32> to vector<128xf32>
    %c0_149 = arith.constant 0 : index
    %c18 = arith.constant 18 : index
    %c0_150 = arith.constant 0 : index
    %366 = vector.load %arg23[%c0_149, %c18, %c0_150] : memref<1x47x128xf32, #tpu.memory_space<vmem>>, vector<1x16x128xf32>
    %367 = vector.shape_cast %365 : vector<128xf32> to vector<1x1x128xf32>
    %368 = vector.broadcast %367 : vector<1x1x128xf32> to vector<1x16x128xf32>
    %369 = arith.mulf %366, %368 : vector<1x16x128xf32>
    %370 = arith.addf %342, %369 : vector<1x16x128xf32>
    %c18_151 = arith.constant 18 : index
    %c0_152 = arith.constant 0 : index
    %371 = vector.load %arg18[%c18_151, %c0_152] : memref<31x128xf32, #tpu.memory_space<vmem>>, vector<1x128xf32>
    %372 = vector.shape_cast %371 : vector<1x128xf32> to vector<128xf32>
    %c0_153 = arith.constant 0 : index
    %c19 = arith.constant 19 : index
    %c0_154 = arith.constant 0 : index
    %373 = vector.load %arg23[%c0_153, %c19, %c0_154] : memref<1x47x128xf32, #tpu.memory_space<vmem>>, vector<1x16x128xf32>
    %374 = vector.shape_cast %372 : vector<128xf32> to vector<1x1x128xf32>
    %375 = vector.broadcast %374 : vector<1x1x128xf32> to vector<1x16x128xf32>
    %376 = arith.mulf %373, %375 : vector<1x16x128xf32>
    %377 = arith.addf %349, %376 : vector<1x16x128xf32>
    %c19_155 = arith.constant 19 : index
    %c0_156 = arith.constant 0 : index
    %378 = vector.load %arg18[%c19_155, %c0_156] : memref<31x128xf32, #tpu.memory_space<vmem>>, vector<1x128xf32>
    %379 = vector.shape_cast %378 : vector<1x128xf32> to vector<128xf32>
    %c0_157 = arith.constant 0 : index
    %c20 = arith.constant 20 : index
    %c0_158 = arith.constant 0 : index
    %380 = vector.load %arg23[%c0_157, %c20, %c0_158] : memref<1x47x128xf32, #tpu.memory_space<vmem>>, vector<1x16x128xf32>
    %381 = vector.shape_cast %379 : vector<128xf32> to vector<1x1x128xf32>
    %382 = vector.broadcast %381 : vector<1x1x128xf32> to vector<1x16x128xf32>
    %383 = arith.mulf %380, %382 : vector<1x16x128xf32>
    %384 = arith.addf %356, %383 : vector<1x16x128xf32>
    %c20_159 = arith.constant 20 : index
    %c0_160 = arith.constant 0 : index
    %385 = vector.load %arg18[%c20_159, %c0_160] : memref<31x128xf32, #tpu.memory_space<vmem>>, vector<1x128xf32>
    %386 = vector.shape_cast %385 : vector<1x128xf32> to vector<128xf32>
    %c0_161 = arith.constant 0 : index
    %c21 = arith.constant 21 : index
    %c0_162 = arith.constant 0 : index
    %387 = vector.load %arg23[%c0_161, %c21, %c0_162] : memref<1x47x128xf32, #tpu.memory_space<vmem>>, vector<1x16x128xf32>
    %388 = vector.shape_cast %386 : vector<128xf32> to vector<1x1x128xf32>
    %389 = vector.broadcast %388 : vector<1x1x128xf32> to vector<1x16x128xf32>
    %390 = arith.mulf %387, %389 : vector<1x16x128xf32>
    %391 = arith.addf %363, %390 : vector<1x16x128xf32>
    %c21_163 = arith.constant 21 : index
    %c0_164 = arith.constant 0 : index
    %392 = vector.load %arg18[%c21_163, %c0_164] : memref<31x128xf32, #tpu.memory_space<vmem>>, vector<1x128xf32>
    %393 = vector.shape_cast %392 : vector<1x128xf32> to vector<128xf32>
    %c0_165 = arith.constant 0 : index
    %c22 = arith.constant 22 : index
    %c0_166 = arith.constant 0 : index
    %394 = vector.load %arg23[%c0_165, %c22, %c0_166] : memref<1x47x128xf32, #tpu.memory_space<vmem>>, vector<1x16x128xf32>
    %395 = vector.shape_cast %393 : vector<128xf32> to vector<1x1x128xf32>
    %396 = vector.broadcast %395 : vector<1x1x128xf32> to vector<1x16x128xf32>
    %397 = arith.mulf %394, %396 : vector<1x16x128xf32>
    %398 = arith.addf %370, %397 : vector<1x16x128xf32>
    %c22_167 = arith.constant 22 : index
    %c0_168 = arith.constant 0 : index
    %399 = vector.load %arg18[%c22_167, %c0_168] : memref<31x128xf32, #tpu.memory_space<vmem>>, vector<1x128xf32>
    %400 = vector.shape_cast %399 : vector<1x128xf32> to vector<128xf32>
    %c0_169 = arith.constant 0 : index
    %c23 = arith.constant 23 : index
    %c0_170 = arith.constant 0 : index
    %401 = vector.load %arg23[%c0_169, %c23, %c0_170] : memref<1x47x128xf32, #tpu.memory_space<vmem>>, vector<1x16x128xf32>
    %402 = vector.shape_cast %400 : vector<128xf32> to vector<1x1x128xf32>
    %403 = vector.broadcast %402 : vector<1x1x128xf32> to vector<1x16x128xf32>
    %404 = arith.mulf %401, %403 : vector<1x16x128xf32>
    %405 = arith.addf %377, %404 : vector<1x16x128xf32>
    %c23_171 = arith.constant 23 : index
    %c0_172 = arith.constant 0 : index
    %406 = vector.load %arg18[%c23_171, %c0_172] : memref<31x128xf32, #tpu.memory_space<vmem>>, vector<1x128xf32>
    %407 = vector.shape_cast %406 : vector<1x128xf32> to vector<128xf32>
    %c0_173 = arith.constant 0 : index
    %c24 = arith.constant 24 : index
    %c0_174 = arith.constant 0 : index
    %408 = vector.load %arg23[%c0_173, %c24, %c0_174] : memref<1x47x128xf32, #tpu.memory_space<vmem>>, vector<1x16x128xf32>
    %409 = vector.shape_cast %407 : vector<128xf32> to vector<1x1x128xf32>
    %410 = vector.broadcast %409 : vector<1x1x128xf32> to vector<1x16x128xf32>
    %411 = arith.mulf %408, %410 : vector<1x16x128xf32>
    %412 = arith.addf %384, %411 : vector<1x16x128xf32>
    %c24_175 = arith.constant 24 : index
    %c0_176 = arith.constant 0 : index
    %413 = vector.load %arg18[%c24_175, %c0_176] : memref<31x128xf32, #tpu.memory_space<vmem>>, vector<1x128xf32>
    %414 = vector.shape_cast %413 : vector<1x128xf32> to vector<128xf32>
    %c0_177 = arith.constant 0 : index
    %c25 = arith.constant 25 : index
    %c0_178 = arith.constant 0 : index
    %415 = vector.load %arg23[%c0_177, %c25, %c0_178] : memref<1x47x128xf32, #tpu.memory_space<vmem>>, vector<1x16x128xf32>
    %416 = vector.shape_cast %414 : vector<128xf32> to vector<1x1x128xf32>
    %417 = vector.broadcast %416 : vector<1x1x128xf32> to vector<1x16x128xf32>
    %418 = arith.mulf %415, %417 : vector<1x16x128xf32>
    %419 = arith.addf %391, %418 : vector<1x16x128xf32>
    %c25_179 = arith.constant 25 : index
    %c0_180 = arith.constant 0 : index
    %420 = vector.load %arg18[%c25_179, %c0_180] : memref<31x128xf32, #tpu.memory_space<vmem>>, vector<1x128xf32>
    %421 = vector.shape_cast %420 : vector<1x128xf32> to vector<128xf32>
    %c0_181 = arith.constant 0 : index
    %c26 = arith.constant 26 : index
    %c0_182 = arith.constant 0 : index
    %422 = vector.load %arg23[%c0_181, %c26, %c0_182] : memref<1x47x128xf32, #tpu.memory_space<vmem>>, vector<1x16x128xf32>
    %423 = vector.shape_cast %421 : vector<128xf32> to vector<1x1x128xf32>
    %424 = vector.broadcast %423 : vector<1x1x128xf32> to vector<1x16x128xf32>
    %425 = arith.mulf %422, %424 : vector<1x16x128xf32>
    %426 = arith.addf %398, %425 : vector<1x16x128xf32>
    %c26_183 = arith.constant 26 : index
    %c0_184 = arith.constant 0 : index
    %427 = vector.load %arg18[%c26_183, %c0_184] : memref<31x128xf32, #tpu.memory_space<vmem>>, vector<1x128xf32>
    %428 = vector.shape_cast %427 : vector<1x128xf32> to vector<128xf32>
    %c0_185 = arith.constant 0 : index
    %c27 = arith.constant 27 : index
    %c0_186 = arith.constant 0 : index
    %429 = vector.load %arg23[%c0_185, %c27, %c0_186] : memref<1x47x128xf32, #tpu.memory_space<vmem>>, vector<1x16x128xf32>
    %430 = vector.shape_cast %428 : vector<128xf32> to vector<1x1x128xf32>
    %431 = vector.broadcast %430 : vector<1x1x128xf32> to vector<1x16x128xf32>
    %432 = arith.mulf %429, %431 : vector<1x16x128xf32>
    %433 = arith.addf %405, %432 : vector<1x16x128xf32>
    %c27_187 = arith.constant 27 : index
    %c0_188 = arith.constant 0 : index
    %434 = vector.load %arg18[%c27_187, %c0_188] : memref<31x128xf32, #tpu.memory_space<vmem>>, vector<1x128xf32>
    %435 = vector.shape_cast %434 : vector<1x128xf32> to vector<128xf32>
    %c0_189 = arith.constant 0 : index
    %c28 = arith.constant 28 : index
    %c0_190 = arith.constant 0 : index
    %436 = vector.load %arg23[%c0_189, %c28, %c0_190] : memref<1x47x128xf32, #tpu.memory_space<vmem>>, vector<1x16x128xf32>
    %437 = vector.shape_cast %435 : vector<128xf32> to vector<1x1x128xf32>
    %438 = vector.broadcast %437 : vector<1x1x128xf32> to vector<1x16x128xf32>
    %439 = arith.mulf %436, %438 : vector<1x16x128xf32>
    %440 = arith.addf %412, %439 : vector<1x16x128xf32>
    %c28_191 = arith.constant 28 : index
    %c0_192 = arith.constant 0 : index
    %441 = vector.load %arg18[%c28_191, %c0_192] : memref<31x128xf32, #tpu.memory_space<vmem>>, vector<1x128xf32>
    %442 = vector.shape_cast %441 : vector<1x128xf32> to vector<128xf32>
    %c0_193 = arith.constant 0 : index
    %c29 = arith.constant 29 : index
    %c0_194 = arith.constant 0 : index
    %443 = vector.load %arg23[%c0_193, %c29, %c0_194] : memref<1x47x128xf32, #tpu.memory_space<vmem>>, vector<1x16x128xf32>
    %444 = vector.shape_cast %442 : vector<128xf32> to vector<1x1x128xf32>
    %445 = vector.broadcast %444 : vector<1x1x128xf32> to vector<1x16x128xf32>
    %446 = arith.mulf %443, %445 : vector<1x16x128xf32>
    %447 = arith.addf %419, %446 : vector<1x16x128xf32>
    %c29_195 = arith.constant 29 : index
    %c0_196 = arith.constant 0 : index
    %448 = vector.load %arg18[%c29_195, %c0_196] : memref<31x128xf32, #tpu.memory_space<vmem>>, vector<1x128xf32>
    %449 = vector.shape_cast %448 : vector<1x128xf32> to vector<128xf32>
    %c0_197 = arith.constant 0 : index
    %c30 = arith.constant 30 : index
    %c0_198 = arith.constant 0 : index
    %450 = vector.load %arg23[%c0_197, %c30, %c0_198] : memref<1x47x128xf32, #tpu.memory_space<vmem>>, vector<1x16x128xf32>
    %451 = vector.shape_cast %449 : vector<128xf32> to vector<1x1x128xf32>
    %452 = vector.broadcast %451 : vector<1x1x128xf32> to vector<1x16x128xf32>
    %453 = arith.mulf %450, %452 : vector<1x16x128xf32>
    %454 = arith.addf %426, %453 : vector<1x16x128xf32>
    %c30_199 = arith.constant 30 : index
    %c0_200 = arith.constant 0 : index
    %455 = vector.load %arg18[%c30_199, %c0_200] : memref<31x128xf32, #tpu.memory_space<vmem>>, vector<1x128xf32>
    %456 = vector.shape_cast %455 : vector<1x128xf32> to vector<128xf32>
    %c0_201 = arith.constant 0 : index
    %c31 = arith.constant 31 : index
    %c0_202 = arith.constant 0 : index
    %457 = vector.load %arg23[%c0_201, %c31, %c0_202] : memref<1x47x128xf32, #tpu.memory_space<vmem>>, vector<1x16x128xf32>
    %458 = vector.shape_cast %456 : vector<128xf32> to vector<1x1x128xf32>
    %459 = vector.broadcast %458 : vector<1x1x128xf32> to vector<1x16x128xf32>
    %460 = arith.mulf %457, %459 : vector<1x16x128xf32>
    %461 = arith.addf %433, %460 : vector<1x16x128xf32>
    %462 = arith.addf %447, %454 : vector<1x16x128xf32>
    %463 = arith.addf %461, %440 : vector<1x16x128xf32>
    %464 = arith.addf %462, %463 : vector<1x16x128xf32>
    %c0_203 = arith.constant 0 : index
    %c0_204 = arith.constant 0 : index
    %465 = vector.load %arg19[%c0_203, %c0_204] : memref<1x128xf32, #tpu.memory_space<vmem>>, vector<1x128xf32>
    %466 = vector.shape_cast %465 : vector<1x128xf32> to vector<128xf32>
    %467 = vector.shape_cast %466 : vector<128xf32> to vector<1x1x128xf32>
    %468 = vector.broadcast %467 : vector<1x1x128xf32> to vector<1x16x128xf32>
    %469 = arith.addf %464, %468 : vector<1x16x128xf32>
    %470 = vector.shape_cast %469 : vector<1x16x128xf32> to vector<16x128xf32>
    %471 = arith.negf %470 : vector<16x128xf32>
    %472 = math.exp %471 : vector<16x128xf32>
    %cst_205 = arith.constant 1.000000e+00 : f32
    %473 = vector.broadcast %cst_205 : f32 to vector<16x128xf32>
    %474 = arith.addf %473, %472 : vector<16x128xf32>
    %475 = arith.divf %473, %474 : vector<16x128xf32>
    %476 = arith.mulf %470, %475 : vector<16x128xf32>
    %477 = arith.truncf %476 : vector<16x128xf32> to vector<16x128xbf16>
    %c0_206 = arith.constant 0 : index
    %c0_207 = arith.constant 0 : index
    %478 = vector.load %arg20[%c0_206, %c0_207] : memref<128x64xbf16, #tpu.memory_space<vmem>>, vector<128x64xbf16>
    %cst_208 = arith.constant dense<0.000000e+00> : vector<16x64xf32>
    %479 = tpu.matmul %477, %478, %cst_208 {dimension_numbers = #tpu.dot_dimension_numbers<[1], [0], [0], [1], [0, 0, 1, 1], [], []>} : vector<16x128xbf16>, vector<128x64xbf16>, vector<16x64xf32> -> vector<16x64xf32>
    %c0_209 = arith.constant 0 : index
    %c0_210 = arith.constant 0 : index
    %480 = vector.load %arg21[%c0_209, %c0_210] : memref<1x64xf32, #tpu.memory_space<vmem>>, vector<1x64xf32>
    %481 = vector.shape_cast %480 : vector<1x64xf32> to vector<64xf32>
    %482 = vector.shape_cast %481 : vector<64xf32> to vector<1x64xf32>
    %483 = vector.broadcast %482 : vector<1x64xf32> to vector<16x64xf32>
    %484 = arith.addf %479, %483 : vector<16x64xf32>
    %485 = arith.addf %210, %484 : vector<16x64xf32>
    %cst_211 = arith.constant dense<0.000000e+00> : vector<16xf32>
    %486 = vector.multi_reduction <add>, %485, %cst_211 [1] : vector<16x64xf32> to vector<16xf32>
    %487 = vector.shape_cast %486 : vector<16xf32> to vector<16x1xf32>
    %cst_212 = arith.constant 6.400000e+01 : f32
    %488 = vector.broadcast %cst_212 : f32 to vector<16x1xf32>
    %489 = arith.divf %487, %488 : vector<16x1xf32>
    %490 = vector.broadcast %489 : vector<16x1xf32> to vector<16x64xf32>
    %491 = arith.subf %485, %490 : vector<16x64xf32>
    %492 = arith.mulf %491, %491 : vector<16x64xf32>
    %cst_213 = arith.constant dense<0.000000e+00> : vector<16xf32>
    %493 = vector.multi_reduction <add>, %492, %cst_213 [1] : vector<16x64xf32> to vector<16xf32>
    %494 = vector.shape_cast %493 : vector<16xf32> to vector<16x1xf32>
    %cst_214 = arith.constant 6.400000e+01 : f32
    %495 = vector.broadcast %cst_214 : f32 to vector<16x1xf32>
    %496 = arith.divf %494, %495 : vector<16x1xf32>
    %497 = vector.broadcast %489 : vector<16x1xf32> to vector<16x64xf32>
    %498 = arith.subf %485, %497 : vector<16x64xf32>
    %cst_215 = arith.constant 9.99999974E-6 : f32
    %499 = vector.broadcast %cst_215 : f32 to vector<16x1xf32>
    %500 = arith.addf %496, %499 : vector<16x1xf32>
    %501 = math.rsqrt %500 : vector<16x1xf32>
    %502 = vector.broadcast %501 : vector<16x1xf32> to vector<16x64xf32>
    %503 = arith.mulf %498, %502 : vector<16x64xf32>
    %c2_216 = arith.constant 2 : index
    %c0_217 = arith.constant 0 : index
    %504 = vector.load %arg8[%c2_216, %c0_217] : memref<4x64xf32, #tpu.memory_space<vmem>>, vector<1x64xf32>
    %505 = vector.shape_cast %504 : vector<1x64xf32> to vector<64xf32>
    %506 = vector.shape_cast %505 : vector<64xf32> to vector<1x64xf32>
    %507 = vector.broadcast %506 : vector<1x64xf32> to vector<16x64xf32>
    %508 = arith.mulf %503, %507 : vector<16x64xf32>
    %c2_218 = arith.constant 2 : index
    %c0_219 = arith.constant 0 : index
    %509 = vector.load %arg9[%c2_218, %c0_219] : memref<4x64xf32, #tpu.memory_space<vmem>>, vector<1x64xf32>
    %510 = vector.shape_cast %509 : vector<1x64xf32> to vector<64xf32>
    %511 = vector.shape_cast %510 : vector<64xf32> to vector<1x64xf32>
    %512 = vector.broadcast %511 : vector<1x64xf32> to vector<16x64xf32>
    %513 = arith.addf %508, %512 : vector<16x64xf32>
    %c1_220 = arith.constant 1 : index
    %c0_221 = arith.constant 0 : index
    %c0_222 = arith.constant 0 : index
    %514 = vector.load %arg10[%c1_220, %c0_221, %c0_222] : memref<2x2x64xf32, #tpu.memory_space<vmem>>, vector<1x2x64xf32>
    %515 = vector.shape_cast %514 : vector<1x2x64xf32> to vector<2x64xf32>
    %516 = vector.extract_strided_slice %515 {offsets = [0, 0], sizes = [1, 64], strides = [1, 1]} : vector<2x64xf32> to vector<1x64xf32>
    %517 = vector.shape_cast %516 : vector<1x64xf32> to vector<64xf32>
    %518 = vector.shape_cast %517 : vector<64xf32> to vector<1x64xf32>
    %519 = vector.broadcast %518 : vector<1x64xf32> to vector<16x64xf32>
    %520 = arith.mulf %513, %519 : vector<16x64xf32>
    %521 = vector.extract_strided_slice %515 {offsets = [1, 0], sizes = [1, 64], strides = [1, 1]} : vector<2x64xf32> to vector<1x64xf32>
    %522 = vector.shape_cast %521 : vector<1x64xf32> to vector<64xf32>
    %523 = vector.shape_cast %522 : vector<64xf32> to vector<1x64xf32>
    %524 = vector.broadcast %523 : vector<1x64xf32> to vector<16x64xf32>
    %525 = arith.addf %520, %524 : vector<16x64xf32>
    %526 = arith.truncf %525 : vector<16x64xf32> to vector<16x64xbf16>
    %c1_223 = arith.constant 1 : index
    %c0_224 = arith.constant 0 : index
    %c0_225 = arith.constant 0 : index
    %527 = vector.load %arg11[%c1_223, %c0_224, %c0_225] : memref<2x64x256xbf16, #tpu.memory_space<vmem>>, vector<1x64x256xbf16>
    %528 = vector.shape_cast %527 : vector<1x64x256xbf16> to vector<64x256xbf16>
    %cst_226 = arith.constant dense<0.000000e+00> : vector<16x256xf32>
    %529 = tpu.matmul %526, %528, %cst_226 {dimension_numbers = #tpu.dot_dimension_numbers<[1], [0], [0], [1], [0, 0, 1, 1], [], []>} : vector<16x64xbf16>, vector<64x256xbf16>, vector<16x256xf32> -> vector<16x256xf32>
    %c1_227 = arith.constant 1 : index
    %c0_228 = arith.constant 0 : index
    %530 = vector.load %arg12[%c1_227, %c0_228] : memref<2x256xf32, #tpu.memory_space<vmem>>, vector<1x256xf32>
    %531 = vector.shape_cast %530 : vector<1x256xf32> to vector<256xf32>
    %532 = vector.shape_cast %531 : vector<256xf32> to vector<1x256xf32>
    %533 = vector.broadcast %532 : vector<1x256xf32> to vector<16x256xf32>
    %534 = arith.addf %529, %533 : vector<16x256xf32>
    %535 = arith.negf %534 : vector<16x256xf32>
    %536 = math.exp %535 : vector<16x256xf32>
    %cst_229 = arith.constant 1.000000e+00 : f32
    %537 = vector.broadcast %cst_229 : f32 to vector<16x256xf32>
    %538 = arith.addf %537, %536 : vector<16x256xf32>
    %539 = arith.divf %537, %538 : vector<16x256xf32>
    %540 = arith.mulf %534, %539 : vector<16x256xf32>
    %541 = arith.truncf %540 : vector<16x256xf32> to vector<16x256xbf16>
    %c1_230 = arith.constant 1 : index
    %c0_231 = arith.constant 0 : index
    %c0_232 = arith.constant 0 : index
    %542 = vector.load %arg13[%c1_230, %c0_231, %c0_232] : memref<2x256x64xbf16, #tpu.memory_space<vmem>>, vector<1x256x64xbf16>
    %543 = vector.shape_cast %542 : vector<1x256x64xbf16> to vector<256x64xbf16>
    %cst_233 = arith.constant dense<0.000000e+00> : vector<16x64xf32>
    %544 = tpu.matmul %541, %543, %cst_233 {dimension_numbers = #tpu.dot_dimension_numbers<[1], [0], [0], [1], [0, 0, 1, 1], [], []>} : vector<16x256xbf16>, vector<256x64xbf16>, vector<16x64xf32> -> vector<16x64xf32>
    %c1_234 = arith.constant 1 : index
    %c0_235 = arith.constant 0 : index
    %545 = vector.load %arg14[%c1_234, %c0_235] : memref<2x64xf32, #tpu.memory_space<vmem>>, vector<1x64xf32>
    %546 = vector.shape_cast %545 : vector<1x64xf32> to vector<64xf32>
    %547 = vector.shape_cast %546 : vector<64xf32> to vector<1x64xf32>
    %548 = vector.broadcast %547 : vector<1x64xf32> to vector<16x64xf32>
    %549 = arith.addf %544, %548 : vector<16x64xf32>
    %550 = arith.addf %513, %549 : vector<16x64xf32>
    %cst_236 = arith.constant dense<0.000000e+00> : vector<16xf32>
    %551 = vector.multi_reduction <add>, %550, %cst_236 [1] : vector<16x64xf32> to vector<16xf32>
    %552 = vector.shape_cast %551 : vector<16xf32> to vector<16x1xf32>
    %cst_237 = arith.constant 6.400000e+01 : f32
    %553 = vector.broadcast %cst_237 : f32 to vector<16x1xf32>
    %554 = arith.divf %552, %553 : vector<16x1xf32>
    %555 = vector.broadcast %554 : vector<16x1xf32> to vector<16x64xf32>
    %556 = arith.subf %550, %555 : vector<16x64xf32>
    %557 = arith.mulf %556, %556 : vector<16x64xf32>
    %cst_238 = arith.constant dense<0.000000e+00> : vector<16xf32>
    %558 = vector.multi_reduction <add>, %557, %cst_238 [1] : vector<16x64xf32> to vector<16xf32>
    %559 = vector.shape_cast %558 : vector<16xf32> to vector<16x1xf32>
    %cst_239 = arith.constant 6.400000e+01 : f32
    %560 = vector.broadcast %cst_239 : f32 to vector<16x1xf32>
    %561 = arith.divf %559, %560 : vector<16x1xf32>
    %562 = vector.broadcast %554 : vector<16x1xf32> to vector<16x64xf32>
    %563 = arith.subf %550, %562 : vector<16x64xf32>
    %cst_240 = arith.constant 9.99999974E-6 : f32
    %564 = vector.broadcast %cst_240 : f32 to vector<16x1xf32>
    %565 = arith.addf %561, %564 : vector<16x1xf32>
    %566 = math.rsqrt %565 : vector<16x1xf32>
    %567 = vector.broadcast %566 : vector<16x1xf32> to vector<16x64xf32>
    %568 = arith.mulf %563, %567 : vector<16x64xf32>
    %c3_241 = arith.constant 3 : index
    %c0_242 = arith.constant 0 : index
    %569 = vector.load %arg8[%c3_241, %c0_242] : memref<4x64xf32, #tpu.memory_space<vmem>>, vector<1x64xf32>
    %570 = vector.shape_cast %569 : vector<1x64xf32> to vector<64xf32>
    %571 = vector.shape_cast %570 : vector<64xf32> to vector<1x64xf32>
    %572 = vector.broadcast %571 : vector<1x64xf32> to vector<16x64xf32>
    %573 = arith.mulf %568, %572 : vector<16x64xf32>
    %c3_243 = arith.constant 3 : index
    %c0_244 = arith.constant 0 : index
    %574 = vector.load %arg9[%c3_243, %c0_244] : memref<4x64xf32, #tpu.memory_space<vmem>>, vector<1x64xf32>
    %575 = vector.shape_cast %574 : vector<1x64xf32> to vector<64xf32>
    %576 = vector.shape_cast %575 : vector<64xf32> to vector<1x64xf32>
    %577 = vector.broadcast %576 : vector<1x64xf32> to vector<16x64xf32>
    %578 = arith.addf %573, %577 : vector<16x64xf32>
    %579 = vector.shape_cast %578 : vector<16x64xf32> to vector<1x16x64xf32>
    %580 = vector.shape_cast %579 : vector<1x16x64xf32> to vector<1x1x1024xf32>
    %c0_245 = arith.constant 0 : index
    %c0_246 = arith.constant 0 : index
    %c0_247 = arith.constant 0 : index
    %581 = vector.load %arg22[%c0_245, %c0_246, %c0_247] : memref<1x1x1024xf32, #tpu.memory_space<vmem>>, vector<1x1x1024xf32>
    tpu.vector_store %arg22[%c0_245, %c0_246, %c0_247], %580 {strides = array<i32>} : memref<1x1x1024xf32, #tpu.memory_space<vmem>>, vector<1x1x1024xf32>,
    return
  }
  func.func @transform_0(%arg0: i32) -> (i32, i32, i32) {
    %c0_i32 = arith.constant 0 : i32
    %c0_i32_0 = arith.constant 0 : i32
    %c0_i32_1 = arith.constant 0 : i32
    return %arg0, %c0_i32, %c0_i32_0 : i32, i32, i32
  }
  func.func @transform_1(%arg0: i32) -> (i32, i32) {
    %c0_i32 = arith.constant 0 : i32
    %c0_i32_0 = arith.constant 0 : i32
    %c0_i32_1 = arith.constant 0 : i32
    return %c0_i32, %c0_i32_0 : i32, i32
  }
  func.func @transform_2(%arg0: i32) -> (i32, i32) {
    %c0_i32 = arith.constant 0 : i32
    %c0_i32_0 = arith.constant 0 : i32
    %c0_i32_1 = arith.constant 0 : i32
    return %c0_i32, %c0_i32_0 : i32, i32
  }
  func.func @transform_3(%arg0: i32) -> (i32, i32) {
    %c0_i32 = arith.constant 0 : i32
    %c0_i32_0 = arith.constant 0 : i32
    %c0_i32_1 = arith.constant 0 : i32
    return %c0_i32, %c0_i32_0 : i32, i32
  }
  func.func @transform_4(%arg0: i32) -> (i32, i32) {
    %c0_i32 = arith.constant 0 : i32
    %c0_i32_0 = arith.constant 0 : i32
    %c0_i32_1 = arith.constant 0 : i32
    return %c0_i32, %c0_i32_0 : i32, i32
  }
  func.func @transform_5(%arg0: i32) -> (i32, i32) {
    %c0_i32 = arith.constant 0 : i32
    %c0_i32_0 = arith.constant 0 : i32
    %c0_i32_1 = arith.constant 0 : i32
    return %c0_i32, %c0_i32_0 : i32, i32
  }
  func.func @transform_6(%arg0: i32) -> (i32, i32) {
    %c0_i32 = arith.constant 0 : i32
    %c0_i32_0 = arith.constant 0 : i32
    %c0_i32_1 = arith.constant 0 : i32
    return %c0_i32, %c0_i32_0 : i32, i32
  }
  func.func @transform_7(%arg0: i32) -> (i32, i32) {
    %c0_i32 = arith.constant 0 : i32
    %c0_i32_0 = arith.constant 0 : i32
    %c0_i32_1 = arith.constant 0 : i32
    return %c0_i32, %c0_i32_0 : i32, i32
  }
  func.func @transform_8(%arg0: i32) -> (i32, i32) {
    %c0_i32 = arith.constant 0 : i32
    %c0_i32_0 = arith.constant 0 : i32
    %c0_i32_1 = arith.constant 0 : i32
    return %c0_i32, %c0_i32_0 : i32, i32
  }
  func.func @transform_9(%arg0: i32) -> (i32, i32, i32) {
    %c0_i32 = arith.constant 0 : i32
    %c0_i32_0 = arith.constant 0 : i32
    %c0_i32_1 = arith.constant 0 : i32
    %c0_i32_2 = arith.constant 0 : i32
    return %c0_i32, %c0_i32_0, %c0_i32_1 : i32, i32, i32
  }
  func.func @transform_10(%arg0: i32) -> (i32, i32, i32) {
    %c0_i32 = arith.constant 0 : i32
    %c0_i32_0 = arith.constant 0 : i32
    %c0_i32_1 = arith.constant 0 : i32
    %c0_i32_2 = arith.constant 0 : i32
    return %c0_i32, %c0_i32_0, %c0_i32_1 : i32, i32, i32
  }
  func.func @transform_11(%arg0: i32) -> (i32, i32) {
    %c0_i32 = arith.constant 0 : i32
    %c0_i32_0 = arith.constant 0 : i32
    %c0_i32_1 = arith.constant 0 : i32
    return %c0_i32, %c0_i32_0 : i32, i32
  }
  func.func @transform_12(%arg0: i32) -> (i32, i32, i32) {
    %c0_i32 = arith.constant 0 : i32
    %c0_i32_0 = arith.constant 0 : i32
    %c0_i32_1 = arith.constant 0 : i32
    %c0_i32_2 = arith.constant 0 : i32
    return %c0_i32, %c0_i32_0, %c0_i32_1 : i32, i32, i32
  }
  func.func @transform_13(%arg0: i32) -> (i32, i32) {
    %c0_i32 = arith.constant 0 : i32
    %c0_i32_0 = arith.constant 0 : i32
    %c0_i32_1 = arith.constant 0 : i32
    return %c0_i32, %c0_i32_0 : i32, i32
  }
  func.func @transform_14(%arg0: i32) -> (i32, i32) {
    %c0_i32 = arith.constant 0 : i32
    %c0_i32_0 = arith.constant 0 : i32
    %c0_i32_1 = arith.constant 0 : i32
    return %c0_i32, %c0_i32_0 : i32, i32
  }
  func.func @transform_15(%arg0: i32) -> (i32, i32) {
    %c0_i32 = arith.constant 0 : i32
    %c0_i32_0 = arith.constant 0 : i32
    %c0_i32_1 = arith.constant 0 : i32
    return %c0_i32, %c0_i32_0 : i32, i32
  }
  func.func @transform_16(%arg0: i32) -> (i32, i32) {
    %c0_i32 = arith.constant 0 : i32
    %c0_i32_0 = arith.constant 0 : i32
    %c0_i32_1 = arith.constant 0 : i32
    return %c0_i32, %c0_i32_0 : i32, i32
  }
  func.func @transform_17(%arg0: i32) -> (i32, i32) {
    %c0_i32 = arith.constant 0 : i32
    %c0_i32_0 = arith.constant 0 : i32
    %c0_i32_1 = arith.constant 0 : i32
    return %c0_i32, %c0_i32_0 : i32, i32
  }
  func.func @transform_18(%arg0: i32) -> (i32, i32) {
    %c0_i32 = arith.constant 0 : i32
    %c0_i32_0 = arith.constant 0 : i32
    %c0_i32_1 = arith.constant 0 : i32
    return %c0_i32, %c0_i32_0 : i32, i32
  }
  func.func @transform_19(%arg0: i32) -> (i32, i32) {
    %c0_i32 = arith.constant 0 : i32
    %c0_i32_0 = arith.constant 0 : i32
    %c0_i32_1 = arith.constant 0 : i32
    return %c0_i32, %c0_i32_0 : i32, i32
  }
  func.func @transform_20(%arg0: i32) -> (i32, i32) {
    %c0_i32 = arith.constant 0 : i32
    %c0_i32_0 = arith.constant 0 : i32
    %c0_i32_1 = arith.constant 0 : i32
    return %c0_i32, %c0_i32_0 : i32, i32
  }
  func.func @transform_21(%arg0: i32) -> (i32, i32, i32) {
    %c0_i32 = arith.constant 0 : i32
    %c0_i32_0 = arith.constant 0 : i32
    %c0_i32_1 = arith.constant 0 : i32
    return %arg0, %c0_i32, %c0_i32_0 : i32, i32, i32
  }
}

module attributes {stable_mosaic.version = 11 : i64} {
  func.func @_squeezeformer_kernel(%arg0: i32, %arg1: memref<1x16x64xf32, #tpu.memory_space<vmem>>, %arg2: memref<16x64xf32, #tpu.memory_space<vmem>>, %arg3: memref<2x64xf32, #tpu.memory_space<vmem>>, %arg4: memref<64x192xbf16, #tpu.memory_space<vmem>>, %arg5: memref<1x192xf32, #tpu.memory_space<vmem>>, %arg6: memref<64x64xbf16, #tpu.memory_space<vmem>>, %arg7: memref<1x64xf32, #tpu.memory_space<vmem>>, %arg8: memref<4x64xf32, #tpu.memory_space<vmem>>, %arg9: memref<4x64xf32, #tpu.memory_space<vmem>>, %arg10: memref<2x2x64xf32, #tpu.memory_space<vmem>>, %arg11: memref<2x64x256xbf16, #tpu.memory_space<vmem>>, %arg12: memref<2x256xf32, #tpu.memory_space<vmem>>, %arg13: memref<2x256x64xbf16, #tpu.memory_space<vmem>>, %arg14: memref<2x64xf32, #tpu.memory_space<vmem>>, %arg15: memref<2x64xf32, #tpu.memory_space<vmem>>, %arg16: memref<64x128xbf16, #tpu.memory_space<vmem>>, %arg17: memref<1x128xf32, #tpu.memory_space<vmem>>, %arg18: memref<31x128xf32, #tpu.memory_space<vmem>>, %arg19: memref<1x128xf32, #tpu.memory_space<vmem>>, %arg20: memref<128x64xbf16, #tpu.memory_space<vmem>>, %arg21: memref<1x64xf32, #tpu.memory_space<vmem>>, %arg22: memref<1x16x64xf32, #tpu.memory_space<vmem>>, %arg23: memref<1x47x128xf32, #tpu.memory_space<vmem>>) attributes {dimension_semantics = [#tpu.dimension_semantics<parallel>], iteration_bounds = array<i64: 2>, scalar_prefetch = 0 : i64, scratch_operands = 1 : i64, tpu.core_type = #tpu.core_type<tc>, window_params = [{transform_indices = @transform_0, window_bounds = array<i64: 1, 16, 64>}, {pipeline_mode = #tpu.pipeline_mode<synchronous>, transform_indices = @transform_1, window_bounds = array<i64: 16, 64>}, {pipeline_mode = #tpu.pipeline_mode<synchronous>, transform_indices = @transform_2, window_bounds = array<i64: 2, 64>}, {pipeline_mode = #tpu.pipeline_mode<synchronous>, transform_indices = @transform_3, window_bounds = array<i64: 64, 192>}, {pipeline_mode = #tpu.pipeline_mode<synchronous>, transform_indices = @transform_4, window_bounds = array<i64: 1, 192>}, {pipeline_mode = #tpu.pipeline_mode<synchronous>, transform_indices = @transform_5, window_bounds = array<i64: 64, 64>}, {pipeline_mode = #tpu.pipeline_mode<synchronous>, transform_indices = @transform_6, window_bounds = array<i64: 1, 64>}, {pipeline_mode = #tpu.pipeline_mode<synchronous>, transform_indices = @transform_7, window_bounds = array<i64: 4, 64>}, {pipeline_mode = #tpu.pipeline_mode<synchronous>, transform_indices = @transform_8, window_bounds = array<i64: 4, 64>}, {pipeline_mode = #tpu.pipeline_mode<synchronous>, transform_indices = @transform_9, window_bounds = array<i64: 2, 2, 64>}, {pipeline_mode = #tpu.pipeline_mode<synchronous>, transform_indices = @transform_10, window_bounds = array<i64: 2, 64, 256>}, {pipeline_mode = #tpu.pipeline_mode<synchronous>, transform_indices = @transform_11, window_bounds = array<i64: 2, 256>}, {pipeline_mode = #tpu.pipeline_mode<synchronous>, transform_indices = @transform_12, window_bounds = array<i64: 2, 256, 64>}, {pipeline_mode = #tpu.pipeline_mode<synchronous>, transform_indices = @transform_13, window_bounds = array<i64: 2, 64>}, {pipeline_mode = #tpu.pipeline_mode<synchronous>, transform_indices = @transform_14, window_bounds = array<i64: 2, 64>}, {pipeline_mode = #tpu.pipeline_mode<synchronous>, transform_indices = @transform_15, window_bounds = array<i64: 64, 128>}, {pipeline_mode = #tpu.pipeline_mode<synchronous>, transform_indices = @transform_16, window_bounds = array<i64: 1, 128>}, {pipeline_mode = #tpu.pipeline_mode<synchronous>, transform_indices = @transform_17, window_bounds = array<i64: 31, 128>}, {pipeline_mode = #tpu.pipeline_mode<synchronous>, transform_indices = @transform_18, window_bounds = array<i64: 1, 128>}, {pipeline_mode = #tpu.pipeline_mode<synchronous>, transform_indices = @transform_19, window_bounds = array<i64: 128, 64>}, {pipeline_mode = #tpu.pipeline_mode<synchronous>, transform_indices = @transform_20, window_bounds = array<i64: 1, 64>}, {transform_indices = @transform_21, window_bounds = array<i64: 1, 16, 64>}]} {
    %c0 = arith.constant 0 : index
    %c0_0 = arith.constant 0 : index
    %c0_1 = arith.constant 0 : index
    %0 = vector.load %arg1[%c0, %c0_0, %c0_1] : memref<1x16x64xf32, #tpu.memory_space<vmem>>, vector<1x16x64xf32>
    %c0_2 = arith.constant 0 : index
    %c0_3 = arith.constant 0 : index
    %1 = vector.load %arg2[%c0_2, %c0_3] : memref<16x64xf32, #tpu.memory_space<vmem>>, vector<16x64xf32>
    %2 = vector.shape_cast %0 : vector<1x16x64xf32> to vector<16x64xf32>
    %c0_4 = arith.constant 0 : index
    %c0_5 = arith.constant 0 : index
    %3 = vector.load %arg3[%c0_4, %c0_5] : memref<2x64xf32, #tpu.memory_space<vmem>>, vector<1x64xf32>
    %4 = vector.shape_cast %3 : vector<1x64xf32> to vector<64xf32>
    %5 = vector.shape_cast %4 : vector<64xf32> to vector<1x1x64xf32>
    %6 = vector.broadcast %5 : vector<1x1x64xf32> to vector<1x16x64xf32>
    %7 = arith.mulf %0, %6 : vector<1x16x64xf32>
    %c1 = arith.constant 1 : index
    %c0_6 = arith.constant 0 : index
    %8 = vector.load %arg3[%c1, %c0_6] : memref<2x64xf32, #tpu.memory_space<vmem>>, vector<1x64xf32>
    %9 = vector.shape_cast %8 : vector<1x64xf32> to vector<64xf32>
    %10 = vector.shape_cast %9 : vector<64xf32> to vector<1x1x64xf32>
    %11 = vector.broadcast %10 : vector<1x1x64xf32> to vector<1x16x64xf32>
    %12 = arith.addf %7, %11 : vector<1x16x64xf32>
    %13 = vector.shape_cast %1 : vector<16x64xf32> to vector<1x16x64xf32>
    %14 = arith.addf %12, %13 : vector<1x16x64xf32>
    %15 = vector.shape_cast %14 : vector<1x16x64xf32> to vector<16x64xf32>
    %16 = arith.truncf %15 : vector<16x64xf32> to vector<16x64xbf16>
    %c0_7 = arith.constant 0 : index
    %c0_8 = arith.constant 0 : index
    %17 = vector.load %arg4[%c0_7, %c0_8] : memref<64x192xbf16, #tpu.memory_space<vmem>>, vector<64x192xbf16>
    %cst = arith.constant dense<0.000000e+00> : vector<16x192xf32>
    %18 = tpu.matmul %16, %17, %cst {dimension_numbers = #tpu.dot_dimension_numbers<[1], [0], [0], [1], [0, 0, 1, 1], [], []>} : vector<16x64xbf16>, vector<64x192xbf16>, vector<16x192xf32> -> vector<16x192xf32>
    %c0_9 = arith.constant 0 : index
    %c0_10 = arith.constant 0 : index
    %19 = vector.load %arg5[%c0_9, %c0_10] : memref<1x192xf32, #tpu.memory_space<vmem>>, vector<1x192xf32>
    %20 = vector.shape_cast %19 : vector<1x192xf32> to vector<192xf32>
    %21 = vector.shape_cast %20 : vector<192xf32> to vector<1x192xf32>
    %22 = vector.broadcast %21 : vector<1x192xf32> to vector<16x192xf32>
    %23 = arith.addf %18, %22 : vector<16x192xf32>
    %24 = vector.extract_strided_slice %23 {offsets = [0, 0], sizes = [16, 8], strides = [1, 1]} : vector<16x192xf32> to vector<16x8xf32>
    %25 = vector.shape_cast %24 : vector<16x8xf32> to vector<1x16x8xf32>
    %26 = vector.extract_strided_slice %23 {offsets = [0, 8], sizes = [16, 8], strides = [1, 1]} : vector<16x192xf32> to vector<16x8xf32>
    %27 = vector.shape_cast %26 : vector<16x8xf32> to vector<1x16x8xf32>
    %28 = vector.extract_strided_slice %23 {offsets = [0, 16], sizes = [16, 8], strides = [1, 1]} : vector<16x192xf32> to vector<16x8xf32>
    %29 = vector.shape_cast %28 : vector<16x8xf32> to vector<1x16x8xf32>
    %30 = vector.extract_strided_slice %23 {offsets = [0, 24], sizes = [16, 8], strides = [1, 1]} : vector<16x192xf32> to vector<16x8xf32>
    %31 = vector.shape_cast %30 : vector<16x8xf32> to vector<1x16x8xf32>
    %32 = vector.extract_strided_slice %23 {offsets = [0, 32], sizes = [16, 8], strides = [1, 1]} : vector<16x192xf32> to vector<16x8xf32>
    %33 = vector.shape_cast %32 : vector<16x8xf32> to vector<1x16x8xf32>
    %34 = vector.extract_strided_slice %23 {offsets = [0, 40], sizes = [16, 8], strides = [1, 1]} : vector<16x192xf32> to vector<16x8xf32>
    %35 = vector.shape_cast %34 : vector<16x8xf32> to vector<1x16x8xf32>
    %36 = vector.extract_strided_slice %23 {offsets = [0, 48], sizes = [16, 8], strides = [1, 1]} : vector<16x192xf32> to vector<16x8xf32>
    %37 = vector.shape_cast %36 : vector<16x8xf32> to vector<1x16x8xf32>
    %38 = vector.extract_strided_slice %23 {offsets = [0, 56], sizes = [16, 8], strides = [1, 1]} : vector<16x192xf32> to vector<16x8xf32>
    %39 = vector.shape_cast %38 : vector<16x8xf32> to vector<1x16x8xf32>
    %40 = tpu.concatenate %25, %27, %29, %31, %33, %35, %37, %39 in 0 : vector<1x16x8xf32>, vector<1x16x8xf32>, vector<1x16x8xf32>, vector<1x16x8xf32>, vector<1x16x8xf32>, vector<1x16x8xf32>, vector<1x16x8xf32>, vector<1x16x8xf32> -> vector<8x16x8xf32>
    %41 = arith.truncf %40 : vector<8x16x8xf32> to vector<8x16x8xbf16>
    %42 = vector.extract_strided_slice %23 {offsets = [0, 64], sizes = [16, 8], strides = [1, 1]} : vector<16x192xf32> to vector<16x8xf32>
    %43 = vector.shape_cast %42 : vector<16x8xf32> to vector<1x16x8xf32>
    %44 = vector.extract_strided_slice %23 {offsets = [0, 72], sizes = [16, 8], strides = [1, 1]} : vector<16x192xf32> to vector<16x8xf32>
    %45 = vector.shape_cast %44 : vector<16x8xf32> to vector<1x16x8xf32>
    %46 = vector.extract_strided_slice %23 {offsets = [0, 80], sizes = [16, 8], strides = [1, 1]} : vector<16x192xf32> to vector<16x8xf32>
    %47 = vector.shape_cast %46 : vector<16x8xf32> to vector<1x16x8xf32>
    %48 = vector.extract_strided_slice %23 {offsets = [0, 88], sizes = [16, 8], strides = [1, 1]} : vector<16x192xf32> to vector<16x8xf32>
    %49 = vector.shape_cast %48 : vector<16x8xf32> to vector<1x16x8xf32>
    %50 = vector.extract_strided_slice %23 {offsets = [0, 96], sizes = [16, 8], strides = [1, 1]} : vector<16x192xf32> to vector<16x8xf32>
    %51 = vector.shape_cast %50 : vector<16x8xf32> to vector<1x16x8xf32>
    %52 = vector.extract_strided_slice %23 {offsets = [0, 104], sizes = [16, 8], strides = [1, 1]} : vector<16x192xf32> to vector<16x8xf32>
    %53 = vector.shape_cast %52 : vector<16x8xf32> to vector<1x16x8xf32>
    %54 = vector.extract_strided_slice %23 {offsets = [0, 112], sizes = [16, 8], strides = [1, 1]} : vector<16x192xf32> to vector<16x8xf32>
    %55 = vector.shape_cast %54 : vector<16x8xf32> to vector<1x16x8xf32>
    %56 = vector.extract_strided_slice %23 {offsets = [0, 120], sizes = [16, 8], strides = [1, 1]} : vector<16x192xf32> to vector<16x8xf32>
    %57 = vector.shape_cast %56 : vector<16x8xf32> to vector<1x16x8xf32>
    %58 = tpu.concatenate %43, %45, %47, %49, %51, %53, %55, %57 in 0 : vector<1x16x8xf32>, vector<1x16x8xf32>, vector<1x16x8xf32>, vector<1x16x8xf32>, vector<1x16x8xf32>, vector<1x16x8xf32>, vector<1x16x8xf32>, vector<1x16x8xf32> -> vector<8x16x8xf32>
    %59 = arith.truncf %58 : vector<8x16x8xf32> to vector<8x16x8xbf16>
    %60 = vector.extract_strided_slice %23 {offsets = [0, 128], sizes = [16, 8], strides = [1, 1]} : vector<16x192xf32> to vector<16x8xf32>
    %61 = vector.shape_cast %60 : vector<16x8xf32> to vector<1x16x8xf32>
    %62 = vector.extract_strided_slice %23 {offsets = [0, 136], sizes = [16, 8], strides = [1, 1]} : vector<16x192xf32> to vector<16x8xf32>
    %63 = vector.shape_cast %62 : vector<16x8xf32> to vector<1x16x8xf32>
    %64 = vector.extract_strided_slice %23 {offsets = [0, 144], sizes = [16, 8], strides = [1, 1]} : vector<16x192xf32> to vector<16x8xf32>
    %65 = vector.shape_cast %64 : vector<16x8xf32> to vector<1x16x8xf32>
    %66 = vector.extract_strided_slice %23 {offsets = [0, 152], sizes = [16, 8], strides = [1, 1]} : vector<16x192xf32> to vector<16x8xf32>
    %67 = vector.shape_cast %66 : vector<16x8xf32> to vector<1x16x8xf32>
    %68 = vector.extract_strided_slice %23 {offsets = [0, 160], sizes = [16, 8], strides = [1, 1]} : vector<16x192xf32> to vector<16x8xf32>
    %69 = vector.shape_cast %68 : vector<16x8xf32> to vector<1x16x8xf32>
    %70 = vector.extract_strided_slice %23 {offsets = [0, 168], sizes = [16, 8], strides = [1, 1]} : vector<16x192xf32> to vector<16x8xf32>
    %71 = vector.shape_cast %70 : vector<16x8xf32> to vector<1x16x8xf32>
    %72 = vector.extract_strided_slice %23 {offsets = [0, 176], sizes = [16, 8], strides = [1, 1]} : vector<16x192xf32> to vector<16x8xf32>
    %73 = vector.shape_cast %72 : vector<16x8xf32> to vector<1x16x8xf32>
    %74 = vector.extract_strided_slice %23 {offsets = [0, 184], sizes = [16, 8], strides = [1, 1]} : vector<16x192xf32> to vector<16x8xf32>
    %75 = vector.shape_cast %74 : vector<16x8xf32> to vector<1x16x8xf32>
    %76 = tpu.concatenate %61, %63, %65, %67, %69, %71, %73, %75 in 0 : vector<1x16x8xf32>, vector<1x16x8xf32>, vector<1x16x8xf32>, vector<1x16x8xf32>, vector<1x16x8xf32>, vector<1x16x8xf32>, vector<1x16x8xf32>, vector<1x16x8xf32> -> vector<8x16x8xf32>
    %77 = arith.truncf %76 : vector<8x16x8xf32> to vector<8x16x8xbf16>
    "tpu.trace_start"() <{level = 10 : i32, message = "bid,bjd->bij"}> : () -> ()
    %cst_11 = arith.constant dense<0.000000e+00> : vector<8x16x16xf32>
    %78 = tpu.matmul %41, %59, %cst_11 {dimension_numbers = #tpu.dot_dimension_numbers<[2], [2], [1], [1], [0, 0, 0, 1, 1, 1], [0], [0]>} : vector<8x16x8xbf16>, vector<8x16x8xbf16>, vector<8x16x16xf32> -> vector<8x16x16xf32>
    "tpu.trace_stop"() : () -> ()
    %cst_12 = arith.constant dense<0xFF800000> : vector<8x16xf32>
    %79 = vector.multi_reduction <maximumf>, %78, %cst_12 [2] : vector<8x16x16xf32> to vector<8x16xf32>
    %80 = vector.shape_cast %79 : vector<8x16xf32> to vector<8x16x1xf32>
    %81 = vector.broadcast %80 : vector<8x16x1xf32> to vector<8x16x16xf32>
    %82 = arith.subf %78, %81 : vector<8x16x16xf32>
    %83 = math.exp %82 : vector<8x16x16xf32>
    %cst_13 = arith.constant dense<0.000000e+00> : vector<8x16xf32>
    %84 = vector.multi_reduction <add>, %83, %cst_13 [2] : vector<8x16x16xf32> to vector<8x16xf32>
    %85 = vector.shape_cast %84 : vector<8x16xf32> to vector<8x16x1xf32>
    %86 = arith.truncf %83 : vector<8x16x16xf32> to vector<8x16x16xbf16>
    "tpu.trace_start"() <{level = 10 : i32, message = "bij,bjd->bid"}> : () -> ()
    %cst_14 = arith.constant dense<0.000000e+00> : vector<8x16x8xf32>
    %87 = tpu.matmul %86, %77, %cst_14 {dimension_numbers = #tpu.dot_dimension_numbers<[2], [1], [1], [2], [0, 0, 0, 1, 1, 2], [0], [0]>} : vector<8x16x16xbf16>, vector<8x16x8xbf16>, vector<8x16x8xf32> -> vector<8x16x8xf32>
    "tpu.trace_stop"() : () -> ()
    %88 = tpu.reciprocal %85 {approx = true} : vector<8x16x1xf32> -> vector<8x16x1xf32>
    %89 = vector.broadcast %88 : vector<8x16x1xf32> to vector<8x16x8xf32>
    %90 = arith.mulf %87, %89 : vector<8x16x8xf32>
    %91 = vector.extract_strided_slice %90 {offsets = [0, 0, 0], sizes = [1, 16, 8], strides = [1, 1, 1]} : vector<8x16x8xf32> to vector<1x16x8xf32>
    %92 = vector.shape_cast %91 : vector<1x16x8xf32> to vector<16x8xf32>
    %93 = vector.extract_strided_slice %90 {offsets = [1, 0, 0], sizes = [1, 16, 8], strides = [1, 1, 1]} : vector<8x16x8xf32> to vector<1x16x8xf32>
    %94 = vector.shape_cast %93 : vector<1x16x8xf32> to vector<16x8xf32>
    %95 = vector.extract_strided_slice %90 {offsets = [2, 0, 0], sizes = [1, 16, 8], strides = [1, 1, 1]} : vector<8x16x8xf32> to vector<1x16x8xf32>
    %96 = vector.shape_cast %95 : vector<1x16x8xf32> to vector<16x8xf32>
    %97 = vector.extract_strided_slice %90 {offsets = [3, 0, 0], sizes = [1, 16, 8], strides = [1, 1, 1]} : vector<8x16x8xf32> to vector<1x16x8xf32>
    %98 = vector.shape_cast %97 : vector<1x16x8xf32> to vector<16x8xf32>
    %99 = vector.extract_strided_slice %90 {offsets = [4, 0, 0], sizes = [1, 16, 8], strides = [1, 1, 1]} : vector<8x16x8xf32> to vector<1x16x8xf32>
    %100 = vector.shape_cast %99 : vector<1x16x8xf32> to vector<16x8xf32>
    %101 = vector.extract_strided_slice %90 {offsets = [5, 0, 0], sizes = [1, 16, 8], strides = [1, 1, 1]} : vector<8x16x8xf32> to vector<1x16x8xf32>
    %102 = vector.shape_cast %101 : vector<1x16x8xf32> to vector<16x8xf32>
    %103 = vector.extract_strided_slice %90 {offsets = [6, 0, 0], sizes = [1, 16, 8], strides = [1, 1, 1]} : vector<8x16x8xf32> to vector<1x16x8xf32>
    %104 = vector.shape_cast %103 : vector<1x16x8xf32> to vector<16x8xf32>
    %105 = vector.extract_strided_slice %90 {offsets = [7, 0, 0], sizes = [1, 16, 8], strides = [1, 1, 1]} : vector<8x16x8xf32> to vector<1x16x8xf32>
    %106 = vector.shape_cast %105 : vector<1x16x8xf32> to vector<16x8xf32>
    %107 = tpu.concatenate %92, %94, %96, %98, %100, %102, %104, %106 in 1 : vector<16x8xf32>, vector<16x8xf32>, vector<16x8xf32>, vector<16x8xf32>, vector<16x8xf32>, vector<16x8xf32>, vector<16x8xf32>, vector<16x8xf32> -> vector<16x64xf32>
    %108 = arith.truncf %107 : vector<16x64xf32> to vector<16x64xbf16>
    %c0_15 = arith.constant 0 : index
    %c0_16 = arith.constant 0 : index
    %109 = vector.load %arg6[%c0_15, %c0_16] : memref<64x64xbf16, #tpu.memory_space<vmem>>, vector<64x64xbf16>
    %cst_17 = arith.constant dense<0.000000e+00> : vector<16x64xf32>
    %110 = tpu.matmul %108, %109, %cst_17 {dimension_numbers = #tpu.dot_dimension_numbers<[1], [0], [0], [1], [0, 0, 1, 1], [], []>} : vector<16x64xbf16>, vector<64x64xbf16>, vector<16x64xf32> -> vector<16x64xf32>
    %c0_18 = arith.constant 0 : index
    %c0_19 = arith.constant 0 : index
    %111 = vector.load %arg7[%c0_18, %c0_19] : memref<1x64xf32, #tpu.memory_space<vmem>>, vector<1x64xf32>
    %112 = vector.shape_cast %111 : vector<1x64xf32> to vector<64xf32>
    %113 = vector.shape_cast %112 : vector<64xf32> to vector<1x64xf32>
    %114 = vector.broadcast %113 : vector<1x64xf32> to vector<16x64xf32>
    %115 = arith.addf %110, %114 : vector<16x64xf32>
    %116 = arith.addf %2, %115 : vector<16x64xf32>
    %cst_20 = arith.constant dense<0.000000e+00> : vector<16xf32>
    %117 = vector.multi_reduction <add>, %116, %cst_20 [1] : vector<16x64xf32> to vector<16xf32>
    %118 = vector.shape_cast %117 : vector<16xf32> to vector<16x1xf32>
    %cst_21 = arith.constant 6.400000e+01 : f32
    %119 = vector.broadcast %cst_21 : f32 to vector<16x1xf32>
    %120 = arith.divf %118, %119 : vector<16x1xf32>
    %121 = vector.broadcast %120 : vector<16x1xf32> to vector<16x64xf32>
    %122 = arith.subf %116, %121 : vector<16x64xf32>
    %123 = arith.mulf %122, %122 : vector<16x64xf32>
    %cst_22 = arith.constant dense<0.000000e+00> : vector<16xf32>
    %124 = vector.multi_reduction <add>, %123, %cst_22 [1] : vector<16x64xf32> to vector<16xf32>
    %125 = vector.shape_cast %124 : vector<16xf32> to vector<16x1xf32>
    %cst_23 = arith.constant 6.400000e+01 : f32
    %126 = vector.broadcast %cst_23 : f32 to vector<16x1xf32>
    %127 = arith.divf %125, %126 : vector<16x1xf32>
    %128 = vector.broadcast %120 : vector<16x1xf32> to vector<16x64xf32>
    %129 = arith.subf %116, %128 : vector<16x64xf32>
    %cst_24 = arith.constant 9.99999974E-6 : f32
    %130 = vector.broadcast %cst_24 : f32 to vector<16x1xf32>
    %131 = arith.addf %127, %130 : vector<16x1xf32>
    %132 = math.rsqrt %131 : vector<16x1xf32>
    %133 = vector.broadcast %132 : vector<16x1xf32> to vector<16x64xf32>
    %134 = arith.mulf %129, %133 : vector<16x64xf32>
    %c0_25 = arith.constant 0 : index
    %c0_26 = arith.constant 0 : index
    %135 = vector.load %arg8[%c0_25, %c0_26] : memref<4x64xf32, #tpu.memory_space<vmem>>, vector<1x64xf32>
    %136 = vector.shape_cast %135 : vector<1x64xf32> to vector<64xf32>
    %137 = vector.shape_cast %136 : vector<64xf32> to vector<1x64xf32>
    %138 = vector.broadcast %137 : vector<1x64xf32> to vector<16x64xf32>
    %139 = arith.mulf %134, %138 : vector<16x64xf32>
    %c0_27 = arith.constant 0 : index
    %c0_28 = arith.constant 0 : index
    %140 = vector.load %arg9[%c0_27, %c0_28] : memref<4x64xf32, #tpu.memory_space<vmem>>, vector<1x64xf32>
    %141 = vector.shape_cast %140 : vector<1x64xf32> to vector<64xf32>
    %142 = vector.shape_cast %141 : vector<64xf32> to vector<1x64xf32>
    %143 = vector.broadcast %142 : vector<1x64xf32> to vector<16x64xf32>
    %144 = arith.addf %139, %143 : vector<16x64xf32>
    %c0_29 = arith.constant 0 : index
    %c0_30 = arith.constant 0 : index
    %c0_31 = arith.constant 0 : index
    %145 = vector.load %arg10[%c0_29, %c0_30, %c0_31] : memref<2x2x64xf32, #tpu.memory_space<vmem>>, vector<1x2x64xf32>
    %146 = vector.shape_cast %145 : vector<1x2x64xf32> to vector<2x64xf32>
    %147 = vector.extract_strided_slice %146 {offsets = [0, 0], sizes = [1, 64], strides = [1, 1]} : vector<2x64xf32> to vector<1x64xf32>
    %148 = vector.shape_cast %147 : vector<1x64xf32> to vector<64xf32>
    %149 = vector.shape_cast %148 : vector<64xf32> to vector<1x64xf32>
    %150 = vector.broadcast %149 : vector<1x64xf32> to vector<16x64xf32>
    %151 = arith.mulf %144, %150 : vector<16x64xf32>
    %152 = vector.extract_strided_slice %146 {offsets = [1, 0], sizes = [1, 64], strides = [1, 1]} : vector<2x64xf32> to vector<1x64xf32>
    %153 = vector.shape_cast %152 : vector<1x64xf32> to vector<64xf32>
    %154 = vector.shape_cast %153 : vector<64xf32> to vector<1x64xf32>
    %155 = vector.broadcast %154 : vector<1x64xf32> to vector<16x64xf32>
    %156 = arith.addf %151, %155 : vector<16x64xf32>
    %157 = arith.truncf %156 : vector<16x64xf32> to vector<16x64xbf16>
    %c0_32 = arith.constant 0 : index
    %c0_33 = arith.constant 0 : index
    %c0_34 = arith.constant 0 : index
    %158 = vector.load %arg11[%c0_32, %c0_33, %c0_34] : memref<2x64x256xbf16, #tpu.memory_space<vmem>>, vector<1x64x256xbf16>
    %159 = vector.shape_cast %158 : vector<1x64x256xbf16> to vector<64x256xbf16>
    %cst_35 = arith.constant dense<0.000000e+00> : vector<16x256xf32>
    %160 = tpu.matmul %157, %159, %cst_35 {dimension_numbers = #tpu.dot_dimension_numbers<[1], [0], [0], [1], [0, 0, 1, 1], [], []>} : vector<16x64xbf16>, vector<64x256xbf16>, vector<16x256xf32> -> vector<16x256xf32>
    %c0_36 = arith.constant 0 : index
    %c0_37 = arith.constant 0 : index
    %161 = vector.load %arg12[%c0_36, %c0_37] : memref<2x256xf32, #tpu.memory_space<vmem>>, vector<1x256xf32>
    %162 = vector.shape_cast %161 : vector<1x256xf32> to vector<256xf32>
    %163 = vector.shape_cast %162 : vector<256xf32> to vector<1x256xf32>
    %164 = vector.broadcast %163 : vector<1x256xf32> to vector<16x256xf32>
    %165 = arith.addf %160, %164 : vector<16x256xf32>
    %166 = arith.negf %165 : vector<16x256xf32>
    %167 = math.exp %166 : vector<16x256xf32>
    %cst_38 = arith.constant 1.000000e+00 : f32
    %168 = vector.broadcast %cst_38 : f32 to vector<16x256xf32>
    %169 = arith.addf %168, %167 : vector<16x256xf32>
    %170 = arith.divf %168, %169 : vector<16x256xf32>
    %171 = arith.mulf %165, %170 : vector<16x256xf32>
    %172 = arith.truncf %171 : vector<16x256xf32> to vector<16x256xbf16>
    %c0_39 = arith.constant 0 : index
    %c0_40 = arith.constant 0 : index
    %c0_41 = arith.constant 0 : index
    %173 = vector.load %arg13[%c0_39, %c0_40, %c0_41] : memref<2x256x64xbf16, #tpu.memory_space<vmem>>, vector<1x256x64xbf16>
    %174 = vector.shape_cast %173 : vector<1x256x64xbf16> to vector<256x64xbf16>
    %cst_42 = arith.constant dense<0.000000e+00> : vector<16x64xf32>
    %175 = tpu.matmul %172, %174, %cst_42 {dimension_numbers = #tpu.dot_dimension_numbers<[1], [0], [0], [1], [0, 0, 1, 1], [], []>} : vector<16x256xbf16>, vector<256x64xbf16>, vector<16x64xf32> -> vector<16x64xf32>
    %c0_43 = arith.constant 0 : index
    %c0_44 = arith.constant 0 : index
    %176 = vector.load %arg14[%c0_43, %c0_44] : memref<2x64xf32, #tpu.memory_space<vmem>>, vector<1x64xf32>
    %177 = vector.shape_cast %176 : vector<1x64xf32> to vector<64xf32>
    %178 = vector.shape_cast %177 : vector<64xf32> to vector<1x64xf32>
    %179 = vector.broadcast %178 : vector<1x64xf32> to vector<16x64xf32>
    %180 = arith.addf %175, %179 : vector<16x64xf32>
    %181 = arith.addf %144, %180 : vector<16x64xf32>
    %cst_45 = arith.constant dense<0.000000e+00> : vector<16xf32>
    %182 = vector.multi_reduction <add>, %181, %cst_45 [1] : vector<16x64xf32> to vector<16xf32>
    %183 = vector.shape_cast %182 : vector<16xf32> to vector<16x1xf32>
    %cst_46 = arith.constant 6.400000e+01 : f32
    %184 = vector.broadcast %cst_46 : f32 to vector<16x1xf32>
    %185 = arith.divf %183, %184 : vector<16x1xf32>
    %186 = vector.broadcast %185 : vector<16x1xf32> to vector<16x64xf32>
    %187 = arith.subf %181, %186 : vector<16x64xf32>
    %188 = arith.mulf %187, %187 : vector<16x64xf32>
    %cst_47 = arith.constant dense<0.000000e+00> : vector<16xf32>
    %189 = vector.multi_reduction <add>, %188, %cst_47 [1] : vector<16x64xf32> to vector<16xf32>
    %190 = vector.shape_cast %189 : vector<16xf32> to vector<16x1xf32>
    %cst_48 = arith.constant 6.400000e+01 : f32
    %191 = vector.broadcast %cst_48 : f32 to vector<16x1xf32>
    %192 = arith.divf %190, %191 : vector<16x1xf32>
    %193 = vector.broadcast %185 : vector<16x1xf32> to vector<16x64xf32>
    %194 = arith.subf %181, %193 : vector<16x64xf32>
    %cst_49 = arith.constant 9.99999974E-6 : f32
    %195 = vector.broadcast %cst_49 : f32 to vector<16x1xf32>
    %196 = arith.addf %192, %195 : vector<16x1xf32>
    %197 = math.rsqrt %196 : vector<16x1xf32>
    %198 = vector.broadcast %197 : vector<16x1xf32> to vector<16x64xf32>
    %199 = arith.mulf %194, %198 : vector<16x64xf32>
    %c1_50 = arith.constant 1 : index
    %c0_51 = arith.constant 0 : index
    %200 = vector.load %arg8[%c1_50, %c0_51] : memref<4x64xf32, #tpu.memory_space<vmem>>, vector<1x64xf32>
    %201 = vector.shape_cast %200 : vector<1x64xf32> to vector<64xf32>
    %202 = vector.shape_cast %201 : vector<64xf32> to vector<1x64xf32>
    %203 = vector.broadcast %202 : vector<1x64xf32> to vector<16x64xf32>
    %204 = arith.mulf %199, %203 : vector<16x64xf32>
    %c1_52 = arith.constant 1 : index
    %c0_53 = arith.constant 0 : index
    %205 = vector.load %arg9[%c1_52, %c0_53] : memref<4x64xf32, #tpu.memory_space<vmem>>, vector<1x64xf32>
    %206 = vector.shape_cast %205 : vector<1x64xf32> to vector<64xf32>
    %207 = vector.shape_cast %206 : vector<64xf32> to vector<1x64xf32>
    %208 = vector.broadcast %207 : vector<1x64xf32> to vector<16x64xf32>
    %209 = arith.addf %204, %208 : vector<16x64xf32>
    %c0_54 = arith.constant 0 : index
    %c0_55 = arith.constant 0 : index
    %210 = vector.load %arg15[%c0_54, %c0_55] : memref<2x64xf32, #tpu.memory_space<vmem>>, vector<1x64xf32>
    %211 = vector.shape_cast %210 : vector<1x64xf32> to vector<64xf32>
    %212 = vector.shape_cast %211 : vector<64xf32> to vector<1x64xf32>
    %213 = vector.broadcast %212 : vector<1x64xf32> to vector<16x64xf32>
    %214 = arith.mulf %209, %213 : vector<16x64xf32>
    %c1_56 = arith.constant 1 : index
    %c0_57 = arith.constant 0 : index
    %215 = vector.load %arg15[%c1_56, %c0_57] : memref<2x64xf32, #tpu.memory_space<vmem>>, vector<1x64xf32>
    %216 = vector.shape_cast %215 : vector<1x64xf32> to vector<64xf32>
    %217 = vector.shape_cast %216 : vector<64xf32> to vector<1x64xf32>
    %218 = vector.broadcast %217 : vector<1x64xf32> to vector<16x64xf32>
    %219 = arith.addf %214, %218 : vector<16x64xf32>
    %220 = arith.truncf %219 : vector<16x64xf32> to vector<16x64xbf16>
    %c0_58 = arith.constant 0 : index
    %c0_59 = arith.constant 0 : index
    %221 = vector.load %arg16[%c0_58, %c0_59] : memref<64x128xbf16, #tpu.memory_space<vmem>>, vector<64x128xbf16>
    %cst_60 = arith.constant dense<0.000000e+00> : vector<16x128xf32>
    %222 = tpu.matmul %220, %221, %cst_60 {dimension_numbers = #tpu.dot_dimension_numbers<[1], [0], [0], [1], [0, 0, 1, 1], [], []>} : vector<16x64xbf16>, vector<64x128xbf16>, vector<16x128xf32> -> vector<16x128xf32>
    %c0_61 = arith.constant 0 : index
    %c0_62 = arith.constant 0 : index
    %223 = vector.load %arg17[%c0_61, %c0_62] : memref<1x128xf32, #tpu.memory_space<vmem>>, vector<1x128xf32>
    %224 = vector.shape_cast %223 : vector<1x128xf32> to vector<128xf32>
    %225 = vector.shape_cast %224 : vector<128xf32> to vector<1x128xf32>
    %226 = vector.broadcast %225 : vector<1x128xf32> to vector<16x128xf32>
    %227 = arith.addf %222, %226 : vector<16x128xf32>
    %228 = arith.negf %227 : vector<16x128xf32>
    %229 = math.exp %228 : vector<16x128xf32>
    %cst_63 = arith.constant 1.000000e+00 : f32
    %230 = vector.broadcast %cst_63 : f32 to vector<16x128xf32>
    %231 = arith.addf %230, %229 : vector<16x128xf32>
    %232 = arith.divf %230, %231 : vector<16x128xf32>
    %233 = arith.mulf %227, %232 : vector<16x128xf32>
    %234 = vector.shape_cast %233 : vector<16x128xf32> to vector<1x16x128xf32>
    %cst_64 = arith.constant 0.000000e+00 : f32
    %235 = vector.broadcast %cst_64 : f32 to vector<1x16x128xf32>
    %c0_65 = arith.constant 0 : index
    %c0_66 = arith.constant 0 : index
    %c0_67 = arith.constant 0 : index
    %236 = vector.load %arg23[%c0_65, %c0_66, %c0_67] : memref<1x47x128xf32, #tpu.memory_space<vmem>>, vector<1x16x128xf32>
    tpu.vector_store %arg23[%c0_65, %c0_66, %c0_67], %235 {strides = array<i32>} : memref<1x47x128xf32, #tpu.memory_space<vmem>>, vector<1x16x128xf32>,
    %cst_68 = arith.constant 0.000000e+00 : f32
    %237 = vector.broadcast %cst_68 : f32 to vector<1x15x128xf32>
    %c0_69 = arith.constant 0 : index
    %c32 = arith.constant 32 : index
    %c0_70 = arith.constant 0 : index
    %238 = vector.load %arg23[%c0_69, %c32, %c0_70] : memref<1x47x128xf32, #tpu.memory_space<vmem>>, vector<1x15x128xf32>
    tpu.vector_store %arg23[%c0_69, %c32, %c0_70], %237 {strides = array<i32>} : memref<1x47x128xf32, #tpu.memory_space<vmem>>, vector<1x15x128xf32>,
    %c0_71 = arith.constant 0 : index
    %c16 = arith.constant 16 : index
    %c0_72 = arith.constant 0 : index
    %239 = vector.load %arg23[%c0_71, %c16, %c0_72] : memref<1x47x128xf32, #tpu.memory_space<vmem>>, vector<1x16x128xf32>
    tpu.vector_store %arg23[%c0_71, %c16, %c0_72], %234 {strides = array<i32>} : memref<1x47x128xf32, #tpu.memory_space<vmem>>, vector<1x16x128xf32>,
    %cst_73 = arith.constant 0.000000e+00 : f32
    %240 = vector.broadcast %cst_73 : f32 to vector<1x16x128xf32>
    %cst_74 = arith.constant 0.000000e+00 : f32
    %241 = vector.broadcast %cst_74 : f32 to vector<1x16x128xf32>
    %cst_75 = arith.constant 0.000000e+00 : f32
    %242 = vector.broadcast %cst_75 : f32 to vector<1x16x128xf32>
    %cst_76 = arith.constant 0.000000e+00 : f32
    %243 = vector.broadcast %cst_76 : f32 to vector<1x16x128xf32>
    %c0_77 = arith.constant 0 : index
    %c0_78 = arith.constant 0 : index
    %244 = vector.load %arg18[%c0_77, %c0_78] : memref<31x128xf32, #tpu.memory_space<vmem>>, vector<1x128xf32>
    %245 = vector.shape_cast %244 : vector<1x128xf32> to vector<128xf32>
    %c0_79 = arith.constant 0 : index
    %c1_80 = arith.constant 1 : index
    %c0_81 = arith.constant 0 : index
    %246 = vector.load %arg23[%c0_79, %c1_80, %c0_81] : memref<1x47x128xf32, #tpu.memory_space<vmem>>, vector<1x16x128xf32>
    %247 = vector.shape_cast %245 : vector<128xf32> to vector<1x1x128xf32>
    %248 = vector.broadcast %247 : vector<1x1x128xf32> to vector<1x16x128xf32>
    %249 = arith.mulf %246, %248 : vector<1x16x128xf32>
    %250 = arith.addf %240, %249 : vector<1x16x128xf32>
    %c1_82 = arith.constant 1 : index
    %c0_83 = arith.constant 0 : index
    %251 = vector.load %arg18[%c1_82, %c0_83] : memref<31x128xf32, #tpu.memory_space<vmem>>, vector<1x128xf32>
    %252 = vector.shape_cast %251 : vector<1x128xf32> to vector<128xf32>
    %c0_84 = arith.constant 0 : index
    %c2 = arith.constant 2 : index
    %c0_85 = arith.constant 0 : index
    %253 = vector.load %arg23[%c0_84, %c2, %c0_85] : memref<1x47x128xf32, #tpu.memory_space<vmem>>, vector<1x16x128xf32>
    %254 = vector.shape_cast %252 : vector<128xf32> to vector<1x1x128xf32>
    %255 = vector.broadcast %254 : vector<1x1x128xf32> to vector<1x16x128xf32>
    %256 = arith.mulf %253, %255 : vector<1x16x128xf32>
    %257 = arith.addf %241, %256 : vector<1x16x128xf32>
    %c2_86 = arith.constant 2 : index
    %c0_87 = arith.constant 0 : index
    %258 = vector.load %arg18[%c2_86, %c0_87] : memref<31x128xf32, #tpu.memory_space<vmem>>, vector<1x128xf32>
    %259 = vector.shape_cast %258 : vector<1x128xf32> to vector<128xf32>
    %c0_88 = arith.constant 0 : index
    %c3 = arith.constant 3 : index
    %c0_89 = arith.constant 0 : index
    %260 = vector.load %arg23[%c0_88, %c3, %c0_89] : memref<1x47x128xf32, #tpu.memory_space<vmem>>, vector<1x16x128xf32>
    %261 = vector.shape_cast %259 : vector<128xf32> to vector<1x1x128xf32>
    %262 = vector.broadcast %261 : vector<1x1x128xf32> to vector<1x16x128xf32>
    %263 = arith.mulf %260, %262 : vector<1x16x128xf32>
    %264 = arith.addf %242, %263 : vector<1x16x128xf32>
    %c3_90 = arith.constant 3 : index
    %c0_91 = arith.constant 0 : index
    %265 = vector.load %arg18[%c3_90, %c0_91] : memref<31x128xf32, #tpu.memory_space<vmem>>, vector<1x128xf32>
    %266 = vector.shape_cast %265 : vector<1x128xf32> to vector<128xf32>
    %c0_92 = arith.constant 0 : index
    %c4 = arith.constant 4 : index
    %c0_93 = arith.constant 0 : index
    %267 = vector.load %arg23[%c0_92, %c4, %c0_93] : memref<1x47x128xf32, #tpu.memory_space<vmem>>, vector<1x16x128xf32>
    %268 = vector.shape_cast %266 : vector<128xf32> to vector<1x1x128xf32>
    %269 = vector.broadcast %268 : vector<1x1x128xf32> to vector<1x16x128xf32>
    %270 = arith.mulf %267, %269 : vector<1x16x128xf32>
    %271 = arith.addf %243, %270 : vector<1x16x128xf32>
    %c4_94 = arith.constant 4 : index
    %c0_95 = arith.constant 0 : index
    %272 = vector.load %arg18[%c4_94, %c0_95] : memref<31x128xf32, #tpu.memory_space<vmem>>, vector<1x128xf32>
    %273 = vector.shape_cast %272 : vector<1x128xf32> to vector<128xf32>
    %c0_96 = arith.constant 0 : index
    %c5 = arith.constant 5 : index
    %c0_97 = arith.constant 0 : index
    %274 = vector.load %arg23[%c0_96, %c5, %c0_97] : memref<1x47x128xf32, #tpu.memory_space<vmem>>, vector<1x16x128xf32>
    %275 = vector.shape_cast %273 : vector<128xf32> to vector<1x1x128xf32>
    %276 = vector.broadcast %275 : vector<1x1x128xf32> to vector<1x16x128xf32>
    %277 = arith.mulf %274, %276 : vector<1x16x128xf32>
    %278 = arith.addf %250, %277 : vector<1x16x128xf32>
    %c5_98 = arith.constant 5 : index
    %c0_99 = arith.constant 0 : index
    %279 = vector.load %arg18[%c5_98, %c0_99] : memref<31x128xf32, #tpu.memory_space<vmem>>, vector<1x128xf32>
    %280 = vector.shape_cast %279 : vector<1x128xf32> to vector<128xf32>
    %c0_100 = arith.constant 0 : index
    %c6 = arith.constant 6 : index
    %c0_101 = arith.constant 0 : index
    %281 = vector.load %arg23[%c0_100, %c6, %c0_101] : memref<1x47x128xf32, #tpu.memory_space<vmem>>, vector<1x16x128xf32>
    %282 = vector.shape_cast %280 : vector<128xf32> to vector<1x1x128xf32>
    %283 = vector.broadcast %282 : vector<1x1x128xf32> to vector<1x16x128xf32>
    %284 = arith.mulf %281, %283 : vector<1x16x128xf32>
    %285 = arith.addf %257, %284 : vector<1x16x128xf32>
    %c6_102 = arith.constant 6 : index
    %c0_103 = arith.constant 0 : index
    %286 = vector.load %arg18[%c6_102, %c0_103] : memref<31x128xf32, #tpu.memory_space<vmem>>, vector<1x128xf32>
    %287 = vector.shape_cast %286 : vector<1x128xf32> to vector<128xf32>
    %c0_104 = arith.constant 0 : index
    %c7 = arith.constant 7 : index
    %c0_105 = arith.constant 0 : index
    %288 = vector.load %arg23[%c0_104, %c7, %c0_105] : memref<1x47x128xf32, #tpu.memory_space<vmem>>, vector<1x16x128xf32>
    %289 = vector.shape_cast %287 : vector<128xf32> to vector<1x1x128xf32>
    %290 = vector.broadcast %289 : vector<1x1x128xf32> to vector<1x16x128xf32>
    %291 = arith.mulf %288, %290 : vector<1x16x128xf32>
    %292 = arith.addf %264, %291 : vector<1x16x128xf32>
    %c7_106 = arith.constant 7 : index
    %c0_107 = arith.constant 0 : index
    %293 = vector.load %arg18[%c7_106, %c0_107] : memref<31x128xf32, #tpu.memory_space<vmem>>, vector<1x128xf32>
    %294 = vector.shape_cast %293 : vector<1x128xf32> to vector<128xf32>
    %c0_108 = arith.constant 0 : index
    %c8 = arith.constant 8 : index
    %c0_109 = arith.constant 0 : index
    %295 = vector.load %arg23[%c0_108, %c8, %c0_109] : memref<1x47x128xf32, #tpu.memory_space<vmem>>, vector<1x16x128xf32>
    %296 = vector.shape_cast %294 : vector<128xf32> to vector<1x1x128xf32>
    %297 = vector.broadcast %296 : vector<1x1x128xf32> to vector<1x16x128xf32>
    %298 = arith.mulf %295, %297 : vector<1x16x128xf32>
    %299 = arith.addf %271, %298 : vector<1x16x128xf32>
    %c8_110 = arith.constant 8 : index
    %c0_111 = arith.constant 0 : index
    %300 = vector.load %arg18[%c8_110, %c0_111] : memref<31x128xf32, #tpu.memory_space<vmem>>, vector<1x128xf32>
    %301 = vector.shape_cast %300 : vector<1x128xf32> to vector<128xf32>
    %c0_112 = arith.constant 0 : index
    %c9 = arith.constant 9 : index
    %c0_113 = arith.constant 0 : index
    %302 = vector.load %arg23[%c0_112, %c9, %c0_113] : memref<1x47x128xf32, #tpu.memory_space<vmem>>, vector<1x16x128xf32>
    %303 = vector.shape_cast %301 : vector<128xf32> to vector<1x1x128xf32>
    %304 = vector.broadcast %303 : vector<1x1x128xf32> to vector<1x16x128xf32>
    %305 = arith.mulf %302, %304 : vector<1x16x128xf32>
    %306 = arith.addf %278, %305 : vector<1x16x128xf32>
    %c9_114 = arith.constant 9 : index
    %c0_115 = arith.constant 0 : index
    %307 = vector.load %arg18[%c9_114, %c0_115] : memref<31x128xf32, #tpu.memory_space<vmem>>, vector<1x128xf32>
    %308 = vector.shape_cast %307 : vector<1x128xf32> to vector<128xf32>
    %c0_116 = arith.constant 0 : index
    %c10 = arith.constant 10 : index
    %c0_117 = arith.constant 0 : index
    %309 = vector.load %arg23[%c0_116, %c10, %c0_117] : memref<1x47x128xf32, #tpu.memory_space<vmem>>, vector<1x16x128xf32>
    %310 = vector.shape_cast %308 : vector<128xf32> to vector<1x1x128xf32>
    %311 = vector.broadcast %310 : vector<1x1x128xf32> to vector<1x16x128xf32>
    %312 = arith.mulf %309, %311 : vector<1x16x128xf32>
    %313 = arith.addf %285, %312 : vector<1x16x128xf32>
    %c10_118 = arith.constant 10 : index
    %c0_119 = arith.constant 0 : index
    %314 = vector.load %arg18[%c10_118, %c0_119] : memref<31x128xf32, #tpu.memory_space<vmem>>, vector<1x128xf32>
    %315 = vector.shape_cast %314 : vector<1x128xf32> to vector<128xf32>
    %c0_120 = arith.constant 0 : index
    %c11 = arith.constant 11 : index
    %c0_121 = arith.constant 0 : index
    %316 = vector.load %arg23[%c0_120, %c11, %c0_121] : memref<1x47x128xf32, #tpu.memory_space<vmem>>, vector<1x16x128xf32>
    %317 = vector.shape_cast %315 : vector<128xf32> to vector<1x1x128xf32>
    %318 = vector.broadcast %317 : vector<1x1x128xf32> to vector<1x16x128xf32>
    %319 = arith.mulf %316, %318 : vector<1x16x128xf32>
    %320 = arith.addf %292, %319 : vector<1x16x128xf32>
    %c11_122 = arith.constant 11 : index
    %c0_123 = arith.constant 0 : index
    %321 = vector.load %arg18[%c11_122, %c0_123] : memref<31x128xf32, #tpu.memory_space<vmem>>, vector<1x128xf32>
    %322 = vector.shape_cast %321 : vector<1x128xf32> to vector<128xf32>
    %c0_124 = arith.constant 0 : index
    %c12 = arith.constant 12 : index
    %c0_125 = arith.constant 0 : index
    %323 = vector.load %arg23[%c0_124, %c12, %c0_125] : memref<1x47x128xf32, #tpu.memory_space<vmem>>, vector<1x16x128xf32>
    %324 = vector.shape_cast %322 : vector<128xf32> to vector<1x1x128xf32>
    %325 = vector.broadcast %324 : vector<1x1x128xf32> to vector<1x16x128xf32>
    %326 = arith.mulf %323, %325 : vector<1x16x128xf32>
    %327 = arith.addf %299, %326 : vector<1x16x128xf32>
    %c12_126 = arith.constant 12 : index
    %c0_127 = arith.constant 0 : index
    %328 = vector.load %arg18[%c12_126, %c0_127] : memref<31x128xf32, #tpu.memory_space<vmem>>, vector<1x128xf32>
    %329 = vector.shape_cast %328 : vector<1x128xf32> to vector<128xf32>
    %c0_128 = arith.constant 0 : index
    %c13 = arith.constant 13 : index
    %c0_129 = arith.constant 0 : index
    %330 = vector.load %arg23[%c0_128, %c13, %c0_129] : memref<1x47x128xf32, #tpu.memory_space<vmem>>, vector<1x16x128xf32>
    %331 = vector.shape_cast %329 : vector<128xf32> to vector<1x1x128xf32>
    %332 = vector.broadcast %331 : vector<1x1x128xf32> to vector<1x16x128xf32>
    %333 = arith.mulf %330, %332 : vector<1x16x128xf32>
    %334 = arith.addf %306, %333 : vector<1x16x128xf32>
    %c13_130 = arith.constant 13 : index
    %c0_131 = arith.constant 0 : index
    %335 = vector.load %arg18[%c13_130, %c0_131] : memref<31x128xf32, #tpu.memory_space<vmem>>, vector<1x128xf32>
    %336 = vector.shape_cast %335 : vector<1x128xf32> to vector<128xf32>
    %c0_132 = arith.constant 0 : index
    %c14 = arith.constant 14 : index
    %c0_133 = arith.constant 0 : index
    %337 = vector.load %arg23[%c0_132, %c14, %c0_133] : memref<1x47x128xf32, #tpu.memory_space<vmem>>, vector<1x16x128xf32>
    %338 = vector.shape_cast %336 : vector<128xf32> to vector<1x1x128xf32>
    %339 = vector.broadcast %338 : vector<1x1x128xf32> to vector<1x16x128xf32>
    %340 = arith.mulf %337, %339 : vector<1x16x128xf32>
    %341 = arith.addf %313, %340 : vector<1x16x128xf32>
    %c14_134 = arith.constant 14 : index
    %c0_135 = arith.constant 0 : index
    %342 = vector.load %arg18[%c14_134, %c0_135] : memref<31x128xf32, #tpu.memory_space<vmem>>, vector<1x128xf32>
    %343 = vector.shape_cast %342 : vector<1x128xf32> to vector<128xf32>
    %c0_136 = arith.constant 0 : index
    %c15 = arith.constant 15 : index
    %c0_137 = arith.constant 0 : index
    %344 = vector.load %arg23[%c0_136, %c15, %c0_137] : memref<1x47x128xf32, #tpu.memory_space<vmem>>, vector<1x16x128xf32>
    %345 = vector.shape_cast %343 : vector<128xf32> to vector<1x1x128xf32>
    %346 = vector.broadcast %345 : vector<1x1x128xf32> to vector<1x16x128xf32>
    %347 = arith.mulf %344, %346 : vector<1x16x128xf32>
    %348 = arith.addf %320, %347 : vector<1x16x128xf32>
    %c15_138 = arith.constant 15 : index
    %c0_139 = arith.constant 0 : index
    %349 = vector.load %arg18[%c15_138, %c0_139] : memref<31x128xf32, #tpu.memory_space<vmem>>, vector<1x128xf32>
    %350 = vector.shape_cast %349 : vector<1x128xf32> to vector<128xf32>
    %c0_140 = arith.constant 0 : index
    %c16_141 = arith.constant 16 : index
    %c0_142 = arith.constant 0 : index
    %351 = vector.load %arg23[%c0_140, %c16_141, %c0_142] : memref<1x47x128xf32, #tpu.memory_space<vmem>>, vector<1x16x128xf32>
    %352 = vector.shape_cast %350 : vector<128xf32> to vector<1x1x128xf32>
    %353 = vector.broadcast %352 : vector<1x1x128xf32> to vector<1x16x128xf32>
    %354 = arith.mulf %351, %353 : vector<1x16x128xf32>
    %355 = arith.addf %327, %354 : vector<1x16x128xf32>
    %c16_143 = arith.constant 16 : index
    %c0_144 = arith.constant 0 : index
    %356 = vector.load %arg18[%c16_143, %c0_144] : memref<31x128xf32, #tpu.memory_space<vmem>>, vector<1x128xf32>
    %357 = vector.shape_cast %356 : vector<1x128xf32> to vector<128xf32>
    %c0_145 = arith.constant 0 : index
    %c17 = arith.constant 17 : index
    %c0_146 = arith.constant 0 : index
    %358 = vector.load %arg23[%c0_145, %c17, %c0_146] : memref<1x47x128xf32, #tpu.memory_space<vmem>>, vector<1x16x128xf32>
    %359 = vector.shape_cast %357 : vector<128xf32> to vector<1x1x128xf32>
    %360 = vector.broadcast %359 : vector<1x1x128xf32> to vector<1x16x128xf32>
    %361 = arith.mulf %358, %360 : vector<1x16x128xf32>
    %362 = arith.addf %334, %361 : vector<1x16x128xf32>
    %c17_147 = arith.constant 17 : index
    %c0_148 = arith.constant 0 : index
    %363 = vector.load %arg18[%c17_147, %c0_148] : memref<31x128xf32, #tpu.memory_space<vmem>>, vector<1x128xf32>
    %364 = vector.shape_cast %363 : vector<1x128xf32> to vector<128xf32>
    %c0_149 = arith.constant 0 : index
    %c18 = arith.constant 18 : index
    %c0_150 = arith.constant 0 : index
    %365 = vector.load %arg23[%c0_149, %c18, %c0_150] : memref<1x47x128xf32, #tpu.memory_space<vmem>>, vector<1x16x128xf32>
    %366 = vector.shape_cast %364 : vector<128xf32> to vector<1x1x128xf32>
    %367 = vector.broadcast %366 : vector<1x1x128xf32> to vector<1x16x128xf32>
    %368 = arith.mulf %365, %367 : vector<1x16x128xf32>
    %369 = arith.addf %341, %368 : vector<1x16x128xf32>
    %c18_151 = arith.constant 18 : index
    %c0_152 = arith.constant 0 : index
    %370 = vector.load %arg18[%c18_151, %c0_152] : memref<31x128xf32, #tpu.memory_space<vmem>>, vector<1x128xf32>
    %371 = vector.shape_cast %370 : vector<1x128xf32> to vector<128xf32>
    %c0_153 = arith.constant 0 : index
    %c19 = arith.constant 19 : index
    %c0_154 = arith.constant 0 : index
    %372 = vector.load %arg23[%c0_153, %c19, %c0_154] : memref<1x47x128xf32, #tpu.memory_space<vmem>>, vector<1x16x128xf32>
    %373 = vector.shape_cast %371 : vector<128xf32> to vector<1x1x128xf32>
    %374 = vector.broadcast %373 : vector<1x1x128xf32> to vector<1x16x128xf32>
    %375 = arith.mulf %372, %374 : vector<1x16x128xf32>
    %376 = arith.addf %348, %375 : vector<1x16x128xf32>
    %c19_155 = arith.constant 19 : index
    %c0_156 = arith.constant 0 : index
    %377 = vector.load %arg18[%c19_155, %c0_156] : memref<31x128xf32, #tpu.memory_space<vmem>>, vector<1x128xf32>
    %378 = vector.shape_cast %377 : vector<1x128xf32> to vector<128xf32>
    %c0_157 = arith.constant 0 : index
    %c20 = arith.constant 20 : index
    %c0_158 = arith.constant 0 : index
    %379 = vector.load %arg23[%c0_157, %c20, %c0_158] : memref<1x47x128xf32, #tpu.memory_space<vmem>>, vector<1x16x128xf32>
    %380 = vector.shape_cast %378 : vector<128xf32> to vector<1x1x128xf32>
    %381 = vector.broadcast %380 : vector<1x1x128xf32> to vector<1x16x128xf32>
    %382 = arith.mulf %379, %381 : vector<1x16x128xf32>
    %383 = arith.addf %355, %382 : vector<1x16x128xf32>
    %c20_159 = arith.constant 20 : index
    %c0_160 = arith.constant 0 : index
    %384 = vector.load %arg18[%c20_159, %c0_160] : memref<31x128xf32, #tpu.memory_space<vmem>>, vector<1x128xf32>
    %385 = vector.shape_cast %384 : vector<1x128xf32> to vector<128xf32>
    %c0_161 = arith.constant 0 : index
    %c21 = arith.constant 21 : index
    %c0_162 = arith.constant 0 : index
    %386 = vector.load %arg23[%c0_161, %c21, %c0_162] : memref<1x47x128xf32, #tpu.memory_space<vmem>>, vector<1x16x128xf32>
    %387 = vector.shape_cast %385 : vector<128xf32> to vector<1x1x128xf32>
    %388 = vector.broadcast %387 : vector<1x1x128xf32> to vector<1x16x128xf32>
    %389 = arith.mulf %386, %388 : vector<1x16x128xf32>
    %390 = arith.addf %362, %389 : vector<1x16x128xf32>
    %c21_163 = arith.constant 21 : index
    %c0_164 = arith.constant 0 : index
    %391 = vector.load %arg18[%c21_163, %c0_164] : memref<31x128xf32, #tpu.memory_space<vmem>>, vector<1x128xf32>
    %392 = vector.shape_cast %391 : vector<1x128xf32> to vector<128xf32>
    %c0_165 = arith.constant 0 : index
    %c22 = arith.constant 22 : index
    %c0_166 = arith.constant 0 : index
    %393 = vector.load %arg23[%c0_165, %c22, %c0_166] : memref<1x47x128xf32, #tpu.memory_space<vmem>>, vector<1x16x128xf32>
    %394 = vector.shape_cast %392 : vector<128xf32> to vector<1x1x128xf32>
    %395 = vector.broadcast %394 : vector<1x1x128xf32> to vector<1x16x128xf32>
    %396 = arith.mulf %393, %395 : vector<1x16x128xf32>
    %397 = arith.addf %369, %396 : vector<1x16x128xf32>
    %c22_167 = arith.constant 22 : index
    %c0_168 = arith.constant 0 : index
    %398 = vector.load %arg18[%c22_167, %c0_168] : memref<31x128xf32, #tpu.memory_space<vmem>>, vector<1x128xf32>
    %399 = vector.shape_cast %398 : vector<1x128xf32> to vector<128xf32>
    %c0_169 = arith.constant 0 : index
    %c23 = arith.constant 23 : index
    %c0_170 = arith.constant 0 : index
    %400 = vector.load %arg23[%c0_169, %c23, %c0_170] : memref<1x47x128xf32, #tpu.memory_space<vmem>>, vector<1x16x128xf32>
    %401 = vector.shape_cast %399 : vector<128xf32> to vector<1x1x128xf32>
    %402 = vector.broadcast %401 : vector<1x1x128xf32> to vector<1x16x128xf32>
    %403 = arith.mulf %400, %402 : vector<1x16x128xf32>
    %404 = arith.addf %376, %403 : vector<1x16x128xf32>
    %c23_171 = arith.constant 23 : index
    %c0_172 = arith.constant 0 : index
    %405 = vector.load %arg18[%c23_171, %c0_172] : memref<31x128xf32, #tpu.memory_space<vmem>>, vector<1x128xf32>
    %406 = vector.shape_cast %405 : vector<1x128xf32> to vector<128xf32>
    %c0_173 = arith.constant 0 : index
    %c24 = arith.constant 24 : index
    %c0_174 = arith.constant 0 : index
    %407 = vector.load %arg23[%c0_173, %c24, %c0_174] : memref<1x47x128xf32, #tpu.memory_space<vmem>>, vector<1x16x128xf32>
    %408 = vector.shape_cast %406 : vector<128xf32> to vector<1x1x128xf32>
    %409 = vector.broadcast %408 : vector<1x1x128xf32> to vector<1x16x128xf32>
    %410 = arith.mulf %407, %409 : vector<1x16x128xf32>
    %411 = arith.addf %383, %410 : vector<1x16x128xf32>
    %c24_175 = arith.constant 24 : index
    %c0_176 = arith.constant 0 : index
    %412 = vector.load %arg18[%c24_175, %c0_176] : memref<31x128xf32, #tpu.memory_space<vmem>>, vector<1x128xf32>
    %413 = vector.shape_cast %412 : vector<1x128xf32> to vector<128xf32>
    %c0_177 = arith.constant 0 : index
    %c25 = arith.constant 25 : index
    %c0_178 = arith.constant 0 : index
    %414 = vector.load %arg23[%c0_177, %c25, %c0_178] : memref<1x47x128xf32, #tpu.memory_space<vmem>>, vector<1x16x128xf32>
    %415 = vector.shape_cast %413 : vector<128xf32> to vector<1x1x128xf32>
    %416 = vector.broadcast %415 : vector<1x1x128xf32> to vector<1x16x128xf32>
    %417 = arith.mulf %414, %416 : vector<1x16x128xf32>
    %418 = arith.addf %390, %417 : vector<1x16x128xf32>
    %c25_179 = arith.constant 25 : index
    %c0_180 = arith.constant 0 : index
    %419 = vector.load %arg18[%c25_179, %c0_180] : memref<31x128xf32, #tpu.memory_space<vmem>>, vector<1x128xf32>
    %420 = vector.shape_cast %419 : vector<1x128xf32> to vector<128xf32>
    %c0_181 = arith.constant 0 : index
    %c26 = arith.constant 26 : index
    %c0_182 = arith.constant 0 : index
    %421 = vector.load %arg23[%c0_181, %c26, %c0_182] : memref<1x47x128xf32, #tpu.memory_space<vmem>>, vector<1x16x128xf32>
    %422 = vector.shape_cast %420 : vector<128xf32> to vector<1x1x128xf32>
    %423 = vector.broadcast %422 : vector<1x1x128xf32> to vector<1x16x128xf32>
    %424 = arith.mulf %421, %423 : vector<1x16x128xf32>
    %425 = arith.addf %397, %424 : vector<1x16x128xf32>
    %c26_183 = arith.constant 26 : index
    %c0_184 = arith.constant 0 : index
    %426 = vector.load %arg18[%c26_183, %c0_184] : memref<31x128xf32, #tpu.memory_space<vmem>>, vector<1x128xf32>
    %427 = vector.shape_cast %426 : vector<1x128xf32> to vector<128xf32>
    %c0_185 = arith.constant 0 : index
    %c27 = arith.constant 27 : index
    %c0_186 = arith.constant 0 : index
    %428 = vector.load %arg23[%c0_185, %c27, %c0_186] : memref<1x47x128xf32, #tpu.memory_space<vmem>>, vector<1x16x128xf32>
    %429 = vector.shape_cast %427 : vector<128xf32> to vector<1x1x128xf32>
    %430 = vector.broadcast %429 : vector<1x1x128xf32> to vector<1x16x128xf32>
    %431 = arith.mulf %428, %430 : vector<1x16x128xf32>
    %432 = arith.addf %404, %431 : vector<1x16x128xf32>
    %c27_187 = arith.constant 27 : index
    %c0_188 = arith.constant 0 : index
    %433 = vector.load %arg18[%c27_187, %c0_188] : memref<31x128xf32, #tpu.memory_space<vmem>>, vector<1x128xf32>
    %434 = vector.shape_cast %433 : vector<1x128xf32> to vector<128xf32>
    %c0_189 = arith.constant 0 : index
    %c28 = arith.constant 28 : index
    %c0_190 = arith.constant 0 : index
    %435 = vector.load %arg23[%c0_189, %c28, %c0_190] : memref<1x47x128xf32, #tpu.memory_space<vmem>>, vector<1x16x128xf32>
    %436 = vector.shape_cast %434 : vector<128xf32> to vector<1x1x128xf32>
    %437 = vector.broadcast %436 : vector<1x1x128xf32> to vector<1x16x128xf32>
    %438 = arith.mulf %435, %437 : vector<1x16x128xf32>
    %439 = arith.addf %411, %438 : vector<1x16x128xf32>
    %c28_191 = arith.constant 28 : index
    %c0_192 = arith.constant 0 : index
    %440 = vector.load %arg18[%c28_191, %c0_192] : memref<31x128xf32, #tpu.memory_space<vmem>>, vector<1x128xf32>
    %441 = vector.shape_cast %440 : vector<1x128xf32> to vector<128xf32>
    %c0_193 = arith.constant 0 : index
    %c29 = arith.constant 29 : index
    %c0_194 = arith.constant 0 : index
    %442 = vector.load %arg23[%c0_193, %c29, %c0_194] : memref<1x47x128xf32, #tpu.memory_space<vmem>>, vector<1x16x128xf32>
    %443 = vector.shape_cast %441 : vector<128xf32> to vector<1x1x128xf32>
    %444 = vector.broadcast %443 : vector<1x1x128xf32> to vector<1x16x128xf32>
    %445 = arith.mulf %442, %444 : vector<1x16x128xf32>
    %446 = arith.addf %418, %445 : vector<1x16x128xf32>
    %c29_195 = arith.constant 29 : index
    %c0_196 = arith.constant 0 : index
    %447 = vector.load %arg18[%c29_195, %c0_196] : memref<31x128xf32, #tpu.memory_space<vmem>>, vector<1x128xf32>
    %448 = vector.shape_cast %447 : vector<1x128xf32> to vector<128xf32>
    %c0_197 = arith.constant 0 : index
    %c30 = arith.constant 30 : index
    %c0_198 = arith.constant 0 : index
    %449 = vector.load %arg23[%c0_197, %c30, %c0_198] : memref<1x47x128xf32, #tpu.memory_space<vmem>>, vector<1x16x128xf32>
    %450 = vector.shape_cast %448 : vector<128xf32> to vector<1x1x128xf32>
    %451 = vector.broadcast %450 : vector<1x1x128xf32> to vector<1x16x128xf32>
    %452 = arith.mulf %449, %451 : vector<1x16x128xf32>
    %453 = arith.addf %425, %452 : vector<1x16x128xf32>
    %c30_199 = arith.constant 30 : index
    %c0_200 = arith.constant 0 : index
    %454 = vector.load %arg18[%c30_199, %c0_200] : memref<31x128xf32, #tpu.memory_space<vmem>>, vector<1x128xf32>
    %455 = vector.shape_cast %454 : vector<1x128xf32> to vector<128xf32>
    %c0_201 = arith.constant 0 : index
    %c31 = arith.constant 31 : index
    %c0_202 = arith.constant 0 : index
    %456 = vector.load %arg23[%c0_201, %c31, %c0_202] : memref<1x47x128xf32, #tpu.memory_space<vmem>>, vector<1x16x128xf32>
    %457 = vector.shape_cast %455 : vector<128xf32> to vector<1x1x128xf32>
    %458 = vector.broadcast %457 : vector<1x1x128xf32> to vector<1x16x128xf32>
    %459 = arith.mulf %456, %458 : vector<1x16x128xf32>
    %460 = arith.addf %432, %459 : vector<1x16x128xf32>
    %461 = arith.addf %446, %453 : vector<1x16x128xf32>
    %462 = arith.addf %460, %439 : vector<1x16x128xf32>
    %463 = arith.addf %461, %462 : vector<1x16x128xf32>
    %c0_203 = arith.constant 0 : index
    %c0_204 = arith.constant 0 : index
    %464 = vector.load %arg19[%c0_203, %c0_204] : memref<1x128xf32, #tpu.memory_space<vmem>>, vector<1x128xf32>
    %465 = vector.shape_cast %464 : vector<1x128xf32> to vector<128xf32>
    %466 = vector.shape_cast %465 : vector<128xf32> to vector<1x1x128xf32>
    %467 = vector.broadcast %466 : vector<1x1x128xf32> to vector<1x16x128xf32>
    %468 = arith.addf %463, %467 : vector<1x16x128xf32>
    %469 = vector.shape_cast %468 : vector<1x16x128xf32> to vector<16x128xf32>
    %470 = arith.negf %469 : vector<16x128xf32>
    %471 = math.exp %470 : vector<16x128xf32>
    %cst_205 = arith.constant 1.000000e+00 : f32
    %472 = vector.broadcast %cst_205 : f32 to vector<16x128xf32>
    %473 = arith.addf %472, %471 : vector<16x128xf32>
    %474 = arith.divf %472, %473 : vector<16x128xf32>
    %475 = arith.mulf %469, %474 : vector<16x128xf32>
    %476 = arith.truncf %475 : vector<16x128xf32> to vector<16x128xbf16>
    %c0_206 = arith.constant 0 : index
    %c0_207 = arith.constant 0 : index
    %477 = vector.load %arg20[%c0_206, %c0_207] : memref<128x64xbf16, #tpu.memory_space<vmem>>, vector<128x64xbf16>
    %cst_208 = arith.constant dense<0.000000e+00> : vector<16x64xf32>
    %478 = tpu.matmul %476, %477, %cst_208 {dimension_numbers = #tpu.dot_dimension_numbers<[1], [0], [0], [1], [0, 0, 1, 1], [], []>} : vector<16x128xbf16>, vector<128x64xbf16>, vector<16x64xf32> -> vector<16x64xf32>
    %c0_209 = arith.constant 0 : index
    %c0_210 = arith.constant 0 : index
    %479 = vector.load %arg21[%c0_209, %c0_210] : memref<1x64xf32, #tpu.memory_space<vmem>>, vector<1x64xf32>
    %480 = vector.shape_cast %479 : vector<1x64xf32> to vector<64xf32>
    %481 = vector.shape_cast %480 : vector<64xf32> to vector<1x64xf32>
    %482 = vector.broadcast %481 : vector<1x64xf32> to vector<16x64xf32>
    %483 = arith.addf %478, %482 : vector<16x64xf32>
    %484 = arith.addf %209, %483 : vector<16x64xf32>
    %cst_211 = arith.constant dense<0.000000e+00> : vector<16xf32>
    %485 = vector.multi_reduction <add>, %484, %cst_211 [1] : vector<16x64xf32> to vector<16xf32>
    %486 = vector.shape_cast %485 : vector<16xf32> to vector<16x1xf32>
    %cst_212 = arith.constant 6.400000e+01 : f32
    %487 = vector.broadcast %cst_212 : f32 to vector<16x1xf32>
    %488 = arith.divf %486, %487 : vector<16x1xf32>
    %489 = vector.broadcast %488 : vector<16x1xf32> to vector<16x64xf32>
    %490 = arith.subf %484, %489 : vector<16x64xf32>
    %491 = arith.mulf %490, %490 : vector<16x64xf32>
    %cst_213 = arith.constant dense<0.000000e+00> : vector<16xf32>
    %492 = vector.multi_reduction <add>, %491, %cst_213 [1] : vector<16x64xf32> to vector<16xf32>
    %493 = vector.shape_cast %492 : vector<16xf32> to vector<16x1xf32>
    %cst_214 = arith.constant 6.400000e+01 : f32
    %494 = vector.broadcast %cst_214 : f32 to vector<16x1xf32>
    %495 = arith.divf %493, %494 : vector<16x1xf32>
    %496 = vector.broadcast %488 : vector<16x1xf32> to vector<16x64xf32>
    %497 = arith.subf %484, %496 : vector<16x64xf32>
    %cst_215 = arith.constant 9.99999974E-6 : f32
    %498 = vector.broadcast %cst_215 : f32 to vector<16x1xf32>
    %499 = arith.addf %495, %498 : vector<16x1xf32>
    %500 = math.rsqrt %499 : vector<16x1xf32>
    %501 = vector.broadcast %500 : vector<16x1xf32> to vector<16x64xf32>
    %502 = arith.mulf %497, %501 : vector<16x64xf32>
    %c2_216 = arith.constant 2 : index
    %c0_217 = arith.constant 0 : index
    %503 = vector.load %arg8[%c2_216, %c0_217] : memref<4x64xf32, #tpu.memory_space<vmem>>, vector<1x64xf32>
    %504 = vector.shape_cast %503 : vector<1x64xf32> to vector<64xf32>
    %505 = vector.shape_cast %504 : vector<64xf32> to vector<1x64xf32>
    %506 = vector.broadcast %505 : vector<1x64xf32> to vector<16x64xf32>
    %507 = arith.mulf %502, %506 : vector<16x64xf32>
    %c2_218 = arith.constant 2 : index
    %c0_219 = arith.constant 0 : index
    %508 = vector.load %arg9[%c2_218, %c0_219] : memref<4x64xf32, #tpu.memory_space<vmem>>, vector<1x64xf32>
    %509 = vector.shape_cast %508 : vector<1x64xf32> to vector<64xf32>
    %510 = vector.shape_cast %509 : vector<64xf32> to vector<1x64xf32>
    %511 = vector.broadcast %510 : vector<1x64xf32> to vector<16x64xf32>
    %512 = arith.addf %507, %511 : vector<16x64xf32>
    %c1_220 = arith.constant 1 : index
    %c0_221 = arith.constant 0 : index
    %c0_222 = arith.constant 0 : index
    %513 = vector.load %arg10[%c1_220, %c0_221, %c0_222] : memref<2x2x64xf32, #tpu.memory_space<vmem>>, vector<1x2x64xf32>
    %514 = vector.shape_cast %513 : vector<1x2x64xf32> to vector<2x64xf32>
    %515 = vector.extract_strided_slice %514 {offsets = [0, 0], sizes = [1, 64], strides = [1, 1]} : vector<2x64xf32> to vector<1x64xf32>
    %516 = vector.shape_cast %515 : vector<1x64xf32> to vector<64xf32>
    %517 = vector.shape_cast %516 : vector<64xf32> to vector<1x64xf32>
    %518 = vector.broadcast %517 : vector<1x64xf32> to vector<16x64xf32>
    %519 = arith.mulf %512, %518 : vector<16x64xf32>
    %520 = vector.extract_strided_slice %514 {offsets = [1, 0], sizes = [1, 64], strides = [1, 1]} : vector<2x64xf32> to vector<1x64xf32>
    %521 = vector.shape_cast %520 : vector<1x64xf32> to vector<64xf32>
    %522 = vector.shape_cast %521 : vector<64xf32> to vector<1x64xf32>
    %523 = vector.broadcast %522 : vector<1x64xf32> to vector<16x64xf32>
    %524 = arith.addf %519, %523 : vector<16x64xf32>
    %525 = arith.truncf %524 : vector<16x64xf32> to vector<16x64xbf16>
    %c1_223 = arith.constant 1 : index
    %c0_224 = arith.constant 0 : index
    %c0_225 = arith.constant 0 : index
    %526 = vector.load %arg11[%c1_223, %c0_224, %c0_225] : memref<2x64x256xbf16, #tpu.memory_space<vmem>>, vector<1x64x256xbf16>
    %527 = vector.shape_cast %526 : vector<1x64x256xbf16> to vector<64x256xbf16>
    %cst_226 = arith.constant dense<0.000000e+00> : vector<16x256xf32>
    %528 = tpu.matmul %525, %527, %cst_226 {dimension_numbers = #tpu.dot_dimension_numbers<[1], [0], [0], [1], [0, 0, 1, 1], [], []>} : vector<16x64xbf16>, vector<64x256xbf16>, vector<16x256xf32> -> vector<16x256xf32>
    %c1_227 = arith.constant 1 : index
    %c0_228 = arith.constant 0 : index
    %529 = vector.load %arg12[%c1_227, %c0_228] : memref<2x256xf32, #tpu.memory_space<vmem>>, vector<1x256xf32>
    %530 = vector.shape_cast %529 : vector<1x256xf32> to vector<256xf32>
    %531 = vector.shape_cast %530 : vector<256xf32> to vector<1x256xf32>
    %532 = vector.broadcast %531 : vector<1x256xf32> to vector<16x256xf32>
    %533 = arith.addf %528, %532 : vector<16x256xf32>
    %534 = arith.negf %533 : vector<16x256xf32>
    %535 = math.exp %534 : vector<16x256xf32>
    %cst_229 = arith.constant 1.000000e+00 : f32
    %536 = vector.broadcast %cst_229 : f32 to vector<16x256xf32>
    %537 = arith.addf %536, %535 : vector<16x256xf32>
    %538 = arith.divf %536, %537 : vector<16x256xf32>
    %539 = arith.mulf %533, %538 : vector<16x256xf32>
    %540 = arith.truncf %539 : vector<16x256xf32> to vector<16x256xbf16>
    %c1_230 = arith.constant 1 : index
    %c0_231 = arith.constant 0 : index
    %c0_232 = arith.constant 0 : index
    %541 = vector.load %arg13[%c1_230, %c0_231, %c0_232] : memref<2x256x64xbf16, #tpu.memory_space<vmem>>, vector<1x256x64xbf16>
    %542 = vector.shape_cast %541 : vector<1x256x64xbf16> to vector<256x64xbf16>
    %cst_233 = arith.constant dense<0.000000e+00> : vector<16x64xf32>
    %543 = tpu.matmul %540, %542, %cst_233 {dimension_numbers = #tpu.dot_dimension_numbers<[1], [0], [0], [1], [0, 0, 1, 1], [], []>} : vector<16x256xbf16>, vector<256x64xbf16>, vector<16x64xf32> -> vector<16x64xf32>
    %c1_234 = arith.constant 1 : index
    %c0_235 = arith.constant 0 : index
    %544 = vector.load %arg14[%c1_234, %c0_235] : memref<2x64xf32, #tpu.memory_space<vmem>>, vector<1x64xf32>
    %545 = vector.shape_cast %544 : vector<1x64xf32> to vector<64xf32>
    %546 = vector.shape_cast %545 : vector<64xf32> to vector<1x64xf32>
    %547 = vector.broadcast %546 : vector<1x64xf32> to vector<16x64xf32>
    %548 = arith.addf %543, %547 : vector<16x64xf32>
    %549 = arith.addf %512, %548 : vector<16x64xf32>
    %cst_236 = arith.constant dense<0.000000e+00> : vector<16xf32>
    %550 = vector.multi_reduction <add>, %549, %cst_236 [1] : vector<16x64xf32> to vector<16xf32>
    %551 = vector.shape_cast %550 : vector<16xf32> to vector<16x1xf32>
    %cst_237 = arith.constant 6.400000e+01 : f32
    %552 = vector.broadcast %cst_237 : f32 to vector<16x1xf32>
    %553 = arith.divf %551, %552 : vector<16x1xf32>
    %554 = vector.broadcast %553 : vector<16x1xf32> to vector<16x64xf32>
    %555 = arith.subf %549, %554 : vector<16x64xf32>
    %556 = arith.mulf %555, %555 : vector<16x64xf32>
    %cst_238 = arith.constant dense<0.000000e+00> : vector<16xf32>
    %557 = vector.multi_reduction <add>, %556, %cst_238 [1] : vector<16x64xf32> to vector<16xf32>
    %558 = vector.shape_cast %557 : vector<16xf32> to vector<16x1xf32>
    %cst_239 = arith.constant 6.400000e+01 : f32
    %559 = vector.broadcast %cst_239 : f32 to vector<16x1xf32>
    %560 = arith.divf %558, %559 : vector<16x1xf32>
    %561 = vector.broadcast %553 : vector<16x1xf32> to vector<16x64xf32>
    %562 = arith.subf %549, %561 : vector<16x64xf32>
    %cst_240 = arith.constant 9.99999974E-6 : f32
    %563 = vector.broadcast %cst_240 : f32 to vector<16x1xf32>
    %564 = arith.addf %560, %563 : vector<16x1xf32>
    %565 = math.rsqrt %564 : vector<16x1xf32>
    %566 = vector.broadcast %565 : vector<16x1xf32> to vector<16x64xf32>
    %567 = arith.mulf %562, %566 : vector<16x64xf32>
    %c3_241 = arith.constant 3 : index
    %c0_242 = arith.constant 0 : index
    %568 = vector.load %arg8[%c3_241, %c0_242] : memref<4x64xf32, #tpu.memory_space<vmem>>, vector<1x64xf32>
    %569 = vector.shape_cast %568 : vector<1x64xf32> to vector<64xf32>
    %570 = vector.shape_cast %569 : vector<64xf32> to vector<1x64xf32>
    %571 = vector.broadcast %570 : vector<1x64xf32> to vector<16x64xf32>
    %572 = arith.mulf %567, %571 : vector<16x64xf32>
    %c3_243 = arith.constant 3 : index
    %c0_244 = arith.constant 0 : index
    %573 = vector.load %arg9[%c3_243, %c0_244] : memref<4x64xf32, #tpu.memory_space<vmem>>, vector<1x64xf32>
    %574 = vector.shape_cast %573 : vector<1x64xf32> to vector<64xf32>
    %575 = vector.shape_cast %574 : vector<64xf32> to vector<1x64xf32>
    %576 = vector.broadcast %575 : vector<1x64xf32> to vector<16x64xf32>
    %577 = arith.addf %572, %576 : vector<16x64xf32>
    %578 = vector.shape_cast %577 : vector<16x64xf32> to vector<1x16x64xf32>
    %c0_245 = arith.constant 0 : index
    %c0_246 = arith.constant 0 : index
    %c0_247 = arith.constant 0 : index
    %579 = vector.load %arg22[%c0_245, %c0_246, %c0_247] : memref<1x16x64xf32, #tpu.memory_space<vmem>>, vector<1x16x64xf32>
    tpu.vector_store %arg22[%c0_245, %c0_246, %c0_247], %578 {strides = array<i32>} : memref<1x16x64xf32, #tpu.memory_space<vmem>>, vector<1x16x64xf32>,
    return
  }
  func.func @transform_0(%arg0: i32) -> (i32, i32, i32) {
    %c0_i32 = arith.constant 0 : i32
    %c0_i32_0 = arith.constant 0 : i32
    %c0_i32_1 = arith.constant 0 : i32
    return %arg0, %c0_i32, %c0_i32_0 : i32, i32, i32
  }
  func.func @transform_1(%arg0: i32) -> (i32, i32) {
    %c0_i32 = arith.constant 0 : i32
    %c0_i32_0 = arith.constant 0 : i32
    %c0_i32_1 = arith.constant 0 : i32
    return %c0_i32, %c0_i32_0 : i32, i32
  }
  func.func @transform_2(%arg0: i32) -> (i32, i32) {
    %c0_i32 = arith.constant 0 : i32
    %c0_i32_0 = arith.constant 0 : i32
    %c0_i32_1 = arith.constant 0 : i32
    return %c0_i32, %c0_i32_0 : i32, i32
  }
  func.func @transform_3(%arg0: i32) -> (i32, i32) {
    %c0_i32 = arith.constant 0 : i32
    %c0_i32_0 = arith.constant 0 : i32
    %c0_i32_1 = arith.constant 0 : i32
    return %c0_i32, %c0_i32_0 : i32, i32
  }
  func.func @transform_4(%arg0: i32) -> (i32, i32) {
    %c0_i32 = arith.constant 0 : i32
    %c0_i32_0 = arith.constant 0 : i32
    %c0_i32_1 = arith.constant 0 : i32
    return %c0_i32, %c0_i32_0 : i32, i32
  }
  func.func @transform_5(%arg0: i32) -> (i32, i32) {
    %c0_i32 = arith.constant 0 : i32
    %c0_i32_0 = arith.constant 0 : i32
    %c0_i32_1 = arith.constant 0 : i32
    return %c0_i32, %c0_i32_0 : i32, i32
  }
  func.func @transform_6(%arg0: i32) -> (i32, i32) {
    %c0_i32 = arith.constant 0 : i32
    %c0_i32_0 = arith.constant 0 : i32
    %c0_i32_1 = arith.constant 0 : i32
    return %c0_i32, %c0_i32_0 : i32, i32
  }
  func.func @transform_7(%arg0: i32) -> (i32, i32) {
    %c0_i32 = arith.constant 0 : i32
    %c0_i32_0 = arith.constant 0 : i32
    %c0_i32_1 = arith.constant 0 : i32
    return %c0_i32, %c0_i32_0 : i32, i32
  }
  func.func @transform_8(%arg0: i32) -> (i32, i32) {
    %c0_i32 = arith.constant 0 : i32
    %c0_i32_0 = arith.constant 0 : i32
    %c0_i32_1 = arith.constant 0 : i32
    return %c0_i32, %c0_i32_0 : i32, i32
  }
  func.func @transform_9(%arg0: i32) -> (i32, i32, i32) {
    %c0_i32 = arith.constant 0 : i32
    %c0_i32_0 = arith.constant 0 : i32
    %c0_i32_1 = arith.constant 0 : i32
    %c0_i32_2 = arith.constant 0 : i32
    return %c0_i32, %c0_i32_0, %c0_i32_1 : i32, i32, i32
  }
  func.func @transform_10(%arg0: i32) -> (i32, i32, i32) {
    %c0_i32 = arith.constant 0 : i32
    %c0_i32_0 = arith.constant 0 : i32
    %c0_i32_1 = arith.constant 0 : i32
    %c0_i32_2 = arith.constant 0 : i32
    return %c0_i32, %c0_i32_0, %c0_i32_1 : i32, i32, i32
  }
  func.func @transform_11(%arg0: i32) -> (i32, i32) {
    %c0_i32 = arith.constant 0 : i32
    %c0_i32_0 = arith.constant 0 : i32
    %c0_i32_1 = arith.constant 0 : i32
    return %c0_i32, %c0_i32_0 : i32, i32
  }
  func.func @transform_12(%arg0: i32) -> (i32, i32, i32) {
    %c0_i32 = arith.constant 0 : i32
    %c0_i32_0 = arith.constant 0 : i32
    %c0_i32_1 = arith.constant 0 : i32
    %c0_i32_2 = arith.constant 0 : i32
    return %c0_i32, %c0_i32_0, %c0_i32_1 : i32, i32, i32
  }
  func.func @transform_13(%arg0: i32) -> (i32, i32) {
    %c0_i32 = arith.constant 0 : i32
    %c0_i32_0 = arith.constant 0 : i32
    %c0_i32_1 = arith.constant 0 : i32
    return %c0_i32, %c0_i32_0 : i32, i32
  }
  func.func @transform_14(%arg0: i32) -> (i32, i32) {
    %c0_i32 = arith.constant 0 : i32
    %c0_i32_0 = arith.constant 0 : i32
    %c0_i32_1 = arith.constant 0 : i32
    return %c0_i32, %c0_i32_0 : i32, i32
  }
  func.func @transform_15(%arg0: i32) -> (i32, i32) {
    %c0_i32 = arith.constant 0 : i32
    %c0_i32_0 = arith.constant 0 : i32
    %c0_i32_1 = arith.constant 0 : i32
    return %c0_i32, %c0_i32_0 : i32, i32
  }
  func.func @transform_16(%arg0: i32) -> (i32, i32) {
    %c0_i32 = arith.constant 0 : i32
    %c0_i32_0 = arith.constant 0 : i32
    %c0_i32_1 = arith.constant 0 : i32
    return %c0_i32, %c0_i32_0 : i32, i32
  }
  func.func @transform_17(%arg0: i32) -> (i32, i32) {
    %c0_i32 = arith.constant 0 : i32
    %c0_i32_0 = arith.constant 0 : i32
    %c0_i32_1 = arith.constant 0 : i32
    return %c0_i32, %c0_i32_0 : i32, i32
  }
  func.func @transform_18(%arg0: i32) -> (i32, i32) {
    %c0_i32 = arith.constant 0 : i32
    %c0_i32_0 = arith.constant 0 : i32
    %c0_i32_1 = arith.constant 0 : i32
    return %c0_i32, %c0_i32_0 : i32, i32
  }
  func.func @transform_19(%arg0: i32) -> (i32, i32) {
    %c0_i32 = arith.constant 0 : i32
    %c0_i32_0 = arith.constant 0 : i32
    %c0_i32_1 = arith.constant 0 : i32
    return %c0_i32, %c0_i32_0 : i32, i32
  }
  func.func @transform_20(%arg0: i32) -> (i32, i32) {
    %c0_i32 = arith.constant 0 : i32
    %c0_i32_0 = arith.constant 0 : i32
    %c0_i32_1 = arith.constant 0 : i32
    return %c0_i32, %c0_i32_0 : i32, i32
  }
  func.func @transform_21(%arg0: i32) -> (i32, i32, i32) {
    %c0_i32 = arith.constant 0 : i32
    %c0_i32_0 = arith.constant 0 : i32
    %c0_i32_1 = arith.constant 0 : i32
    return %arg0, %c0_i32, %c0_i32_0 : i32, i32, i32
  }
}

</mosaic_0001>

<bundles_post_ra>
// kernel: tpu_custom_call.1
= control target key start
LH: loop header
LB: loop body
LE: loop exit
PB: predicated region body
PF: predicated region fallthrough
CT: control target
= control target key end

     0   :  { %s5398_s0 = inlined_call_operand.vmem [shape: f32[2,16,64], index: 0, kind: input, shape index: {}]   ;;  %s5399_s1 = inlined_call_operand.vmem [shape: f32[16,64], index: 1, kind: input, shape index: {}]   ;;  %s5400_s2 = inlined_call_operand.vmem [shape: f32[2,64], index: 2, kind: input, shape index: {}]   ;;  %s5401_s3 = inlined_call_operand.vmem [shape: bf16[64,192], index: 3, kind: input, shape index: {}]   ;;  %s5402_s4 = inlined_call_operand.vmem [shape: f32[1,192], index: 4, kind: input, shape index: {}]   ;;  %s5403_s5 = inlined_call_operand.vmem [shape: bf16[64,64], index: 5, kind: input, shape index: {}]   ;;  %s5404_s6 = inlined_call_operand.vmem [shape: f32[1,64], index: 6, kind: input, shape index: {}]   ;;  %s5405_s7 = inlined_call_operand.vmem [shape: f32[4,64], index: 7, kind: input, shape index: {}]   ;;  %s5406_s8 = inlined_call_operand.vmem [shape: f32[4,64], index: 8, kind: input, shape index: {}]   ;;  %s5407_s9 = inlined_call_operand.vmem [shape: f32[2,2,64], index: 9, kind: input, shape index: {}]   ;;  %s5408_s10 = inlined_call_operand.vmem [shape: bf16[2,64,256], index: 10, kind: input, shape index: {}]   ;;  %s5409_s11 = inlined_call_operand.vmem [shape: f32[2,256], index: 11, kind: input, shape index: {}]   ;;  %s5410_s12 = inlined_call_operand.vmem [shape: bf16[2,256,64], index: 12, kind: input, shape index: {}]   ;;  %s5411_s13 = inlined_call_operand.vmem [shape: f32[2,64], index: 13, kind: input, shape index: {}]   ;;  %s5412_s14 = inlined_call_operand.vmem [shape: f32[2,64], index: 14, kind: input, shape index: {}]   ;;  %s5413_s15 = inlined_call_operand.vmem [shape: bf16[64,128], index: 15, kind: input, shape index: {}]   ;;  %s5414_s16 = inlined_call_operand.vmem [shape: f32[1,128], index: 16, kind: input, shape index: {}]   ;;  %s5415_s17 = inlined_call_operand.vmem [shape: f32[31,128], index: 17, kind: input, shape index: {}]   ;;  %s5416_s18 = inlined_call_operand.vmem [shape: f32[1,128], index: 18, kind: input, shape index: {}]   ;;  %s5417_s19 = inlined_call_operand.vmem [shape: bf16[128,64], index: 19, kind: input, shape index: {}]   ;;  %s5418_s20 = inlined_call_operand.vmem [shape: f32[1,64], index: 20, kind: input, shape index: {}]   ;;  %s5419_s21 = inlined_call_operand.hbm [shape: f32[2,16,64], index: 21, kind: output, shape index: {}]  }
   0x1   :  { %5437 = sst [smem:[#allocation14_spill]] %s5398_s0 }
   0x2   :  { %5438 = sst [smem:[#allocation15_spill]] %s5399_s1 }
   0x3   :  { %5439 = sst [smem:[#allocation16_spill]] %s5400_s2 }
   0x4   :  { %5440 = sst [smem:[#allocation17_spill]] %s5401_s3 }
   0x5   :  { %5441 = sst [smem:[#allocation18_spill]] %s5402_s4 }
   0x6   :  { %5442 = sst [smem:[#allocation19_spill]] %s5403_s5 }
   0x7   :  { %5443 = sst [smem:[#allocation20_spill]] %s5404_s6 }
   0x8   :  { %5444 = sst [smem:[#allocation21_spill]] %s5407_s9 }
   0x9   :  { %5445 = sst [smem:[#allocation22_spill]] %s5419_s21 }
   0xa   :  { %26 = vsyncpa [#allocation4], 0 }
   0xb   :  { %28 = vsyncpa [#allocation4 + $0x1], 0  ;;  %s4480_s2 = smov 0   ;;  %s4482_s25 = smov 0  }
   0xc   :  { %s4484_s26 = smov 0   ;;  %s4486_s27 = smov 0  }
   0xd LB: > { %5446 = sst [smem:[#allocation6_spill]] %s4336_s2  ;;  %s4501_s3 = sadd.s32 4294967295, %s4348_s27   ;;  %s4348_s27 = sphi %s4486_s27, %s5472_s27   ;;  %s4344_s26 = sphi %s4484_s26, %s5474_s26   ;;  %s4340_s25 = sphi %s4482_s25, %s5476_s25   ;;  %s4336_s2 = sphi %s4480_s2, %s5475_s2  }
   0xe   : > { %5447 = sst [smem:[#allocation7_spill]] %s4344_s26  ;;  %s3463_s28 = sadd.s32 4294967294, %s4348_s27  }
   0xf   : > { %5448 = sst [smem:[#allocation8_spill]] %s4348_s27  ;;  %s4505_s29 = sadd.s32 1, %s4348_s27  }
  0x10   : > { %5449 = sst [smem:[#allocation9_spill]] %s4501_s3  ;;  %s487_s0 = sadd.s32 1, %s4344_s26 }
  0x11   : > { %5450 = sst [smem:[#allocation10_spill]] %s4505_s29  ;;  %s484_s4 = ssub.s32 %s4348_s27, %s4505_s29 }
  0x12   : > { %p497_p0 = scmp.ne.s32.totalorder %s4344_s26, %s4340_s25  ;;  %p485_p1 = scmp.eq.s32.totalorder %s484_s4, 0 }
  0x13   : > { %p498_p2 = scmp.eq.s32.totalorder %s4501_s3, 1  ;;  %p503_p3 = scmp.ne.s32.totalorder %s4340_s25, %s4336_s2 }
  0x14   : > { %p504_p4 = scmp.eq.s32.totalorder %s3463_s28, 1  ;;  %p3466_p7 = scmp.ge.s32.totalorder %s4348_s27, 1 }
  0x15   : > { %s4516_s30 = scalar_select %p485_p1, %s4344_s26, %s487_s0  }
  0x16   : > { %p4518_p5 = por %p498_p2, %p497_p0  ;;  %p4522_p6 = por %p504_p4, %p503_p3 }
  0x17   : > { %5451 = sst [smem:[#allocation11_spill]] %s4516_s30  ;;  %p590_p8 = scmp.lt.s32.totalorder %s4348_s27, 3 }
  0x18   : > { %s5452_s5 = scalar_select %p4518_p5, 1, 0 }
  0x19   : > { %s5454_s22 = scalar_select %p4522_p6, 1, 0 }
  0x1a   : > { %5453 = sst [smem:[#allocation12_spill]] %s5452_s5  ;;  %p591_p9 = pnand %p3466_p7, %p590_p8 }
  0x1b   : > { %5455 = sst [smem:[#allocation13_spill]] %s5454_s22  ;;  %s5456_s24 = sld [smem:[#allocation17_spill]] (!%p591_p9)  ;;  %v4350_v2 = vmov (!%p591_p9), 0   ;;  %vm737_vm0 = vcmask (!%p591_p9), 523264   ;;  %v687_v22 = vlaneseq (!%p591_p9)  ;;  %v4353_v40 = vmov (!%p591_p9), 0.0  }
  0x1c   : > { %594 = sbr.rel (%p591_p9) target bundleno = 4218 (0x107a), region = 104  ;;  %p650_p10 = scmp.lt.s32.totalorder (!%p591_p9), %s4501_s3, 1  ;;  %773 = vmatprep.mubr.bf16.mxu1 (!%p591_p9), %v4350_v2  ;;  %2506 = vst [vmem:[#allocation2] sm:$0xff] (!%p591_p9), %v4353_v40  ;;  %2507 = vst [vmem:[#allocation2 + $0x8] sm:$0xff] (!%p591_p9), %v4353_v40  ;;  %3780 = vmatprep.subr.bf16.mxu0 (!%p591_p9), %v4353_v40  ;;  %vm4356_vm1 = vmmov (!%p591_p9), 0   ;;  %vm891_vm2 = vcmask (!%p591_p9), 64512  }
  0x1d   : > { %s5457_s30 = sld [smem:[#allocation14_spill]] (!%p591_p9)  ;;  %s5460_s0 = sld [smem:[#allocation16_spill]] (!%p591_p9)  ;;  %v688_v23 = vshrl.u32 (!%p591_p9), %v687_v22, 7  ;;  %2508 = vst [vmem:[#allocation2 + $0x20] sm:$0xff] (!%p591_p9), %v4353_v40  ;;  %2509 = vst [vmem:[#allocation2 + $0x28] sm:$0x7f] (!%p591_p9), %v4353_v40  ;;  %3782 = vmatprep.mubr.msk.bf16.mxu0 (!%p591_p9), %vm4356_vm1, %v4353_v40 }
  0x1e   : > { %s4351_s1 = smov (!%p591_p9), 104   ;;  %s4352_s2 = smov (!%p591_p9), 120   ;;  %vm1289_vm3 = vcmask (!%p591_p9), 130048   ;;  %vm1886_vm4 = vcmask (!%p591_p9), 195584   ;;  %vm1889_vm5 = vcmask (!%p591_p9), 261120   ;;  %vm1892_vm6 = vcmask (!%p591_p9), 326656  }
  0x1f   : > { %v4575_v24 = vsub.s32 (!%p591_p9), 0, %v688_v23  ;;  %v4580_v26 = vsub.s32 (!%p591_p9), 1, %v688_v23  ;;  %s4354_s21 = smov (!%p591_p9), 96   ;;  %s4355_s27 = smov (!%p591_p9), 112   ;;  %vm1895_vm7 = vcmask (!%p591_p9), 392192   ;;  %vm1898_vm8 = vcmask (!%p591_p9), 457728  }
  0x20   : > { %s4358_s5 = smov (!%p591_p9), 88   ;;  %s5434_s29 = smov (!%p591_p9), 8  }
  0x21   : > { %v4071_v0 = vld [vmem:[%s5456_s24 + $0x4] ss:$8 sps:$4 sm:$0xff] (!%p591_p9)   ;;  %v4073_v1 = vld [vmem:[%s5456_s24] ss:$8 sps:$4 sm:$0xff] (!%p591_p9)   ;;  %v4074_v3 = vld [vmem:[%s5456_s24 + $0x14] ss:$8 sps:$4 sm:$0xff] (!%p591_p9)  }
  0x22   : > { %741 = vmatprep.subr.bf16.mxu1 (!%p591_p9), %v4071_v0  ;;  %v4076_v4 = vld [vmem:[%s5456_s24 + $0x10] ss:$8 sps:$4 sm:$0xff] (!%p591_p9)   ;;  %v4077_v5 = vld [vmem:[%s5456_s24 + $0x24] ss:$8 sps:$4 sm:$0xff] (!%p591_p9)   ;;  %v4079_v6 = vld [vmem:[%s5456_s24 + $0x20] ss:$8 sps:$4 sm:$0xff] (!%p591_p9)  }
  0x23   : > { %s651_s26 = scalar_select %p650_p10, %s4501_s3, 1  ;;  %742 = vmatpush1.bf16.msra.mxu1 %v4073_v1  ;;  %v4080_v7 = vld [vmem:[%s5456_s24 + $0x34] ss:$8 sps:$4 sm:$0xff]   ;;  %v3470_v11 = vld [vmem:[%s5460_s0] ss:$0 sm:$0xff] }
  0x24   : > { %743 = vmatprep.subr.bf16.mxu1 %v4074_v3  ;;  %v3471_v15 = vld [vmem:[%s5460_s0 + $0x1] ss:$0 sm:$0xff]  ;;  %v4082_v16 = vld [vmem:[%s5456_s24 + $0x30] ss:$8 sps:$4 sm:$0xff]   ;;  %s4357_s3 = smov 80   ;;  %s5463_s6 = sld [smem:[#allocation20_spill]] }
  0x25   : > { %s3671_s28 = sshll.u32 %s651_s26, 4  ;;  %s5458_s26 = sld [smem:[#allocation15_spill]] }
  0x26   : > { %s4552_s4 = scalar_lea.vmem %s5457_s30, %s3671_s28  ;;  %s4359_s28 = smov 72  }
  0x27   : > { %v656_v8 = vld [vmem:[%s4552_s4] sm:$0xff]  ;;  %v657_v9 = vld [vmem:[%s4552_s4 + $0x8] sm:$0xff]  ;;  %744 = vmatpush1.bf16.msra.mxu1 %v4076_v4  ;;  %s4360_s30 = smov 64   ;;  %s5464_s9 = sld [smem:[#allocation21_spill]] }
  0x28   : > { %v665_v13 = vmul.f32 %v3470_v11, %v656_v8  ;;  %v666_v14 = vmul.f32 %v3470_v11, %v657_v9  ;;  %745 = vmatprep.subr.bf16.mxu1 %v4077_v5  ;;  %s4368_s0 = smov [#allocation3]  }
  0x2a   : > { %v672_v17 = vadd.f32 %v3471_v15, %v665_v13  ;;  %v673_v18 = vadd.f32 %v3471_v15, %v666_v14 }
  0x2b   : > { %s5459_s23 = smov %s5458_s26  ;;  %v658_v10 = vld [vmem:[%s5458_s26] sm:$0xff]  ;;  %746 = vmatpush1.bf16.msra.mxu1 %v4079_v6  ;;  %s5461_s26 = sld [smem:[#allocation18_spill]] }
  0x2c   : > { %v659_v12 = vld [vmem:[%s5459_s23 + $0x8] sm:$0xff]  ;;  %v674_v19 = vadd.f32 %v672_v17, %v658_v10  ;;  %747 = vmatprep.subr.bf16.mxu1 %v4080_v7 }
  0x2d   : > { %v675_v20 = vadd.f32 %v673_v18, %v659_v12 }
  0x2f   : > { %v676_v21 = vpack.c.bf16 %v675_v20, %v674_v19  ;;  %748 = vmatpush1.bf16.msra.mxu1 %v4082_v16 }
  0x30   : > { %3768 = vmatprep.subr.bf16.mxu1 %v4353_v40 }
  0x31   : > { %v685_v25 = vld [vmem:[%s5461_s26] sm:$0x3] }
  0x32   : > { %3480 = vmatmul.mubr.msk.bf16.vlgmr.msra.gmra.mrb[0].mxu1 %vm737_vm0, %v676_v21  ;;  %v690_v27 = vrot.slane %v685_v25, %v4575_v24  ;;  %v694_v29 = vrot.slane %v685_v25, %v4580_v26 }
  0x33   : > { %3770 = vmatprep.mubr.msk.bf16.mxu1 %vm4356_vm1, %v4353_v40 }
 0x105   : > { %v775_v28 = vpop.f32.mrb[0].mxu1 }
 0x106   : > { %v777_v30 = vpop.f32.mrb[1].mxu1  ;;  %v776_v32 = vadd.f32 %v775_v28, %v690_v27 }
 0x107   : > { %v779_v31 = vpop.f32.mrb[2].mxu1  ;;  %v4584_v35 = vadd.f32 %v777_v30, %v694_v29 }
 0x108   : > { %v780_v33 = vadd.f32 %v779_v31, %v690_v27  ;;  %v781_v34 = vpop.f32.mrb[3].mxu1 }
 0x109   : > { %v4586_v36 = vadd.f32 %v781_v34, %v694_v29 }
 0x10a   : > { %v3976_v37 = vpack.i.bf16 %v780_v33, %v776_v32  ;;  %v4588_v38 = vpack.c.bf16 %v780_v33, %v776_v32 }
 0x10b   : > { %v4594_v39 = vpack.i.bf16 %v4586_v36, %v4584_v35  ;;  %v880_v41 = vpack.c.bf16 %v4586_v36, %v4584_v35 }
 0x10c   : > { %3977 = vrot.lane.b32.xlu1 %v3976_v37, %s4351_s1  ;;  %3967 = vrot.lane.b32.xlu0 %v3976_v37, %s4352_s2 }
 0x110   : > { %3982 = vrot.lane.b32.xlu1 %v3976_v37, %s4354_s21  ;;  %3972 = vrot.lane.b32.xlu0 %v3976_v37, %s4355_s27 }
 0x114   : > { %3992 = vrot.lane.b32.xlu1 %v3976_v37, %s4357_s3  ;;  %3987 = vrot.lane.b32.xlu0 %v3976_v37, %s4358_s5 }
 0x118   : > { %3997 = vrot.lane.b32.xlu0 %v3976_v37, %s4359_s28  ;;  %889 = vrot.lane.b32.xlu1 %v4588_v38, %s4360_s30 }
 0x17e   : > { %v3978_v42 = vpop.permute.xlu1 %3977  ;;  %v3968_v43 = vpop.permute.xlu0 %3967 }
 0x17f   : > { %v3970_v44 = vunpack.i.h.bf16 %v3968_v43  ;;  %v3969_v45 = vunpack.i.l.bf16 %v3968_v43  ;;  %v3980_v46 = vunpack.i.h.bf16 %v3978_v42  ;;  %v3979_v47 = vunpack.i.l.bf16 %v3978_v42 }
 0x181   : > { %v829_v48 = vpack.c.bf16 %v3970_v44, %v3969_v45  ;;  %v831_v53 = vpack.c.bf16 %v3980_v46, %v3979_v47 }
 0x182   : > { %v3983_v49 = vpop.permute.xlu1 %3982  ;;  %v3973_v50 = vpop.permute.xlu0 %3972 }
 0x183   : > { %v3975_v51 = vunpack.i.h.bf16 %v3973_v50  ;;  %v3974_v52 = vunpack.i.l.bf16 %v3973_v50  ;;  %940 = vrot.lane.b32.xlu0 %v829_v48, %s4360_s30  ;;  %v3985_v54 = vunpack.i.h.bf16 %v3983_v49  ;;  %v3984_v55 = vunpack.i.l.bf16 %v3983_v49 }
 0x185   : > { %v830_v56 = vpack.c.bf16 %v3975_v51, %v3974_v52  ;;  %v832_v61 = vpack.c.bf16 %v3985_v54, %v3984_v55 }
 0x186   : > { %v3993_v57 = vpop.permute.xlu1 %3992  ;;  %v3988_v58 = vpop.permute.xlu0 %3987 }
 0x187   : > { %v3990_v59 = vunpack.i.h.bf16 %v3988_v58  ;;  %v3989_v60 = vunpack.i.l.bf16 %v3988_v58  ;;  %1040 = vrot.lane.b32.xlu0 %v831_v53, %s4360_s30  ;;  %990 = vrot.lane.b32.xlu1 %v830_v56, %s4360_s30  ;;  %v3995_v62 = vunpack.i.h.bf16 %v3993_v57  ;;  %v3994_v63 = vunpack.i.l.bf16 %v3993_v57 }
 0x189   : > { %v833_v0 = vpack.c.bf16 %v3990_v59, %v3989_v60  ;;  %v834_v7 = vpack.c.bf16 %v3995_v62, %v3994_v63 }
 0x18a   : > { %v3998_v1 = vpop.permute.xlu0 %3997  ;;  %v890_v3 = vpop.permute.xlu1 %889 }
 0x18b   : > { %v4000_v4 = vunpack.i.h.bf16 %v3998_v1  ;;  %v3999_v5 = vunpack.i.l.bf16 %v3998_v1  ;;  %v896_v6 = vsel %vm891_vm2, %v890_v3, 0  ;;  %1140 = vrot.lane.b32.xlu0 %v833_v0, %s4360_s30  ;;  %1090 = vrot.lane.b32.xlu1 %v832_v61, %s4360_s30 }
 0x18c   : > { %3769 = vmatpush3.bf16.xpose.msra.mxu1 %v896_v6 }
 0x18d   : > { %v835_v8 = vpack.c.bf16 %v4000_v4, %v3999_v5  ;;  %3774 = vmatprep.subr.bf16.mxu1 %v4353_v40 }
 0x18f   : > { %1240 = vrot.lane.b32.xlu0 %v835_v8, %s4360_s30  ;;  %1190 = vrot.lane.b32.xlu1 %v834_v7, %s4360_s30  ;;  %s4364_s30 = smov 32  }
 0x193   : > { %4002 = vrot.lane.b32.xlu0 %v4594_v39, %s4352_s2  ;;  %4007 = vrot.lane.b32.xlu1 %v4594_v39, %s4355_s27  ;;  %s4362_s2 = smov 16   ;;  %s4367_s27 = smov 56  }
 0x194   : > { %3771 = vmatmul.mubr.msk.bf16.vlgmr.msra.gmra.mrb[4].mxu1 %vm891_vm2, %v4588_v38 }
 0x195   : > { %3776 = vmatprep.mubr.msk.bf16.mxu1 %vm4356_vm1, %v4353_v40 }
 0x197   : > { %4017 = vrot.lane.b32.xlu0 %v4594_v39, %s4354_s21  ;;  %4012 = vrot.lane.b32.xlu1 %v4594_v39, %s4351_s1  ;;  %s5462_s1 = sld [smem:[#allocation19_spill]]  ;;  %s4366_s21 = smov 48  }
 0x19b   : > { %4022 = vrot.lane.b32.xlu1 %v4594_v39, %s4358_s5 }
 0x1f5   : > { %v941_v9 = vpop.permute.xlu0 %940 }
 0x1f6   : > { %v946_v10 = vsel %vm891_vm2, %v941_v9, 0 }
 0x1f7   : > { %3775 = vmatpush3.bf16.xpose.msra.mxu1 %v946_v10 }
 0x1f8   : > { %3786 = vmatprep.subr.bf16.mxu1 %v4353_v40 }
 0x1f9   : > { %v991_v11 = vpop.permute.xlu1 %990  ;;  %v1041_v13 = vpop.permute.xlu0 %1040 }
 0x1fa   : > { %v996_v12 = vsel %vm891_vm2, %v991_v11, 0  ;;  %v1046_v14 = vsel %vm891_vm2, %v1041_v13, 0 }
 0x1fb   : > { %3781 = vmatpush3.bf16.xpose.msra.mxu0 %v996_v12 }
 0x1fc   : > { %3792 = vmatprep.subr.bf16.mxu0 %v4353_v40 }
 0x1fd   : > { %v1091_v15 = vpop.permute.xlu1 %1090  ;;  %v1141_v16 = vpop.permute.xlu0 %1140 }
 0x1fe   : > { %3777 = vmatmul.mubr.msk.bf16.vlgmr.msra.gmra.mrb[8].mxu1 %vm891_vm2, %v829_v48  ;;  %v1096_v17 = vsel %vm891_vm2, %v1091_v15, 0  ;;  %v1146_v18 = vsel %vm891_vm2, %v1141_v16, 0 }
 0x1ff   : > { %3787 = vmatpush3.bf16.xpose.msra.mxu1 %v1046_v14  ;;  %3788 = vmatprep.mubr.msk.bf16.mxu1 %vm4356_vm1, %v4353_v40 }
 0x200   : > { %3798 = vmatprep.subr.bf16.mxu1 %v4353_v40 }
 0x201   : > { %v1191_v19 = vpop.permute.xlu1 %1190  ;;  %v1241_v20 = vpop.permute.xlu0 %1240 }
 0x202   : > { %3783 = vmatmul.mubr.msk.bf16.vlgmr.msra.gmra.mrb[0].mxu0 %vm891_vm2, %v830_v56  ;;  %v1196_v21 = vsel %vm891_vm2, %v1191_v19, 0  ;;  %v1246_v22 = vsel %vm891_vm2, %v1241_v20, 0 }
 0x203   : > { %3793 = vmatpush3.bf16.xpose.msra.mxu0 %v1096_v17  ;;  %3794 = vmatprep.mubr.msk.bf16.mxu0 %vm4356_vm1, %v4353_v40 }
 0x204   : > { %3804 = vmatprep.subr.bf16.mxu0 %v4353_v40 }
 0x205   : > { %v4003_v23 = vpop.permute.xlu0 %4002  ;;  %v4008_v5 = vpop.permute.xlu1 %4007 }
 0x206   : > { %3789 = vmatmul.mubr.msk.bf16.vlgmr.msra.gmra.mrb[12].mxu1 %vm891_vm2, %v831_v53  ;;  %v4005_v25 = vunpack.i.h.bf16 %v4003_v23  ;;  %v4004_v27 = vunpack.i.l.bf16 %v4003_v23 }
 0x207   : > { %3799 = vmatpush3.bf16.xpose.msra.mxu1 %v1146_v18  ;;  %3800 = vmatprep.mubr.msk.bf16.mxu1 %vm4356_vm1, %v4353_v40 }
 0x208   : > { %3810 = vmatprep.subr.bf16.mxu1 %v4353_v40  ;;  %v881_v28 = vpack.c.bf16 %v4005_v25, %v4004_v27 }
 0x209   : > { %v4740_v15 = vpop.permute.xlu1 %4012  ;;  %v4746_v19 = vpop.permute.xlu0 %4017 }
 0x20a   : > { %3795 = vmatmul.mubr.msk.bf16.vlgmr.msra.gmra.mrb[4].mxu0 %vm891_vm2, %v832_v61 }
 0x20b   : > { %3805 = vmatpush3.bf16.xpose.msra.mxu0 %v1196_v21  ;;  %3806 = vmatprep.mubr.msk.bf16.mxu0 %vm4356_vm1, %v4353_v40 }
 0x20c   : > { %3816 = vmatprep.subr.bf16.mxu0 %v4353_v40 }
 0x20d   : > { %v4744_v18 = vpop.permute.xlu1 %4022 }
 0x20e   : > { %3801 = vmatmul.mubr.msk.bf16.vlgmr.msra.gmra.mrb[16].mxu1 %vm891_vm2, %v833_v0 }
 0x20f   : > { %3811 = vmatpush3.bf16.xpose.msra.mxu1 %v1246_v22  ;;  %3812 = vmatprep.mubr.msk.bf16.mxu1 %vm4356_vm1, %v4353_v40 }
 0x210   : > { %3822 = vmatprep.subr.bf16.mxu1 %v4353_v40 }
 0x212   : > { %3807 = vmatmul.mubr.msk.bf16.vlgmr.msra.gmra.mrb[8].mxu0 %vm891_vm2, %v834_v7 }
 0x213   : > { %3817 = vmatpush3.bf16.msra.mxu0 %v880_v41  ;;  %3818 = vmatprep.mubr.msk.bf16.mxu0 %vm4356_vm1, %v4353_v40 }
 0x214   : > { %3828 = vmatprep.subr.bf16.mxu0 %v4353_v40 }
 0x216   : > { %3813 = vmatmul.mubr.msk.bf16.vlgmr.msra.gmra.mrb[20].mxu1 %vm891_vm2, %v835_v8 }
 0x217   : > { %3823 = vmatpush3.bf16.msra.mxu1 %v881_v28  ;;  %3824 = vmatprep.mubr.msk.bf16.mxu1 %vm4356_vm1, %v4353_v40  ;;  %v4010_v28 = vunpack.i.h.bf16 %v4008_v5 }
 0x218   : > { %3834 = vmatprep.subr.bf16.mxu1 %v4353_v40 }
 0x267   : > { %v4678_v29 = vpop.f32.mrb[4].mxu1 }
 0x268   : > { %v3772_v30 = vpop.f32.mrb[5].mxu1  ;;  %v1290_v31 = vsel %vm1289_vm3, %v4678_v29, -inf }
 0x269   : > { %1291 = vmax.xlane.f32.xlu1 %v1290_v31  ;;  %v4682_v32 = vpop.f32.mrb[6].mxu1  ;;  %v4009_v30 = vunpack.i.l.bf16 %v4008_v5 }
 0x26a   : > { %v3773_v33 = vpop.f32.mrb[7].mxu1  ;;  %v1293_v34 = vsel %vm1289_vm3, %v4682_v32, -inf }
 0x26b   : > { %1294 = vmax.xlane.f32.xlu0 %v1293_v34  ;;  %v882_v34 = vpack.c.bf16 %v4010_v28, %v4009_v30  ;;  %v4024_v30 = vunpack.i.l.bf16 %v4744_v18 }
 0x2d1   : > { %v4686_v35 = vpop.f32.mrb[8].mxu1 }
 0x2d2   : > { %v3778_v36 = vpop.f32.mrb[9].mxu1  ;;  %v1296_v37 = vsel %vm1289_vm3, %v4686_v35, -inf }
 0x2d3   : > { %1297 = vmax.xlane.f32.xlu0 %v1296_v37  ;;  %v4690_v38 = vpop.f32.mrb[10].mxu1 }
 0x2d4   : > { %v3779_v41 = vpop.f32.mrb[11].mxu1  ;;  %v1299_v42 = vsel %vm1289_vm3, %v4690_v38, -inf }
 0x2d5   : > { %1300 = vmax.xlane.f32.xlu1 %v1299_v42  ;;  %v4694_v43 = vpop.f32.mrb[0].mxu0 }
 0x2d6   : > { %v3784_v44 = vpop.f32.mrb[1].mxu0  ;;  %v1302_v45 = vsel %vm1289_vm3, %v4694_v43, -inf }
 0x2d7   : > { %1303 = vmax.xlane.f32.xlu0 %v1302_v45  ;;  %v4698_v46 = vpop.f32.mrb[2].mxu0 }
 0x2d8   : > { %v3785_v47 = vpop.f32.mrb[3].mxu0  ;;  %v1305_v48 = vsel %vm1289_vm3, %v4698_v46, -inf }
 0x2d9   : > { %v4702_v49 = vpop.f32.mrb[12].mxu1  ;;  %1306 = vmax.xlane.f32.xlu1 %v1305_v48 }
 0x2da   : > { %v3790_v50 = vpop.f32.mrb[13].mxu1  ;;  %v1308_v51 = vsel %vm1289_vm3, %v4702_v49, -inf }
 0x2db   : > { %v4706_v52 = vpop.f32.mrb[14].mxu1  ;;  %1309 = vmax.xlane.f32.xlu0 %v1308_v51 }
 0x2dc   : > { %v3791_v53 = vpop.f32.mrb[15].mxu1  ;;  %v1311_v54 = vsel %vm1289_vm3, %v4706_v52, -inf }
 0x2dd   : > { %1312 = vmax.xlane.f32.xlu1 %v1311_v54  ;;  %v4710_v55 = vpop.f32.mrb[4].mxu0 }
 0x2de   : > { %v3796_v56 = vpop.f32.mrb[5].mxu0  ;;  %v1314_v57 = vsel %vm1289_vm3, %v4710_v55, -inf }
 0x2df   : > { %1315 = vmax.xlane.f32.xlu0 %v1314_v57  ;;  %v4714_v58 = vpop.f32.mrb[6].mxu0 }
 0x2e0   : > { %v3797_v59 = vpop.f32.mrb[7].mxu0  ;;  %v1317_v60 = vsel %vm1289_vm3, %v4714_v58, -inf }
 0x2e1   : > { %v4718_v61 = vpop.f32.mrb[16].mxu1  ;;  %1318 = vmax.xlane.f32.xlu1 %v1317_v60  ;;  %v4015_v60 = vunpack.i.h.bf16 %v4740_v15 }
 0x2e2   : > { %v3802_v62 = vpop.f32.mrb[17].mxu1  ;;  %v1320_v63 = vsel %vm1289_vm3, %v4718_v61, -inf }
 0x2e3   : > { %v4722_v0 = vpop.f32.mrb[18].mxu1  ;;  %1321 = vmax.xlane.f32.xlu0 %v1320_v63 }
 0x2e4   : > { %v3803_v1 = vpop.f32.mrb[19].mxu1  ;;  %v1323_v3 = vsel %vm1289_vm3, %v4722_v0, -inf }
 0x2e5   : > { %1324 = vmax.xlane.f32.xlu1 %v1323_v3  ;;  %v4726_v4 = vpop.f32.mrb[8].mxu0 }
 0x2e6   : > { %v3808_v6 = vpop.f32.mrb[9].mxu0  ;;  %v1326_v7 = vsel %vm1289_vm3, %v4726_v4, -inf }
 0x2e7   : > { %1327 = vmax.xlane.f32.xlu0 %v1326_v7  ;;  %v4730_v8 = vpop.f32.mrb[10].mxu0 }
 0x2e8   : > { %v3809_v9 = vpop.f32.mrb[11].mxu0  ;;  %v1329_v10 = vsel %vm1289_vm3, %v4730_v8, -inf }
 0x2e9   : > { %v4734_v11 = vpop.f32.mrb[20].mxu1  ;;  %1330 = vmax.xlane.f32.xlu1 %v1329_v10  ;;  %v4019_v9 = vunpack.i.l.bf16 %v4746_v19 }
 0x2ea   : > { %v3814_v12 = vpop.f32.mrb[21].mxu1  ;;  %v1332_v13 = vsel %vm1289_vm3, %v4734_v11, -inf }
 0x2eb   : > { %v4738_v14 = vpop.f32.mrb[22].mxu1  ;;  %1333 = vmax.xlane.f32.xlu0 %v1332_v13 }
 0x2ec   : > { %v3815_v16 = vpop.f32.mrb[23].mxu1  ;;  %v1335_v17 = vsel %vm1289_vm3, %v4738_v14, -inf }
 0x2ed   : > { %1336 = vmax.xlane.f32.xlu1 %v1335_v17 }
 0x2f6   : > { %v1292_v20 = vpop.xlane.xlu1 %1291 }
 0x2f7   : > { %v1338_v21 = vsub.f32 %v4678_v29, %v1292_v20 }
 0x2f8   : > { %v1295_v22 = vpop.xlane.xlu0 %1294 }
 0x2f9   : > { %v1354_v23 = vmul.f32 1.442695, %v1338_v21  ;;  %v1339_v25 = vsub.f32 %v4682_v32, %v1295_v22 }
 0x2fb   : > { %v1356_v27 = vmul.f32 1.442695, %v1339_v25  ;;  %4155 = vpow2.f32 %v1354_v23  ;;  %v4025_v25 = vunpack.i.h.bf16 %v4744_v18 }
 0x2fd   : > { %4157 = vpow2.f32 %v1356_v27 }
 0x2fe   : > { %4032 = vrot.lane.b32.xlu1 %v4594_v39, %s4359_s28 }
 0x301   : > { %4027 = vrot.lane.b32.xlu0 %v4594_v39, %s4357_s3  ;;  %s4363_s3 = smov 24  }
 0x305   : > { %v4754_v31 = vpop.eup %4155 }
 0x307   : > { %v4756_v33 = vpop.eup %4157 }
 0x308   : > { %v1434_v29 = vpack.c.bf16 %v4756_v33, %v4754_v31 }
 0x30a   : > { %3819 = vmatmul.mubr.msk.bf16.vlgmr.msra.gmra.mrb[12].mxu0 %vm1289_vm3, %v1434_v29 }
 0x30b   : > { %3829 = vmatpush3.bf16.msra.mxu0 %v882_v34  ;;  %3830 = vmatprep.mubr.msk.bf16.mxu0 %vm4356_vm1, %v4353_v40 }
 0x30c   : > { %3840 = vmatprep.subr.bf16.mxu0 %v4353_v40 }
 0x360   : > { %v1298_v32 = vpop.xlane.xlu0 %1297 }
 0x361   : > { %v1340_v39 = vsub.f32 %v4686_v35, %v1298_v32 }
 0x362   : > { %v1301_v36 = vpop.xlane.xlu1 %1300 }
 0x363   : > { %v1358_v37 = vmul.f32 1.442695, %v1340_v39  ;;  %v1341_v41 = vsub.f32 %v4690_v38, %v1301_v36 }
 0x364   : > { %v1304_v42 = vpop.xlane.xlu0 %1303 }
 0x365   : > { %4159 = vpow2.f32 %v1358_v37  ;;  %v1360_v44 = vmul.f32 1.442695, %v1341_v41  ;;  %v1342_v45 = vsub.f32 %v4694_v43, %v1304_v42 }
 0x366   : > { %v1307_v47 = vpop.xlane.xlu1 %1306 }
 0x367   : > { %4161 = vpow2.f32 %v1360_v44  ;;  %v1362_v48 = vmul.f32 1.442695, %v1342_v45  ;;  %v1343_v50 = vsub.f32 %v4698_v46, %v1307_v47  ;;  %v4014_v46 = vunpack.i.l.bf16 %v4740_v15 }
 0x368   : > { %v1310_v51 = vpop.xlane.xlu0 %1309  ;;  %v885_v44 = vpack.c.bf16 %v4025_v25, %v4024_v30 }
 0x369   : > { %4163 = vpow2.f32 %v1362_v48  ;;  %v1364_v53 = vmul.f32 1.442695, %v1343_v50  ;;  %v1344_v54 = vsub.f32 %v4702_v49, %v1310_v51  ;;  %v883_v16 = vpack.c.bf16 %v4015_v60, %v4014_v46 }
 0x36a   : > { %v1313_v35 = vpop.xlane.xlu1 %1312 }
 0x36b   : > { %4165 = vpow2.f32 %v1364_v53  ;;  %v1366_v56 = vmul.f32 1.442695, %v1344_v54  ;;  %v1345_v38 = vsub.f32 %v4706_v52, %v1313_v35 }
 0x36c   : > { %v1316_v57 = vpop.xlane.xlu0 %1315 }
 0x36d   : > { %4167 = vpow2.f32 %v1366_v56  ;;  %v1368_v59 = vmul.f32 1.442695, %v1345_v38  ;;  %v1346_v43 = vsub.f32 %v4710_v55, %v1316_v57  ;;  %v4020_v55 = vunpack.i.h.bf16 %v4746_v19 }
 0x36e   : > { %v1319_v62 = vpop.xlane.xlu1 %1318 }
 0x36f   : > { %v4160_v63 = vpop.eup %4159  ;;  %4169 = vpow2.f32 %v1368_v59  ;;  %v1370_v1 = vmul.f32 1.442695, %v1346_v43  ;;  %v1347_v49 = vsub.f32 %v4714_v58, %v1319_v62  ;;  %v884_v23 = vpack.c.bf16 %v4020_v55, %v4019_v9 }
 0x370   : > { %v1322_v3 = vpop.xlane.xlu0 %1321  ;;  %v1392_v5 = vsel %vm1289_vm3, %v4160_v63, 0.0 }
 0x371   : > { %v4162_v6 = vpop.eup %4161  ;;  %4171 = vpow2.f32 %v1370_v1  ;;  %v1372_v52 = vmul.f32 1.442695, %v1347_v49  ;;  %v1348_v7 = vsub.f32 %v4718_v61, %v1322_v3  ;;  %1393 = vadd.xlane.f32.xlu0 %v1392_v5 }
 0x372   : > { %v1325_v10 = vpop.xlane.xlu1 %1324  ;;  %v1395_v12 = vsel %vm1289_vm3, %v4162_v6, 0.0  ;;  %v1435_v13 = vpack.c.bf16 %v4162_v6, %v4160_v63 }
 0x373   : > { %v4164_v15 = vpop.eup %4163  ;;  %4173 = vpow2.f32 %v1372_v52  ;;  %v1374_v58 = vmul.f32 1.442695, %v1348_v7  ;;  %v1349_v17 = vsub.f32 %v4722_v0, %v1325_v10  ;;  %1396 = vadd.xlane.f32.xlu1 %v1395_v12 }
 0x374   : > { %v1328_v20 = vpop.xlane.xlu0 %1327  ;;  %3825 = vmatmul.mubr.msk.bf16.vlgmr.msra.gmra.mrb[24].mxu1 %vm1289_vm3, %v1435_v13  ;;  %v1398_v61 = vsel %vm1289_vm3, %v4164_v15, 0.0  ;;  %v1386_v13 = vsel %vm1289_vm3, %v4754_v31, 0.0 }
 0x375   : > { %v4166_v21 = vpop.eup %4165  ;;  %4175 = vpow2.f32 %v1374_v58  ;;  %v1376_v22 = vmul.f32 1.442695, %v1349_v17  ;;  %v1350_v19 = vsub.f32 %v4726_v4, %v1328_v20  ;;  %3835 = vmatpush3.bf16.msra.mxu1 %v883_v16  ;;  %1399 = vadd.xlane.f32.xlu0 %v1398_v61  ;;  %v1389_v16 = vsel %vm1289_vm3, %v4756_v33, 0.0 }
 0x376   : > { %v1331_v27 = vpop.xlane.xlu1 %1330  ;;  %v1436_v28 = vpack.c.bf16 %v4166_v21, %v4164_v15  ;;  %3836 = vmatprep.mubr.msk.bf16.mxu1 %vm4356_vm1, %v4353_v40  ;;  %3846 = vmatprep.subr.bf16.mxu1 %v4353_v40  ;;  %v1401_v41 = vsel %vm1289_vm3, %v4166_v21, 0.0 }
 0x377   : > { %v4168_v0 = vpop.eup %4167  ;;  %4177 = vpow2.f32 %v1376_v22  ;;  %v1378_v29 = vmul.f32 1.442695, %v1350_v19  ;;  %v1351_v34 = vsub.f32 %v4730_v8, %v1331_v27 }
 0x378   : > { %v1334_v4 = vpop.xlane.xlu0 %1333  ;;  %3831 = vmatmul.mubr.msk.bf16.vlgmr.msra.gmra.mrb[16].mxu0 %vm1289_vm3, %v1436_v28  ;;  %v1404_v32 = vsel %vm1289_vm3, %v4168_v0, 0.0 }
 0x379   : > { %v4170_v39 = vpop.eup %4169  ;;  %4179 = vpow2.f32 %v1378_v29  ;;  %v1380_v36 = vmul.f32 1.442695, %v1351_v34  ;;  %v1352_v37 = vsub.f32 %v4734_v11, %v1334_v4  ;;  %3841 = vmatpush3.bf16.msra.mxu0 %v884_v23  ;;  %1405 = vadd.xlane.f32.xlu1 %v1404_v32 }
 0x37a   : > { %1402 = vadd.xlane.f32.xlu0 %v1401_v41  ;;  %v1337_v18 = vpop.xlane.xlu1 %1336  ;;  %v1437_v42 = vpack.c.bf16 %v4170_v39, %v4168_v0  ;;  %3842 = vmatprep.mubr.msk.bf16.mxu0 %vm4356_vm1, %v4353_v40  ;;  %v1407_v50 = vsel %vm1289_vm3, %v4170_v39, 0.0 }
 0x37b   : > { %v4172_v8 = vpop.eup %4171  ;;  %4181 = vpow2.f32 %v1380_v36  ;;  %v1382_v45 = vmul.f32 1.442695, %v1352_v37  ;;  %v1353_v47 = vsub.f32 %v4738_v14, %v1337_v18  ;;  %3852 = vmatprep.subr.bf16.mxu0 %v4353_v40 }
 0x37c   : > { %v4028_v48 = vpop.permute.xlu0 %4027  ;;  %3837 = vmatmul.mubr.msk.bf16.vlgmr.msra.gmra.mrb[28].mxu1 %vm1289_vm3, %v1437_v42  ;;  %v1410_v11 = vsel %vm1289_vm3, %v4172_v8, 0.0 }
 0x37d   : > { %v4174_v51 = vpop.eup %4173  ;;  %4183 = vpow2.f32 %v1382_v45  ;;  %v1384_v53 = vmul.f32 1.442695, %v1353_v47  ;;  %v4030_v54 = vunpack.i.h.bf16 %v4028_v48  ;;  %v4029_v35 = vunpack.i.l.bf16 %v4028_v48  ;;  %3847 = vmatpush3.bf16.msra.mxu1 %v885_v44  ;;  %1411 = vadd.xlane.f32.xlu1 %v1410_v11 }
 0x37e   : > { %1408 = vadd.xlane.f32.xlu0 %v1407_v50  ;;  %v4033_v56 = vpop.permute.xlu1 %4032  ;;  %v1438_v38 = vpack.c.bf16 %v4174_v51, %v4172_v8  ;;  %3848 = vmatprep.mubr.msk.bf16.mxu1 %vm4356_vm1, %v4353_v40  ;;  %v1413_v46 = vsel %vm1289_vm3, %v4174_v51, 0.0 }
 0x37f   : > { %v4176_v14 = vpop.eup %4175  ;;  %4185 = vpow2.f32 %v1384_v53  ;;  %v886_v57 = vpack.c.bf16 %v4030_v54, %v4029_v35  ;;  %v4035_v59 = vunpack.i.h.bf16 %v4033_v56  ;;  %v4034_v43 = vunpack.i.l.bf16 %v4033_v56  ;;  %3858 = vmatprep.subr.bf16.mxu1 %v4353_v40  ;;  %v4083_v54 = vld [vmem:[%s5462_s1] sm:$0xff]  }
 0x380   : > { %3843 = vmatmul.mubr.msk.bf16.vlgmr.msra.gmra.mrb[20].mxu0 %vm1289_vm3, %v1438_v38  ;;  %v1416_v60 = vsel %vm1289_vm3, %v4176_v14, 0.0 }
 0x381   : > { %v4178_v62 = vpop.eup %4177  ;;  %v887_v63 = vpack.c.bf16 %v4035_v59, %v4034_v43  ;;  %1417 = vadd.xlane.f32.xlu1 %v1416_v60  ;;  %3853 = vmatpush3.bf16.msra.mxu0 %v886_v57 }
 0x382   : > { %1414 = vadd.xlane.f32.xlu0 %v1413_v46  ;;  %v1439_v1 = vpack.c.bf16 %v4178_v62, %v4176_v14  ;;  %3854 = vmatprep.mubr.msk.bf16.mxu0 %vm4356_vm1, %v4353_v40  ;;  %v1419_v6 = vsel %vm1289_vm3, %v4178_v62, 0.0  ;;  %v4084_v46 = vld [vmem:[%s5462_s1 + $0x8] sm:$0xff]  }
 0x383   : > { %v4180_v49 = vpop.eup %4179  ;;  %3864 = vmatprep.subr.bf16.mxu0 %v4353_v40 }
 0x384   : > { %3849 = vmatmul.mubr.msk.bf16.vlgmr.msra.gmra.mrb[32].mxu1 %vm1289_vm3, %v1439_v1  ;;  %v1422_v3 = vsel %vm1289_vm3, %v4180_v49, 0.0 }
 0x385   : > { %v4182_v5 = vpop.eup %4181  ;;  %3859 = vmatpush3.bf16.msra.mxu1 %v887_v63  ;;  %1423 = vadd.xlane.f32.xlu1 %v1422_v3 }
 0x386   : > { %1420 = vadd.xlane.f32.xlu0 %v1419_v6  ;;  %v1440_v52 = vpack.c.bf16 %v4182_v5, %v4180_v49  ;;  %3860 = vmatprep.mubr.msk.bf16.mxu1 %vm4356_vm1, %v4353_v40  ;;  %v1425_v10 = vsel %vm1289_vm3, %v4182_v5, 0.0 }
 0x387   : > { %v4184_v7 = vpop.eup %4183 }
 0x388   : > { %3855 = vmatmul.mubr.msk.bf16.vlgmr.msra.gmra.mrb[24].mxu0 %vm1289_vm3, %v1440_v52  ;;  %v1428_v55 = vsel %vm1289_vm3, %v4184_v7, 0.0 }
 0x389   : > { %v4186_v9 = vpop.eup %4185  ;;  %1429 = vadd.xlane.f32.xlu1 %v1428_v55  ;;  %3872 = vmatprep.mubr.msk.bf16.mxu0 %vm4356_vm1, %v4353_v40 }
 0x38a   : > { %1426 = vadd.xlane.f32.xlu0 %v1425_v10  ;;  %v1441_v12 = vpack.c.bf16 %v4186_v9, %v4184_v7  ;;  %v1431_v15 = vsel %vm1289_vm3, %v4186_v9, 0.0  ;;  %3865 = vmatpush3.bf16.msra.mxu0 %v4083_v54 }
 0x38b   : > { %3866 = vmatprep.subr.bf16.mxu0 %v4353_v40 }
 0x38c   : > { %3861 = vmatmul.mubr.msk.bf16.vlgmr.msra.gmra.mrb[36].mxu1 %vm1289_vm3, %v1441_v12  ;;  %v4085_v12 = vld [vmem:[%s5462_s1 + $0x10] sm:$0xff]  }
 0x38d   : > { %1387 = vadd.xlane.f32.xlu1 %v1386_v13  ;;  %2137 = vmatprep.mubr.bf16.mxu1 %v4350_v2 }
 0x38e   : > { %1432 = vadd.xlane.f32.xlu0 %v1431_v15  ;;  %3867 = vmatpush3.bf16.msra.mxu0 %v4084_v46 }
 0x38f   : > { %3868 = vmatprep.subr.bf16.mxu0 %v4353_v40 }
 0x392   : > { %1390 = vadd.xlane.f32.xlu0 %v1389_v16  ;;  %3869 = vmatpush3.bf16.msra.mxu0 %v4085_v12 }
 0x393   : > { %3870 = vmatprep.subr.bf16.mxu0 %v4353_v40 }
 0x3dd   : > { %v4826_v58 = vpop.f32.mrb[12].mxu0 }
 0x3de   : > { %v3820_v17 = vpop.f32.mrb[13].mxu0 }
 0x3df   : > { %v4828_v20 = vpop.f32.mrb[14].mxu0 }
 0x3e0   : > { %v3821_v61 = vpop.f32.mrb[15].mxu0 }
 0x3fe   : > { %v1394_v21 = vpop.xlane.xlu0 %1393 }
 0x3ff   : > { %4187 = vrcp.f32 %v1394_v21 }
 0x400   : > { %v1397_v31 = vpop.xlane.xlu1 %1396 }
 0x401   : > { %4189 = vrcp.f32 %v1397_v31 }
 0x402   : > { %v1400_v22 = vpop.xlane.xlu0 %1399 }
 0x403   : > { %4191 = vrcp.f32 %v1400_v22 }
 0x406   : > { %v1406_v23 = vpop.xlane.xlu1 %1405 }
 0x407   : > { %v1403_v19 = vpop.xlane.xlu0 %1402 }
 0x408   : > { %4193 = vrcp.f32 %v1403_v19 }
 0x409   : > { %4195 = vrcp.f32 %v1406_v23  ;;  %v4188_v30 = vpop.eup %4187 }
 0x40a   : > { %v1412_v27 = vpop.xlane.xlu1 %1411 }
 0x40b   : > { %v1409_v25 = vpop.xlane.xlu0 %1408  ;;  %v4190_v4 = vpop.eup %4189 }
 0x40c   : > { %4197 = vrcp.f32 %v1409_v25 }
 0x40d   : > { %4199 = vrcp.f32 %v1412_v27  ;;  %v4192_v18 = vpop.eup %4191 }
 0x40e   : > { %v1418_v33 = vpop.xlane.xlu1 %1417 }
 0x40f   : > { %v1415_v28 = vpop.xlane.xlu0 %1414 }
 0x410   : > { %4201 = vrcp.f32 %v1415_v28  ;;  %v4086_v28 = vld [vmem:[%s5462_s1 + $0x18] sm:$0xff]   ;;  %s4290_s1 = sshll.u32 %s4368_s0, 4  ;;  %s4291_s1 = int_to_ptr.vmem [resolvable:$false] %s4290_s1 }
 0x411   : > { %4203 = vrcp.f32 %v1418_v33  ;;  %3871 = vmatpush3.bf16.msra.mxu0 %v4086_v28  ;;  %s4292_s5 = scalar_lea.vmem %s4291_s1, 512 }
 0x412   : > { %v4194_v44 = vpop.eup %4193  ;;  %v1424_v45 = vpop.xlane.xlu1 %1423 }
 0x413   : > { %v1421_v29 = vpop.xlane.xlu0 %1420  ;;  %v4196_v35 = vpop.eup %4195 }
 0x414   : > { %4205 = vrcp.f32 %v1421_v29 }
 0x415   : > { %4207 = vrcp.f32 %v1424_v45 }
 0x416   : > { %v4198_v14 = vpop.eup %4197  ;;  %v1430_v62 = vpop.xlane.xlu1 %1429 }
 0x417   : > { %v1427_v48 = vpop.xlane.xlu0 %1426  ;;  %v4200_v1 = vpop.eup %4199 }
 0x418   : > { %4209 = vrcp.f32 %v1427_v48 }
 0x419   : > { %4211 = vrcp.f32 %v1430_v62 }
 0x41a   : > { %v4202_v6 = vpop.eup %4201 }
 0x41b   : > { %v1433_v49 = vpop.xlane.xlu0 %1432  ;;  %v4204_v13 = vpop.eup %4203 }
 0x41c   : > { %4213 = vrcp.f32 %v1433_v49 }
 0x41e   : > { %v4206_v17 = vpop.eup %4205 }
 0x41f   : > { %v4208_v23 = vpop.eup %4207  ;;  %v1391_v45 = vpop.xlane.xlu0 %1390 }
 0x422   : > { %v4210_v33 = vpop.eup %4209 }
 0x447   : > { %v1523_v0 = vpop.f32.mrb[24].mxu1 }
 0x448   : > { %v3826_v34 = vpop.f32.mrb[25].mxu1  ;;  %v1812_v39 = vmul.f32 %v4188_v30, %v1523_v0 }
 0x449   : > { %v1526_v32 = vpop.f32.mrb[26].mxu1 }
 0x44a   : > { %v1813_v36 = vmul.f32 %v4190_v4, %v1526_v32  ;;  %v3827_v37 = vpop.f32.mrb[27].mxu1  ;;  %v4212_v32 = vpop.eup %4211 }
 0x44b   : > { %v1567_v41 = vpop.f32.mrb[16].mxu0 }
 0x44c   : > { %v4036_v42 = vpack.i.bf16 %v1813_v36, %v1812_v39  ;;  %v3832_v8 = vpop.f32.mrb[17].mxu0  ;;  %v1814_v11 = vmul.f32 %v4192_v18, %v1567_v41  ;;  %v4214_v36 = vpop.eup %4213 }
 0x44d   : > { %v1570_v47 = vpop.f32.mrb[18].mxu0 }
 0x44e   : > { %v1815_v50 = vmul.f32 %v4194_v44, %v1570_v47  ;;  %4037 = vrot.lane.b32.xlu1 %v4036_v42, %s5434_s29  ;;  %v3833_v51 = vpop.f32.mrb[19].mxu0  ;;  %v1388_v44 = vpop.xlane.xlu1 %1387 }
 0x44f   : > { %v1611_v53 = vpop.f32.mrb[28].mxu1  ;;  %4215 = vrcp.f32 %v1388_v44 }
 0x450   : > { %v4041_v56 = vpack.i.bf16 %v1815_v50, %v1814_v11  ;;  %v3838_v38 = vpop.f32.mrb[29].mxu1  ;;  %v1816_v59 = vmul.f32 %v4196_v35, %v1611_v53  ;;  %4217 = vrcp.f32 %v1391_v45 }
 0x451   : > { %v1614_v57 = vpop.f32.mrb[30].mxu1 }
 0x452   : > { %v1817_v43 = vmul.f32 %v4198_v14, %v1614_v57  ;;  %v3839_v60 = vpop.f32.mrb[31].mxu1  ;;  %4042 = vrot.lane.b32.xlu0 %v4041_v56, %s4362_s2  ;;  %s4365_s2 = smov 40  }
 0x453   : > { %v1655_v63 = vpop.f32.mrb[20].mxu0 }
 0x454   : > { %v4046_v3 = vpack.i.bf16 %v1817_v43, %v1816_v59  ;;  %v3844_v5 = vpop.f32.mrb[21].mxu0  ;;  %v1818_v7 = vmul.f32 %v4200_v1, %v1655_v63 }
 0x455   : > { %v1658_v52 = vpop.f32.mrb[22].mxu0 }
 0x456   : > { %v1819_v55 = vmul.f32 %v4202_v6, %v1658_v52  ;;  %4047 = vrot.lane.b32.xlu1 %v4046_v3, %s4363_s3  ;;  %v3845_v9 = vpop.f32.mrb[23].mxu0 }
 0x457   : > { %v1699_v10 = vpop.f32.mrb[32].mxu1 }
 0x458   : > { %v4051_v15 = vpack.i.bf16 %v1819_v55, %v1818_v7  ;;  %v3850_v16 = vpop.f32.mrb[33].mxu1  ;;  %v1820_v21 = vmul.f32 %v4204_v13, %v1699_v10 }
 0x459   : > { %v1702_v61 = vpop.f32.mrb[34].mxu1  ;;  %v4216_v50 = vpop.eup %4215 }
 0x45a   : > { %v1821_v22 = vmul.f32 %v4206_v17, %v1702_v61  ;;  %v3851_v19 = vpop.f32.mrb[35].mxu1  ;;  %4052 = vrot.lane.b32.xlu1 %v4051_v15, %s4364_s30  ;;  %v4218_v51 = vpop.eup %4217  ;;  %v1810_v56 = vmul.f32 %v4216_v50, %v4826_v58  ;;  %v4087_v50 = vld [vmem:[%s5408_s10] ss:$8 sps:$4 sm:$0xff]  }
 0x45b   : > { %v1743_v31 = vpop.f32.mrb[24].mxu0  ;;  %v1811_v59 = vmul.f32 %v4218_v51, %v4828_v20  ;;  %v4092_v51 = vld [vmem:[%s5408_s10 + $0x14] ss:$8 sps:$4 sm:$0xff]  }
 0x45c   : > { %v4056_v25 = vpack.i.bf16 %v1821_v22, %v1820_v21  ;;  %v3856_v27 = vpop.f32.mrb[25].mxu0  ;;  %v1822_v30 = vmul.f32 %v4208_v23, %v1743_v31  ;;  %v3497_v23 = vld [vmem:[%s5463_s6] ss:$0 sm:$0xff]  ;;  %s5467_s6 = sld [smem:[#allocation22_spill]] }
 0x45d   : > { %v1746_v0 = vpop.f32.mrb[26].mxu0 }
 0x45e   : > { %v1823_v29 = vmul.f32 %v4210_v33, %v1746_v0  ;;  %4057 = vrot.lane.b32.xlu0 %v4056_v25, %s4365_s2  ;;  %v3857_v34 = vpop.f32.mrb[27].mxu0 }
 0x45f   : > { %v1787_v4 = vpop.f32.mrb[36].mxu1 }
 0x460   : > { %v4061_v39 = vpack.i.bf16 %v1823_v29, %v1822_v30  ;;  %v3862_v40 = vpop.f32.mrb[37].mxu1  ;;  %v1824_v41 = vmul.f32 %v4212_v32, %v1787_v4  ;;  %v4283_v29 = vld [vmem:[%s4552_s4] sm:$0xff]  ;;  %v4284_v32 = vld [vmem:[%s4552_s4 + $0x8] sm:$0xff] }
 0x461   : > { %v1790_v37 = vpop.f32.mrb[38].mxu1 }
 0x462   : > { %v1825_v18 = vmul.f32 %v4214_v36, %v1790_v37  ;;  %v3863_v42 = vpop.f32.mrb[39].mxu1  ;;  %4062 = vrot.lane.b32.xlu1 %v4061_v39, %s4366_s21  ;;  %s5465_s21 = sld [smem:[#allocation9_spill]] }
 0x464   : > { %v4066_v8 = vpack.i.bf16 %v1825_v18, %v1824_v41 }
 0x466   : > { %4067 = vrot.lane.b32.xlu0 %v4066_v8, %s4367_s27  ;;  %s647_s27 = sand.u32 1, %s4340_s25  }
 0x467   : > { %s3467_s3 = sshll.u32 %s647_s27, 4 }
 0x468   : > { %s3672_s26 = sshll.u32 %s5465_s21, 8  ;;  %s649_s2 = scalar_lea.vmem [#allocation3], %s3467_s3 }
 0x469   : > { %s3401_s29 = sshll.u32 %s649_s2, 4  ;;  %s5356_s21 = scalar_lea.sflag [#allocation4], %s647_s27  ;;  %s5353_s29 = int_to_ptr.vmem [resolvable:$true] %s3401_s29 }
 0x46a   : > { %s4286_s3 = scalar_lea.vmem %s5353_s29, 256  ;;  %p4293_p0 = scmp.lt.s32.totalorder %s5353_s29, %s4291_s1 }
 0x46b   : > { %p4287_p11 = scmp.ne.s32.totalorder %s5353_s29, %s4286_s3  ;;  %p4294_p1 = scmp.lt.s32.totalorder %s4292_s5, %s4286_s3 }
 0x46d   : > { %p4288_p12 = pnand %p4287_p11, %p4518_p5  ;;  %p4295_p2 = por %p4294_p1, %p4293_p0 }
 0x46f   : > { %p4289_p13 = pneg %p4288_p12 }
 0x471   : > { %p4296_p3 = pnand %p4295_p2, %p4289_p13 }
 0x4c0   : > { %v4038_v47 = vpop.permute.xlu1 %4037 }
 0x4c1   : > { %v4040_v54 = vunpack.i.h.bf16 %v4038_v47  ;;  %v4039_v35 = vunpack.i.l.bf16 %v4038_v47 }
 0x4c3   : > { %v1883_v1 = vsel %vm891_vm2, %v1811_v59, %v4040_v54  ;;  %v1882_v49 = vsel %vm891_vm2, %v1810_v56, %v4039_v35  ;;  %v4093_v54 = vld [vmem:[%s5408_s10 + $0x20] ss:$8 sps:$4 sm:$0xff]   ;;  %v4095_v35 = vld [vmem:[%s5408_s10 + $0x24] ss:$8 sps:$4 sm:$0xff]   ;;  %v4098_v56 = vld [vmem:[%s5408_s10 + $0x34] ss:$8 sps:$4 sm:$0xff]  }
 0x4c4   : > { %v4043_v11 = vpop.permute.xlu0 %4042 }
 0x4c5   : > { %v4045_v38 = vunpack.i.h.bf16 %v4043_v11  ;;  %v4044_v14 = vunpack.i.l.bf16 %v4043_v11  ;;  %v4089_v11 = vld [vmem:[%s5408_s10 + $0x4] ss:$8 sps:$4 sm:$0xff]  }
 0x4c6   : > { %2105 = vmatprep.subr.bf16.mxu1 %v4089_v11 }
 0x4c7   : > { %v1885_v58 = vsel %vm1289_vm3, %v1883_v1, %v4045_v38  ;;  %v1884_v6 = vsel %vm1289_vm3, %v1882_v49, %v4044_v14  ;;  %2106 = vmatpush1.bf16.msra.mxu1 %v4087_v50  ;;  %v4096_v38 = vld [vmem:[%s5408_s10 + $0x30] ss:$8 sps:$4 sm:$0xff]   ;;  %v4892_v14 = vld [vmem:[#allocation2] sm:$0xff] }
 0x4c8   : > { %v4048_v48 = vpop.permute.xlu1 %4047  ;;  %2107 = vmatprep.subr.bf16.mxu1 %v4092_v51  ;;  %v3503_v1 = vld [vmem:[%s5405_s7] ss:$0 sm:$0xff] }
 0x4c9   : > { %v4050_v43 = vunpack.i.h.bf16 %v4048_v48  ;;  %v4049_v60 = vunpack.i.l.bf16 %v4048_v48  ;;  %v2028_v49 = vld [vmem:[%s5464_s9] sm:$0x3] }
 0x4cb   : > { %v1887_v7 = vsel %vm1886_vm4, %v1884_v6, %v4049_v60  ;;  %v1888_v55 = vsel %vm1886_vm4, %v1885_v58, %v4050_v43  ;;  %v3504_v58 = vld [vmem:[%s5406_s8] ss:$0 sm:$0xff] }
 0x4cc   : > { %v4053_v53 = vpop.permute.xlu1 %4052 }
 0x4cd   : > { %v4055_v62 = vunpack.i.h.bf16 %v4053_v53  ;;  %v4054_v63 = vunpack.i.l.bf16 %v4053_v53  ;;  %v4090_v53 = vld [vmem:[%s5408_s10 + $0x10] ss:$8 sps:$4 sm:$0xff]  }
 0x4ce   : > { %2108 = vmatpush1.bf16.msra.mxu1 %v4090_v53 }
 0x4cf   : > { %v1891_v9 = vsel %vm1889_vm5, %v1888_v55, %v4055_v62  ;;  %v1890_v10 = vsel %vm1889_vm5, %v1887_v7, %v4054_v63  ;;  %2109 = vmatprep.subr.bf16.mxu1 %v4095_v35 }
 0x4d0   : > { %v4058_v57 = vpop.permute.xlu0 %4057 }
 0x4d1   : > { %v4060_v3 = vunpack.i.h.bf16 %v4058_v57  ;;  %v4059_v5 = vunpack.i.l.bf16 %v4058_v57 }
 0x4d2   : > { %2110 = vmatpush1.bf16.msra.mxu1 %v4093_v54 }
 0x4d3   : > { %v1893_v13 = vsel %vm1892_vm6, %v1890_v10, %v4059_v5  ;;  %v1894_v15 = vsel %vm1892_vm6, %v1891_v9, %v4060_v3  ;;  %2111 = vmatprep.subr.bf16.mxu1 %v4098_v56 }
 0x4d4   : > { %v4063_v46 = vpop.permute.xlu1 %4062 }
 0x4d5   : > { %v4065_v52 = vunpack.i.h.bf16 %v4063_v46  ;;  %v4064_v20 = vunpack.i.l.bf16 %v4063_v46 }
 0x4d6   : > { %2112 = vmatpush1.bf16.msra.mxu1 %v4096_v38 }
 0x4d7   : > { %v1897_v61 = vsel %vm1895_vm7, %v1894_v15, %v4065_v52  ;;  %v1896_v21 = vsel %vm1895_vm7, %v1893_v13, %v4064_v20  ;;  %3876 = vmatprep.subr.bf16.mxu1 %v4892_v14  ;;  %v2032_v20 = vrot.slane %v2028_v49, %v4575_v24 }
 0x4d8   : > { %v4068_v12 = vpop.permute.xlu0 %4067 }
 0x4d9   : > { %v4070_v16 = vunpack.i.h.bf16 %v4068_v12  ;;  %v4069_v17 = vunpack.i.l.bf16 %v4068_v12  ;;  %v2038_v12 = vrot.slane %v2028_v49, %v4580_v26 }
 0x4db   : > { %v1899_v22 = vsel %vm1898_vm8, %v1896_v21, %v4069_v17  ;;  %v1900_v19 = vsel %vm1898_vm8, %v1897_v61, %v4070_v16  ;;  %v4099_v61 = vld [vmem:[%s5410_s12 + $0x40] sm:$0xff]  }
 0x4dc   : > { %v1901_v31 = vpack.c.bf16 %v1900_v19, %v1899_v22  ;;  %v4100_v21 = vld [vmem:[%s5410_s12] sm:$0xff]   ;;  %3710 = vmatprep.subr.bf16.mxu0 %v4099_v61  ;;  %v4101_v22 = vld [vmem:[%s5410_s12 + $0x48] sm:$0xff]  }
 0x4dd   : > { %v4102_v19 = vld [vmem:[%s5410_s12 + $0x8] sm:$0xff]  }
 0x4de   : > { %3873 = vmatmul.mubr.msk.bf16.vlgmr.msra.gmra.mrb[28].mxu0 %vm737_vm0, %v1901_v31  ;;  %v4103_v31 = vld [vmem:[%s5410_s12 + $0x50] sm:$0xff]  }
 0x4df   : > { %3711 = vmatpush3.bf16.msra.mxu0 %v4100_v21 }
 0x4e0   : > { %3712 = vmatprep.subr.bf16.mxu0 %v4101_v22 }
 0x4e3   : > { %3713 = vmatpush3.bf16.msra.mxu0 %v4102_v19 }
 0x4e4   : > { %3714 = vmatprep.subr.bf16.mxu0 %v4103_v31 }
 0x5b1   : > { %v1978_v25 = vpop.f32.mrb[28].mxu0 }
 0x5b2   : > { %v1979_v27 = vadd.f32 %v3497_v23, %v1978_v25  ;;  %v3874_v28 = vpop.f32.mrb[29].mxu0  ;;  %v4105_v25 = vld [vmem:[%s5410_s12 + $0x58] sm:$0xff]  }
 0x5b3   : > { %v1981_v33 = vpop.f32.mrb[30].mxu0  ;;  %v4107_v28 = vld [vmem:[%s5410_s12 + $0x60] sm:$0xff]  }
 0x5b4   : > { %v1982_v0 = vadd.f32 %v3497_v23, %v1981_v33  ;;  %v3875_v30 = vpop.f32.mrb[31].mxu0  ;;  %v1985_v34 = vadd.f32 %v4283_v29, %v1979_v27  ;;  %v4104_v23 = vld [vmem:[%s5410_s12 + $0x10] sm:$0xff]   ;;  %v4106_v27 = vld [vmem:[%s5410_s12 + $0x18] sm:$0xff]   ;;  %v4108_v33 = vld [vmem:[%s5410_s12 + $0x20] sm:$0xff]  }
 0x5b5   : > { %3715 = vmatpush3.bf16.msra.mxu0 %v4104_v23  ;;  %v4110_v30 = vld [vmem:[%s5410_s12 + $0x28] sm:$0xff]   ;;  %v4111_v29 = vld [vmem:[%s5410_s12 + $0x70] sm:$0xff]  }
 0x5b6   : > { %v1987_v4 = vsel %vm737_vm0, %v1985_v34, 0.0  ;;  %v1986_v39 = vadd.f32 %v4284_v32, %v1982_v0  ;;  %3716 = vmatprep.subr.bf16.mxu0 %v4105_v25  ;;  %v4109_v0 = vld [vmem:[%s5410_s12 + $0x68] sm:$0xff]   ;;  %v4114_v32 = vld [vmem:[%s5410_s12 + $0x38] sm:$0xff]  }
 0x5b7   : > { %1988 = vadd.xlane.f32.xlu1 %v1987_v4  ;;  %v4113_v4 = vld [vmem:[%s5410_s12 + $0x78] sm:$0xff]  }
 0x5b8   : > { %v1990_v40 = vsel %vm737_vm0, %v1986_v39, 0.0 }
 0x5b9   : > { %1991 = vadd.xlane.f32.xlu0 %v1990_v40  ;;  %3717 = vmatpush3.bf16.msra.mxu0 %v4106_v27 }
 0x5ba   : > { %3718 = vmatprep.subr.bf16.mxu0 %v4107_v28 }
 0x5bd   : > { %3719 = vmatpush3.bf16.msra.mxu0 %v4108_v33 }
 0x5be   : > { %3720 = vmatprep.subr.bf16.mxu0 %v4109_v0 }
 0x5c1   : > { %3721 = vmatpush3.bf16.msra.mxu0 %v4110_v30 }
 0x5c2   : > { %3722 = vmatprep.subr.bf16.mxu0 %v4111_v29  ;;  %v4116_v29 = vld [vmem:[%s5413_s15 + $0x8] sm:$0xff]  }
 0x644   : > { %v1989_v36 = vpop.xlane.xlu1 %1988 }
 0x645   : > { %v1994_v37 = vmul.f32 0.015625, %v1989_v36 }
 0x646   : > { %v1992_v41 = vpop.xlane.xlu0 %1991 }
 0x647   : > { %v1996_v18 = vsub.f32 %v1985_v34, %v1994_v37  ;;  %v1995_v42 = vmul.f32 0.015625, %v1992_v41  ;;  %v4112_v34 = vld [vmem:[%s5410_s12 + $0x30] sm:$0xff]  }
 0x648   : > { %3723 = vmatpush3.bf16.msra.mxu0 %v4112_v34  ;;  %v4117_v34 = vld [vmem:[%s5413_s15 + $0x10] sm:$0xff]  }
 0x649   : > { %v1997_v8 = vsub.f32 %v1986_v39, %v1995_v42  ;;  %v1998_v44 = vmul.f32 %v1996_v18, %v1996_v18  ;;  %3724 = vmatprep.subr.bf16.mxu0 %v4113_v4  ;;  %v2050_v39 = vld [vmem:[%s5409_s11] ss:$2 sm:$0x3]  ;;  %v4118_v4 = vld [vmem:[%s5413_s15 + $0x18] sm:$0xff]  }
 0x64a   : > { %v2055_v40 = vrot.slane %v2050_v39, %v4575_v24  ;;  %v2059_v36 = vrot.slane %v2050_v39, %v4580_v26 }
 0x64b   : > { %v2000_v45 = vsel %vm737_vm0, %v1998_v44, 0.0  ;;  %v1999_v47 = vmul.f32 %v1997_v8, %v1997_v8 }
 0x64c   : > { %2001 = vadd.xlane.f32.xlu0 %v2000_v45  ;;  %3725 = vmatpush3.bf16.msra.mxu0 %v4114_v32 }
 0x64d   : > { %v2003_v48 = vsel %vm737_vm0, %v1999_v47, 0.0 }
 0x64e   : > { %2004 = vadd.xlane.f32.xlu1 %v2003_v48 }
 0x6d9   : > { %v2002_v57 = vpop.xlane.xlu0 %2001 }
 0x6da   : > { %v2006_v59 = vmul.f32 0.015625, %v2002_v57 }
 0x6db   : > { %v2005_v43 = vpop.xlane.xlu1 %2004 }
 0x6dc   : > { %v2008_v60 = vadd.f32 1e-05, %v2006_v59  ;;  %v2007_v62 = vmul.f32 0.015625, %v2005_v43 }
 0x6de   : > { %4219 = vrsqrt.f32 %v2008_v60  ;;  %v2009_v63 = vadd.f32 1e-05, %v2007_v62 }
 0x6e0   : > { %4221 = vrsqrt.f32 %v2009_v63 }
 0x6e8   : > { %v4220_v46 = vpop.eup %4219 }
 0x6e9   : > { %v2012_v3 = vmul.f32 %v4220_v46, %v1996_v18 }
 0x6ea   : > { %v4222_v5 = vpop.eup %4221 }
 0x6eb   : > { %v2019_v6 = vmul.f32 %v3503_v1, %v2012_v3  ;;  %v2013_v52 = vmul.f32 %v4222_v5, %v1997_v8 }
 0x6ed   : > { %v4905_v7 = vadd.f32 %v3504_v58, %v2019_v6  ;;  %v2020_v55 = vmul.f32 %v3503_v1, %v2013_v52 }
 0x6ef   : > { %v4907_v9 = vadd.f32 %v3504_v58, %v2020_v55  ;;  %v2033_v10 = vmul.f32 %v2032_v20, %v4905_v7 }
 0x6f1   : > { %v2034_v13 = vmul.f32 %v2032_v20, %v4907_v9  ;;  %v2039_v15 = vadd.f32 %v2038_v12, %v2033_v10  ;;  %v3518_v20 = vld [vmem:[%s5411_s13] ss:$0 sm:$0xff] }
 0x6f3   : > { %v2040_v16 = vadd.f32 %v2038_v12, %v2034_v13 }
 0x6f5   : > { %v2041_v17 = vpack.c.bf16 %v2040_v16, %v2039_v15 }
 0x6f7   : > { %3513 = vmatmul.mubr.msk.bf16.vlgmr.msra.gmra.mrb[40].mxu1 %vm737_vm0, %v2041_v17 }
 0x6f8   : > { %3884 = vmatprep.mubr.msk.bf16.mxu1 %vm4356_vm1, %v4892_v14 }
 0x7ca   : > { %v2139_v37 = vpop.f32.mrb[40].mxu1 }
 0x7cb   : > { %v2140_v41 = vadd.f32 %v2139_v37, %v2055_v40  ;;  %v2141_v18 = vpop.f32.mrb[41].mxu1 }
 0x7cc   : > { %v2142_v42 = vadd.f32 %v2141_v18, %v2059_v36  ;;  %v2143_v8 = vpop.f32.mrb[42].mxu1 }
 0x7cd   : > { %v3514_v44 = vmul.f32 -1.442695, %v2140_v41  ;;  %v2144_v45 = vadd.f32 %v2143_v8, %v2055_v40  ;;  %v2145_v47 = vpop.f32.mrb[43].mxu1 }
 0x7ce   : > { %v3515_v48 = vmul.f32 -1.442695, %v2142_v42  ;;  %v2146_v11 = vadd.f32 %v2145_v47, %v2059_v36 }
 0x7cf   : > { %4223 = vpow2.f32 %v3514_v44  ;;  %v3516_v50 = vmul.f32 -1.442695, %v2144_v45 }
 0x7d0   : > { %4225 = vpow2.f32 %v3515_v48  ;;  %v3517_v51 = vmul.f32 -1.442695, %v2146_v11 }
 0x7d1   : > { %4227 = vpow2.f32 %v3516_v50 }
 0x7d2   : > { %4229 = vpow2.f32 %v3517_v51 }
 0x7d9   : > { %v4224_v53 = vpop.eup %4223 }
 0x7da   : > { %v4226_v54 = vpop.eup %4225  ;;  %v2160_v35 = vadd.f32 1.0, %v4224_v53 }
 0x7db   : > { %v4228_v56 = vpop.eup %4227  ;;  %v2161_v38 = vadd.f32 1.0, %v4226_v54 }
 0x7dc   : > { %v4230_v57 = vpop.eup %4229  ;;  %4231 = vrcp.f32 %v2160_v35  ;;  %v2162_v59 = vadd.f32 1.0, %v4228_v56  ;;  %v3538_v35 = vld [vmem:[%s5412_s14 + $0x1] ss:$0 sm:$0xff] }
 0x7dd   : > { %4233 = vrcp.f32 %v2161_v38  ;;  %v2163_v43 = vadd.f32 1.0, %v4230_v57 }
 0x7de   : > { %4235 = vrcp.f32 %v2162_v59 }
 0x7df   : > { %4237 = vrcp.f32 %v2163_v43  ;;  %v4119_v43 = vld [vmem:[%s5417_s19] sm:$0xff]  }
 0x7e6   : > { %v4232_v60 = vpop.eup %4231 }
 0x7e7   : > { %v4234_v62 = vpop.eup %4233  ;;  %v2172_v1 = vmul.f32 %v4232_v60, %v2140_v41  ;;  %v4120_v60 = vld [vmem:[%s5417_s19 + $0x8] sm:$0xff]  }
 0x7e8   : > { %v4236_v63 = vpop.eup %4235  ;;  %v2173_v3 = vmul.f32 %v4234_v62, %v2142_v42  ;;  %v3535_v42 = vld [vmem:[%s5405_s7 + $0x1] ss:$0 sm:$0xff]  ;;  %v4121_v62 = vld [vmem:[%s5417_s19 + $0x10] sm:$0xff]  }
 0x7e9   : > { %v4238_v46 = vpop.eup %4237  ;;  %v2174_v49 = vmul.f32 %v4236_v63, %v2144_v45  ;;  %v3536_v45 = vld [vmem:[%s5406_s8 + $0x1] ss:$0 sm:$0xff]  ;;  %v4122_v63 = vld [vmem:[%s5417_s19 + $0x18] sm:$0xff]  }
 0x7ea   : > { %v2175_v5 = vmul.f32 %v4238_v46, %v2146_v11  ;;  %v3537_v11 = vld [vmem:[%s5412_s14] ss:$0 sm:$0xff] }
 0x7eb   : > { %v2176_v58 = vpack.c.bf16 %v2174_v49, %v2172_v1  ;;  %v4123_v46 = vld [vmem:[%s5417_s19 + $0x20] sm:$0xff]   ;;  %v4124_v1 = vld [vmem:[%s5417_s19 + $0x28] sm:$0xff]   ;;  %v4125_v49 = vld [vmem:[%s5417_s19 + $0x30] sm:$0xff]  }
 0x7ec   : > { %v2177_v6 = vpack.c.bf16 %v2175_v5, %v2173_v3  ;;  %v4126_v3 = vld [vmem:[%s5417_s19 + $0x38] sm:$0xff]   ;;  %v3539_v5 = vld [vmem:[%s5414_s16] ss:$0 sm:$0xff] }
 0x7ee   : > { %2343 = vmatprep.mubr.bf16.mxu0 %v2177_v6 }
 0x7ef   : > { %2344 = vmatmul.mubr.bf16.vlgmr.msra.gmra.mrb[32].mxu0 %v2176_v58 }
 0x7f0   : > { %3127 = vmatprep.mubr.bf16.mxu0 %v4350_v2 }
 0x8c2   : > { %v3726_v52 = vpop.f32.mrb[32].mxu0 }
 0x8c3   : > { %v3727_v55 = vpop.f32.mrb[33].mxu0 }
 0x8c4   : > { %v3728_v10 = vadd.f32 %v3727_v55, %v3726_v52  ;;  %v3729_v12 = vpop.f32.mrb[34].mxu0 }
 0x8c5   : > { %v3730_v13 = vpop.f32.mrb[35].mxu0 }
 0x8c6   : > { %v2346_v15 = vadd.f32 %v3728_v10, %v3518_v20  ;;  %v3731_v16 = vadd.f32 %v3730_v13, %v3729_v12 }
 0x8c8   : > { %v2349_v17 = vadd.f32 %v3731_v16, %v3518_v20  ;;  %v2352_v61 = vadd.f32 %v2346_v15, %v4905_v7 }
 0x8ca   : > { %v2354_v21 = vsel %vm737_vm0, %v2352_v61, 0.0  ;;  %v2353_v22 = vadd.f32 %v2349_v17, %v4907_v9  ;;  %v4115_v9 = vld [vmem:[%s5413_s15] sm:$0xff]  }
 0x8cb   : > { %2355 = vadd.xlane.f32.xlu0 %v2354_v21  ;;  %3877 = vmatpush3.bf16.msra.mxu1 %v4115_v9  ;;  %v5052_v21 = vld [vmem:[%s5415_s17] ss:$0 sm:$0xff] }
 0x8cc   : > { %v2357_v2 = vsel %vm737_vm0, %v2353_v22, 0.0  ;;  %3878 = vmatprep.subr.bf16.mxu1 %v4892_v14 }
 0x8cd   : > { %2358 = vadd.xlane.f32.xlu1 %v2357_v2  ;;  %v5057_v2 = vld [vmem:[%s5415_s17 + $0x1] ss:$0 sm:$0xff] }
 0x8cf   : > { %3879 = vmatpush3.bf16.msra.mxu1 %v4116_v29  ;;  %v2535_v29 = vld [vmem:[#allocation2 + $0x3] sm:$0xff] }
 0x8d0   : > { %3880 = vmatprep.subr.bf16.mxu1 %v4892_v14 }
 0x8d3   : > { %3881 = vmatpush3.bf16.msra.mxu1 %v4117_v34  ;;  %v5085_v34 = vld [vmem:[%s5415_s17 + $0x6] ss:$0 sm:$0xff] }
 0x8d4   : > { %3882 = vmatprep.subr.bf16.mxu1 %v4892_v14 }
 0x8d7   : > { %3883 = vmatpush3.bf16.msra.mxu1 %v4118_v4  ;;  %v2579_v4 = vld [vmem:[#allocation2 + $0x7] sm:$0xff] }
 0x8d8   : > { %3888 = vmatprep.subr.bf16.mxu1 %v4892_v14 }
 0x958   : > { %v2356_v19 = vpop.xlane.xlu0 %2355 }
 0x959   : > { %v2360_v31 = vmul.f32 0.015625, %v2356_v19  ;;  %v2524_v19 = vld [vmem:[#allocation2 + $0x2] sm:$0xff] }
 0x95a   : > { %v2359_v23 = vpop.xlane.xlu1 %2358 }
 0x95b   : > { %v2362_v25 = vsub.f32 %v2352_v61, %v2360_v31  ;;  %v2361_v27 = vmul.f32 0.015625, %v2359_v23  ;;  %v5062_v31 = vld [vmem:[%s5415_s17 + $0x2] ss:$0 sm:$0xff]  ;;  %v5067_v23 = vld [vmem:[%s5415_s17 + $0x3] ss:$0 sm:$0xff] }
 0x95d   : > { %v2363_v28 = vsub.f32 %v2353_v22, %v2361_v27  ;;  %v2364_v33 = vmul.f32 %v2362_v25, %v2362_v25  ;;  %v2513_v22 = vld [vmem:[#allocation2 + $0x1] sm:$0xff] }
 0x95e   : > { %v5072_v27 = vld [vmem:[%s5415_s17 + $0x4] ss:$0 sm:$0xff] }
 0x95f   : > { %v2366_v0 = vsel %vm737_vm0, %v2364_v33, 0.0  ;;  %v2365_v30 = vmul.f32 %v2363_v28, %v2363_v28 }
 0x960   : > { %2367 = vadd.xlane.f32.xlu0 %v2366_v0  ;;  %v2557_v0 = vld [vmem:[#allocation2 + $0x5] sm:$0xff] }
 0x961   : > { %v2369_v7 = vsel %vm737_vm0, %v2365_v30, 0.0  ;;  %v5080_v30 = vld [vmem:[%s5415_s17 + $0x5] ss:$0 sm:$0xff] }
 0x962   : > { %2370 = vadd.xlane.f32.xlu1 %v2369_v7  ;;  %v2568_v7 = vld [vmem:[#allocation2 + $0x6] sm:$0xff] }
 0x9ed   : > { %v2368_v32 = vpop.xlane.xlu0 %2367 }
 0x9ee   : > { %v2372_v39 = vmul.f32 0.015625, %v2368_v32 }
 0x9ef   : > { %v2371_v40 = vpop.xlane.xlu1 %2370 }
 0x9f0   : > { %v2374_v36 = vadd.f32 1e-05, %v2372_v39  ;;  %v2373_v37 = vmul.f32 0.015625, %v2371_v40  ;;  %v2519_v39 = vmul.f32 %v5052_v21, %v2513_v22  ;;  %v2530_v40 = vmul.f32 %v5057_v2, %v2524_v19 }
 0x9f2   : > { %4239 = vrsqrt.f32 %v2374_v36  ;;  %v2375_v41 = vadd.f32 1e-05, %v2373_v37 }
 0x9f4   : > { %4241 = vrsqrt.f32 %v2375_v41 }
 0x9fc   : > { %v4240_v18 = vpop.eup %4239 }
 0x9fd   : > { %v2378_v8 = vmul.f32 %v4240_v18, %v2362_v25  ;;  %v2546_v25 = vld [vmem:[#allocation2 + $0x4] sm:$0xff]  ;;  %v2563_v18 = vmul.f32 %v5072_v27, %v2557_v0 }
 0x9fe   : > { %v4242_v44 = vpop.eup %4241  ;;  %v2552_v41 = vmul.f32 %v5067_v23, %v2546_v25 }
 0x9ff   : > { %v2385_v47 = vmul.f32 %v3535_v42, %v2378_v8  ;;  %v2379_v48 = vmul.f32 %v4242_v44, %v2363_v28  ;;  %v3554_v28 = vld [vmem:[%s5415_s17 + $0x7] ss:$0 sm:$0xff]  ;;  %v2541_v8 = vmul.f32 %v5062_v31, %v2535_v29  ;;  %v2585_v44 = vmul.f32 %v5085_v34, %v2579_v4 }
 0xa00   : > { %v2596_v36 = vmul.f32 %v4892_v14, %v3554_v28 }
 0xa01   : > { %v5003_v50 = vadd.f32 %v3536_v45, %v2385_v47  ;;  %v2386_v51 = vmul.f32 %v3535_v42, %v2379_v48  ;;  %v2574_v42 = vmul.f32 %v5080_v30, %v2568_v7  ;;  %v3570_v47 = vld [vmem:[%s5415_s17 + $0x17] ss:$0 sm:$0xff]  ;;  %v2761_v48 = vld [vmem:[#allocation2 + $0x21] sm:$0xff] }
 0xa03   : > { %v5005_v53 = vadd.f32 %v3536_v45, %v2386_v51  ;;  %v2399_v54 = vmul.f32 %v3537_v11, %v5003_v50  ;;  %v3562_v45 = vld [vmem:[%s5415_s17 + $0xf] ss:$0 sm:$0xff]  ;;  %v2781_v51 = vld [vmem:[#allocation2 + $0x23] sm:$0xff] }
 0xa05   : > { %v2400_v56 = vmul.f32 %v3537_v11, %v5005_v53  ;;  %v2406_v38 = vadd.f32 %v3538_v35, %v2399_v54  ;;  %v2771_v11 = vld [vmem:[#allocation2 + $0x22] sm:$0xff] }
 0xa06   : > { %v3555_v54 = vld [vmem:[%s5415_s17 + $0x8] ss:$0 sm:$0xff] }
 0xa07   : > { %v2407_v57 = vadd.f32 %v3538_v35, %v2400_v56  ;;  %v2791_v35 = vld [vmem:[#allocation2 + $0x24] sm:$0xff] }
 0xa08   : > { %v2801_v56 = vld [vmem:[#allocation2 + $0x25] sm:$0xff] }
 0xa09   : > { %v2408_v59 = vpack.c.bf16 %v2407_v57, %v2406_v38  ;;  %v2811_v38 = vld [vmem:[#allocation2 + $0x26] sm:$0xff]  ;;  %v2565_v57 = vadd.f32 %v2563_v18, %v2519_v39 }
 0xa0b   : > { %3885 = vmatmul.mubr.msk.bf16.vlgmr.msra.gmra.mrb[44].mxu1 %vm737_vm0, %v2408_v59  ;;  %v2576_v59 = vadd.f32 %v2574_v42, %v2530_v40 }
 0xa0c   : > { %3904 = vmatprep.mubr.msk.bf16.mxu1 %vm4356_vm1, %v4892_v14  ;;  %3889 = vmatpush3.bf16.msra.mxu1 %v4119_v43  ;;  %v5104_v43 = vadd.f32 %v2596_v36, %v2552_v41 }
 0xa0d   : > { %3890 = vmatprep.subr.bf16.mxu1 %v4892_v14 }
 0xa10   : > { %3891 = vmatpush3.bf16.msra.mxu1 %v4120_v60  ;;  %v5109_v60 = vld [vmem:[%s5415_s17 + $0x18] ss:$0 sm:$0xff] }
 0xa11   : > { %3892 = vmatprep.subr.bf16.mxu1 %v4892_v14 }
 0xa14   : > { %3893 = vmatpush3.bf16.msra.mxu1 %v4121_v62  ;;  %v5114_v62 = vld [vmem:[%s5415_s17 + $0x19] ss:$0 sm:$0xff] }
 0xa15   : > { %3894 = vmatprep.subr.bf16.mxu1 %v4892_v14 }
 0xa18   : > { %3895 = vmatpush3.bf16.msra.mxu1 %v4122_v63  ;;  %v5119_v63 = vld [vmem:[%s5415_s17 + $0x1a] ss:$0 sm:$0xff] }
 0xa19   : > { %3896 = vmatprep.subr.bf16.mxu1 %v4892_v14 }
 0xa1c   : > { %3897 = vmatpush3.bf16.msra.mxu1 %v4123_v46  ;;  %v2587_v46 = vadd.f32 %v2585_v44, %v2541_v8 }
 0xa1d   : > { %3898 = vmatprep.subr.bf16.mxu1 %v4892_v14 }
 0xa20   : > { %3899 = vmatpush3.bf16.msra.mxu1 %v4124_v1  ;;  %v5122_v1 = vmul.f32 %v4892_v14, %v3570_v47 }
 0xa21   : > { %3900 = vmatprep.subr.bf16.mxu1 %v4892_v14 }
 0xa24   : > { %3901 = vmatpush3.bf16.msra.mxu1 %v4125_v49  ;;  %v5125_v49 = vmul.f32 %v5109_v60, %v2761_v48 }
 0xa25   : > { %3902 = vmatprep.subr.bf16.mxu1 %v4892_v14  ;;  %v5143_v14 = vld [vmem:[%s5415_s17 + $0x1d] ss:$0 sm:$0xff] }
 0xa28   : > { %3903 = vmatpush3.bf16.msra.mxu1 %v4126_v3  ;;  %v5128_v3 = vmul.f32 %v5114_v62, %v2771_v11 }
 0xade   : > { %v2485_v58 = vpop.f32.mrb[44].mxu1 }
 0xadf   : > { %v2486_v6 = vadd.f32 %v3539_v5, %v2485_v58  ;;  %v3886_v52 = vpop.f32.mrb[45].mxu1  ;;  %v5138_v58 = vld [vmem:[%s5415_s17 + $0x1c] ss:$0 sm:$0xff] }
 0xae0   : > { %v2488_v20 = vpop.f32.mrb[46].mxu1  ;;  %v5149_v52 = vmul.f32 %v5119_v63, %v2781_v51 }
 0xae1   : > { %v3545_v55 = vmul.f32 -1.442695, %v2486_v6  ;;  %v2489_v10 = vadd.f32 %v3539_v5, %v2488_v20  ;;  %v3887_v12 = vpop.f32.mrb[47].mxu1  ;;  %v5133_v5 = vld [vmem:[%s5415_s17 + $0x1b] ss:$0 sm:$0xff] }
 0xae2   : > { %v5152_v20 = vmul.f32 %v5133_v5, %v2791_v35 }
 0xae3   : > { %4243 = vpow2.f32 %v3545_v55  ;;  %v3546_v13 = vmul.f32 -1.442695, %v2489_v10  ;;  %v5155_v55 = vmul.f32 %v5138_v58, %v2801_v56 }
 0xae5   : > { %4245 = vpow2.f32 %v3546_v13 }
 0xaed   : > { %v4244_v15 = vpop.eup %4243 }
 0xaee   : > { %v2498_v16 = vadd.f32 1.0, %v4244_v15 }
 0xaef   : > { %v4246_v17 = vpop.eup %4245 }
 0xaf0   : > { %4247 = vrcp.f32 %v2498_v16  ;;  %v2499_v61 = vadd.f32 1.0, %v4246_v17  ;;  %v3557_v17 = vld [vmem:[%s5415_s17 + $0xa] ss:$0 sm:$0xff] }
 0xaf2   : > { %4249 = vrcp.f32 %v2499_v61  ;;  %v3558_v61 = vld [vmem:[%s5415_s17 + $0xb] ss:$0 sm:$0xff] }
 0xafa   : > { %v4248_v33 = vpop.eup %4247 }
 0xafb   : > { %v2504_v9 = vmul.f32 %v4248_v33, %v2486_v6  ;;  %v3556_v6 = vld [vmem:[%s5415_s17 + $0x9] ss:$0 sm:$0xff] }
 0xafc   : > { %v4250_v32 = vpop.eup %4249 }
 0xafd   : > { %2510 = vst [vmem:[#allocation2 + $0x10] sm:$0xff] %v2504_v9  ;;  %v2505_v37 = vmul.f32 %v4250_v32, %v2489_v10  ;;  %v5158_v10 = vmul.f32 %v5143_v14, %v2811_v38  ;;  %v2597_v16 = vmul.f32 %v3554_v28, %v2504_v9  ;;  %v2676_v22 = vmul.f32 %v3562_v45, %v2504_v9 }
 0xaff   : > { %2511 = vst [vmem:[#allocation2 + $0x18] sm:$0xff] %v2505_v37  ;;  %v2677_v19 = vmul.f32 %v3562_v45, %v2505_v37  ;;  %v5166_v25 = vmul.f32 %v3570_v47, %v2505_v37  ;;  %v3559_v45 = vld [vmem:[%s5415_s17 + $0xc] ss:$0 sm:$0xff] }
 0xb04   : > { %v2514_v12 = vld [vmem:[#allocation2 + $0x9] sm:$0xff] }
 0xb05   : > { %v2525_v13 = vld [vmem:[#allocation2 + $0xa] sm:$0xff]  ;;  %v2520_v33 = vmul.f32 %v5052_v21, %v2514_v12  ;;  %v2606_v32 = vmul.f32 %v3555_v54, %v2514_v12 }
 0xb06   : > { %v2536_v15 = vld [vmem:[#allocation2 + $0xb] sm:$0xff]  ;;  %v2531_v0 = vmul.f32 %v5057_v2, %v2525_v13  ;;  %v2616_v18 = vmul.f32 %v3556_v6, %v2525_v13  ;;  %v2631_v44 = vld [vmem:[#allocation2 + $0x14] sm:$0xff] }
 0xb07   : > { %v2542_v7 = vmul.f32 %v5062_v31, %v2536_v15  ;;  %v2547_v29 = vld [vmem:[#allocation2 + $0xc] sm:$0xff]  ;;  %v2608_v2 = vadd.f32 %v2606_v32, %v2565_v57  ;;  %v2626_v51 = vmul.f32 %v3557_v17, %v2536_v15 }
 0xb08   : > { %v2558_v28 = vld [vmem:[#allocation2 + $0xd] sm:$0xff]  ;;  %v2553_v39 = vmul.f32 %v5067_v23, %v2547_v29  ;;  %v2618_v48 = vadd.f32 %v2616_v18, %v2576_v59  ;;  %v2636_v56 = vmul.f32 %v3558_v61, %v2547_v29 }
 0xb09   : > { %v2569_v4 = vld [vmem:[#allocation2 + $0xe] sm:$0xff]  ;;  %v2564_v40 = vmul.f32 %v5072_v27, %v2558_v28  ;;  %v2646_v12 = vmul.f32 %v3559_v45, %v2558_v28  ;;  %v2628_v59 = vadd.f32 %v2626_v51, %v2587_v46 }
 0xb0a   : > { %v2575_v36 = vmul.f32 %v5080_v30, %v2569_v4  ;;  %v2580_v9 = vld [vmem:[#allocation2 + $0xf] sm:$0xff]  ;;  %v2599_v27 = vadd.f32 %v2597_v16, %v2553_v39  ;;  %v3561_v13 = vld [vmem:[%s5415_s17 + $0xe] ss:$0 sm:$0xff]  ;;  %v2661_v16 = vld [vmem:[#allocation2 + $0x17] sm:$0xff]  ;;  %v2638_v15 = vadd.f32 %v2636_v56, %v5104_v43 }
 0xb0b   : > { %v2601_v41 = vld [vmem:[#allocation2 + $0x11] sm:$0xff]  ;;  %v2586_v21 = vmul.f32 %v5085_v34, %v2580_v9  ;;  %v2566_v23 = vadd.f32 %v2564_v40, %v2520_v33  ;;  %v3560_v34 = vld [vmem:[%s5415_s17 + $0xd] ss:$0 sm:$0xff]  ;;  %v2648_v29 = vadd.f32 %v2646_v12, %v2608_v2  ;;  %v2667_v46 = vmul.f32 %v3561_v13, %v2661_v16 }
 0xb0c   : > { %v2611_v37 = vld [vmem:[#allocation2 + $0x12] sm:$0xff]  ;;  %v2607_v42 = vmul.f32 %v3555_v54, %v2601_v41  ;;  %v2577_v47 = vadd.f32 %v2575_v36, %v2531_v0  ;;  %v3563_v0 = vld [vmem:[%s5415_s17 + $0x10] ss:$0 sm:$0xff]  ;;  %v2656_v32 = vmul.f32 %v3560_v34, %v2569_v4  ;;  %v3564_v28 = vld [vmem:[%s5415_s17 + $0x11] ss:$0 sm:$0xff]  ;;  %v2666_v36 = vmul.f32 %v3561_v13, %v2580_v9 }
 0xb0d   : > { %v2617_v8 = vmul.f32 %v3556_v6, %v2611_v37  ;;  %v2621_v31 = vld [vmem:[#allocation2 + $0x13] sm:$0xff]  ;;  %v2588_v11 = vadd.f32 %v2586_v21, %v2542_v7  ;;  %v2637_v6 = vmul.f32 %v3558_v61, %v2631_v44  ;;  %v2678_v18 = vadd.f32 %v2676_v22, %v2638_v15  ;;  %v3565_v43 = vld [vmem:[%s5415_s17 + $0x12] ss:$0 sm:$0xff]  ;;  %v2731_v13 = vld [vmem:[#allocation2 + $0x1e] sm:$0xff] }
 0xb0e   : > { %v2641_v30 = vld [vmem:[#allocation2 + $0x15] sm:$0xff]  ;;  %v2627_v35 = vmul.f32 %v3557_v17, %v2621_v31  ;;  %v2609_v38 = vadd.f32 %v2607_v42, %v2566_v23  ;;  %v2686_v4 = vmul.f32 %v3563_v0, %v2601_v41  ;;  %v3566_v23 = vld [vmem:[%s5415_s17 + $0x13] ss:$0 sm:$0xff]  ;;  %v2696_v51 = vmul.f32 %v3564_v28, %v2611_v37  ;;  %v3567_v22 = vld [vmem:[%s5415_s17 + $0x14] ss:$0 sm:$0xff] }
 0xb0f   : > { %v2651_v54 = vld [vmem:[#allocation2 + $0x16] sm:$0xff]  ;;  %v2619_v57 = vadd.f32 %v2617_v8, %v2577_v47  ;;  %v2647_v17 = vmul.f32 %v3559_v45, %v2641_v30  ;;  %v2639_v7 = vadd.f32 %v2637_v6, %v2599_v27  ;;  %v2658_v8 = vadd.f32 %v2656_v32, %v2618_v48 }
 0xb10   : > { %v2629_v33 = vadd.f32 %v2627_v35, %v2588_v11  ;;  %v2657_v39 = vmul.f32 %v3560_v34, %v2651_v54  ;;  %v2681_v61 = vld [vmem:[#allocation2 + $0x19] sm:$0xff]  ;;  %v2668_v27 = vadd.f32 %v2666_v36, %v2628_v59  ;;  %v2688_v35 = vadd.f32 %v2686_v4, %v2648_v29  ;;  %v3569_v37 = vld [vmem:[%s5415_s17 + $0x16] ss:$0 sm:$0xff] }
 0xb11   : > { %v2649_v40 = vadd.f32 %v2647_v17, %v2609_v38  ;;  %v2691_v21 = vld [vmem:[#allocation2 + $0x1a] sm:$0xff]  ;;  %v2679_v2 = vadd.f32 %v2677_v19, %v2639_v7  ;;  %v2687_v9 = vmul.f32 %v3563_v0, %v2681_v61  ;;  %v2706_v34 = vmul.f32 %v3565_v43, %v2621_v31  ;;  %v3568_v19 = vld [vmem:[%s5415_s17 + $0x15] ss:$0 sm:$0xff]  ;;  %v2822_v0 = vld [vmem:[#allocation2 + $0x27] sm:$0xff] }
 0xb12   : > { %v2701_v42 = vld [vmem:[#allocation2 + $0x1b] sm:$0xff]  ;;  %v2659_v45 = vadd.f32 %v2657_v39, %v2619_v57  ;;  %v2669_v11 = vadd.f32 %v2667_v46, %v2629_v33  ;;  %v2697_v56 = vmul.f32 %v3564_v28, %v2691_v21  ;;  %v2698_v57 = vadd.f32 %v2696_v51, %v2658_v8 }
 0xb13   : > { %v2711_v47 = vld [vmem:[#allocation2 + $0x1c] sm:$0xff]  ;;  %v2707_v48 = vmul.f32 %v3565_v43, %v2701_v42  ;;  %v2689_v41 = vadd.f32 %v2687_v9, %v2649_v40  ;;  %v2716_v6 = vmul.f32 %v3566_v23, %v2631_v44  ;;  %v2708_v15 = vadd.f32 %v2706_v34, %v2668_v27 }
 0xb14   : > { %v2721_v38 = vld [vmem:[#allocation2 + $0x1d] sm:$0xff]  ;;  %v2717_v12 = vmul.f32 %v3566_v23, %v2711_v47  ;;  %v2699_v33 = vadd.f32 %v2697_v56, %v2659_v45  ;;  %v2726_v31 = vmul.f32 %v3567_v22, %v2641_v30  ;;  %v2736_v39 = vmul.f32 %v3568_v19, %v2651_v54 }
 0xb15   : > { %v2741_v59 = vld [vmem:[#allocation2 + $0x1f] sm:$0xff]  ;;  %v2709_v17 = vadd.f32 %v2707_v48, %v2669_v11  ;;  %v2718_v7 = vadd.f32 %v2716_v6, %v2678_v18  ;;  %v2727_v32 = vmul.f32 %v3567_v22, %v2721_v38  ;;  %v2737_v40 = vmul.f32 %v3568_v19, %v2731_v13  ;;  %v3577_v46 = vld [vmem:[%s5415_s17 + $0x1e] ss:$0 sm:$0xff] }
 0xb16   : > { %v2719_v29 = vadd.f32 %v2717_v12, %v2679_v2  ;;  %v2728_v28 = vadd.f32 %v2726_v31, %v2688_v35  ;;  %v2746_v36 = vmul.f32 %v3569_v37, %v2661_v16  ;;  %v2747_v44 = vmul.f32 %v3569_v37, %v2741_v59  ;;  %v3581_v31 = vld [vmem:[%s5418_s20] ss:$0 sm:$0xff] }
 0xb17   : > { %v2729_v43 = vadd.f32 %v2727_v32, %v2689_v41  ;;  %v2738_v8 = vadd.f32 %v2736_v39, %v2698_v57  ;;  %v2758_v45 = vadd.f32 %v5166_v25, %v2718_v7  ;;  %v2828_v4 = vmul.f32 %v3577_v46, %v2822_v0 }
 0xb18   : > { %v2739_v23 = vadd.f32 %v2737_v40, %v2699_v33  ;;  %v2748_v30 = vadd.f32 %v2746_v36, %v2708_v15  ;;  %v2749_v27 = vadd.f32 %v2747_v44, %v2709_v17  ;;  %v2766_v18 = vmul.f32 %v5109_v60, %v2681_v61 }
 0xb19   : > { %v2759_v54 = vadd.f32 %v5122_v1, %v2719_v29  ;;  %v2769_v2 = vadd.f32 %v5125_v49, %v2729_v43  ;;  %v2776_v16 = vmul.f32 %v5114_v62, %v2691_v21  ;;  %v2786_v11 = vmul.f32 %v5119_v63, %v2701_v42 }
 0xb1a   : > { %v2768_v9 = vadd.f32 %v2766_v18, %v2728_v28  ;;  %v2779_v51 = vadd.f32 %v5128_v3, %v2739_v23  ;;  %v2789_v22 = vadd.f32 %v5149_v52, %v2749_v27  ;;  %v2796_v56 = vmul.f32 %v5133_v5, %v2711_v47 }
 0xb1b   : > { %v2778_v25 = vadd.f32 %v2776_v16, %v2738_v8  ;;  %v2788_v35 = vadd.f32 %v2786_v11, %v2748_v30  ;;  %v2806_v34 = vmul.f32 %v5138_v58, %v2721_v38  ;;  %v2809_v60 = vadd.f32 %v5155_v55, %v2769_v2  ;;  %v3578_v58 = vld [vmem:[%s5416_s18] ss:$0 sm:$0xff]  ;;  %v4129_v2 = vld [vmem:[%s5408_s10 + $0x44] ss:$8 sps:$4 sm:$0xff]   ;;  %v4132_v16 = vld [vmem:[%s5408_s10 + $0x54] ss:$8 sps:$4 sm:$0xff]  }
 0xb1c   : > { %v2816_v1 = vmul.f32 %v5143_v14, %v2731_v13  ;;  %v2819_v49 = vadd.f32 %v5158_v10, %v2779_v51  ;;  %v2827_v62 = vmul.f32 %v3577_v46, %v2741_v59  ;;  %v2799_v63 = vadd.f32 %v5152_v20, %v2759_v54  ;;  %3095 = vmatprep.subr.bf16.mxu0 %v4129_v2  ;;  %v4130_v11 = vld [vmem:[%s5408_s10 + $0x50] ss:$8 sps:$4 sm:$0xff]   ;;  %v4133_v51 = vld [vmem:[%s5408_s10 + $0x60] ss:$8 sps:$4 sm:$0xff]  }
 0xb1d   : > { %v2808_v61 = vadd.f32 %v2806_v34, %v2768_v9  ;;  %v2830_v21 = vadd.f32 %v2828_v4, %v2789_v22  ;;  %v2798_v3 = vadd.f32 %v2796_v56, %v2758_v45  ;;  %v4135_v9 = vld [vmem:[%s5408_s10 + $0x64] ss:$8 sps:$4 sm:$0xff]   ;;  %v4138_v22 = vld [vmem:[%s5408_s10 + $0x74] ss:$8 sps:$4 sm:$0xff]  }
 0xb1e   : > { %v2818_v42 = vadd.f32 %v2816_v1, %v2778_v25  ;;  %v2829_v52 = vadd.f32 %v2827_v62, %v2788_v35  ;;  %v2832_v48 = vadd.f32 %v2819_v49, %v2809_v60  ;;  %v4136_v25 = vld [vmem:[%s5408_s10 + $0x70] ss:$8 sps:$4 sm:$0xff]  }
 0xb1f   : > { %v2834_v19 = vadd.f32 %v2830_v21, %v2799_v63  ;;  %v3590_v63 = vld [vmem:[%s5405_s7 + $0x2] ss:$0 sm:$0xff] }
 0xb20   : > { %v2831_v41 = vadd.f32 %v2818_v42, %v2808_v61  ;;  %v2833_v5 = vadd.f32 %v2829_v52, %v2798_v3  ;;  %v3592_v61 = vld [vmem:[%s5464_s9 + $0x2] sm:$0x3]  ;;  %s5350_s9 = scalar_lea.hbm %s5467_s6, %s3672_s26 }
 0xb21   : > { %v2836_v47 = vadd.f32 %v2834_v19, %v2832_v48  ;;  %v3591_v42 = vld [vmem:[%s5406_s8 + $0x2] ss:$0 sm:$0xff]  ;;  %v3020_v19 = vrot.slane %v3592_v61, %v4575_v24 }
 0xb22   : > { %v2835_v14 = vadd.f32 %v2833_v5, %v2831_v41 }
 0xb23   : > { %v2845_v55 = vadd.f32 %v3578_v58, %v2836_v47 }
 0xb24   : > { %v2844_v10 = vadd.f32 %v3578_v58, %v2835_v14  ;;  %v3026_v14 = vrot.slane %v3592_v61, %v4580_v26 }
 0xb25   : > { %v3580_v38 = vmul.f32 -1.442695, %v2845_v55 }
 0xb26   : > { %v3579_v57 = vmul.f32 -1.442695, %v2844_v10 }
 0xb27   : > { %4251 = vpow2.f32 %v3580_v38 }
 0xb28   : > { %4253 = vpow2.f32 %v3579_v57 }
 0xb31   : > { %v4252_v20 = vpop.eup %4251 }
 0xb32   : > { %v4254_v6 = vpop.eup %4253  ;;  %v2853_v12 = vadd.f32 1.0, %v4252_v20  ;;  %v4139_v20 = vld [vmem:[%s5410_s12 + $0xc0] sm:$0xff]  }
 0xb33   : > { %v2852_v13 = vadd.f32 1.0, %v4254_v6  ;;  %v4140_v6 = vld [vmem:[%s5410_s12 + $0x80] sm:$0xff]  }
 0xb34   : > { %4255 = vrcp.f32 %v2853_v12  ;;  %v4141_v12 = vld [vmem:[%s5410_s12 + $0xc8] sm:$0xff]  }
 0xb35   : > { %4257 = vrcp.f32 %v2852_v13  ;;  %v4142_v13 = vld [vmem:[%s5410_s12 + $0x88] sm:$0xff]  }
 0xb3e   : > { %v4256_v37 = vpop.eup %4255 }
 0xb3f   : > { %v4258_v59 = vpop.eup %4257  ;;  %v2859_v33 = vmul.f32 %v4256_v37, %v2845_v55  ;;  %v4143_v37 = vld [vmem:[%s5410_s12 + $0xd0] sm:$0xff]  }
 0xb40   : > { %v2858_v15 = vmul.f32 %v4258_v59, %v2844_v10  ;;  %v4144_v59 = vld [vmem:[%s5410_s12 + $0x90] sm:$0xff]  }
 0xb42   : > { %v2860_v17 = vpack.c.bf16 %v2859_v33, %v2858_v15  ;;  %v4145_v33 = vld [vmem:[%s5410_s12 + $0xd8] sm:$0xff]  }
 0xb43   : > { %v4146_v15 = vld [vmem:[%s5410_s12 + $0x98] sm:$0xff]  }
 0xb44   : > { %3905 = vmatmul.mubr.bf16.vlgmr.msra.gmra.mrb[48].mxu1 %v2860_v17  ;;  %v4147_v17 = vld [vmem:[%s5410_s12 + $0xe0] sm:$0xff]  }
 0xc17   : > { %v2966_v0 = vpop.f32.mrb[48].mxu1 }
 0xc18   : > { %v2967_v7 = vadd.f32 %v3581_v31, %v2966_v0  ;;  %v3906_v29 = vpop.f32.mrb[49].mxu1  ;;  %v4149_v0 = vld [vmem:[%s5410_s12 + $0xe8] sm:$0xff]  }
 0xc19   : > { %v2969_v32 = vpop.f32.mrb[50].mxu1  ;;  %v4151_v29 = vld [vmem:[%s5410_s12 + $0xf0] sm:$0xff]  }
 0xc1a   : > { %v2970_v39 = vadd.f32 %v3581_v31, %v2969_v32  ;;  %v3907_v28 = vpop.f32.mrb[51].mxu1  ;;  %v2973_v40 = vadd.f32 %v2967_v7, %v5003_v50  ;;  %v4148_v31 = vld [vmem:[%s5410_s12 + $0xa0] sm:$0xff]   ;;  %v4150_v7 = vld [vmem:[%s5410_s12 + $0xa8] sm:$0xff]   ;;  %v4152_v32 = vld [vmem:[%s5410_s12 + $0xb0] sm:$0xff]  }
 0xc1b   : > { %v4154_v28 = vld [vmem:[%s5410_s12 + $0xb8] sm:$0xff]  }
 0xc1c   : > { %v2975_v36 = vsel %vm737_vm0, %v2973_v40, 0.0  ;;  %v2974_v44 = vadd.f32 %v2970_v39, %v5005_v53  ;;  %v4127_v53 = vld [vmem:[%s5408_s10 + $0x40] ss:$8 sps:$4 sm:$0xff]   ;;  %v4153_v39 = vld [vmem:[%s5410_s12 + $0xf8] sm:$0xff]  }
 0xc1d   : > { %2976 = vadd.xlane.f32.xlu0 %v2975_v36  ;;  %3096 = vmatpush1.bf16.msra.mxu0 %v4127_v53 }
 0xc1e   : > { %v2978_v46 = vsel %vm737_vm0, %v2974_v44, 0.0  ;;  %3097 = vmatprep.subr.bf16.mxu0 %v4132_v16 }
 0xc1f   : > { %2979 = vadd.xlane.f32.xlu1 %v2978_v46 }
 0xc21   : > { %3098 = vmatpush1.bf16.msra.mxu0 %v4130_v11 }
 0xc22   : > { %3099 = vmatprep.subr.bf16.mxu0 %v4135_v9 }
 0xc25   : > { %3100 = vmatpush1.bf16.msra.mxu0 %v4133_v51 }
 0xc26   : > { %3101 = vmatprep.subr.bf16.mxu0 %v4138_v22 }
 0xc29   : > { %3102 = vmatpush1.bf16.msra.mxu0 %v4136_v25 }
 0xc2a   : > { %3746 = vmatprep.subr.bf16.mxu0 %v4139_v20 }
 0xcaa   : > { %v2977_v43 = vpop.xlane.xlu0 %2976 }
 0xcab   : > { %v2981_v8 = vmul.f32 0.015625, %v2977_v43 }
 0xcac   : > { %v2980_v45 = vpop.xlane.xlu1 %2979 }
 0xcad   : > { %v2983_v4 = vsub.f32 %v2973_v40, %v2981_v8  ;;  %v2982_v23 = vmul.f32 0.015625, %v2980_v45  ;;  %v3601_v40 = vld [vmem:[%s5409_s11 + $0x1] ss:$2 sm:$0x3] }
 0xcae   : > { %v3045_v36 = vrot.slane %v3601_v40, %v4575_v24 }
 0xcaf   : > { %v2984_v30 = vsub.f32 %v2974_v44, %v2982_v23  ;;  %v2985_v27 = vmul.f32 %v2983_v4, %v2983_v4  ;;  %v3049_v44 = vrot.slane %v3601_v40, %v4580_v26 }
 0xcb1   : > { %v2987_v18 = vsel %vm737_vm0, %v2985_v27, 0.0  ;;  %v2986_v54 = vmul.f32 %v2984_v30, %v2984_v30 }
 0xcb2   : > { %2988 = vadd.xlane.f32.xlu0 %v2987_v18 }
 0xcb3   : > { %v2990_v50 = vsel %vm737_vm0, %v2986_v54, 0.0 }
 0xcb4   : > { %2991 = vadd.xlane.f32.xlu1 %v2990_v50 }
 0xd3f   : > { %v2989_v35 = vpop.xlane.xlu0 %2988 }
 0xd40   : > { %v2993_v56 = vmul.f32 0.015625, %v2989_v35 }
 0xd41   : > { %v2992_v34 = vpop.xlane.xlu1 %2991 }
 0xd42   : > { %v2995_v60 = vadd.f32 1e-05, %v2993_v56  ;;  %v2994_v1 = vmul.f32 0.015625, %v2992_v34 }
 0xd44   : > { %4259 = vrsqrt.f32 %v2995_v60  ;;  %v2996_v49 = vadd.f32 1e-05, %v2994_v1 }
 0xd46   : > { %4261 = vrsqrt.f32 %v2996_v49 }
 0xd4e   : > { %v4260_v62 = vpop.eup %4259 }
 0xd4f   : > { %v2999_v21 = vmul.f32 %v4260_v62, %v2983_v4 }
 0xd50   : > { %v4262_v3 = vpop.eup %4261 }
 0xd51   : > { %v3006_v52 = vmul.f32 %v3590_v63, %v2999_v21  ;;  %v3000_v48 = vmul.f32 %v4262_v3, %v2984_v30  ;;  %v3647_v3 = vld [vmem:[%s5411_s13 + $0x1] ss:$0 sm:$0xff] }
 0xd53   : > { %v5269_v41 = vadd.f32 %v3591_v42, %v3006_v52  ;;  %v3007_v5 = vmul.f32 %v3590_v63, %v3000_v48 }
 0xd55   : > { %v5271_v47 = vadd.f32 %v3591_v42, %v3007_v5  ;;  %v3021_v58 = vmul.f32 %v3020_v19, %v5269_v41 }
 0xd57   : > { %v3022_v55 = vmul.f32 %v3020_v19, %v5271_v47  ;;  %v3027_v10 = vadd.f32 %v3026_v14, %v3021_v58 }
 0xd59   : > { %v3028_v38 = vadd.f32 %v3026_v14, %v3022_v55 }
 0xd5b   : > { %v3029_v57 = vpack.c.bf16 %v3028_v38, %v3027_v10 }
 0xd5d   : > { %3610 = vmatmul.mubr.msk.bf16.vlgmr.msra.gmra.mrb[36].mxu0 %vm737_vm0, %v3029_v57 }
 0xd5e   : > { %3747 = vmatpush3.bf16.msra.mxu0 %v4140_v6 }
 0xd5f   : > { %3748 = vmatprep.subr.bf16.mxu0 %v4141_v12 }
 0xd62   : > { %3749 = vmatpush3.bf16.msra.mxu0 %v4142_v13 }
 0xd63   : > { %3750 = vmatprep.subr.bf16.mxu0 %v4143_v37 }
 0xd66   : > { %3751 = vmatpush3.bf16.msra.mxu0 %v4144_v59 }
 0xd67   : > { %3752 = vmatprep.subr.bf16.mxu0 %v4145_v33 }
 0xd6a   : > { %3753 = vmatpush3.bf16.msra.mxu0 %v4146_v15 }
 0xd6b   : > { %3754 = vmatprep.subr.bf16.mxu0 %v4147_v17 }
 0xd6e   : > { %3755 = vmatpush3.bf16.msra.mxu0 %v4148_v31 }
 0xd6f   : > { %3756 = vmatprep.subr.bf16.mxu0 %v4149_v0 }
 0xd72   : > { %3757 = vmatpush3.bf16.msra.mxu0 %v4150_v7 }
 0xd73   : > { %3758 = vmatprep.subr.bf16.mxu0 %v4151_v29 }
 0xd76   : > { %3759 = vmatpush3.bf16.msra.mxu0 %v4152_v32 }
 0xd77   : > { %3760 = vmatprep.subr.bf16.mxu0 %v4153_v39 }
 0xd7a   : > { %3761 = vmatpush3.bf16.msra.mxu0 %v4154_v28  ;;  %v3664_v28 = vld [vmem:[%s5405_s7 + $0x3] ss:$0 sm:$0xff] }
 0xe30   : > { %v3129_v46 = vpop.f32.mrb[36].mxu0 }
 0xe31   : > { %v3130_v43 = vadd.f32 %v3129_v46, %v3045_v36  ;;  %v3131_v8 = vpop.f32.mrb[37].mxu0 }
 0xe32   : > { %v3132_v45 = vadd.f32 %v3131_v8, %v3049_v44  ;;  %v3133_v4 = vpop.f32.mrb[38].mxu0 }
 0xe33   : > { %v3611_v23 = vmul.f32 -1.442695, %v3130_v43  ;;  %v3134_v30 = vadd.f32 %v3133_v4, %v3045_v36  ;;  %v3135_v27 = vpop.f32.mrb[39].mxu0 }
 0xe34   : > { %v3612_v18 = vmul.f32 -1.442695, %v3132_v45  ;;  %v3136_v54 = vadd.f32 %v3135_v27, %v3049_v44  ;;  %v3665_v44 = vld [vmem:[%s5406_s8 + $0x3] ss:$0 sm:$0xff] }
 0xe35   : > { %4263 = vpow2.f32 %v3611_v23  ;;  %v3613_v50 = vmul.f32 -1.442695, %v3134_v30 }
 0xe36   : > { %4265 = vpow2.f32 %v3612_v18  ;;  %v3614_v53 = vmul.f32 -1.442695, %v3136_v54 }
 0xe37   : > { %4267 = vpow2.f32 %v3613_v50 }
 0xe38   : > { %4269 = vpow2.f32 %v3614_v53 }
 0xe3f   : > { %v4264_v2 = vpop.eup %4263 }
 0xe40   : > { %v4266_v24 = vpop.eup %4265  ;;  %v3150_v16 = vadd.f32 1.0, %v4264_v2 }
 0xe41   : > { %v4268_v26 = vpop.eup %4267  ;;  %v3151_v11 = vadd.f32 1.0, %v4266_v24 }
 0xe42   : > { %v4270_v9 = vpop.eup %4269  ;;  %4271 = vrcp.f32 %v3150_v16  ;;  %v3152_v51 = vadd.f32 1.0, %v4268_v26 }
 0xe43   : > { %4273 = vrcp.f32 %v3151_v11  ;;  %v3153_v22 = vadd.f32 1.0, %v4270_v9 }
 0xe44   : > { %4275 = vrcp.f32 %v3152_v51 }
 0xe45   : > { %4277 = vrcp.f32 %v3153_v22 }
 0xe4c   : > { %v4272_v25 = vpop.eup %4271 }
 0xe4d   : > { %v4274_v35 = vpop.eup %4273  ;;  %v3162_v60 = vmul.f32 %v4272_v25, %v3130_v43 }
 0xe4e   : > { %v4276_v56 = vpop.eup %4275  ;;  %v3163_v49 = vmul.f32 %v4274_v35, %v3132_v45 }
 0xe4f   : > { %v4278_v34 = vpop.eup %4277  ;;  %v3164_v1 = vmul.f32 %v4276_v56, %v3134_v30 }
 0xe50   : > { %v3165_v62 = vmul.f32 %v4278_v34, %v3136_v54 }
 0xe51   : > { %v3166_v63 = vpack.c.bf16 %v3164_v1, %v3162_v60 }
 0xe52   : > { %v3167_v61 = vpack.c.bf16 %v3165_v62, %v3163_v49 }
 0xe54   : > { %3334 = vmatprep.mubr.bf16.mxu0 %v3167_v61 }
 0xe55   : > { %3335 = vmatmul.mubr.bf16.vlgmr.msra.gmra.mrb[40].mxu0 %v3166_v63 }
 0xf28   : > { %v3762_v21 = vpop.f32.mrb[40].mxu0 }
 0xf29   : > { %v3763_v42 = vpop.f32.mrb[41].mxu0 }
 0xf2a   : > { %v3764_v52 = vadd.f32 %v3763_v42, %v3762_v21  ;;  %v3765_v48 = vpop.f32.mrb[42].mxu0 }
 0xf2b   : > { %v3766_v19 = vpop.f32.mrb[43].mxu0 }
 0xf2c   : > { %v3337_v5 = vadd.f32 %v3764_v52, %v3647_v3  ;;  %v3767_v58 = vadd.f32 %v3766_v19, %v3765_v48 }
 0xf2e   : > { %v3340_v14 = vadd.f32 %v3767_v58, %v3647_v3  ;;  %v3343_v55 = vadd.f32 %v3337_v5, %v5269_v41 }
 0xf30   : > { %v3345_v10 = vsel %vm737_vm0, %v3343_v55, 0.0  ;;  %v3344_v38 = vadd.f32 %v3340_v14, %v5271_v47 }
 0xf31   : > { %3346 = vadd.xlane.f32.xlu0 %v3345_v10 }
 0xf32   : > { %v3348_v57 = vsel %vm737_vm0, %v3344_v38, 0.0 }
 0xf33   : > { %3349 = vadd.xlane.f32.xlu1 %v3348_v57 }
 0xfbe   : > { %v3347_v20 = vpop.xlane.xlu0 %3346 }
 0xfbf   : > { %v3351_v6 = vmul.f32 0.015625, %v3347_v20 }
 0xfc0   : > { %v3350_v12 = vpop.xlane.xlu1 %3349 }
 0xfc1   : > { %v3353_v13 = vsub.f32 %v3343_v55, %v3351_v6  ;;  %v3352_v37 = vmul.f32 0.015625, %v3350_v12 }
 0xfc3   : > { %v3354_v59 = vsub.f32 %v3344_v38, %v3352_v37  ;;  %v3355_v33 = vmul.f32 %v3353_v13, %v3353_v13 }
 0xfc5   : > { %v3357_v15 = vsel %vm737_vm0, %v3355_v33, 0.0  ;;  %v3356_v17 = vmul.f32 %v3354_v59, %v3354_v59 }
 0xfc6   : > { %3358 = vadd.xlane.f32.xlu0 %v3357_v15 }
 0xfc7   : > { %v3360_v41 = vsel %vm737_vm0, %v3356_v17, 0.0 }
 0xfc8   : > { %3361 = vadd.xlane.f32.xlu1 %v3360_v41 }
0x1053   : > { %v3359_v47 = vpop.xlane.xlu0 %3358 }
0x1054   : > { %v3363_v31 = vmul.f32 0.015625, %v3359_v47 }
0x1055   : > { %v3362_v0 = vpop.xlane.xlu1 %3361 }
0x1056   : > { %v3365_v7 = vadd.f32 1e-05, %v3363_v31  ;;  %v3364_v29 = vmul.f32 0.015625, %v3362_v0 }
0x1058   : > { %4279 = vrsqrt.f32 %v3365_v7  ;;  %v3366_v32 = vadd.f32 1e-05, %v3364_v29 }
0x105a   : > { %4281 = vrsqrt.f32 %v3366_v32 }
0x1062   : > { %v4280_v39 = vpop.eup %4279 }
0x1063   : > { %v3369_v40 = vmul.f32 %v4280_v39, %v3353_v13 }
0x1064   : > { %v4282_v36 = vpop.eup %4281 }
0x1065   : > { %v3376_v46 = vmul.f32 %v3664_v28, %v3369_v40  ;;  %v3370_v43 = vmul.f32 %v4282_v36, %v3354_v59 }
0x1067   : > { %v3383_v8 = vadd.f32 %v3665_v44, %v3376_v46  ;;  %v3377_v45 = vmul.f32 %v3664_v28, %v3370_v43 }
0x1069   : > { %v3384_v4 = vadd.f32 %v3665_v44, %v3377_v45  ;;  %3385 = vst.msk [vmem:[%s649_s2] sm:$0xff] %vm737_vm0, %v3383_v8 }
0x106b   : > { %3386 = vst.msk [vmem:[%s649_s2 + $0x8] sm:$0xff] %vm737_vm0, %v3384_v4 }
0x106c   : > { %4299 = shalt.err (!%p4296_p3)
}
0x106d   : > { %s4300_s27 = scalar_lea.hbm %s5350_s9, 256  ;;  %s4304_s30 = scalar_lea.hbm %s5467_s6, 512 }
0x106e   : > { %p4301_p4 = scmp.ne.s32.totalorder %s5350_s9, %s4300_s27  ;;  %p4305_p9 = scmp.lt.u32.totalorder %s5350_s9, %s5467_s6 }
0x106f   : > { %p4306_p10 = scmp.lt.u32.totalorder %s4304_s30, %s4300_s27  ;;  %p4308_p12 = scmp.lt.u32.totalorder %s4300_s27, %s5350_s9 }
0x1070   : > { %p4302_p7 = pnand %p4301_p4, %p4518_p5 }
0x1071   : > { %p4307_p11 = por %p4306_p10, %p4305_p9 }
0x1072   : > { %p4303_p8 = pneg %p4302_p7 }
0x1073   : > { %p4309_p13 = por %p4308_p12, %p4307_p11 }
0x1075   : > { %p4310_p0 = pnand %p4309_p13, %p4303_p8 }
0x1077   : > { %4313 = shalt.err (!%p4310_p0)
}
0x1078   : > { %s4369_s3 = smov 128   ;;  %s5468_s0 = smov 8  }
0x1079   : > { %3908 = dma.vmem_to_hbm [thread:$0]  (%p4518_p5), %s5353_s29, 256, %s5350_s9, %s5356_s21, %s4369_s3, %s4369_s3, %s5468_s0  }
0x107a PF: > { %s5469_s1 = sld [smem:[#allocation8_spill]]  ;;  %s5470_s5 = sld [smem:[#allocation6_spill]] }
0x1080   : > { %p3914_p1 = scmp.ge.s32.totalorder %s5469_s1, 2  ;;  %s3416_s28 = sand.u32 1, %s5470_s5  }
0x1081   : > { %s3417_s27 = scalar_lea.sflag [#allocation4], %s3416_s28 }
0x1082   : > { %p3911_p2 = pnand %p3914_p1, %p4522_p6 }
0x1084   : > { %4331 = dma.done.wait (!%p3911_p2), %s3417_s27, 256  }
0x1085   : > { %4333 = vsyncadd (!%p3911_p2), %s3417_s27, 4294967040  ;;  %s5472_s27 = sld [smem:[#allocation10_spill]]  ;;  %s5473_s30 = sld [smem:[#allocation7_spill]] }
0x1086   : > { %s5474_s26 = sld [smem:[#allocation11_spill]]  ;;  %s5475_s2 = smov %s4340_s25 }
0x108b   : > { %p31_p3 = scmp.ge.s32.totalorder %s5472_s27, 4   ;;  %s5476_s25 = smov %s5473_s30 }
0x108d   :  { %33 = sbr.rel (!%p31_p3) target bundleno = 13 (0xd), region = 143 }
0x1094   :  { %3422 = vsyncpa [#allocation4], 1 }
0x1095   :  { %3424 = vsyncpa [#allocation4 + $0x1], 1 }

</bundles_post_ra>
